<compile_context>
chip_gen: v5e
topology: v5e:2x2
jax: 0.10.0
libtpu: 0.0.40
codegen_flags: <defaults>
</compile_context>

<pallas_src>
import math

import jax
import jax.numpy as jnp
import numpy as np
from jax import lax
from jax.experimental import pallas as pl
from jax.experimental.pallas import tpu as pltpu


def _pointer_net_kernel(x_ref, wih_e_ref, whh_e_ref, b_e_ref,
                        w_dec_ref, b_d_ref, gum_ref, out_ref,
                        ih_scr, enc_scr):
    S, Bp = out_ref.shape                 # decode steps / padded batch
    Hp = enc_scr.shape[-1]                # lane-padded hidden size
    f32 = jnp.float32
    bf16 = jnp.bfloat16

    def gate_math(pre, c):
        # Gate slices are full 128-lane-aligned blocks thanks to Hp padding.
        i = jax.nn.sigmoid(pre[:, 0 * Hp:1 * Hp])
        f = jax.nn.sigmoid(pre[:, 1 * Hp:2 * Hp])
        g = jnp.tanh(pre[:, 2 * Hp:3 * Hp])
        o = jax.nn.sigmoid(pre[:, 3 * Hp:4 * Hp])
        c_new = f * c + i * g
        h_new = o * jnp.tanh(c_new)
        return h_new, c_new

    # ---------------- encoder input projection (off the serial path) -------
    # One [S*Bp, D] @ [D, 4Hp] matmul, stored time-major in VMEM scratch.
    ih = jnp.dot(x_ref[...], wih_e_ref[...], preferred_element_type=f32)
    ih = ih + b_e_ref[...]
    ih_scr[...] = ih.reshape(S, Bp, 4 * Hp)

    unroll = S <= 16

    # ---------------- encoder LSTM (h0 = c0 = 0) ---------------------------
    def enc_body(t, carry):
        h, c = carry
        pre = ih_scr[t] + jnp.dot(h.astype(bf16), whh_e_ref[...],
                                  preferred_element_type=f32)
        h, c = gate_math(pre, c)
        enc_scr[t] = h                       # time-major, lane-dense store
        return (h, c)

    h0 = jnp.zeros((Bp, Hp), f32)
    c0 = jnp.zeros((Bp, Hp), f32)
    h, c = lax.fori_loop(0, S, enc_body, (h0, c0), unroll=unroll)

    # ---------------- pointer decoding loop (time-major [S, Bp] layout) ----
    pos = lax.broadcasted_iota(jnp.int32, (S, Bp), 0)   # position / step ids

    def dec_body(t, carry):
        dec_h, dec_c, dec_input, mask, acc = carry

        # single fused MXU dot per serial step
        xz = jnp.concatenate([dec_input, dec_h], axis=1).astype(bf16)  # [Bp, 2Hp]
        pre = jnp.dot(xz, w_dec_ref[...], preferred_element_type=f32) + b_d_ref[...]
        dec_h, dec_c = gate_math(pre, dec_c)

        enc = enc_scr[...]                                    # [S, Bp, Hp]
        # scores[s, b] = <enc[s, b, :], dec_h[b, :]>  (VPU mul + XLU reduce)
        scores = jnp.sum(enc * dec_h[None, :, :], axis=-1)    # [S, Bp]
        # masked_fill(-inf): -1e30 is safely below any score + Gumbel noise.
        scores = jnp.where(mask > 0.5, jnp.float32(-1e30), scores)

        # categorical sample (softmax + multinomial(1)) via Gumbel-max
        z = scores + gum_ref[t]                               # [S, Bp]
        z_max = jnp.max(z, axis=0, keepdims=True)             # [1, Bp]
        idx = jnp.min(jnp.where(z == z_max, pos, S), axis=0,
                      keepdims=True)                          # [1, Bp] int32

        one_hot = (pos == idx).astype(f32)                    # [S, Bp]
        mask = jnp.maximum(mask, one_hot)
        # dec_input[b, :] = enc[idx[b], b, :]  (one-hot gather on the VPU)
        dec_input = jnp.sum(one_hot[:, :, None] * enc, axis=0)  # [Bp, Hp]
        # accumulate this step's indices into column t (single final store)
        acc = jnp.where(pos == t, idx, acc)                   # [S, Bp]
        return (dec_h, dec_c, dec_input, mask, acc)

    init = (h, c,
            jnp.zeros((Bp, Hp), f32),          # dec_input
            jnp.zeros((S, Bp), f32),           # mask
            jnp.zeros((S, Bp), jnp.int32))     # index accumulator
    _, _, _, _, acc = lax.fori_loop(0, S, dec_body, init, unroll=unroll)

    out_ref[...] = acc                         # one unmasked store


def init_params(key, input_dim, hidden_dim):
    """torch.nn.LSTM / LSTMCell default init: U(-1/sqrt(H), 1/sqrt(H))."""
    H = hidden_dim
    bound = 1.0 / math.sqrt(H)
    ks = jax.random.split(key, 8)

    def u(k, shape):
        return jax.random.uniform(k, shape, jnp.float32, -bound, bound)

    return dict(
        w_ih_enc=u(ks[0], (4 * H, input_dim)),
        w_hh_enc=u(ks[1], (4 * H, H)),
        b_ih_enc=u(ks[2], (4 * H,)),
        b_hh_enc=u(ks[3], (4 * H,)),
        w_ih_dec=u(ks[4], (4 * H, H)),
        w_hh_dec=u(ks[5], (4 * H, H)),
        b_ih_dec=u(ks[6], (4 * H,)),
        b_hh_dec=u(ks[7], (4 * H,)),
    )


def _pad_gate_blocks(w, H, Hp):
    """Zero-pad each of the 4 stacked (i,f,g,o) gate blocks of a torch-layout
    LSTM weight/bias along the gate-output dimension from H to Hp."""
    if H == Hp:
        return w
    blocks = w.reshape(4, H, *w.shape[1:])
    pad = [(0, 0), (0, Hp - H)] + [(0, 0)] * (blocks.ndim - 2)
    blocks = jnp.pad(blocks, pad)
    return blocks.reshape(4 * Hp, *w.shape[1:])


def _prep_weights(params, H, Hp):
    bf16 = jnp.bfloat16

    def pad_cols(w):  # pad the recurrent/hidden input dimension to Hp
        return jnp.pad(w, ((0, 0), (0, Hp - H))) if Hp != H else w

    wih_e = _pad_gate_blocks(params["w_ih_enc"], H, Hp).T.astype(bf16)            # [D , 4Hp]
    whh_e = pad_cols(_pad_gate_blocks(params["w_hh_enc"], H, Hp)).T.astype(bf16)  # [Hp, 4Hp]
    wih_d = pad_cols(_pad_gate_blocks(params["w_ih_dec"], H, Hp)).T               # [Hp, 4Hp]
    whh_d = pad_cols(_pad_gate_blocks(params["w_hh_dec"], H, Hp)).T               # [Hp, 4Hp]
    w_dec = jnp.concatenate([wih_d, whh_d], axis=0).astype(bf16)                  # [2Hp, 4Hp]
    b_e = (_pad_gate_blocks(params["b_ih_enc"], H, Hp)
           + _pad_gate_blocks(params["b_hh_enc"], H, Hp)).reshape(1, 4 * Hp).astype(jnp.float32)
    b_d = (_pad_gate_blocks(params["b_ih_dec"], H, Hp)
           + _pad_gate_blocks(params["b_hh_dec"], H, Hp)).reshape(1, 4 * Hp).astype(jnp.float32)
    return wih_e, whh_e, b_e, w_dec, b_d


def pointer_net_forward(x, params, seed=0):
    B, S, D = x.shape
    H = params["w_hh_enc"].shape[1]
    Hp = ((H + 127) // 128) * 128          # lane-align the hidden dimension
    Bp = ((B + 7) // 8) * 8                # sublane-align the batch dimension

    wih_e, whh_e, b_e, w_dec, b_d = _prep_weights(params, H, Hp)

    # Batch pad + time-major flatten so the encoder input projection is one
    # [S*Bp, D] @ [D, 4Hp] matmul.  bf16 MXU operand; padded rows are zeros
    # and their outputs are sliced off after the call.
    xp = jnp.pad(x.astype(jnp.float32), ((0, Bp - B), (0, 0), (0, 0)))
    x_sb = jnp.transpose(xp, (1, 0, 2)).reshape(S * Bp, D).astype(jnp.bfloat16)

    # Pre-drawn Gumbel noise: one [S, Bp] slab per decode step.
    # TODO(synk): distribution matches torch.multinomial, but the RNG bit
    # stream cannot match PyTorch's generator.
    gumbel = jax.random.gumbel(jax.random.PRNGKey(seed), (S, S, Bp), jnp.float32)

    in_bytes = (x_sb.size * 2 + wih_e.size * 2 + whh_e.size * 2 + w_dec.size * 2
                + b_e.size * 4 + b_d.size * 4 + gumbel.size * 4)
    scratch_bytes = (S * Bp * 4 * Hp + S * Bp * Hp) * 4
    out_bytes = S * Bp * 4
    budget = int(min(max(2 * (in_bytes + scratch_bytes + out_bytes),
                         32 * 1024 * 1024), 64 * 1024 * 1024))

    vmem = pl.BlockSpec(memory_space=pltpu.MemorySpace.VMEM)
    out = pl.pallas_call(
        _pointer_net_kernel,
        out_shape=jax.ShapeDtypeStruct((S, Bp), jnp.int32),
        in_specs=[vmem] * 7,
        out_specs=vmem,
        scratch_shapes=[
            pltpu.VMEM((S, Bp, 4 * Hp), jnp.float32),   # input projection
            pltpu.VMEM((S, Bp, Hp), jnp.float32),       # encoder outputs
        ],
        compiler_params=pltpu.CompilerParams(vmem_limit_bytes=budget),
    )(x_sb, wih_e, whh_e, b_e, w_dec, b_d, gumbel)

    # time-major [S, Bp] -> [B, S]
    return jnp.transpose(out)[:B, :]


if __name__ == "__main__":
    B, S, D, H = 2, 8, 4, 32        # batch, seq_len, input_dim, hidden_dim
    key = jax.random.PRNGKey(0)
    k_x, k_p = jax.random.split(key)
    x = jax.random.normal(k_x, (B, S, D), dtype=jnp.float32)
    params = init_params(k_p, D, H)

    idx = pointer_net_forward(x, params, seed=0)
    idx = jax.block_until_ready(idx)

    rows = np.asarray(idx)
    assert rows.shape == (B, S) and rows.dtype == np.int32
    # masking guarantees each row is a permutation of [0, S)
    for r in rows:
        assert sorted(r.tolist()) == list(range(S)), r
    print("KERNEL_OK")
</pallas_src>

<mosaic_0001>
module attributes {stable_mosaic.version = 11 : i64} {
  func.func @_pointer_net_kernel(%arg0: memref<64x4xbf16, #tpu.memory_space<vmem>>, %arg1: memref<4x512xbf16, #tpu.memory_space<vmem>>, %arg2: memref<128x512xbf16, #tpu.memory_space<vmem>>, %arg3: memref<1x512xf32, #tpu.memory_space<vmem>>, %arg4: memref<256x512xbf16, #tpu.memory_space<vmem>>, %arg5: memref<1x512xf32, #tpu.memory_space<vmem>>, %arg6: memref<8x8x8xf32, #tpu.memory_space<vmem>>, %arg7: memref<8x8xi32, #tpu.memory_space<vmem>>, %arg8: memref<8x8x512xf32, #tpu.memory_space<vmem>>, %arg9: memref<8x8x128xf32, #tpu.memory_space<vmem>>) attributes {dimension_semantics = [], scalar_prefetch = 0 : i64, scratch_operands = 2 : i64, tpu.core_type = #tpu.core_type<tc>} {
    %c0 = arith.constant 0 : index
    %c0_0 = arith.constant 0 : index
    %0 = vector.load %arg0[%c0, %c0_0] : memref<64x4xbf16, #tpu.memory_space<vmem>>, vector<64x4xbf16>
    %c0_1 = arith.constant 0 : index
    %c0_2 = arith.constant 0 : index
    %1 = vector.load %arg1[%c0_1, %c0_2] : memref<4x512xbf16, #tpu.memory_space<vmem>>, vector<4x512xbf16>
    %cst = arith.constant dense<0.000000e+00> : vector<64x512xf32>
    %2 = tpu.matmul %0, %1, %cst {dimension_numbers = #tpu.dot_dimension_numbers<[1], [0], [0], [1], [0, 0, 1, 1], [], []>} : vector<64x4xbf16>, vector<4x512xbf16>, vector<64x512xf32> -> vector<64x512xf32>
    %c0_3 = arith.constant 0 : index
    %c0_4 = arith.constant 0 : index
    %3 = vector.load %arg3[%c0_3, %c0_4] : memref<1x512xf32, #tpu.memory_space<vmem>>, vector<1x512xf32>
    %4 = vector.broadcast %3 : vector<1x512xf32> to vector<64x512xf32>
    %5 = arith.addf %2, %4 : vector<64x512xf32>
    %6 = vector.shape_cast %5 : vector<64x512xf32> to vector<8x8x512xf32>
    %c0_5 = arith.constant 0 : index
    %c0_6 = arith.constant 0 : index
    %c0_7 = arith.constant 0 : index
    %7 = vector.load %arg8[%c0_5, %c0_6, %c0_7] : memref<8x8x512xf32, #tpu.memory_space<vmem>>, vector<8x8x512xf32>
    tpu.vector_store %arg8[%c0_5, %c0_6, %c0_7], %6 {strides = array<i32>} : memref<8x8x512xf32, #tpu.memory_space<vmem>>, vector<8x8x512xf32>,
    %cst_8 = arith.constant 0.000000e+00 : f32
    %8 = vector.broadcast %cst_8 : f32 to vector<8x128xf32>
    %cst_9 = arith.constant 0.000000e+00 : f32
    %9 = vector.broadcast %cst_9 : f32 to vector<8x128xf32>
    %c0_i32 = arith.constant 0 : i32
    %10 = arith.index_cast %c0_i32 : i32 to index
    %c0_10 = arith.constant 0 : index
    %c0_11 = arith.constant 0 : index
    %11 = vector.load %arg8[%10, %c0_10, %c0_11] : memref<8x8x512xf32, #tpu.memory_space<vmem>>, vector<1x8x512xf32>
    %12 = vector.shape_cast %11 : vector<1x8x512xf32> to vector<8x512xf32>
    %13 = arith.truncf %8 : vector<8x128xf32> to vector<8x128xbf16>
    %c0_12 = arith.constant 0 : index
    %c0_13 = arith.constant 0 : index
    %14 = vector.load %arg2[%c0_12, %c0_13] : memref<128x512xbf16, #tpu.memory_space<vmem>>, vector<128x512xbf16>
    %cst_14 = arith.constant dense<0.000000e+00> : vector<8x512xf32>
    %15 = tpu.matmul %13, %14, %cst_14 {dimension_numbers = #tpu.dot_dimension_numbers<[1], [0], [0], [1], [0, 0, 1, 1], [], []>} : vector<8x128xbf16>, vector<128x512xbf16>, vector<8x512xf32> -> vector<8x512xf32>
    %16 = arith.addf %12, %15 : vector<8x512xf32>
    %17 = vector.extract_strided_slice %16 {offsets = [0, 0], sizes = [8, 128], strides = [1, 1]} : vector<8x512xf32> to vector<8x128xf32>
    %18 = arith.negf %17 : vector<8x128xf32>
    %19 = math.exp %18 : vector<8x128xf32>
    %cst_15 = arith.constant 1.000000e+00 : f32
    %20 = vector.broadcast %cst_15 : f32 to vector<8x128xf32>
    %21 = arith.addf %20, %19 : vector<8x128xf32>
    %22 = arith.divf %20, %21 : vector<8x128xf32>
    %23 = vector.extract_strided_slice %16 {offsets = [0, 128], sizes = [8, 128], strides = [1, 1]} : vector<8x512xf32> to vector<8x128xf32>
    %24 = arith.negf %23 : vector<8x128xf32>
    %25 = math.exp %24 : vector<8x128xf32>
    %cst_16 = arith.constant 1.000000e+00 : f32
    %26 = vector.broadcast %cst_16 : f32 to vector<8x128xf32>
    %27 = arith.addf %26, %25 : vector<8x128xf32>
    %28 = arith.divf %26, %27 : vector<8x128xf32>
    %29 = vector.extract_strided_slice %16 {offsets = [0, 256], sizes = [8, 128], strides = [1, 1]} : vector<8x512xf32> to vector<8x128xf32>
    %30 = math.tanh %29 : vector<8x128xf32>
    %31 = vector.extract_strided_slice %16 {offsets = [0, 384], sizes = [8, 128], strides = [1, 1]} : vector<8x512xf32> to vector<8x128xf32>
    %32 = arith.negf %31 : vector<8x128xf32>
    %33 = math.exp %32 : vector<8x128xf32>
    %cst_17 = arith.constant 1.000000e+00 : f32
    %34 = vector.broadcast %cst_17 : f32 to vector<8x128xf32>
    %35 = arith.addf %34, %33 : vector<8x128xf32>
    %36 = arith.divf %34, %35 : vector<8x128xf32>
    %37 = arith.mulf %28, %9 : vector<8x128xf32>
    %38 = arith.mulf %22, %30 : vector<8x128xf32>
    %39 = arith.addf %37, %38 : vector<8x128xf32>
    %40 = math.tanh %39 : vector<8x128xf32>
    %41 = arith.mulf %36, %40 : vector<8x128xf32>
    %42 = arith.index_cast %c0_i32 : i32 to index
    %c0_18 = arith.constant 0 : index
    %c0_19 = arith.constant 0 : index
    %43 = vector.load %arg9[%42, %c0_18, %c0_19] : memref<8x8x128xf32, #tpu.memory_space<vmem>>, vector<1x8x128xf32>
    %44 = vector.shape_cast %43 : vector<1x8x128xf32> to vector<8x128xf32>
    %45 = vector.shape_cast %41 : vector<8x128xf32> to vector<1x8x128xf32>
    tpu.vector_store %arg9[%42, %c0_18, %c0_19], %45 {strides = array<i32>} : memref<8x8x128xf32, #tpu.memory_space<vmem>>, vector<1x8x128xf32>,
    %c1_i32 = arith.constant 1 : i32
    %46 = arith.index_cast %c1_i32 : i32 to index
    %c0_20 = arith.constant 0 : index
    %c0_21 = arith.constant 0 : index
    %47 = vector.load %arg8[%46, %c0_20, %c0_21] : memref<8x8x512xf32, #tpu.memory_space<vmem>>, vector<1x8x512xf32>
    %48 = vector.shape_cast %47 : vector<1x8x512xf32> to vector<8x512xf32>
    %49 = arith.truncf %41 : vector<8x128xf32> to vector<8x128xbf16>
    %c0_22 = arith.constant 0 : index
    %c0_23 = arith.constant 0 : index
    %50 = vector.load %arg2[%c0_22, %c0_23] : memref<128x512xbf16, #tpu.memory_space<vmem>>, vector<128x512xbf16>
    %cst_24 = arith.constant dense<0.000000e+00> : vector<8x512xf32>
    %51 = tpu.matmul %49, %50, %cst_24 {dimension_numbers = #tpu.dot_dimension_numbers<[1], [0], [0], [1], [0, 0, 1, 1], [], []>} : vector<8x128xbf16>, vector<128x512xbf16>, vector<8x512xf32> -> vector<8x512xf32>
    %52 = arith.addf %48, %51 : vector<8x512xf32>
    %53 = vector.extract_strided_slice %52 {offsets = [0, 0], sizes = [8, 128], strides = [1, 1]} : vector<8x512xf32> to vector<8x128xf32>
    %54 = arith.negf %53 : vector<8x128xf32>
    %55 = math.exp %54 : vector<8x128xf32>
    %cst_25 = arith.constant 1.000000e+00 : f32
    %56 = vector.broadcast %cst_25 : f32 to vector<8x128xf32>
    %57 = arith.addf %56, %55 : vector<8x128xf32>
    %58 = arith.divf %56, %57 : vector<8x128xf32>
    %59 = vector.extract_strided_slice %52 {offsets = [0, 128], sizes = [8, 128], strides = [1, 1]} : vector<8x512xf32> to vector<8x128xf32>
    %60 = arith.negf %59 : vector<8x128xf32>
    %61 = math.exp %60 : vector<8x128xf32>
    %cst_26 = arith.constant 1.000000e+00 : f32
    %62 = vector.broadcast %cst_26 : f32 to vector<8x128xf32>
    %63 = arith.addf %62, %61 : vector<8x128xf32>
    %64 = arith.divf %62, %63 : vector<8x128xf32>
    %65 = vector.extract_strided_slice %52 {offsets = [0, 256], sizes = [8, 128], strides = [1, 1]} : vector<8x512xf32> to vector<8x128xf32>
    %66 = math.tanh %65 : vector<8x128xf32>
    %67 = vector.extract_strided_slice %52 {offsets = [0, 384], sizes = [8, 128], strides = [1, 1]} : vector<8x512xf32> to vector<8x128xf32>
    %68 = arith.negf %67 : vector<8x128xf32>
    %69 = math.exp %68 : vector<8x128xf32>
    %cst_27 = arith.constant 1.000000e+00 : f32
    %70 = vector.broadcast %cst_27 : f32 to vector<8x128xf32>
    %71 = arith.addf %70, %69 : vector<8x128xf32>
    %72 = arith.divf %70, %71 : vector<8x128xf32>
    %73 = arith.mulf %64, %39 : vector<8x128xf32>
    %74 = arith.mulf %58, %66 : vector<8x128xf32>
    %75 = arith.addf %73, %74 : vector<8x128xf32>
    %76 = math.tanh %75 : vector<8x128xf32>
    %77 = arith.mulf %72, %76 : vector<8x128xf32>
    %78 = arith.index_cast %c1_i32 : i32 to index
    %c0_28 = arith.constant 0 : index
    %c0_29 = arith.constant 0 : index
    %79 = vector.load %arg9[%78, %c0_28, %c0_29] : memref<8x8x128xf32, #tpu.memory_space<vmem>>, vector<1x8x128xf32>
    %80 = vector.shape_cast %79 : vector<1x8x128xf32> to vector<8x128xf32>
    %81 = vector.shape_cast %77 : vector<8x128xf32> to vector<1x8x128xf32>
    tpu.vector_store %arg9[%78, %c0_28, %c0_29], %81 {strides = array<i32>} : memref<8x8x128xf32, #tpu.memory_space<vmem>>, vector<1x8x128xf32>,
    %c2_i32 = arith.constant 2 : i32
    %82 = arith.index_cast %c2_i32 : i32 to index
    %c0_30 = arith.constant 0 : index
    %c0_31 = arith.constant 0 : index
    %83 = vector.load %arg8[%82, %c0_30, %c0_31] : memref<8x8x512xf32, #tpu.memory_space<vmem>>, vector<1x8x512xf32>
    %84 = vector.shape_cast %83 : vector<1x8x512xf32> to vector<8x512xf32>
    %85 = arith.truncf %77 : vector<8x128xf32> to vector<8x128xbf16>
    %c0_32 = arith.constant 0 : index
    %c0_33 = arith.constant 0 : index
    %86 = vector.load %arg2[%c0_32, %c0_33] : memref<128x512xbf16, #tpu.memory_space<vmem>>, vector<128x512xbf16>
    %cst_34 = arith.constant dense<0.000000e+00> : vector<8x512xf32>
    %87 = tpu.matmul %85, %86, %cst_34 {dimension_numbers = #tpu.dot_dimension_numbers<[1], [0], [0], [1], [0, 0, 1, 1], [], []>} : vector<8x128xbf16>, vector<128x512xbf16>, vector<8x512xf32> -> vector<8x512xf32>
    %88 = arith.addf %84, %87 : vector<8x512xf32>
    %89 = vector.extract_strided_slice %88 {offsets = [0, 0], sizes = [8, 128], strides = [1, 1]} : vector<8x512xf32> to vector<8x128xf32>
    %90 = arith.negf %89 : vector<8x128xf32>
    %91 = math.exp %90 : vector<8x128xf32>
    %cst_35 = arith.constant 1.000000e+00 : f32
    %92 = vector.broadcast %cst_35 : f32 to vector<8x128xf32>
    %93 = arith.addf %92, %91 : vector<8x128xf32>
    %94 = arith.divf %92, %93 : vector<8x128xf32>
    %95 = vector.extract_strided_slice %88 {offsets = [0, 128], sizes = [8, 128], strides = [1, 1]} : vector<8x512xf32> to vector<8x128xf32>
    %96 = arith.negf %95 : vector<8x128xf32>
    %97 = math.exp %96 : vector<8x128xf32>
    %cst_36 = arith.constant 1.000000e+00 : f32
    %98 = vector.broadcast %cst_36 : f32 to vector<8x128xf32>
    %99 = arith.addf %98, %97 : vector<8x128xf32>
    %100 = arith.divf %98, %99 : vector<8x128xf32>
    %101 = vector.extract_strided_slice %88 {offsets = [0, 256], sizes = [8, 128], strides = [1, 1]} : vector<8x512xf32> to vector<8x128xf32>
    %102 = math.tanh %101 : vector<8x128xf32>
    %103 = vector.extract_strided_slice %88 {offsets = [0, 384], sizes = [8, 128], strides = [1, 1]} : vector<8x512xf32> to vector<8x128xf32>
    %104 = arith.negf %103 : vector<8x128xf32>
    %105 = math.exp %104 : vector<8x128xf32>
    %cst_37 = arith.constant 1.000000e+00 : f32
    %106 = vector.broadcast %cst_37 : f32 to vector<8x128xf32>
    %107 = arith.addf %106, %105 : vector<8x128xf32>
    %108 = arith.divf %106, %107 : vector<8x128xf32>
    %109 = arith.mulf %100, %75 : vector<8x128xf32>
    %110 = arith.mulf %94, %102 : vector<8x128xf32>
    %111 = arith.addf %109, %110 : vector<8x128xf32>
    %112 = math.tanh %111 : vector<8x128xf32>
    %113 = arith.mulf %108, %112 : vector<8x128xf32>
    %114 = arith.index_cast %c2_i32 : i32 to index
    %c0_38 = arith.constant 0 : index
    %c0_39 = arith.constant 0 : index
    %115 = vector.load %arg9[%114, %c0_38, %c0_39] : memref<8x8x128xf32, #tpu.memory_space<vmem>>, vector<1x8x128xf32>
    %116 = vector.shape_cast %115 : vector<1x8x128xf32> to vector<8x128xf32>
    %117 = vector.shape_cast %113 : vector<8x128xf32> to vector<1x8x128xf32>
    tpu.vector_store %arg9[%114, %c0_38, %c0_39], %117 {strides = array<i32>} : memref<8x8x128xf32, #tpu.memory_space<vmem>>, vector<1x8x128xf32>,
    %c3_i32 = arith.constant 3 : i32
    %118 = arith.index_cast %c3_i32 : i32 to index
    %c0_40 = arith.constant 0 : index
    %c0_41 = arith.constant 0 : index
    %119 = vector.load %arg8[%118, %c0_40, %c0_41] : memref<8x8x512xf32, #tpu.memory_space<vmem>>, vector<1x8x512xf32>
    %120 = vector.shape_cast %119 : vector<1x8x512xf32> to vector<8x512xf32>
    %121 = arith.truncf %113 : vector<8x128xf32> to vector<8x128xbf16>
    %c0_42 = arith.constant 0 : index
    %c0_43 = arith.constant 0 : index
    %122 = vector.load %arg2[%c0_42, %c0_43] : memref<128x512xbf16, #tpu.memory_space<vmem>>, vector<128x512xbf16>
    %cst_44 = arith.constant dense<0.000000e+00> : vector<8x512xf32>
    %123 = tpu.matmul %121, %122, %cst_44 {dimension_numbers = #tpu.dot_dimension_numbers<[1], [0], [0], [1], [0, 0, 1, 1], [], []>} : vector<8x128xbf16>, vector<128x512xbf16>, vector<8x512xf32> -> vector<8x512xf32>
    %124 = arith.addf %120, %123 : vector<8x512xf32>
    %125 = vector.extract_strided_slice %124 {offsets = [0, 0], sizes = [8, 128], strides = [1, 1]} : vector<8x512xf32> to vector<8x128xf32>
    %126 = arith.negf %125 : vector<8x128xf32>
    %127 = math.exp %126 : vector<8x128xf32>
    %cst_45 = arith.constant 1.000000e+00 : f32
    %128 = vector.broadcast %cst_45 : f32 to vector<8x128xf32>
    %129 = arith.addf %128, %127 : vector<8x128xf32>
    %130 = arith.divf %128, %129 : vector<8x128xf32>
    %131 = vector.extract_strided_slice %124 {offsets = [0, 128], sizes = [8, 128], strides = [1, 1]} : vector<8x512xf32> to vector<8x128xf32>
    %132 = arith.negf %131 : vector<8x128xf32>
    %133 = math.exp %132 : vector<8x128xf32>
    %cst_46 = arith.constant 1.000000e+00 : f32
    %134 = vector.broadcast %cst_46 : f32 to vector<8x128xf32>
    %135 = arith.addf %134, %133 : vector<8x128xf32>
    %136 = arith.divf %134, %135 : vector<8x128xf32>
    %137 = vector.extract_strided_slice %124 {offsets = [0, 256], sizes = [8, 128], strides = [1, 1]} : vector<8x512xf32> to vector<8x128xf32>
    %138 = math.tanh %137 : vector<8x128xf32>
    %139 = vector.extract_strided_slice %124 {offsets = [0, 384], sizes = [8, 128], strides = [1, 1]} : vector<8x512xf32> to vector<8x128xf32>
    %140 = arith.negf %139 : vector<8x128xf32>
    %141 = math.exp %140 : vector<8x128xf32>
    %cst_47 = arith.constant 1.000000e+00 : f32
    %142 = vector.broadcast %cst_47 : f32 to vector<8x128xf32>
    %143 = arith.addf %142, %141 : vector<8x128xf32>
    %144 = arith.divf %142, %143 : vector<8x128xf32>
    %145 = arith.mulf %136, %111 : vector<8x128xf32>
    %146 = arith.mulf %130, %138 : vector<8x128xf32>
    %147 = arith.addf %145, %146 : vector<8x128xf32>
    %148 = math.tanh %147 : vector<8x128xf32>
    %149 = arith.mulf %144, %148 : vector<8x128xf32>
    %150 = arith.index_cast %c3_i32 : i32 to index
    %c0_48 = arith.constant 0 : index
    %c0_49 = arith.constant 0 : index
    %151 = vector.load %arg9[%150, %c0_48, %c0_49] : memref<8x8x128xf32, #tpu.memory_space<vmem>>, vector<1x8x128xf32>
    %152 = vector.shape_cast %151 : vector<1x8x128xf32> to vector<8x128xf32>
    %153 = vector.shape_cast %149 : vector<8x128xf32> to vector<1x8x128xf32>
    tpu.vector_store %arg9[%150, %c0_48, %c0_49], %153 {strides = array<i32>} : memref<8x8x128xf32, #tpu.memory_space<vmem>>, vector<1x8x128xf32>,
    %c4_i32 = arith.constant 4 : i32
    %154 = arith.index_cast %c4_i32 : i32 to index
    %c0_50 = arith.constant 0 : index
    %c0_51 = arith.constant 0 : index
    %155 = vector.load %arg8[%154, %c0_50, %c0_51] : memref<8x8x512xf32, #tpu.memory_space<vmem>>, vector<1x8x512xf32>
    %156 = vector.shape_cast %155 : vector<1x8x512xf32> to vector<8x512xf32>
    %157 = arith.truncf %149 : vector<8x128xf32> to vector<8x128xbf16>
    %c0_52 = arith.constant 0 : index
    %c0_53 = arith.constant 0 : index
    %158 = vector.load %arg2[%c0_52, %c0_53] : memref<128x512xbf16, #tpu.memory_space<vmem>>, vector<128x512xbf16>
    %cst_54 = arith.constant dense<0.000000e+00> : vector<8x512xf32>
    %159 = tpu.matmul %157, %158, %cst_54 {dimension_numbers = #tpu.dot_dimension_numbers<[1], [0], [0], [1], [0, 0, 1, 1], [], []>} : vector<8x128xbf16>, vector<128x512xbf16>, vector<8x512xf32> -> vector<8x512xf32>
    %160 = arith.addf %156, %159 : vector<8x512xf32>
    %161 = vector.extract_strided_slice %160 {offsets = [0, 0], sizes = [8, 128], strides = [1, 1]} : vector<8x512xf32> to vector<8x128xf32>
    %162 = arith.negf %161 : vector<8x128xf32>
    %163 = math.exp %162 : vector<8x128xf32>
    %cst_55 = arith.constant 1.000000e+00 : f32
    %164 = vector.broadcast %cst_55 : f32 to vector<8x128xf32>
    %165 = arith.addf %164, %163 : vector<8x128xf32>
    %166 = arith.divf %164, %165 : vector<8x128xf32>
    %167 = vector.extract_strided_slice %160 {offsets = [0, 128], sizes = [8, 128], strides = [1, 1]} : vector<8x512xf32> to vector<8x128xf32>
    %168 = arith.negf %167 : vector<8x128xf32>
    %169 = math.exp %168 : vector<8x128xf32>
    %cst_56 = arith.constant 1.000000e+00 : f32
    %170 = vector.broadcast %cst_56 : f32 to vector<8x128xf32>
    %171 = arith.addf %170, %169 : vector<8x128xf32>
    %172 = arith.divf %170, %171 : vector<8x128xf32>
    %173 = vector.extract_strided_slice %160 {offsets = [0, 256], sizes = [8, 128], strides = [1, 1]} : vector<8x512xf32> to vector<8x128xf32>
    %174 = math.tanh %173 : vector<8x128xf32>
    %175 = vector.extract_strided_slice %160 {offsets = [0, 384], sizes = [8, 128], strides = [1, 1]} : vector<8x512xf32> to vector<8x128xf32>
    %176 = arith.negf %175 : vector<8x128xf32>
    %177 = math.exp %176 : vector<8x128xf32>
    %cst_57 = arith.constant 1.000000e+00 : f32
    %178 = vector.broadcast %cst_57 : f32 to vector<8x128xf32>
    %179 = arith.addf %178, %177 : vector<8x128xf32>
    %180 = arith.divf %178, %179 : vector<8x128xf32>
    %181 = arith.mulf %172, %147 : vector<8x128xf32>
    %182 = arith.mulf %166, %174 : vector<8x128xf32>
    %183 = arith.addf %181, %182 : vector<8x128xf32>
    %184 = math.tanh %183 : vector<8x128xf32>
    %185 = arith.mulf %180, %184 : vector<8x128xf32>
    %186 = arith.index_cast %c4_i32 : i32 to index
    %c0_58 = arith.constant 0 : index
    %c0_59 = arith.constant 0 : index
    %187 = vector.load %arg9[%186, %c0_58, %c0_59] : memref<8x8x128xf32, #tpu.memory_space<vmem>>, vector<1x8x128xf32>
    %188 = vector.shape_cast %187 : vector<1x8x128xf32> to vector<8x128xf32>
    %189 = vector.shape_cast %185 : vector<8x128xf32> to vector<1x8x128xf32>
    tpu.vector_store %arg9[%186, %c0_58, %c0_59], %189 {strides = array<i32>} : memref<8x8x128xf32, #tpu.memory_space<vmem>>, vector<1x8x128xf32>,
    %c5_i32 = arith.constant 5 : i32
    %190 = arith.index_cast %c5_i32 : i32 to index
    %c0_60 = arith.constant 0 : index
    %c0_61 = arith.constant 0 : index
    %191 = vector.load %arg8[%190, %c0_60, %c0_61] : memref<8x8x512xf32, #tpu.memory_space<vmem>>, vector<1x8x512xf32>
    %192 = vector.shape_cast %191 : vector<1x8x512xf32> to vector<8x512xf32>
    %193 = arith.truncf %185 : vector<8x128xf32> to vector<8x128xbf16>
    %c0_62 = arith.constant 0 : index
    %c0_63 = arith.constant 0 : index
    %194 = vector.load %arg2[%c0_62, %c0_63] : memref<128x512xbf16, #tpu.memory_space<vmem>>, vector<128x512xbf16>
    %cst_64 = arith.constant dense<0.000000e+00> : vector<8x512xf32>
    %195 = tpu.matmul %193, %194, %cst_64 {dimension_numbers = #tpu.dot_dimension_numbers<[1], [0], [0], [1], [0, 0, 1, 1], [], []>} : vector<8x128xbf16>, vector<128x512xbf16>, vector<8x512xf32> -> vector<8x512xf32>
    %196 = arith.addf %192, %195 : vector<8x512xf32>
    %197 = vector.extract_strided_slice %196 {offsets = [0, 0], sizes = [8, 128], strides = [1, 1]} : vector<8x512xf32> to vector<8x128xf32>
    %198 = arith.negf %197 : vector<8x128xf32>
    %199 = math.exp %198 : vector<8x128xf32>
    %cst_65 = arith.constant 1.000000e+00 : f32
    %200 = vector.broadcast %cst_65 : f32 to vector<8x128xf32>
    %201 = arith.addf %200, %199 : vector<8x128xf32>
    %202 = arith.divf %200, %201 : vector<8x128xf32>
    %203 = vector.extract_strided_slice %196 {offsets = [0, 128], sizes = [8, 128], strides = [1, 1]} : vector<8x512xf32> to vector<8x128xf32>
    %204 = arith.negf %203 : vector<8x128xf32>
    %205 = math.exp %204 : vector<8x128xf32>
    %cst_66 = arith.constant 1.000000e+00 : f32
    %206 = vector.broadcast %cst_66 : f32 to vector<8x128xf32>
    %207 = arith.addf %206, %205 : vector<8x128xf32>
    %208 = arith.divf %206, %207 : vector<8x128xf32>
    %209 = vector.extract_strided_slice %196 {offsets = [0, 256], sizes = [8, 128], strides = [1, 1]} : vector<8x512xf32> to vector<8x128xf32>
    %210 = math.tanh %209 : vector<8x128xf32>
    %211 = vector.extract_strided_slice %196 {offsets = [0, 384], sizes = [8, 128], strides = [1, 1]} : vector<8x512xf32> to vector<8x128xf32>
    %212 = arith.negf %211 : vector<8x128xf32>
    %213 = math.exp %212 : vector<8x128xf32>
    %cst_67 = arith.constant 1.000000e+00 : f32
    %214 = vector.broadcast %cst_67 : f32 to vector<8x128xf32>
    %215 = arith.addf %214, %213 : vector<8x128xf32>
    %216 = arith.divf %214, %215 : vector<8x128xf32>
    %217 = arith.mulf %208, %183 : vector<8x128xf32>
    %218 = arith.mulf %202, %210 : vector<8x128xf32>
    %219 = arith.addf %217, %218 : vector<8x128xf32>
    %220 = math.tanh %219 : vector<8x128xf32>
    %221 = arith.mulf %216, %220 : vector<8x128xf32>
    %222 = arith.index_cast %c5_i32 : i32 to index
    %c0_68 = arith.constant 0 : index
    %c0_69 = arith.constant 0 : index
    %223 = vector.load %arg9[%222, %c0_68, %c0_69] : memref<8x8x128xf32, #tpu.memory_space<vmem>>, vector<1x8x128xf32>
    %224 = vector.shape_cast %223 : vector<1x8x128xf32> to vector<8x128xf32>
    %225 = vector.shape_cast %221 : vector<8x128xf32> to vector<1x8x128xf32>
    tpu.vector_store %arg9[%222, %c0_68, %c0_69], %225 {strides = array<i32>} : memref<8x8x128xf32, #tpu.memory_space<vmem>>, vector<1x8x128xf32>,
    %c6_i32 = arith.constant 6 : i32
    %226 = arith.index_cast %c6_i32 : i32 to index
    %c0_70 = arith.constant 0 : index
    %c0_71 = arith.constant 0 : index
    %227 = vector.load %arg8[%226, %c0_70, %c0_71] : memref<8x8x512xf32, #tpu.memory_space<vmem>>, vector<1x8x512xf32>
    %228 = vector.shape_cast %227 : vector<1x8x512xf32> to vector<8x512xf32>
    %229 = arith.truncf %221 : vector<8x128xf32> to vector<8x128xbf16>
    %c0_72 = arith.constant 0 : index
    %c0_73 = arith.constant 0 : index
    %230 = vector.load %arg2[%c0_72, %c0_73] : memref<128x512xbf16, #tpu.memory_space<vmem>>, vector<128x512xbf16>
    %cst_74 = arith.constant dense<0.000000e+00> : vector<8x512xf32>
    %231 = tpu.matmul %229, %230, %cst_74 {dimension_numbers = #tpu.dot_dimension_numbers<[1], [0], [0], [1], [0, 0, 1, 1], [], []>} : vector<8x128xbf16>, vector<128x512xbf16>, vector<8x512xf32> -> vector<8x512xf32>
    %232 = arith.addf %228, %231 : vector<8x512xf32>
    %233 = vector.extract_strided_slice %232 {offsets = [0, 0], sizes = [8, 128], strides = [1, 1]} : vector<8x512xf32> to vector<8x128xf32>
    %234 = arith.negf %233 : vector<8x128xf32>
    %235 = math.exp %234 : vector<8x128xf32>
    %cst_75 = arith.constant 1.000000e+00 : f32
    %236 = vector.broadcast %cst_75 : f32 to vector<8x128xf32>
    %237 = arith.addf %236, %235 : vector<8x128xf32>
    %238 = arith.divf %236, %237 : vector<8x128xf32>
    %239 = vector.extract_strided_slice %232 {offsets = [0, 128], sizes = [8, 128], strides = [1, 1]} : vector<8x512xf32> to vector<8x128xf32>
    %240 = arith.negf %239 : vector<8x128xf32>
    %241 = math.exp %240 : vector<8x128xf32>
    %cst_76 = arith.constant 1.000000e+00 : f32
    %242 = vector.broadcast %cst_76 : f32 to vector<8x128xf32>
    %243 = arith.addf %242, %241 : vector<8x128xf32>
    %244 = arith.divf %242, %243 : vector<8x128xf32>
    %245 = vector.extract_strided_slice %232 {offsets = [0, 256], sizes = [8, 128], strides = [1, 1]} : vector<8x512xf32> to vector<8x128xf32>
    %246 = math.tanh %245 : vector<8x128xf32>
    %247 = vector.extract_strided_slice %232 {offsets = [0, 384], sizes = [8, 128], strides = [1, 1]} : vector<8x512xf32> to vector<8x128xf32>
    %248 = arith.negf %247 : vector<8x128xf32>
    %249 = math.exp %248 : vector<8x128xf32>
    %cst_77 = arith.constant 1.000000e+00 : f32
    %250 = vector.broadcast %cst_77 : f32 to vector<8x128xf32>
    %251 = arith.addf %250, %249 : vector<8x128xf32>
    %252 = arith.divf %250, %251 : vector<8x128xf32>
    %253 = arith.mulf %244, %219 : vector<8x128xf32>
    %254 = arith.mulf %238, %246 : vector<8x128xf32>
    %255 = arith.addf %253, %254 : vector<8x128xf32>
    %256 = math.tanh %255 : vector<8x128xf32>
    %257 = arith.mulf %252, %256 : vector<8x128xf32>
    %258 = arith.index_cast %c6_i32 : i32 to index
    %c0_78 = arith.constant 0 : index
    %c0_79 = arith.constant 0 : index
    %259 = vector.load %arg9[%258, %c0_78, %c0_79] : memref<8x8x128xf32, #tpu.memory_space<vmem>>, vector<1x8x128xf32>
    %260 = vector.shape_cast %259 : vector<1x8x128xf32> to vector<8x128xf32>
    %261 = vector.shape_cast %257 : vector<8x128xf32> to vector<1x8x128xf32>
    tpu.vector_store %arg9[%258, %c0_78, %c0_79], %261 {strides = array<i32>} : memref<8x8x128xf32, #tpu.memory_space<vmem>>, vector<1x8x128xf32>,
    %c7_i32 = arith.constant 7 : i32
    %262 = arith.index_cast %c7_i32 : i32 to index
    %c0_80 = arith.constant 0 : index
    %c0_81 = arith.constant 0 : index
    %263 = vector.load %arg8[%262, %c0_80, %c0_81] : memref<8x8x512xf32, #tpu.memory_space<vmem>>, vector<1x8x512xf32>
    %264 = vector.shape_cast %263 : vector<1x8x512xf32> to vector<8x512xf32>
    %265 = arith.truncf %257 : vector<8x128xf32> to vector<8x128xbf16>
    %c0_82 = arith.constant 0 : index
    %c0_83 = arith.constant 0 : index
    %266 = vector.load %arg2[%c0_82, %c0_83] : memref<128x512xbf16, #tpu.memory_space<vmem>>, vector<128x512xbf16>
    %cst_84 = arith.constant dense<0.000000e+00> : vector<8x512xf32>
    %267 = tpu.matmul %265, %266, %cst_84 {dimension_numbers = #tpu.dot_dimension_numbers<[1], [0], [0], [1], [0, 0, 1, 1], [], []>} : vector<8x128xbf16>, vector<128x512xbf16>, vector<8x512xf32> -> vector<8x512xf32>
    %268 = arith.addf %264, %267 : vector<8x512xf32>
    %269 = vector.extract_strided_slice %268 {offsets = [0, 0], sizes = [8, 128], strides = [1, 1]} : vector<8x512xf32> to vector<8x128xf32>
    %270 = arith.negf %269 : vector<8x128xf32>
    %271 = math.exp %270 : vector<8x128xf32>
    %cst_85 = arith.constant 1.000000e+00 : f32
    %272 = vector.broadcast %cst_85 : f32 to vector<8x128xf32>
    %273 = arith.addf %272, %271 : vector<8x128xf32>
    %274 = arith.divf %272, %273 : vector<8x128xf32>
    %275 = vector.extract_strided_slice %268 {offsets = [0, 128], sizes = [8, 128], strides = [1, 1]} : vector<8x512xf32> to vector<8x128xf32>
    %276 = arith.negf %275 : vector<8x128xf32>
    %277 = math.exp %276 : vector<8x128xf32>
    %cst_86 = arith.constant 1.000000e+00 : f32
    %278 = vector.broadcast %cst_86 : f32 to vector<8x128xf32>
    %279 = arith.addf %278, %277 : vector<8x128xf32>
    %280 = arith.divf %278, %279 : vector<8x128xf32>
    %281 = vector.extract_strided_slice %268 {offsets = [0, 256], sizes = [8, 128], strides = [1, 1]} : vector<8x512xf32> to vector<8x128xf32>
    %282 = math.tanh %281 : vector<8x128xf32>
    %283 = vector.extract_strided_slice %268 {offsets = [0, 384], sizes = [8, 128], strides = [1, 1]} : vector<8x512xf32> to vector<8x128xf32>
    %284 = arith.negf %283 : vector<8x128xf32>
    %285 = math.exp %284 : vector<8x128xf32>
    %cst_87 = arith.constant 1.000000e+00 : f32
    %286 = vector.broadcast %cst_87 : f32 to vector<8x128xf32>
    %287 = arith.addf %286, %285 : vector<8x128xf32>
    %288 = arith.divf %286, %287 : vector<8x128xf32>
    %289 = arith.mulf %280, %255 : vector<8x128xf32>
    %290 = arith.mulf %274, %282 : vector<8x128xf32>
    %291 = arith.addf %289, %290 : vector<8x128xf32>
    %292 = math.tanh %291 : vector<8x128xf32>
    %293 = arith.mulf %288, %292 : vector<8x128xf32>
    %294 = arith.index_cast %c7_i32 : i32 to index
    %c0_88 = arith.constant 0 : index
    %c0_89 = arith.constant 0 : index
    %295 = vector.load %arg9[%294, %c0_88, %c0_89] : memref<8x8x128xf32, #tpu.memory_space<vmem>>, vector<1x8x128xf32>
    %296 = vector.shape_cast %295 : vector<1x8x128xf32> to vector<8x128xf32>
    %297 = vector.shape_cast %293 : vector<8x128xf32> to vector<1x8x128xf32>
    tpu.vector_store %arg9[%294, %c0_88, %c0_89], %297 {strides = array<i32>} : memref<8x8x128xf32, #tpu.memory_space<vmem>>, vector<1x8x128xf32>,
    %c8_i32 = arith.constant 8 : i32
    %298 = tpu.iota {dimensions = array<i32: 0>} : vector<8x8xi32>
    %cst_90 = arith.constant 0.000000e+00 : f32
    %299 = vector.broadcast %cst_90 : f32 to vector<8x128xf32>
    %cst_91 = arith.constant 0.000000e+00 : f32
    %300 = vector.broadcast %cst_91 : f32 to vector<8x8xf32>
    %c0_i32_92 = arith.constant 0 : i32
    %301 = vector.broadcast %c0_i32_92 : i32 to vector<8x8xi32>
    %c0_i32_93 = arith.constant 0 : i32
    %302 = tpu.concatenate %299, %293 in 1 : vector<8x128xf32>, vector<8x128xf32> -> vector<8x256xf32>
    %303 = arith.truncf %302 : vector<8x256xf32> to vector<8x256xbf16>
    %c0_94 = arith.constant 0 : index
    %c0_95 = arith.constant 0 : index
    %304 = vector.load %arg4[%c0_94, %c0_95] : memref<256x512xbf16, #tpu.memory_space<vmem>>, vector<256x512xbf16>
    %cst_96 = arith.constant dense<0.000000e+00> : vector<8x512xf32>
    %305 = tpu.matmul %303, %304, %cst_96 {dimension_numbers = #tpu.dot_dimension_numbers<[1], [0], [0], [1], [0, 0, 1, 1], [], []>} : vector<8x256xbf16>, vector<256x512xbf16>, vector<8x512xf32> -> vector<8x512xf32>
    %c0_97 = arith.constant 0 : index
    %c0_98 = arith.constant 0 : index
    %306 = vector.load %arg5[%c0_97, %c0_98] : memref<1x512xf32, #tpu.memory_space<vmem>>, vector<1x512xf32>
    %307 = vector.broadcast %306 : vector<1x512xf32> to vector<8x512xf32>
    %308 = arith.addf %305, %307 : vector<8x512xf32>
    %309 = vector.extract_strided_slice %308 {offsets = [0, 0], sizes = [8, 128], strides = [1, 1]} : vector<8x512xf32> to vector<8x128xf32>
    %310 = arith.negf %309 : vector<8x128xf32>
    %311 = math.exp %310 : vector<8x128xf32>
    %cst_99 = arith.constant 1.000000e+00 : f32
    %312 = vector.broadcast %cst_99 : f32 to vector<8x128xf32>
    %313 = arith.addf %312, %311 : vector<8x128xf32>
    %314 = arith.divf %312, %313 : vector<8x128xf32>
    %315 = vector.extract_strided_slice %308 {offsets = [0, 128], sizes = [8, 128], strides = [1, 1]} : vector<8x512xf32> to vector<8x128xf32>
    %316 = arith.negf %315 : vector<8x128xf32>
    %317 = math.exp %316 : vector<8x128xf32>
    %cst_100 = arith.constant 1.000000e+00 : f32
    %318 = vector.broadcast %cst_100 : f32 to vector<8x128xf32>
    %319 = arith.addf %318, %317 : vector<8x128xf32>
    %320 = arith.divf %318, %319 : vector<8x128xf32>
    %321 = vector.extract_strided_slice %308 {offsets = [0, 256], sizes = [8, 128], strides = [1, 1]} : vector<8x512xf32> to vector<8x128xf32>
    %322 = math.tanh %321 : vector<8x128xf32>
    %323 = vector.extract_strided_slice %308 {offsets = [0, 384], sizes = [8, 128], strides = [1, 1]} : vector<8x512xf32> to vector<8x128xf32>
    %324 = arith.negf %323 : vector<8x128xf32>
    %325 = math.exp %324 : vector<8x128xf32>
    %cst_101 = arith.constant 1.000000e+00 : f32
    %326 = vector.broadcast %cst_101 : f32 to vector<8x128xf32>
    %327 = arith.addf %326, %325 : vector<8x128xf32>
    %328 = arith.divf %326, %327 : vector<8x128xf32>
    %329 = arith.mulf %320, %291 : vector<8x128xf32>
    %330 = arith.mulf %314, %322 : vector<8x128xf32>
    %331 = arith.addf %329, %330 : vector<8x128xf32>
    %332 = math.tanh %331 : vector<8x128xf32>
    %333 = arith.mulf %328, %332 : vector<8x128xf32>
    %c0_102 = arith.constant 0 : index
    %c0_103 = arith.constant 0 : index
    %c0_104 = arith.constant 0 : index
    %334 = vector.load %arg9[%c0_102, %c0_103, %c0_104] : memref<8x8x128xf32, #tpu.memory_space<vmem>>, vector<8x8x128xf32>
    %335 = vector.shape_cast %333 : vector<8x128xf32> to vector<1x8x128xf32>
    %336 = vector.broadcast %335 : vector<1x8x128xf32> to vector<8x8x128xf32>
    %337 = arith.mulf %334, %336 : vector<8x8x128xf32>
    %cst_105 = arith.constant dense<0.000000e+00> : vector<8x8xf32>
    %338 = vector.multi_reduction <add>, %337, %cst_105 [2] : vector<8x8x128xf32> to vector<8x8xf32>
    %cst_106 = arith.constant 5.000000e-01 : f32
    %339 = vector.broadcast %cst_106 : f32 to vector<8x8xf32>
    %340 = arith.cmpf ogt, %300, %339 : vector<8x8xf32>
    %cst_107 = arith.constant -1.000000e+30 : f32
    %341 = vector.broadcast %cst_107 : f32 to vector<8x8xf32>
    %342 = arith.select %340, %341, %338 : vector<8x8xi1>, vector<8x8xf32>
    %343 = arith.index_cast %c0_i32_93 : i32 to index
    %c0_108 = arith.constant 0 : index
    %c0_109 = arith.constant 0 : index
    %344 = vector.load %arg6[%343, %c0_108, %c0_109] : memref<8x8x8xf32, #tpu.memory_space<vmem>>, vector<1x8x8xf32>
    %345 = vector.shape_cast %344 : vector<1x8x8xf32> to vector<8x8xf32>
    %346 = arith.addf %342, %345 : vector<8x8xf32>
    %cst_110 = arith.constant dense<0xFF800000> : vector<8xf32>
    %347 = vector.multi_reduction <maximumf>, %346, %cst_110 [0] : vector<8x8xf32> to vector<8xf32>
    %348 = vector.shape_cast %347 : vector<8xf32> to vector<1x8xf32>
    %349 = vector.broadcast %348 : vector<1x8xf32> to vector<8x8xf32>
    %350 = arith.cmpf oeq, %346, %349 : vector<8x8xf32>
    %c8_i32_111 = arith.constant 8 : i32
    %351 = vector.broadcast %c8_i32_111 : i32 to vector<8x8xi32>
    %352 = arith.select %350, %298, %351 : vector<8x8xi1>, vector<8x8xi32>
    %cst_112 = arith.constant dense<2147483647> : vector<8xi32>
    %353 = vector.multi_reduction <minsi>, %352, %cst_112 [0] : vector<8x8xi32> to vector<8xi32>
    %354 = vector.shape_cast %353 : vector<8xi32> to vector<1x8xi32>
    %355 = vector.broadcast %354 : vector<1x8xi32> to vector<8x8xi32>
    %356 = arith.cmpi eq, %298, %355 : vector<8x8xi32>
    %357 = arith.extui %356 : vector<8x8xi1> to vector<8x8xi32>
    %358 = arith.sitofp %357 : vector<8x8xi32> to vector<8x8xf32>
    %359 = arith.maximumf %300, %358 : vector<8x8xf32>
    %360 = vector.shape_cast %358 : vector<8x8xf32> to vector<8x8x1xf32>
    %361 = vector.broadcast %360 : vector<8x8x1xf32> to vector<8x8x128xf32>
    %362 = arith.mulf %361, %334 : vector<8x8x128xf32>
    %cst_113 = arith.constant dense<0.000000e+00> : vector<8x128xf32>
    %363 = vector.multi_reduction <add>, %362, %cst_113 [0] : vector<8x8x128xf32> to vector<8x128xf32>
    %364 = vector.broadcast %c0_i32_93 : i32 to vector<8x8xi32>
    %365 = arith.cmpi eq, %298, %364 : vector<8x8xi32>
    %366 = vector.shape_cast %354 : vector<1x8xi32> to vector<1x8xi32>
    %367 = vector.broadcast %366 : vector<1x8xi32> to vector<8x8xi32>
    %368 = arith.select %365, %367, %301 : vector<8x8xi1>, vector<8x8xi32>
    %c1_i32_114 = arith.constant 1 : i32
    %369 = tpu.concatenate %363, %333 in 1 : vector<8x128xf32>, vector<8x128xf32> -> vector<8x256xf32>
    %370 = arith.truncf %369 : vector<8x256xf32> to vector<8x256xbf16>
    %c0_115 = arith.constant 0 : index
    %c0_116 = arith.constant 0 : index
    %371 = vector.load %arg4[%c0_115, %c0_116] : memref<256x512xbf16, #tpu.memory_space<vmem>>, vector<256x512xbf16>
    %cst_117 = arith.constant dense<0.000000e+00> : vector<8x512xf32>
    %372 = tpu.matmul %370, %371, %cst_117 {dimension_numbers = #tpu.dot_dimension_numbers<[1], [0], [0], [1], [0, 0, 1, 1], [], []>} : vector<8x256xbf16>, vector<256x512xbf16>, vector<8x512xf32> -> vector<8x512xf32>
    %c0_118 = arith.constant 0 : index
    %c0_119 = arith.constant 0 : index
    %373 = vector.load %arg5[%c0_118, %c0_119] : memref<1x512xf32, #tpu.memory_space<vmem>>, vector<1x512xf32>
    %374 = vector.broadcast %373 : vector<1x512xf32> to vector<8x512xf32>
    %375 = arith.addf %372, %374 : vector<8x512xf32>
    %376 = vector.extract_strided_slice %375 {offsets = [0, 0], sizes = [8, 128], strides = [1, 1]} : vector<8x512xf32> to vector<8x128xf32>
    %377 = arith.negf %376 : vector<8x128xf32>
    %378 = math.exp %377 : vector<8x128xf32>
    %cst_120 = arith.constant 1.000000e+00 : f32
    %379 = vector.broadcast %cst_120 : f32 to vector<8x128xf32>
    %380 = arith.addf %379, %378 : vector<8x128xf32>
    %381 = arith.divf %379, %380 : vector<8x128xf32>
    %382 = vector.extract_strided_slice %375 {offsets = [0, 128], sizes = [8, 128], strides = [1, 1]} : vector<8x512xf32> to vector<8x128xf32>
    %383 = arith.negf %382 : vector<8x128xf32>
    %384 = math.exp %383 : vector<8x128xf32>
    %cst_121 = arith.constant 1.000000e+00 : f32
    %385 = vector.broadcast %cst_121 : f32 to vector<8x128xf32>
    %386 = arith.addf %385, %384 : vector<8x128xf32>
    %387 = arith.divf %385, %386 : vector<8x128xf32>
    %388 = vector.extract_strided_slice %375 {offsets = [0, 256], sizes = [8, 128], strides = [1, 1]} : vector<8x512xf32> to vector<8x128xf32>
    %389 = math.tanh %388 : vector<8x128xf32>
    %390 = vector.extract_strided_slice %375 {offsets = [0, 384], sizes = [8, 128], strides = [1, 1]} : vector<8x512xf32> to vector<8x128xf32>
    %391 = arith.negf %390 : vector<8x128xf32>
    %392 = math.exp %391 : vector<8x128xf32>
    %cst_122 = arith.constant 1.000000e+00 : f32
    %393 = vector.broadcast %cst_122 : f32 to vector<8x128xf32>
    %394 = arith.addf %393, %392 : vector<8x128xf32>
    %395 = arith.divf %393, %394 : vector<8x128xf32>
    %396 = arith.mulf %387, %331 : vector<8x128xf32>
    %397 = arith.mulf %381, %389 : vector<8x128xf32>
    %398 = arith.addf %396, %397 : vector<8x128xf32>
    %399 = math.tanh %398 : vector<8x128xf32>
    %400 = arith.mulf %395, %399 : vector<8x128xf32>
    %c0_123 = arith.constant 0 : index
    %c0_124 = arith.constant 0 : index
    %c0_125 = arith.constant 0 : index
    %401 = vector.load %arg9[%c0_123, %c0_124, %c0_125] : memref<8x8x128xf32, #tpu.memory_space<vmem>>, vector<8x8x128xf32>
    %402 = vector.shape_cast %400 : vector<8x128xf32> to vector<1x8x128xf32>
    %403 = vector.broadcast %402 : vector<1x8x128xf32> to vector<8x8x128xf32>
    %404 = arith.mulf %401, %403 : vector<8x8x128xf32>
    %cst_126 = arith.constant dense<0.000000e+00> : vector<8x8xf32>
    %405 = vector.multi_reduction <add>, %404, %cst_126 [2] : vector<8x8x128xf32> to vector<8x8xf32>
    %cst_127 = arith.constant 5.000000e-01 : f32
    %406 = vector.broadcast %cst_127 : f32 to vector<8x8xf32>
    %407 = arith.cmpf ogt, %359, %406 : vector<8x8xf32>
    %cst_128 = arith.constant -1.000000e+30 : f32
    %408 = vector.broadcast %cst_128 : f32 to vector<8x8xf32>
    %409 = arith.select %407, %408, %405 : vector<8x8xi1>, vector<8x8xf32>
    %410 = arith.index_cast %c1_i32_114 : i32 to index
    %c0_129 = arith.constant 0 : index
    %c0_130 = arith.constant 0 : index
    %411 = vector.load %arg6[%410, %c0_129, %c0_130] : memref<8x8x8xf32, #tpu.memory_space<vmem>>, vector<1x8x8xf32>
    %412 = vector.shape_cast %411 : vector<1x8x8xf32> to vector<8x8xf32>
    %413 = arith.addf %409, %412 : vector<8x8xf32>
    %cst_131 = arith.constant dense<0xFF800000> : vector<8xf32>
    %414 = vector.multi_reduction <maximumf>, %413, %cst_131 [0] : vector<8x8xf32> to vector<8xf32>
    %415 = vector.shape_cast %414 : vector<8xf32> to vector<1x8xf32>
    %416 = vector.broadcast %415 : vector<1x8xf32> to vector<8x8xf32>
    %417 = arith.cmpf oeq, %413, %416 : vector<8x8xf32>
    %c8_i32_132 = arith.constant 8 : i32
    %418 = vector.broadcast %c8_i32_132 : i32 to vector<8x8xi32>
    %419 = arith.select %417, %298, %418 : vector<8x8xi1>, vector<8x8xi32>
    %cst_133 = arith.constant dense<2147483647> : vector<8xi32>
    %420 = vector.multi_reduction <minsi>, %419, %cst_133 [0] : vector<8x8xi32> to vector<8xi32>
    %421 = vector.shape_cast %420 : vector<8xi32> to vector<1x8xi32>
    %422 = vector.broadcast %421 : vector<1x8xi32> to vector<8x8xi32>
    %423 = arith.cmpi eq, %298, %422 : vector<8x8xi32>
    %424 = arith.extui %423 : vector<8x8xi1> to vector<8x8xi32>
    %425 = arith.sitofp %424 : vector<8x8xi32> to vector<8x8xf32>
    %426 = arith.maximumf %359, %425 : vector<8x8xf32>
    %427 = vector.shape_cast %425 : vector<8x8xf32> to vector<8x8x1xf32>
    %428 = vector.broadcast %427 : vector<8x8x1xf32> to vector<8x8x128xf32>
    %429 = arith.mulf %428, %401 : vector<8x8x128xf32>
    %cst_134 = arith.constant dense<0.000000e+00> : vector<8x128xf32>
    %430 = vector.multi_reduction <add>, %429, %cst_134 [0] : vector<8x8x128xf32> to vector<8x128xf32>
    %431 = vector.broadcast %c1_i32_114 : i32 to vector<8x8xi32>
    %432 = arith.cmpi eq, %298, %431 : vector<8x8xi32>
    %433 = vector.shape_cast %421 : vector<1x8xi32> to vector<1x8xi32>
    %434 = vector.broadcast %433 : vector<1x8xi32> to vector<8x8xi32>
    %435 = arith.select %432, %434, %368 : vector<8x8xi1>, vector<8x8xi32>
    %c2_i32_135 = arith.constant 2 : i32
    %436 = tpu.concatenate %430, %400 in 1 : vector<8x128xf32>, vector<8x128xf32> -> vector<8x256xf32>
    %437 = arith.truncf %436 : vector<8x256xf32> to vector<8x256xbf16>
    %c0_136 = arith.constant 0 : index
    %c0_137 = arith.constant 0 : index
    %438 = vector.load %arg4[%c0_136, %c0_137] : memref<256x512xbf16, #tpu.memory_space<vmem>>, vector<256x512xbf16>
    %cst_138 = arith.constant dense<0.000000e+00> : vector<8x512xf32>
    %439 = tpu.matmul %437, %438, %cst_138 {dimension_numbers = #tpu.dot_dimension_numbers<[1], [0], [0], [1], [0, 0, 1, 1], [], []>} : vector<8x256xbf16>, vector<256x512xbf16>, vector<8x512xf32> -> vector<8x512xf32>
    %c0_139 = arith.constant 0 : index
    %c0_140 = arith.constant 0 : index
    %440 = vector.load %arg5[%c0_139, %c0_140] : memref<1x512xf32, #tpu.memory_space<vmem>>, vector<1x512xf32>
    %441 = vector.broadcast %440 : vector<1x512xf32> to vector<8x512xf32>
    %442 = arith.addf %439, %441 : vector<8x512xf32>
    %443 = vector.extract_strided_slice %442 {offsets = [0, 0], sizes = [8, 128], strides = [1, 1]} : vector<8x512xf32> to vector<8x128xf32>
    %444 = arith.negf %443 : vector<8x128xf32>
    %445 = math.exp %444 : vector<8x128xf32>
    %cst_141 = arith.constant 1.000000e+00 : f32
    %446 = vector.broadcast %cst_141 : f32 to vector<8x128xf32>
    %447 = arith.addf %446, %445 : vector<8x128xf32>
    %448 = arith.divf %446, %447 : vector<8x128xf32>
    %449 = vector.extract_strided_slice %442 {offsets = [0, 128], sizes = [8, 128], strides = [1, 1]} : vector<8x512xf32> to vector<8x128xf32>
    %450 = arith.negf %449 : vector<8x128xf32>
    %451 = math.exp %450 : vector<8x128xf32>
    %cst_142 = arith.constant 1.000000e+00 : f32
    %452 = vector.broadcast %cst_142 : f32 to vector<8x128xf32>
    %453 = arith.addf %452, %451 : vector<8x128xf32>
    %454 = arith.divf %452, %453 : vector<8x128xf32>
    %455 = vector.extract_strided_slice %442 {offsets = [0, 256], sizes = [8, 128], strides = [1, 1]} : vector<8x512xf32> to vector<8x128xf32>
    %456 = math.tanh %455 : vector<8x128xf32>
    %457 = vector.extract_strided_slice %442 {offsets = [0, 384], sizes = [8, 128], strides = [1, 1]} : vector<8x512xf32> to vector<8x128xf32>
    %458 = arith.negf %457 : vector<8x128xf32>
    %459 = math.exp %458 : vector<8x128xf32>
    %cst_143 = arith.constant 1.000000e+00 : f32
    %460 = vector.broadcast %cst_143 : f32 to vector<8x128xf32>
    %461 = arith.addf %460, %459 : vector<8x128xf32>
    %462 = arith.divf %460, %461 : vector<8x128xf32>
    %463 = arith.mulf %454, %398 : vector<8x128xf32>
    %464 = arith.mulf %448, %456 : vector<8x128xf32>
    %465 = arith.addf %463, %464 : vector<8x128xf32>
    %466 = math.tanh %465 : vector<8x128xf32>
    %467 = arith.mulf %462, %466 : vector<8x128xf32>
    %c0_144 = arith.constant 0 : index
    %c0_145 = arith.constant 0 : index
    %c0_146 = arith.constant 0 : index
    %468 = vector.load %arg9[%c0_144, %c0_145, %c0_146] : memref<8x8x128xf32, #tpu.memory_space<vmem>>, vector<8x8x128xf32>
    %469 = vector.shape_cast %467 : vector<8x128xf32> to vector<1x8x128xf32>
    %470 = vector.broadcast %469 : vector<1x8x128xf32> to vector<8x8x128xf32>
    %471 = arith.mulf %468, %470 : vector<8x8x128xf32>
    %cst_147 = arith.constant dense<0.000000e+00> : vector<8x8xf32>
    %472 = vector.multi_reduction <add>, %471, %cst_147 [2] : vector<8x8x128xf32> to vector<8x8xf32>
    %cst_148 = arith.constant 5.000000e-01 : f32
    %473 = vector.broadcast %cst_148 : f32 to vector<8x8xf32>
    %474 = arith.cmpf ogt, %426, %473 : vector<8x8xf32>
    %cst_149 = arith.constant -1.000000e+30 : f32
    %475 = vector.broadcast %cst_149 : f32 to vector<8x8xf32>
    %476 = arith.select %474, %475, %472 : vector<8x8xi1>, vector<8x8xf32>
    %477 = arith.index_cast %c2_i32_135 : i32 to index
    %c0_150 = arith.constant 0 : index
    %c0_151 = arith.constant 0 : index
    %478 = vector.load %arg6[%477, %c0_150, %c0_151] : memref<8x8x8xf32, #tpu.memory_space<vmem>>, vector<1x8x8xf32>
    %479 = vector.shape_cast %478 : vector<1x8x8xf32> to vector<8x8xf32>
    %480 = arith.addf %476, %479 : vector<8x8xf32>
    %cst_152 = arith.constant dense<0xFF800000> : vector<8xf32>
    %481 = vector.multi_reduction <maximumf>, %480, %cst_152 [0] : vector<8x8xf32> to vector<8xf32>
    %482 = vector.shape_cast %481 : vector<8xf32> to vector<1x8xf32>
    %483 = vector.broadcast %482 : vector<1x8xf32> to vector<8x8xf32>
    %484 = arith.cmpf oeq, %480, %483 : vector<8x8xf32>
    %c8_i32_153 = arith.constant 8 : i32
    %485 = vector.broadcast %c8_i32_153 : i32 to vector<8x8xi32>
    %486 = arith.select %484, %298, %485 : vector<8x8xi1>, vector<8x8xi32>
    %cst_154 = arith.constant dense<2147483647> : vector<8xi32>
    %487 = vector.multi_reduction <minsi>, %486, %cst_154 [0] : vector<8x8xi32> to vector<8xi32>
    %488 = vector.shape_cast %487 : vector<8xi32> to vector<1x8xi32>
    %489 = vector.broadcast %488 : vector<1x8xi32> to vector<8x8xi32>
    %490 = arith.cmpi eq, %298, %489 : vector<8x8xi32>
    %491 = arith.extui %490 : vector<8x8xi1> to vector<8x8xi32>
    %492 = arith.sitofp %491 : vector<8x8xi32> to vector<8x8xf32>
    %493 = arith.maximumf %426, %492 : vector<8x8xf32>
    %494 = vector.shape_cast %492 : vector<8x8xf32> to vector<8x8x1xf32>
    %495 = vector.broadcast %494 : vector<8x8x1xf32> to vector<8x8x128xf32>
    %496 = arith.mulf %495, %468 : vector<8x8x128xf32>
    %cst_155 = arith.constant dense<0.000000e+00> : vector<8x128xf32>
    %497 = vector.multi_reduction <add>, %496, %cst_155 [0] : vector<8x8x128xf32> to vector<8x128xf32>
    %498 = vector.broadcast %c2_i32_135 : i32 to vector<8x8xi32>
    %499 = arith.cmpi eq, %298, %498 : vector<8x8xi32>
    %500 = vector.shape_cast %488 : vector<1x8xi32> to vector<1x8xi32>
    %501 = vector.broadcast %500 : vector<1x8xi32> to vector<8x8xi32>
    %502 = arith.select %499, %501, %435 : vector<8x8xi1>, vector<8x8xi32>
    %c3_i32_156 = arith.constant 3 : i32
    %503 = tpu.concatenate %497, %467 in 1 : vector<8x128xf32>, vector<8x128xf32> -> vector<8x256xf32>
    %504 = arith.truncf %503 : vector<8x256xf32> to vector<8x256xbf16>
    %c0_157 = arith.constant 0 : index
    %c0_158 = arith.constant 0 : index
    %505 = vector.load %arg4[%c0_157, %c0_158] : memref<256x512xbf16, #tpu.memory_space<vmem>>, vector<256x512xbf16>
    %cst_159 = arith.constant dense<0.000000e+00> : vector<8x512xf32>
    %506 = tpu.matmul %504, %505, %cst_159 {dimension_numbers = #tpu.dot_dimension_numbers<[1], [0], [0], [1], [0, 0, 1, 1], [], []>} : vector<8x256xbf16>, vector<256x512xbf16>, vector<8x512xf32> -> vector<8x512xf32>
    %c0_160 = arith.constant 0 : index
    %c0_161 = arith.constant 0 : index
    %507 = vector.load %arg5[%c0_160, %c0_161] : memref<1x512xf32, #tpu.memory_space<vmem>>, vector<1x512xf32>
    %508 = vector.broadcast %507 : vector<1x512xf32> to vector<8x512xf32>
    %509 = arith.addf %506, %508 : vector<8x512xf32>
    %510 = vector.extract_strided_slice %509 {offsets = [0, 0], sizes = [8, 128], strides = [1, 1]} : vector<8x512xf32> to vector<8x128xf32>
    %511 = arith.negf %510 : vector<8x128xf32>
    %512 = math.exp %511 : vector<8x128xf32>
    %cst_162 = arith.constant 1.000000e+00 : f32
    %513 = vector.broadcast %cst_162 : f32 to vector<8x128xf32>
    %514 = arith.addf %513, %512 : vector<8x128xf32>
    %515 = arith.divf %513, %514 : vector<8x128xf32>
    %516 = vector.extract_strided_slice %509 {offsets = [0, 128], sizes = [8, 128], strides = [1, 1]} : vector<8x512xf32> to vector<8x128xf32>
    %517 = arith.negf %516 : vector<8x128xf32>
    %518 = math.exp %517 : vector<8x128xf32>
    %cst_163 = arith.constant 1.000000e+00 : f32
    %519 = vector.broadcast %cst_163 : f32 to vector<8x128xf32>
    %520 = arith.addf %519, %518 : vector<8x128xf32>
    %521 = arith.divf %519, %520 : vector<8x128xf32>
    %522 = vector.extract_strided_slice %509 {offsets = [0, 256], sizes = [8, 128], strides = [1, 1]} : vector<8x512xf32> to vector<8x128xf32>
    %523 = math.tanh %522 : vector<8x128xf32>
    %524 = vector.extract_strided_slice %509 {offsets = [0, 384], sizes = [8, 128], strides = [1, 1]} : vector<8x512xf32> to vector<8x128xf32>
    %525 = arith.negf %524 : vector<8x128xf32>
    %526 = math.exp %525 : vector<8x128xf32>
    %cst_164 = arith.constant 1.000000e+00 : f32
    %527 = vector.broadcast %cst_164 : f32 to vector<8x128xf32>
    %528 = arith.addf %527, %526 : vector<8x128xf32>
    %529 = arith.divf %527, %528 : vector<8x128xf32>
    %530 = arith.mulf %521, %465 : vector<8x128xf32>
    %531 = arith.mulf %515, %523 : vector<8x128xf32>
    %532 = arith.addf %530, %531 : vector<8x128xf32>
    %533 = math.tanh %532 : vector<8x128xf32>
    %534 = arith.mulf %529, %533 : vector<8x128xf32>
    %c0_165 = arith.constant 0 : index
    %c0_166 = arith.constant 0 : index
    %c0_167 = arith.constant 0 : index
    %535 = vector.load %arg9[%c0_165, %c0_166, %c0_167] : memref<8x8x128xf32, #tpu.memory_space<vmem>>, vector<8x8x128xf32>
    %536 = vector.shape_cast %534 : vector<8x128xf32> to vector<1x8x128xf32>
    %537 = vector.broadcast %536 : vector<1x8x128xf32> to vector<8x8x128xf32>
    %538 = arith.mulf %535, %537 : vector<8x8x128xf32>
    %cst_168 = arith.constant dense<0.000000e+00> : vector<8x8xf32>
    %539 = vector.multi_reduction <add>, %538, %cst_168 [2] : vector<8x8x128xf32> to vector<8x8xf32>
    %cst_169 = arith.constant 5.000000e-01 : f32
    %540 = vector.broadcast %cst_169 : f32 to vector<8x8xf32>
    %541 = arith.cmpf ogt, %493, %540 : vector<8x8xf32>
    %cst_170 = arith.constant -1.000000e+30 : f32
    %542 = vector.broadcast %cst_170 : f32 to vector<8x8xf32>
    %543 = arith.select %541, %542, %539 : vector<8x8xi1>, vector<8x8xf32>
    %544 = arith.index_cast %c3_i32_156 : i32 to index
    %c0_171 = arith.constant 0 : index
    %c0_172 = arith.constant 0 : index
    %545 = vector.load %arg6[%544, %c0_171, %c0_172] : memref<8x8x8xf32, #tpu.memory_space<vmem>>, vector<1x8x8xf32>
    %546 = vector.shape_cast %545 : vector<1x8x8xf32> to vector<8x8xf32>
    %547 = arith.addf %543, %546 : vector<8x8xf32>
    %cst_173 = arith.constant dense<0xFF800000> : vector<8xf32>
    %548 = vector.multi_reduction <maximumf>, %547, %cst_173 [0] : vector<8x8xf32> to vector<8xf32>
    %549 = vector.shape_cast %548 : vector<8xf32> to vector<1x8xf32>
    %550 = vector.broadcast %549 : vector<1x8xf32> to vector<8x8xf32>
    %551 = arith.cmpf oeq, %547, %550 : vector<8x8xf32>
    %c8_i32_174 = arith.constant 8 : i32
    %552 = vector.broadcast %c8_i32_174 : i32 to vector<8x8xi32>
    %553 = arith.select %551, %298, %552 : vector<8x8xi1>, vector<8x8xi32>
    %cst_175 = arith.constant dense<2147483647> : vector<8xi32>
    %554 = vector.multi_reduction <minsi>, %553, %cst_175 [0] : vector<8x8xi32> to vector<8xi32>
    %555 = vector.shape_cast %554 : vector<8xi32> to vector<1x8xi32>
    %556 = vector.broadcast %555 : vector<1x8xi32> to vector<8x8xi32>
    %557 = arith.cmpi eq, %298, %556 : vector<8x8xi32>
    %558 = arith.extui %557 : vector<8x8xi1> to vector<8x8xi32>
    %559 = arith.sitofp %558 : vector<8x8xi32> to vector<8x8xf32>
    %560 = arith.maximumf %493, %559 : vector<8x8xf32>
    %561 = vector.shape_cast %559 : vector<8x8xf32> to vector<8x8x1xf32>
    %562 = vector.broadcast %561 : vector<8x8x1xf32> to vector<8x8x128xf32>
    %563 = arith.mulf %562, %535 : vector<8x8x128xf32>
    %cst_176 = arith.constant dense<0.000000e+00> : vector<8x128xf32>
    %564 = vector.multi_reduction <add>, %563, %cst_176 [0] : vector<8x8x128xf32> to vector<8x128xf32>
    %565 = vector.broadcast %c3_i32_156 : i32 to vector<8x8xi32>
    %566 = arith.cmpi eq, %298, %565 : vector<8x8xi32>
    %567 = vector.shape_cast %555 : vector<1x8xi32> to vector<1x8xi32>
    %568 = vector.broadcast %567 : vector<1x8xi32> to vector<8x8xi32>
    %569 = arith.select %566, %568, %502 : vector<8x8xi1>, vector<8x8xi32>
    %c4_i32_177 = arith.constant 4 : i32
    %570 = tpu.concatenate %564, %534 in 1 : vector<8x128xf32>, vector<8x128xf32> -> vector<8x256xf32>
    %571 = arith.truncf %570 : vector<8x256xf32> to vector<8x256xbf16>
    %c0_178 = arith.constant 0 : index
    %c0_179 = arith.constant 0 : index
    %572 = vector.load %arg4[%c0_178, %c0_179] : memref<256x512xbf16, #tpu.memory_space<vmem>>, vector<256x512xbf16>
    %cst_180 = arith.constant dense<0.000000e+00> : vector<8x512xf32>
    %573 = tpu.matmul %571, %572, %cst_180 {dimension_numbers = #tpu.dot_dimension_numbers<[1], [0], [0], [1], [0, 0, 1, 1], [], []>} : vector<8x256xbf16>, vector<256x512xbf16>, vector<8x512xf32> -> vector<8x512xf32>
    %c0_181 = arith.constant 0 : index
    %c0_182 = arith.constant 0 : index
    %574 = vector.load %arg5[%c0_181, %c0_182] : memref<1x512xf32, #tpu.memory_space<vmem>>, vector<1x512xf32>
    %575 = vector.broadcast %574 : vector<1x512xf32> to vector<8x512xf32>
    %576 = arith.addf %573, %575 : vector<8x512xf32>
    %577 = vector.extract_strided_slice %576 {offsets = [0, 0], sizes = [8, 128], strides = [1, 1]} : vector<8x512xf32> to vector<8x128xf32>
    %578 = arith.negf %577 : vector<8x128xf32>
    %579 = math.exp %578 : vector<8x128xf32>
    %cst_183 = arith.constant 1.000000e+00 : f32
    %580 = vector.broadcast %cst_183 : f32 to vector<8x128xf32>
    %581 = arith.addf %580, %579 : vector<8x128xf32>
    %582 = arith.divf %580, %581 : vector<8x128xf32>
    %583 = vector.extract_strided_slice %576 {offsets = [0, 128], sizes = [8, 128], strides = [1, 1]} : vector<8x512xf32> to vector<8x128xf32>
    %584 = arith.negf %583 : vector<8x128xf32>
    %585 = math.exp %584 : vector<8x128xf32>
    %cst_184 = arith.constant 1.000000e+00 : f32
    %586 = vector.broadcast %cst_184 : f32 to vector<8x128xf32>
    %587 = arith.addf %586, %585 : vector<8x128xf32>
    %588 = arith.divf %586, %587 : vector<8x128xf32>
    %589 = vector.extract_strided_slice %576 {offsets = [0, 256], sizes = [8, 128], strides = [1, 1]} : vector<8x512xf32> to vector<8x128xf32>
    %590 = math.tanh %589 : vector<8x128xf32>
    %591 = vector.extract_strided_slice %576 {offsets = [0, 384], sizes = [8, 128], strides = [1, 1]} : vector<8x512xf32> to vector<8x128xf32>
    %592 = arith.negf %591 : vector<8x128xf32>
    %593 = math.exp %592 : vector<8x128xf32>
    %cst_185 = arith.constant 1.000000e+00 : f32
    %594 = vector.broadcast %cst_185 : f32 to vector<8x128xf32>
    %595 = arith.addf %594, %593 : vector<8x128xf32>
    %596 = arith.divf %594, %595 : vector<8x128xf32>
    %597 = arith.mulf %588, %532 : vector<8x128xf32>
    %598 = arith.mulf %582, %590 : vector<8x128xf32>
    %599 = arith.addf %597, %598 : vector<8x128xf32>
    %600 = math.tanh %599 : vector<8x128xf32>
    %601 = arith.mulf %596, %600 : vector<8x128xf32>
    %c0_186 = arith.constant 0 : index
    %c0_187 = arith.constant 0 : index
    %c0_188 = arith.constant 0 : index
    %602 = vector.load %arg9[%c0_186, %c0_187, %c0_188] : memref<8x8x128xf32, #tpu.memory_space<vmem>>, vector<8x8x128xf32>
    %603 = vector.shape_cast %601 : vector<8x128xf32> to vector<1x8x128xf32>
    %604 = vector.broadcast %603 : vector<1x8x128xf32> to vector<8x8x128xf32>
    %605 = arith.mulf %602, %604 : vector<8x8x128xf32>
    %cst_189 = arith.constant dense<0.000000e+00> : vector<8x8xf32>
    %606 = vector.multi_reduction <add>, %605, %cst_189 [2] : vector<8x8x128xf32> to vector<8x8xf32>
    %cst_190 = arith.constant 5.000000e-01 : f32
    %607 = vector.broadcast %cst_190 : f32 to vector<8x8xf32>
    %608 = arith.cmpf ogt, %560, %607 : vector<8x8xf32>
    %cst_191 = arith.constant -1.000000e+30 : f32
    %609 = vector.broadcast %cst_191 : f32 to vector<8x8xf32>
    %610 = arith.select %608, %609, %606 : vector<8x8xi1>, vector<8x8xf32>
    %611 = arith.index_cast %c4_i32_177 : i32 to index
    %c0_192 = arith.constant 0 : index
    %c0_193 = arith.constant 0 : index
    %612 = vector.load %arg6[%611, %c0_192, %c0_193] : memref<8x8x8xf32, #tpu.memory_space<vmem>>, vector<1x8x8xf32>
    %613 = vector.shape_cast %612 : vector<1x8x8xf32> to vector<8x8xf32>
    %614 = arith.addf %610, %613 : vector<8x8xf32>
    %cst_194 = arith.constant dense<0xFF800000> : vector<8xf32>
    %615 = vector.multi_reduction <maximumf>, %614, %cst_194 [0] : vector<8x8xf32> to vector<8xf32>
    %616 = vector.shape_cast %615 : vector<8xf32> to vector<1x8xf32>
    %617 = vector.broadcast %616 : vector<1x8xf32> to vector<8x8xf32>
    %618 = arith.cmpf oeq, %614, %617 : vector<8x8xf32>
    %c8_i32_195 = arith.constant 8 : i32
    %619 = vector.broadcast %c8_i32_195 : i32 to vector<8x8xi32>
    %620 = arith.select %618, %298, %619 : vector<8x8xi1>, vector<8x8xi32>
    %cst_196 = arith.constant dense<2147483647> : vector<8xi32>
    %621 = vector.multi_reduction <minsi>, %620, %cst_196 [0] : vector<8x8xi32> to vector<8xi32>
    %622 = vector.shape_cast %621 : vector<8xi32> to vector<1x8xi32>
    %623 = vector.broadcast %622 : vector<1x8xi32> to vector<8x8xi32>
    %624 = arith.cmpi eq, %298, %623 : vector<8x8xi32>
    %625 = arith.extui %624 : vector<8x8xi1> to vector<8x8xi32>
    %626 = arith.sitofp %625 : vector<8x8xi32> to vector<8x8xf32>
    %627 = arith.maximumf %560, %626 : vector<8x8xf32>
    %628 = vector.shape_cast %626 : vector<8x8xf32> to vector<8x8x1xf32>
    %629 = vector.broadcast %628 : vector<8x8x1xf32> to vector<8x8x128xf32>
    %630 = arith.mulf %629, %602 : vector<8x8x128xf32>
    %cst_197 = arith.constant dense<0.000000e+00> : vector<8x128xf32>
    %631 = vector.multi_reduction <add>, %630, %cst_197 [0] : vector<8x8x128xf32> to vector<8x128xf32>
    %632 = vector.broadcast %c4_i32_177 : i32 to vector<8x8xi32>
    %633 = arith.cmpi eq, %298, %632 : vector<8x8xi32>
    %634 = vector.shape_cast %622 : vector<1x8xi32> to vector<1x8xi32>
    %635 = vector.broadcast %634 : vector<1x8xi32> to vector<8x8xi32>
    %636 = arith.select %633, %635, %569 : vector<8x8xi1>, vector<8x8xi32>
    %c5_i32_198 = arith.constant 5 : i32
    %637 = tpu.concatenate %631, %601 in 1 : vector<8x128xf32>, vector<8x128xf32> -> vector<8x256xf32>
    %638 = arith.truncf %637 : vector<8x256xf32> to vector<8x256xbf16>
    %c0_199 = arith.constant 0 : index
    %c0_200 = arith.constant 0 : index
    %639 = vector.load %arg4[%c0_199, %c0_200] : memref<256x512xbf16, #tpu.memory_space<vmem>>, vector<256x512xbf16>
    %cst_201 = arith.constant dense<0.000000e+00> : vector<8x512xf32>
    %640 = tpu.matmul %638, %639, %cst_201 {dimension_numbers = #tpu.dot_dimension_numbers<[1], [0], [0], [1], [0, 0, 1, 1], [], []>} : vector<8x256xbf16>, vector<256x512xbf16>, vector<8x512xf32> -> vector<8x512xf32>
    %c0_202 = arith.constant 0 : index
    %c0_203 = arith.constant 0 : index
    %641 = vector.load %arg5[%c0_202, %c0_203] : memref<1x512xf32, #tpu.memory_space<vmem>>, vector<1x512xf32>
    %642 = vector.broadcast %641 : vector<1x512xf32> to vector<8x512xf32>
    %643 = arith.addf %640, %642 : vector<8x512xf32>
    %644 = vector.extract_strided_slice %643 {offsets = [0, 0], sizes = [8, 128], strides = [1, 1]} : vector<8x512xf32> to vector<8x128xf32>
    %645 = arith.negf %644 : vector<8x128xf32>
    %646 = math.exp %645 : vector<8x128xf32>
    %cst_204 = arith.constant 1.000000e+00 : f32
    %647 = vector.broadcast %cst_204 : f32 to vector<8x128xf32>
    %648 = arith.addf %647, %646 : vector<8x128xf32>
    %649 = arith.divf %647, %648 : vector<8x128xf32>
    %650 = vector.extract_strided_slice %643 {offsets = [0, 128], sizes = [8, 128], strides = [1, 1]} : vector<8x512xf32> to vector<8x128xf32>
    %651 = arith.negf %650 : vector<8x128xf32>
    %652 = math.exp %651 : vector<8x128xf32>
    %cst_205 = arith.constant 1.000000e+00 : f32
    %653 = vector.broadcast %cst_205 : f32 to vector<8x128xf32>
    %654 = arith.addf %653, %652 : vector<8x128xf32>
    %655 = arith.divf %653, %654 : vector<8x128xf32>
    %656 = vector.extract_strided_slice %643 {offsets = [0, 256], sizes = [8, 128], strides = [1, 1]} : vector<8x512xf32> to vector<8x128xf32>
    %657 = math.tanh %656 : vector<8x128xf32>
    %658 = vector.extract_strided_slice %643 {offsets = [0, 384], sizes = [8, 128], strides = [1, 1]} : vector<8x512xf32> to vector<8x128xf32>
    %659 = arith.negf %658 : vector<8x128xf32>
    %660 = math.exp %659 : vector<8x128xf32>
    %cst_206 = arith.constant 1.000000e+00 : f32
    %661 = vector.broadcast %cst_206 : f32 to vector<8x128xf32>
    %662 = arith.addf %661, %660 : vector<8x128xf32>
    %663 = arith.divf %661, %662 : vector<8x128xf32>
    %664 = arith.mulf %655, %599 : vector<8x128xf32>
    %665 = arith.mulf %649, %657 : vector<8x128xf32>
    %666 = arith.addf %664, %665 : vector<8x128xf32>
    %667 = math.tanh %666 : vector<8x128xf32>
    %668 = arith.mulf %663, %667 : vector<8x128xf32>
    %c0_207 = arith.constant 0 : index
    %c0_208 = arith.constant 0 : index
    %c0_209 = arith.constant 0 : index
    %669 = vector.load %arg9[%c0_207, %c0_208, %c0_209] : memref<8x8x128xf32, #tpu.memory_space<vmem>>, vector<8x8x128xf32>
    %670 = vector.shape_cast %668 : vector<8x128xf32> to vector<1x8x128xf32>
    %671 = vector.broadcast %670 : vector<1x8x128xf32> to vector<8x8x128xf32>
    %672 = arith.mulf %669, %671 : vector<8x8x128xf32>
    %cst_210 = arith.constant dense<0.000000e+00> : vector<8x8xf32>
    %673 = vector.multi_reduction <add>, %672, %cst_210 [2] : vector<8x8x128xf32> to vector<8x8xf32>
    %cst_211 = arith.constant 5.000000e-01 : f32
    %674 = vector.broadcast %cst_211 : f32 to vector<8x8xf32>
    %675 = arith.cmpf ogt, %627, %674 : vector<8x8xf32>
    %cst_212 = arith.constant -1.000000e+30 : f32
    %676 = vector.broadcast %cst_212 : f32 to vector<8x8xf32>
    %677 = arith.select %675, %676, %673 : vector<8x8xi1>, vector<8x8xf32>
    %678 = arith.index_cast %c5_i32_198 : i32 to index
    %c0_213 = arith.constant 0 : index
    %c0_214 = arith.constant 0 : index
    %679 = vector.load %arg6[%678, %c0_213, %c0_214] : memref<8x8x8xf32, #tpu.memory_space<vmem>>, vector<1x8x8xf32>
    %680 = vector.shape_cast %679 : vector<1x8x8xf32> to vector<8x8xf32>
    %681 = arith.addf %677, %680 : vector<8x8xf32>
    %cst_215 = arith.constant dense<0xFF800000> : vector<8xf32>
    %682 = vector.multi_reduction <maximumf>, %681, %cst_215 [0] : vector<8x8xf32> to vector<8xf32>
    %683 = vector.shape_cast %682 : vector<8xf32> to vector<1x8xf32>
    %684 = vector.broadcast %683 : vector<1x8xf32> to vector<8x8xf32>
    %685 = arith.cmpf oeq, %681, %684 : vector<8x8xf32>
    %c8_i32_216 = arith.constant 8 : i32
    %686 = vector.broadcast %c8_i32_216 : i32 to vector<8x8xi32>
    %687 = arith.select %685, %298, %686 : vector<8x8xi1>, vector<8x8xi32>
    %cst_217 = arith.constant dense<2147483647> : vector<8xi32>
    %688 = vector.multi_reduction <minsi>, %687, %cst_217 [0] : vector<8x8xi32> to vector<8xi32>
    %689 = vector.shape_cast %688 : vector<8xi32> to vector<1x8xi32>
    %690 = vector.broadcast %689 : vector<1x8xi32> to vector<8x8xi32>
    %691 = arith.cmpi eq, %298, %690 : vector<8x8xi32>
    %692 = arith.extui %691 : vector<8x8xi1> to vector<8x8xi32>
    %693 = arith.sitofp %692 : vector<8x8xi32> to vector<8x8xf32>
    %694 = arith.maximumf %627, %693 : vector<8x8xf32>
    %695 = vector.shape_cast %693 : vector<8x8xf32> to vector<8x8x1xf32>
    %696 = vector.broadcast %695 : vector<8x8x1xf32> to vector<8x8x128xf32>
    %697 = arith.mulf %696, %669 : vector<8x8x128xf32>
    %cst_218 = arith.constant dense<0.000000e+00> : vector<8x128xf32>
    %698 = vector.multi_reduction <add>, %697, %cst_218 [0] : vector<8x8x128xf32> to vector<8x128xf32>
    %699 = vector.broadcast %c5_i32_198 : i32 to vector<8x8xi32>
    %700 = arith.cmpi eq, %298, %699 : vector<8x8xi32>
    %701 = vector.shape_cast %689 : vector<1x8xi32> to vector<1x8xi32>
    %702 = vector.broadcast %701 : vector<1x8xi32> to vector<8x8xi32>
    %703 = arith.select %700, %702, %636 : vector<8x8xi1>, vector<8x8xi32>
    %c6_i32_219 = arith.constant 6 : i32
    %704 = tpu.concatenate %698, %668 in 1 : vector<8x128xf32>, vector<8x128xf32> -> vector<8x256xf32>
    %705 = arith.truncf %704 : vector<8x256xf32> to vector<8x256xbf16>
    %c0_220 = arith.constant 0 : index
    %c0_221 = arith.constant 0 : index
    %706 = vector.load %arg4[%c0_220, %c0_221] : memref<256x512xbf16, #tpu.memory_space<vmem>>, vector<256x512xbf16>
    %cst_222 = arith.constant dense<0.000000e+00> : vector<8x512xf32>
    %707 = tpu.matmul %705, %706, %cst_222 {dimension_numbers = #tpu.dot_dimension_numbers<[1], [0], [0], [1], [0, 0, 1, 1], [], []>} : vector<8x256xbf16>, vector<256x512xbf16>, vector<8x512xf32> -> vector<8x512xf32>
    %c0_223 = arith.constant 0 : index
    %c0_224 = arith.constant 0 : index
    %708 = vector.load %arg5[%c0_223, %c0_224] : memref<1x512xf32, #tpu.memory_space<vmem>>, vector<1x512xf32>
    %709 = vector.broadcast %708 : vector<1x512xf32> to vector<8x512xf32>
    %710 = arith.addf %707, %709 : vector<8x512xf32>
    %711 = vector.extract_strided_slice %710 {offsets = [0, 0], sizes = [8, 128], strides = [1, 1]} : vector<8x512xf32> to vector<8x128xf32>
    %712 = arith.negf %711 : vector<8x128xf32>
    %713 = math.exp %712 : vector<8x128xf32>
    %cst_225 = arith.constant 1.000000e+00 : f32
    %714 = vector.broadcast %cst_225 : f32 to vector<8x128xf32>
    %715 = arith.addf %714, %713 : vector<8x128xf32>
    %716 = arith.divf %714, %715 : vector<8x128xf32>
    %717 = vector.extract_strided_slice %710 {offsets = [0, 128], sizes = [8, 128], strides = [1, 1]} : vector<8x512xf32> to vector<8x128xf32>
    %718 = arith.negf %717 : vector<8x128xf32>
    %719 = math.exp %718 : vector<8x128xf32>
    %cst_226 = arith.constant 1.000000e+00 : f32
    %720 = vector.broadcast %cst_226 : f32 to vector<8x128xf32>
    %721 = arith.addf %720, %719 : vector<8x128xf32>
    %722 = arith.divf %720, %721 : vector<8x128xf32>
    %723 = vector.extract_strided_slice %710 {offsets = [0, 256], sizes = [8, 128], strides = [1, 1]} : vector<8x512xf32> to vector<8x128xf32>
    %724 = math.tanh %723 : vector<8x128xf32>
    %725 = vector.extract_strided_slice %710 {offsets = [0, 384], sizes = [8, 128], strides = [1, 1]} : vector<8x512xf32> to vector<8x128xf32>
    %726 = arith.negf %725 : vector<8x128xf32>
    %727 = math.exp %726 : vector<8x128xf32>
    %cst_227 = arith.constant 1.000000e+00 : f32
    %728 = vector.broadcast %cst_227 : f32 to vector<8x128xf32>
    %729 = arith.addf %728, %727 : vector<8x128xf32>
    %730 = arith.divf %728, %729 : vector<8x128xf32>
    %731 = arith.mulf %722, %666 : vector<8x128xf32>
    %732 = arith.mulf %716, %724 : vector<8x128xf32>
    %733 = arith.addf %731, %732 : vector<8x128xf32>
    %734 = math.tanh %733 : vector<8x128xf32>
    %735 = arith.mulf %730, %734 : vector<8x128xf32>
    %c0_228 = arith.constant 0 : index
    %c0_229 = arith.constant 0 : index
    %c0_230 = arith.constant 0 : index
    %736 = vector.load %arg9[%c0_228, %c0_229, %c0_230] : memref<8x8x128xf32, #tpu.memory_space<vmem>>, vector<8x8x128xf32>
    %737 = vector.shape_cast %735 : vector<8x128xf32> to vector<1x8x128xf32>
    %738 = vector.broadcast %737 : vector<1x8x128xf32> to vector<8x8x128xf32>
    %739 = arith.mulf %736, %738 : vector<8x8x128xf32>
    %cst_231 = arith.constant dense<0.000000e+00> : vector<8x8xf32>
    %740 = vector.multi_reduction <add>, %739, %cst_231 [2] : vector<8x8x128xf32> to vector<8x8xf32>
    %cst_232 = arith.constant 5.000000e-01 : f32
    %741 = vector.broadcast %cst_232 : f32 to vector<8x8xf32>
    %742 = arith.cmpf ogt, %694, %741 : vector<8x8xf32>
    %cst_233 = arith.constant -1.000000e+30 : f32
    %743 = vector.broadcast %cst_233 : f32 to vector<8x8xf32>
    %744 = arith.select %742, %743, %740 : vector<8x8xi1>, vector<8x8xf32>
    %745 = arith.index_cast %c6_i32_219 : i32 to index
    %c0_234 = arith.constant 0 : index
    %c0_235 = arith.constant 0 : index
    %746 = vector.load %arg6[%745, %c0_234, %c0_235] : memref<8x8x8xf32, #tpu.memory_space<vmem>>, vector<1x8x8xf32>
    %747 = vector.shape_cast %746 : vector<1x8x8xf32> to vector<8x8xf32>
    %748 = arith.addf %744, %747 : vector<8x8xf32>
    %cst_236 = arith.constant dense<0xFF800000> : vector<8xf32>
    %749 = vector.multi_reduction <maximumf>, %748, %cst_236 [0] : vector<8x8xf32> to vector<8xf32>
    %750 = vector.shape_cast %749 : vector<8xf32> to vector<1x8xf32>
    %751 = vector.broadcast %750 : vector<1x8xf32> to vector<8x8xf32>
    %752 = arith.cmpf oeq, %748, %751 : vector<8x8xf32>
    %c8_i32_237 = arith.constant 8 : i32
    %753 = vector.broadcast %c8_i32_237 : i32 to vector<8x8xi32>
    %754 = arith.select %752, %298, %753 : vector<8x8xi1>, vector<8x8xi32>
    %cst_238 = arith.constant dense<2147483647> : vector<8xi32>
    %755 = vector.multi_reduction <minsi>, %754, %cst_238 [0] : vector<8x8xi32> to vector<8xi32>
    %756 = vector.shape_cast %755 : vector<8xi32> to vector<1x8xi32>
    %757 = vector.broadcast %756 : vector<1x8xi32> to vector<8x8xi32>
    %758 = arith.cmpi eq, %298, %757 : vector<8x8xi32>
    %759 = arith.extui %758 : vector<8x8xi1> to vector<8x8xi32>
    %760 = arith.sitofp %759 : vector<8x8xi32> to vector<8x8xf32>
    %761 = arith.maximumf %694, %760 : vector<8x8xf32>
    %762 = vector.shape_cast %760 : vector<8x8xf32> to vector<8x8x1xf32>
    %763 = vector.broadcast %762 : vector<8x8x1xf32> to vector<8x8x128xf32>
    %764 = arith.mulf %763, %736 : vector<8x8x128xf32>
    %cst_239 = arith.constant dense<0.000000e+00> : vector<8x128xf32>
    %765 = vector.multi_reduction <add>, %764, %cst_239 [0] : vector<8x8x128xf32> to vector<8x128xf32>
    %766 = vector.broadcast %c6_i32_219 : i32 to vector<8x8xi32>
    %767 = arith.cmpi eq, %298, %766 : vector<8x8xi32>
    %768 = vector.shape_cast %756 : vector<1x8xi32> to vector<1x8xi32>
    %769 = vector.broadcast %768 : vector<1x8xi32> to vector<8x8xi32>
    %770 = arith.select %767, %769, %703 : vector<8x8xi1>, vector<8x8xi32>
    %c7_i32_240 = arith.constant 7 : i32
    %771 = tpu.concatenate %765, %735 in 1 : vector<8x128xf32>, vector<8x128xf32> -> vector<8x256xf32>
    %772 = arith.truncf %771 : vector<8x256xf32> to vector<8x256xbf16>
    %c0_241 = arith.constant 0 : index
    %c0_242 = arith.constant 0 : index
    %773 = vector.load %arg4[%c0_241, %c0_242] : memref<256x512xbf16, #tpu.memory_space<vmem>>, vector<256x512xbf16>
    %cst_243 = arith.constant dense<0.000000e+00> : vector<8x512xf32>
    %774 = tpu.matmul %772, %773, %cst_243 {dimension_numbers = #tpu.dot_dimension_numbers<[1], [0], [0], [1], [0, 0, 1, 1], [], []>} : vector<8x256xbf16>, vector<256x512xbf16>, vector<8x512xf32> -> vector<8x512xf32>
    %c0_244 = arith.constant 0 : index
    %c0_245 = arith.constant 0 : index
    %775 = vector.load %arg5[%c0_244, %c0_245] : memref<1x512xf32, #tpu.memory_space<vmem>>, vector<1x512xf32>
    %776 = vector.broadcast %775 : vector<1x512xf32> to vector<8x512xf32>
    %777 = arith.addf %774, %776 : vector<8x512xf32>
    %778 = vector.extract_strided_slice %777 {offsets = [0, 0], sizes = [8, 128], strides = [1, 1]} : vector<8x512xf32> to vector<8x128xf32>
    %779 = arith.negf %778 : vector<8x128xf32>
    %780 = math.exp %779 : vector<8x128xf32>
    %cst_246 = arith.constant 1.000000e+00 : f32
    %781 = vector.broadcast %cst_246 : f32 to vector<8x128xf32>
    %782 = arith.addf %781, %780 : vector<8x128xf32>
    %783 = arith.divf %781, %782 : vector<8x128xf32>
    %784 = vector.extract_strided_slice %777 {offsets = [0, 128], sizes = [8, 128], strides = [1, 1]} : vector<8x512xf32> to vector<8x128xf32>
    %785 = arith.negf %784 : vector<8x128xf32>
    %786 = math.exp %785 : vector<8x128xf32>
    %cst_247 = arith.constant 1.000000e+00 : f32
    %787 = vector.broadcast %cst_247 : f32 to vector<8x128xf32>
    %788 = arith.addf %787, %786 : vector<8x128xf32>
    %789 = arith.divf %787, %788 : vector<8x128xf32>
    %790 = vector.extract_strided_slice %777 {offsets = [0, 256], sizes = [8, 128], strides = [1, 1]} : vector<8x512xf32> to vector<8x128xf32>
    %791 = math.tanh %790 : vector<8x128xf32>
    %792 = vector.extract_strided_slice %777 {offsets = [0, 384], sizes = [8, 128], strides = [1, 1]} : vector<8x512xf32> to vector<8x128xf32>
    %793 = arith.negf %792 : vector<8x128xf32>
    %794 = math.exp %793 : vector<8x128xf32>
    %cst_248 = arith.constant 1.000000e+00 : f32
    %795 = vector.broadcast %cst_248 : f32 to vector<8x128xf32>
    %796 = arith.addf %795, %794 : vector<8x128xf32>
    %797 = arith.divf %795, %796 : vector<8x128xf32>
    %798 = arith.mulf %789, %733 : vector<8x128xf32>
    %799 = arith.mulf %783, %791 : vector<8x128xf32>
    %800 = arith.addf %798, %799 : vector<8x128xf32>
    %801 = math.tanh %800 : vector<8x128xf32>
    %802 = arith.mulf %797, %801 : vector<8x128xf32>
    %c0_249 = arith.constant 0 : index
    %c0_250 = arith.constant 0 : index
    %c0_251 = arith.constant 0 : index
    %803 = vector.load %arg9[%c0_249, %c0_250, %c0_251] : memref<8x8x128xf32, #tpu.memory_space<vmem>>, vector<8x8x128xf32>
    %804 = vector.shape_cast %802 : vector<8x128xf32> to vector<1x8x128xf32>
    %805 = vector.broadcast %804 : vector<1x8x128xf32> to vector<8x8x128xf32>
    %806 = arith.mulf %803, %805 : vector<8x8x128xf32>
    %cst_252 = arith.constant dense<0.000000e+00> : vector<8x8xf32>
    %807 = vector.multi_reduction <add>, %806, %cst_252 [2] : vector<8x8x128xf32> to vector<8x8xf32>
    %cst_253 = arith.constant 5.000000e-01 : f32
    %808 = vector.broadcast %cst_253 : f32 to vector<8x8xf32>
    %809 = arith.cmpf ogt, %761, %808 : vector<8x8xf32>
    %cst_254 = arith.constant -1.000000e+30 : f32
    %810 = vector.broadcast %cst_254 : f32 to vector<8x8xf32>
    %811 = arith.select %809, %810, %807 : vector<8x8xi1>, vector<8x8xf32>
    %812 = arith.index_cast %c7_i32_240 : i32 to index
    %c0_255 = arith.constant 0 : index
    %c0_256 = arith.constant 0 : index
    %813 = vector.load %arg6[%812, %c0_255, %c0_256] : memref<8x8x8xf32, #tpu.memory_space<vmem>>, vector<1x8x8xf32>
    %814 = vector.shape_cast %813 : vector<1x8x8xf32> to vector<8x8xf32>
    %815 = arith.addf %811, %814 : vector<8x8xf32>
    %cst_257 = arith.constant dense<0xFF800000> : vector<8xf32>
    %816 = vector.multi_reduction <maximumf>, %815, %cst_257 [0] : vector<8x8xf32> to vector<8xf32>
    %817 = vector.shape_cast %816 : vector<8xf32> to vector<1x8xf32>
    %818 = vector.broadcast %817 : vector<1x8xf32> to vector<8x8xf32>
    %819 = arith.cmpf oeq, %815, %818 : vector<8x8xf32>
    %c8_i32_258 = arith.constant 8 : i32
    %820 = vector.broadcast %c8_i32_258 : i32 to vector<8x8xi32>
    %821 = arith.select %819, %298, %820 : vector<8x8xi1>, vector<8x8xi32>
    %cst_259 = arith.constant dense<2147483647> : vector<8xi32>
    %822 = vector.multi_reduction <minsi>, %821, %cst_259 [0] : vector<8x8xi32> to vector<8xi32>
    %823 = vector.shape_cast %822 : vector<8xi32> to vector<1x8xi32>
    %824 = vector.broadcast %823 : vector<1x8xi32> to vector<8x8xi32>
    %825 = arith.cmpi eq, %298, %824 : vector<8x8xi32>
    %826 = arith.extui %825 : vector<8x8xi1> to vector<8x8xi32>
    %827 = arith.sitofp %826 : vector<8x8xi32> to vector<8x8xf32>
    %828 = arith.maximumf %761, %827 : vector<8x8xf32>
    %829 = vector.shape_cast %827 : vector<8x8xf32> to vector<8x8x1xf32>
    %830 = vector.broadcast %829 : vector<8x8x1xf32> to vector<8x8x128xf32>
    %831 = arith.mulf %830, %803 : vector<8x8x128xf32>
    %cst_260 = arith.constant dense<0.000000e+00> : vector<8x128xf32>
    %832 = vector.multi_reduction <add>, %831, %cst_260 [0] : vector<8x8x128xf32> to vector<8x128xf32>
    %833 = vector.broadcast %c7_i32_240 : i32 to vector<8x8xi32>
    %834 = arith.cmpi eq, %298, %833 : vector<8x8xi32>
    %835 = vector.shape_cast %823 : vector<1x8xi32> to vector<1x8xi32>
    %836 = vector.broadcast %835 : vector<1x8xi32> to vector<8x8xi32>
    %837 = arith.select %834, %836, %770 : vector<8x8xi1>, vector<8x8xi32>
    %c8_i32_261 = arith.constant 8 : i32
    %c0_262 = arith.constant 0 : index
    %c0_263 = arith.constant 0 : index
    %838 = vector.load %arg7[%c0_262, %c0_263] : memref<8x8xi32, #tpu.memory_space<vmem>>, vector<8x8xi32>
    tpu.vector_store %arg7[%c0_262, %c0_263], %837 {strides = array<i32>} : memref<8x8xi32, #tpu.memory_space<vmem>>, vector<8x8xi32>,
    return
  }
}

</mosaic_0001>

<bundles_post_ra>
// kernel: tpu_custom_call.1
= control target key start
LH: loop header
LB: loop body
LE: loop exit
PB: predicated region body
PF: predicated region fallthrough
CT: control target
= control target key end

     0   :  { %12 = vsyncpa [#allocation5], 0  ;;  %s9641_s0 = inlined_call_operand.vmem [shape: bf16[64,4], index: 0, kind: input, shape index: {}]   ;;  %s9642_s1 = inlined_call_operand.vmem [shape: bf16[4,512], index: 1, kind: input, shape index: {}]   ;;  %s9643_s2 = inlined_call_operand.hbm [shape: bf16[128,512], index: 2, kind: input, shape index: {}]   ;;  %s9644_s3 = inlined_call_operand.vmem [shape: f32[1,512], index: 3, kind: input, shape index: {}]   ;;  %s9645_s4 = inlined_call_operand.hbm [shape: bf16[256,512], index: 4, kind: input, shape index: {}]   ;;  %s9646_s5 = inlined_call_operand.vmem [shape: f32[1,512], index: 5, kind: input, shape index: {}]   ;;  %s9647_s6 = inlined_call_operand.hbm [shape: f32[8,8,8], index: 6, kind: input, shape index: {}]   ;;  %s9648_s7 = inlined_call_operand.hbm [shape: s32[8,8], index: 7, kind: output, shape index: {}]  }
   0x1   :  { %13 = vsyncpa [#allocation8], 0 }
   0x2   :  { %14 = vsyncpa [#allocation6], 0  ;;  %s38_s26 = sshll.u32 %s9645_s4, 4  ;;  %s8053_s27 = smov [#allocation7]   ;;  %s39_s26 = int_to_ptr.hbm [resolvable:$true] %s38_s26 }
   0x3   :  { %s40_s28 = sshll.u32 %s8053_s27, 4  ;;  %s23_s8 = sshll.u32 %s9643_s2, 4  ;;  %s41_s28 = int_to_ptr.vmem [resolvable:$true] %s40_s28  ;;  %s24_s8 = int_to_ptr.hbm [resolvable:$true] %s23_s8 }
   0x4   :  { %s8054_s9 = smov 256   ;;  %s8055_s10 = smov 16  }
   0x5   :  { %46 = dma.hbm_to_vmem [thread:$0]  %s39_s26, 8192, %s41_s28, [#allocation8], %s8054_s9, %s8054_s9, %s8055_s10  }
   0x6   :  { %s8056_s11 = smov [#allocation4]   ;;  %s53_s15 = sshll.u32 %s9647_s6, 4  ;;  %s54_s15 = int_to_ptr.hbm [resolvable:$true] %s53_s15 }
   0x7   :  { %s25_s12 = sshll.u32 %s8056_s11, 4  ;;  %s8057_s4 = smov [#allocation9]   ;;  %s26_s12 = int_to_ptr.vmem [resolvable:$true] %s25_s12 }
   0x8   :  { %31 = dma.hbm_to_vmem [thread:$0]  %s24_s8, 4096, %s26_s12, [#allocation5], %s8054_s9, %s8054_s9, %s8055_s10  }
   0x9   :  { %s55_s16 = sshll.u32 %s8057_s4, 4  ;;  %s8058_s17 = smov 128   ;;  %s56_s16 = int_to_ptr.vmem [resolvable:$true] %s55_s16 }
   0xa   :  { %s8059_s18 = smov 8  }
   0xb   :  { %61 = dma.hbm_to_vmem [thread:$0]  %s54_s15, 1024, %s56_s16, [#allocation8], %s8058_s17, %s8058_s17, %s8059_s18  }
   0xc   :  { %8047 = dma.done.wait [#allocation5], 4096  }
   0xd   :  { %8048 = vsyncadd [#allocation5], 4294963200 }
   0xe   :  { %8049 = dma.done.wait [#allocation8], 9216  }
   0xf   :  { %8050 = vsyncadd [#allocation8], 4294958080  ;;  %v83_v0 = vld [vmem:[%s9642_s1] sm:$0xff]  ;;  %vm133_vm0 = vcmask 1041408   ;;  %v5994_v1 = vld [vmem:[#allocation4 + $0xe0] sm:$0xf] }
  0x10   :  { %115 = vst [vmem:[#allocation1] ss:$4 sm:$0xff] %v83_v0  ;;  %v7249_v2 = vld [vmem:[#allocation4 + $0xec] sm:$0xf0]  ;;  %v7247_v3 = vld [vmem:[#allocation4 + $0xe4] sm:$0xf] }
  0x11   :  { %v5996_v4 = vld [vmem:[#allocation4 + $0xf0] sm:$0xf0]  ;;  %v7248_v5 = vld [vmem:[#allocation4 + $0xec] sm:$0xf]  ;;  %v6004_v6 = vld [vmem:[#allocation4 + $0xf8] sm:$0xf0]  ;;  %v5995_v9 = vor.u32 %v7249_v2, %v5994_v1 }
  0x12   :  { %v5978_v7 = vld [vmem:[#allocation4 + $0xc0] sm:$0xf]  ;;  %v7245_v8 = vld [vmem:[#allocation4 + $0xcc] sm:$0xf0]  ;;  %v7243_v10 = vld [vmem:[#allocation4 + $0xc4] sm:$0xf]  ;;  %v5999_v16 = vor.u32 %v7247_v3, %v5996_v4  ;;  %v6007_v23 = vor.u32 %v7248_v5, %v6004_v6 }
  0x13   :  { %v5980_v11 = vld [vmem:[#allocation4 + $0xd0] sm:$0xf0]  ;;  %v6002_v12 = vld [vmem:[#allocation4 + $0xe8] sm:$0xf]  ;;  %v7250_v13 = vld [vmem:[#allocation4 + $0xf4] sm:$0xf0]  ;;  %v5979_v25 = vor.u32 %v7245_v8, %v5978_v7 }
  0x14   :  { %v7215_v20 = vld [vmem:[%s9641_s0] sm:$0xff]  ;;  %vm120_vm1 = vcmask 31744   ;;  %v7244_v26 = vld [vmem:[#allocation4 + $0xcc] sm:$0xf]  ;;  %v5983_v28 = vor.u32 %v7243_v10, %v5980_v11  ;;  %v6003_v29 = vor.u32 %v7250_v13, %v6002_v12  ;;  %v5962_v30 = vld [vmem:[#allocation4 + $0xa0] sm:$0xf] }
  0x15   :  { %v5988_v27 = vld [vmem:[#allocation4 + $0xd8] sm:$0xf0]  ;;  %v7241_v31 = vld [vmem:[#allocation4 + $0xac] sm:$0xf0]  ;;  %v7239_v32 = vld [vmem:[#allocation4 + $0xa4] sm:$0xf] }
  0x16   :  { %v5964_v33 = vld [vmem:[#allocation4 + $0xb0] sm:$0xf0]  ;;  %v5986_v34 = vld [vmem:[#allocation4 + $0xc8] sm:$0xf]  ;;  %v7246_v35 = vld [vmem:[#allocation4 + $0xd4] sm:$0xf0]  ;;  %v5991_v36 = vor.u32 %v7244_v26, %v5988_v27  ;;  %v5963_v37 = vor.u32 %v7241_v31, %v5962_v30 }
  0x17   :  { %v116_v14 = vld.sshfl [vmem:[#allocation1] sm:$0xff pattern:$0x73625140]  ;;  %v117_v15 = vld.sshfl [vmem:[#allocation1 + $0x8] sm:$0xff pattern:$0x73625140]  ;;  %v5967_v40 = vor.u32 %v7239_v32, %v5964_v33  ;;  %v5987_v41 = vor.u32 %v7246_v35, %v5986_v34 }
  0x18   :  { %v134_v17 = vsel %vm133_vm0, %v116_v14, 0  ;;  %v136_v18 = vsel %vm133_vm0, %v117_v15, 0  ;;  %v118_v19 = vld.sshfl [vmem:[#allocation1 + $0x10] sm:$0xff pattern:$0x73625140]  ;;  %v7216_v61 = vld [vmem:[%s9641_s0 + $0x8] sm:$0xff] }
  0x19   :  { %149 = vmatpush.bf16.msra.mxu0 %v134_v17  ;;  %178 = vmatpush.bf16.msra.mxu1 %v136_v18  ;;  %v138_v21 = vsel %vm133_vm0, %v118_v19, 0  ;;  %v119_v22 = vld.sshfl [vmem:[#allocation1 + $0x18] sm:$0xff pattern:$0x73625140]  ;;  %v7240_v38 = vld [vmem:[#allocation4 + $0xac] sm:$0xf] }
  0x1a   :  { %207 = vmatpush.bf16.msra.mxu2 %v138_v21  ;;  %v140_v24 = vsel %vm133_vm0, %v119_v22, 0  ;;  %v5972_v39 = vld [vmem:[#allocation4 + $0xb8] sm:$0xf0]  ;;  %v5946_v42 = vld [vmem:[#allocation4 + $0x80] sm:$0xf]  ;;  %s5837_s8 = sshll.u32 %s9648_s7, 4  ;;  %s5838_s8 = int_to_ptr.hbm [resolvable:$true] %s5837_s8 }
  0x1b   :  { %236 = vmatpush.bf16.msra.mxu3 %v140_v24  ;;  %v7237_v43 = vld [vmem:[#allocation4 + $0x8c] sm:$0xf0]  ;;  %v7235_v44 = vld [vmem:[#allocation4 + $0x84] sm:$0xf]  ;;  %v5948_v45 = vld [vmem:[#allocation4 + $0x90] sm:$0xf0]  ;;  %v5975_v48 = vor.u32 %v7240_v38, %v5972_v39 }
  0x1c   :  { %5864 = vmatmul.msk.bf16.vlgmr.msra.gmra.mxu0 %vm120_vm1, %v7215_v20  ;;  %5868 = vmatmul.msk.bf16.vlgmr.msra.gmra.mxu1 %vm120_vm1, %v7215_v20  ;;  %v5970_v46 = vld [vmem:[#allocation4 + $0xa8] sm:$0xf]  ;;  %v7242_v47 = vld [vmem:[#allocation4 + $0xb4] sm:$0xf0]  ;;  %v5947_v49 = vor.u32 %v7237_v43, %v5946_v42  ;;  %v7236_v50 = vld [vmem:[#allocation4 + $0x8c] sm:$0xf]  ;;  %v5951_v52 = vor.u32 %v7235_v44, %v5948_v45 }
  0x1d   :  { %486 = vmatpush.bf16.msrb.mxu0 %v5995_v9  ;;  %499 = vmatpush.bf16.msrb.mxu1 %v5999_v16  ;;  %v5956_v51 = vld [vmem:[#allocation4 + $0x98] sm:$0xf0]  ;;  %v5971_v53 = vor.u32 %v7242_v47, %v5970_v46  ;;  %v5930_v54 = vld [vmem:[#allocation4 + $0x60] sm:$0xf]  ;;  %v7233_v55 = vld [vmem:[#allocation4 + $0x6c] sm:$0xf0] }
  0x1e   :  { %5872 = vmatmul.msk.bf16.vlgmr.msra.gmra.mxu2 %vm120_vm1, %v7215_v20  ;;  %5876 = vmatmul.msk.bf16.vlgmr.msra.gmra.mxu3 %vm120_vm1, %v7215_v20  ;;  %v7231_v56 = vld [vmem:[#allocation4 + $0x64] sm:$0xf]  ;;  %v5932_v57 = vld [vmem:[#allocation4 + $0x70] sm:$0xf0]  ;;  %v5954_v58 = vld [vmem:[#allocation4 + $0x88] sm:$0xf]  ;;  %v5959_v60 = vor.u32 %v7236_v50, %v5956_v51  ;;  %v5931_v62 = vor.u32 %v7233_v55, %v5930_v54 }
  0x1f   :  { %525 = vmatpush.bf16.msrb.mxu3 %v6007_v23  ;;  %512 = vmatpush.bf16.msrb.mxu2 %v6003_v29  ;;  %v7238_v59 = vld [vmem:[#allocation4 + $0x94] sm:$0xf0]  ;;  %v7232_v63 = vld [vmem:[#allocation4 + $0x6c] sm:$0xf]  ;;  %v5940_v0 = vld [vmem:[#allocation4 + $0x78] sm:$0xf0]  ;;  %v5935_v1 = vor.u32 %v7231_v56, %v5932_v57 }
  0x20   :  { %v5955_v2 = vor.u32 %v7238_v59, %v5954_v58  ;;  %v5914_v3 = vld [vmem:[#allocation4 + $0x40] sm:$0xf]  ;;  %v7229_v4 = vld [vmem:[#allocation4 + $0x4c] sm:$0xf0]  ;;  %v7227_v5 = vld [vmem:[#allocation4 + $0x44] sm:$0xf]  ;;  %v5943_v9 = vor.u32 %v7232_v63, %v5940_v0 }
  0x21   :  { %487 = vmatpush.bf16.msrb.mxu0 %v5979_v25  ;;  %500 = vmatpush.bf16.msrb.mxu1 %v5983_v28  ;;  %v5916_v6 = vld [vmem:[#allocation4 + $0x50] sm:$0xf0]  ;;  %v5938_v7 = vld [vmem:[#allocation4 + $0x68] sm:$0xf]  ;;  %v7234_v8 = vld [vmem:[#allocation4 + $0x74] sm:$0xf0]  ;;  %v5915_v10 = vor.u32 %v7229_v4, %v5914_v3 }
  0x22   :  { %v7228_v11 = vld [vmem:[#allocation4 + $0x4c] sm:$0xf]  ;;  %v5924_v12 = vld [vmem:[#allocation4 + $0x58] sm:$0xf0]  ;;  %v5919_v13 = vor.u32 %v7227_v5, %v5916_v6  ;;  %v5939_v14 = vor.u32 %v7234_v8, %v5938_v7  ;;  %v5898_v16 = vld [vmem:[#allocation4 + $0x20] sm:$0xf] }
  0x23   :  { %526 = vmatpush.bf16.msrb.mxu3 %v5991_v36  ;;  %513 = vmatpush.bf16.msrb.mxu2 %v5987_v41  ;;  %v5927_v15 = vor.u32 %v7228_v11, %v5924_v12  ;;  %v7225_v17 = vld [vmem:[#allocation4 + $0x2c] sm:$0xf0]  ;;  %v7223_v18 = vld [vmem:[#allocation4 + $0x24] sm:$0xf]  ;;  %v5900_v20 = vld [vmem:[#allocation4 + $0x30] sm:$0xf0] }
  0x24   :  { %v5899_v19 = vor.u32 %v7225_v17, %v5898_v16  ;;  %v5922_v21 = vld [vmem:[#allocation4 + $0x48] sm:$0xf]  ;;  %v7230_v22 = vld [vmem:[#allocation4 + $0x54] sm:$0xf0]  ;;  %v5903_v23 = vor.u32 %v7223_v18, %v5900_v20  ;;  %v7224_v25 = vld [vmem:[#allocation4 + $0x2c] sm:$0xf] }
  0x25   :  { %488 = vmatpush.bf16.msrb.mxu0 %v5963_v37  ;;  %501 = vmatpush.bf16.msrb.mxu1 %v5967_v40  ;;  %v5923_v24 = vor.u32 %v7230_v22, %v5922_v21  ;;  %v5908_v26 = vld [vmem:[#allocation4 + $0x38] sm:$0xf0]  ;;  %v5882_v27 = vld [vmem:[#allocation4] sm:$0xf]  ;;  %v7221_v29 = vld [vmem:[#allocation4 + $0xc] sm:$0xf0] }
  0x26   :  { %v5911_v28 = vor.u32 %v7224_v25, %v5908_v26  ;;  %v7219_v30 = vld [vmem:[#allocation4 + $0x4] sm:$0xf]  ;;  %v5884_v31 = vld [vmem:[#allocation4 + $0x10] sm:$0xf0]  ;;  %v5883_v32 = vor.u32 %v7221_v29, %v5882_v27  ;;  %v5906_v33 = vld [vmem:[#allocation4 + $0x28] sm:$0xf] }
  0x27   :  { %527 = vmatpush.bf16.msrb.mxu3 %v5975_v48  ;;  %514 = vmatpush.bf16.msrb.mxu2 %v5971_v53  ;;  %v7226_v34 = vld [vmem:[#allocation4 + $0x34] sm:$0xf0]  ;;  %v5887_v35 = vor.u32 %v7219_v30, %v5884_v31  ;;  %v7220_v37 = vld [vmem:[#allocation4 + $0xc] sm:$0xf]  ;;  %v5892_v38 = vld [vmem:[#allocation4 + $0x18] sm:$0xf0] }
  0x28   :  { %v5907_v36 = vor.u32 %v7226_v34, %v5906_v33  ;;  %v5890_v39 = vld [vmem:[#allocation4 + $0x8] sm:$0xf]  ;;  %v7222_v40 = vld [vmem:[#allocation4 + $0x14] sm:$0xf0]  ;;  %v5895_v41 = vor.u32 %v7220_v37, %v5892_v38  ;;  %v7218_v44 = vld [vmem:[%s9641_s0 + $0x18] sm:$0xff]  ;;  %v9649_v45 = vmov 0  }
  0x29   :  { %489 = vmatpush.bf16.msrb.mxu0 %v5947_v49  ;;  %502 = vmatpush.bf16.msrb.mxu1 %v5951_v52  ;;  %v5891_v42 = vor.u32 %v7222_v40, %v5890_v39  ;;  %v7217_v43 = vld [vmem:[%s9641_s0 + $0x10] sm:$0xff]  ;;  %v84_v52 = vld [vmem:[%s9644_s3] sm:$0xf]  ;;  %v6125_v18 = vld [vmem:[#allocation4 + $0xe0] sm:$0xf] }
  0x2a   :  { %v8167_v53 = vperm.slane %v84_v52, 0  ;;  %v8171_v55 = vperm.slane %v84_v52, 1  ;;  %v7279_v20 = vld [vmem:[#allocation4 + $0xe4] sm:$0xf]  ;;  %v6133_v25 = vld [vmem:[#allocation4 + $0xe8] sm:$0xf] }
  0x2b   :  { %528 = vmatpush.bf16.msrb.mxu3 %v5959_v60  ;;  %515 = vmatpush.bf16.msrb.mxu2 %v5955_v2  ;;  %v7282_v26 = vld [vmem:[#allocation4 + $0xf4] sm:$0xf0]  ;;  %v7280_v31 = vld [vmem:[#allocation4 + $0xec] sm:$0xf]  ;;  %v7275_v37 = vld [vmem:[#allocation4 + $0xc4] sm:$0xf] }
  0x2c   :  { %5865 = vmatmul.msk.bf16.gmra.mxu0 %vm120_vm1, %v7216_v61  ;;  %5869 = vmatmul.msk.bf16.gmra.mxu1 %vm120_vm1, %v7216_v61  ;;  %v6134_v30 = vor.u32 %v7282_v26, %v6133_v25  ;;  %v6111_v39 = vld [vmem:[#allocation4 + $0xd0] sm:$0xf0]  ;;  %v6117_v40 = vld [vmem:[#allocation4 + $0xc8] sm:$0xf] }
  0x2d   :  { %490 = vmatpush.bf16.msrb.mxu0 %v5931_v62  ;;  %503 = vmatpush.bf16.msrb.mxu1 %v5935_v1  ;;  %v8183_v62 = vperm.slane %v84_v52, 3 }
  0x2e   :  { %5873 = vmatmul.msk.bf16.gmra.mxu2 %vm120_vm1, %v7216_v61  ;;  %5877 = vmatmul.msk.bf16.gmra.mxu3 %vm120_vm1, %v7216_v61  ;;  %v8181_v61 = vperm.slane %v84_v52, 2  ;;  %v6119_v52 = vld [vmem:[#allocation4 + $0xd8] sm:$0xf0] }
  0x2f   :  { %529 = vmatpush.bf16.msrb.mxu3 %v5943_v9  ;;  %516 = vmatpush.bf16.msrb.mxu2 %v5939_v14 }
  0x31   :  { %491 = vmatpush.bf16.msrb.mxu0 %v5915_v10  ;;  %504 = vmatpush.bf16.msrb.mxu1 %v5919_v13 }
  0x33   :  { %530 = vmatpush.bf16.msrb.mxu3 %v5927_v15  ;;  %517 = vmatpush.bf16.msrb.mxu2 %v5923_v24  ;;  %v6127_v24 = vld [vmem:[#allocation4 + $0xf0] sm:$0xf0] }
  0x34   :  { %v6130_v29 = vor.u32 %v7279_v20, %v6127_v24  ;;  %v6101_v20 = vld [vmem:[#allocation4 + $0xa8] sm:$0xf] }
  0x35   :  { %492 = vmatpush.bf16.msrb.mxu0 %v5899_v19  ;;  %505 = vmatpush.bf16.msrb.mxu1 %v5903_v23  ;;  %v7281_v19 = vld [vmem:[#allocation4 + $0xec] sm:$0xf0] }
  0x36   :  { %v6126_v23 = vor.u32 %v7281_v19, %v6125_v18  ;;  %v6095_v19 = vld [vmem:[#allocation4 + $0xb0] sm:$0xf0] }
  0x37   :  { %531 = vmatpush.bf16.msrb.mxu3 %v5911_v28  ;;  %518 = vmatpush.bf16.msrb.mxu2 %v5907_v36  ;;  %v7277_v36 = vld [vmem:[#allocation4 + $0xcc] sm:$0xf0] }
  0x39   :  { %493 = vmatpush.bf16.msrb.mxu0 %v5883_v32  ;;  %506 = vmatpush.bf16.msrb.mxu1 %v5887_v35  ;;  %v6135_v32 = vld [vmem:[#allocation4 + $0xf8] sm:$0xf0]  ;;  %v6109_v35 = vld [vmem:[#allocation4 + $0xc0] sm:$0xf] }
  0x3a   :  { %v6138_v34 = vor.u32 %v7280_v31, %v6135_v32  ;;  %v6110_v38 = vor.u32 %v7277_v36, %v6109_v35  ;;  %v6077_v31 = vld [vmem:[#allocation4 + $0x80] sm:$0xf]  ;;  %v7269_v32 = vld [vmem:[#allocation4 + $0x8c] sm:$0xf0]  ;;  %v6079_v36 = vld [vmem:[#allocation4 + $0x90] sm:$0xf0] }
  0x3b   :  { %532 = vmatpush.bf16.msrb.mxu3 %v5895_v41  ;;  %519 = vmatpush.bf16.msrb.mxu2 %v5891_v42  ;;  %v7278_v41 = vld [vmem:[#allocation4 + $0xd4] sm:$0xf0]  ;;  %v6114_v42 = vor.u32 %v7275_v37, %v6111_v39  ;;  %v6078_v35 = vor.u32 %v7269_v32, %v6077_v31  ;;  %v6085_v37 = vld [vmem:[#allocation4 + $0x88] sm:$0xf] }
  0x3c   :  { %5866 = vmatmul.msk.bf16.gmra.mxu0 %vm120_vm1, %v7217_v43  ;;  %5870 = vmatmul.msk.bf16.gmra.mxu1 %vm120_vm1, %v7217_v43 }
  0x3d   :  { %804 = vmatpush.bf16.msra.mxu0 %v6126_v23  ;;  %817 = vmatpush.bf16.msra.mxu1 %v6130_v29  ;;  %v6103_v29 = vld [vmem:[#allocation4 + $0xb8] sm:$0xf0] }
  0x3e   :  { %5874 = vmatmul.msk.bf16.gmra.mxu2 %vm120_vm1, %v7217_v43  ;;  %5878 = vmatmul.msk.bf16.gmra.mxu3 %vm120_vm1, %v7217_v43  ;;  %v6118_v43 = vor.u32 %v7278_v41, %v6117_v40  ;;  %v7268_v41 = vld [vmem:[#allocation4 + $0x8c] sm:$0xf] }
  0x3f   :  { %830 = vmatpush.bf16.msra.mxu2 %v6134_v30  ;;  %843 = vmatpush.bf16.msra.mxu3 %v6138_v34  ;;  %v7267_v34 = vld [vmem:[#allocation4 + $0x84] sm:$0xf] }
  0x40   :  { %v6082_v39 = vor.u32 %v7267_v34, %v6079_v36 }
  0x41   :  { %805 = vmatpush.bf16.msra.mxu0 %v6110_v38  ;;  %818 = vmatpush.bf16.msra.mxu1 %v6114_v42  ;;  %v7270_v38 = vld [vmem:[#allocation4 + $0x94] sm:$0xf0]  ;;  %v6087_v42 = vld [vmem:[#allocation4 + $0x98] sm:$0xf0] }
  0x42   :  { %v6086_v40 = vor.u32 %v7270_v38, %v6085_v37  ;;  %v7259_v38 = vld [vmem:[#allocation4 + $0x44] sm:$0xf] }
  0x43   :  { %831 = vmatpush.bf16.msra.mxu2 %v6118_v43  ;;  %v6090_v43 = vor.u32 %v7268_v41, %v6087_v42  ;;  %v6053_v41 = vld [vmem:[#allocation4 + $0x48] sm:$0xf]  ;;  %v7262_v42 = vld [vmem:[#allocation4 + $0x54] sm:$0xf0] }
  0x4c   :  { %5867 = vmatmul.msk.bf16.gmra.mxu0 %vm120_vm1, %v7218_v44  ;;  %5871 = vmatmul.msk.bf16.gmra.mxu1 %vm120_vm1, %v7218_v44 }
  0x4e   :  { %5875 = vmatmul.msk.bf16.gmra.mxu2 %vm120_vm1, %v7218_v44  ;;  %5879 = vmatmul.msk.bf16.gmra.mxu3 %vm120_vm1, %v7218_v44  ;;  %v7276_v44 = vld [vmem:[#allocation4 + $0xcc] sm:$0xf] }
  0x5c   :  { %494 = vmatmul.bf16.vlgmr.msrb.gmra.mxu0 %v9649_v45  ;;  %507 = vmatmul.bf16.vlgmr.msrb.gmra.mxu1 %v9649_v45 }
  0x5e   :  { %520 = vmatmul.bf16.vlgmr.msrb.gmra.mxu2 %v9649_v45  ;;  %533 = vmatmul.bf16.vlgmr.msrb.gmra.mxu3 %v9649_v45  ;;  %v7180_v45 = vld [vmem:[#allocation7 + $0x1f8] sm:$0xf0] }
  0x99   :  { %v8152_v46 = vpop.f32.mrf.mxu0  ;;  %v8154_v47 = vpop.f32.mrf.mxu1 }
  0xa1   :  { %v8156_v48 = vpop.f32.mrf.mxu2  ;;  %v8158_v49 = vpop.f32.mrf.mxu3 }
  0xa2   :  { %v8160_v50 = vpop.f32.mrf.mxu0  ;;  %v8162_v51 = vpop.f32.mrf.mxu1 }
  0xa9   :  { %v8169_v54 = vpop.f32.mrf.mxu2  ;;  %v8173_v56 = vpop.f32.mrf.mxu3 }
  0xaa   :  { %v156_v57 = vpop.f32.mrf.mxu0  ;;  %v185_v59 = vpop.f32.mrf.mxu1 }
  0xab   :  { %v8176_v58 = vadd.f32 %v156_v57, %v8167_v53  ;;  %v8179_v60 = vadd.f32 %v185_v59, %v8171_v55  ;;  %v6122_v57 = vor.u32 %v7276_v44, %v6119_v52  ;;  %v152_v44 = vadd.f32 %v8152_v46, %v8167_v53 }
  0xad   :  { %844 = vmatpush.bf16.msra.mxu3 %v6122_v57  ;;  %v6061_v57 = vld [vmem:[#allocation4 + $0x60] sm:$0xf] }
  0xb1   :  { %v214_v63 = vpop.f32.mrf.mxu2  ;;  %v243_v1 = vpop.f32.mrf.mxu3 }
  0xb2   :  { %v8186_v0 = vadd.f32 %v214_v63, %v8181_v61  ;;  %v8188_v2 = vpop.f32.mrf.mxu0  ;;  %v8191_v3 = vadd.f32 %v243_v1, %v8183_v62  ;;  %v8193_v4 = vpop.f32.mrf.mxu1  ;;  %v6093_v63 = vld [vmem:[#allocation4 + $0xa0] sm:$0xf]  ;;  %v7273_v1 = vld [vmem:[#allocation4 + $0xac] sm:$0xf0] }
  0xb3   :  { %v6094_v18 = vor.u32 %v7273_v1, %v6093_v63  ;;  %v7263_v63 = vld [vmem:[#allocation4 + $0x64] sm:$0xf]  ;;  %v181_v1 = vadd.f32 %v8154_v47, %v8171_v55  ;;  %v6045_v47 = vld [vmem:[#allocation4 + $0x40] sm:$0xf] }
  0xb5   :  { %806 = vmatpush.bf16.msra.mxu0 %v6094_v18 }
  0xb9   :  { %v8195_v5 = vpop.f32.mrf.mxu2  ;;  %v8197_v6 = vpop.f32.mrf.mxu3  ;;  %807 = vmatpush.bf16.msra.mxu0 %v6078_v35  ;;  %v7261_v35 = vld [vmem:[#allocation4 + $0x4c] sm:$0xf0] }
  0xba   :  { %v161_v7 = vpop.f32.mrf.mxu0  ;;  %v190_v9 = vpop.f32.mrf.mxu1  ;;  %v6046_v37 = vor.u32 %v7261_v35, %v6045_v47 }
  0xbb   :  { %v8200_v8 = vadd.f32 %v161_v7, %v8167_v53  ;;  %v8203_v10 = vadd.f32 %v190_v9, %v8171_v55  ;;  %v7271_v7 = vld [vmem:[#allocation4 + $0xa4] sm:$0xf] }
  0xbc   :  { %v6098_v25 = vor.u32 %v7271_v7, %v6095_v19  ;;  %v6063_v19 = vld [vmem:[#allocation4 + $0x70] sm:$0xf0] }
  0xbe   :  { %819 = vmatpush.bf16.msra.mxu1 %v6098_v25 }
  0xc1   :  { %v219_v11 = vpop.f32.mrf.mxu2  ;;  %v248_v13 = vpop.f32.mrf.mxu3 }
  0xc2   :  { %v8206_v12 = vadd.f32 %v219_v11, %v8181_v61  ;;  %v8208_v14 = vpop.f32.mrf.mxu0  ;;  %v8211_v15 = vadd.f32 %v248_v13, %v8183_v62  ;;  %v8213_v16 = vpop.f32.mrf.mxu1  ;;  %820 = vmatpush.bf16.msra.mxu1 %v6082_v39  ;;  %v6047_v39 = vld [vmem:[#allocation4 + $0x50] sm:$0xf0] }
  0xc9   :  { %v8215_v17 = vpop.f32.mrf.mxu2  ;;  %v8217_v21 = vpop.f32.mrf.mxu3 }
  0xca   :  { %v166_v22 = vpop.f32.mrf.mxu0  ;;  %v195_v28 = vpop.f32.mrf.mxu1 }
  0xcb   :  { %v8220_v27 = vadd.f32 %v166_v22, %v8167_v53  ;;  %v8223_v33 = vadd.f32 %v195_v28, %v8171_v55  ;;  %v7274_v22 = vld [vmem:[#allocation4 + $0xb4] sm:$0xf0]  ;;  %v7272_v28 = vld [vmem:[#allocation4 + $0xac] sm:$0xf] }
  0xcc   :  { %v6102_v26 = vor.u32 %v7274_v22, %v6101_v20  ;;  %v6106_v30 = vor.u32 %v7272_v28, %v6103_v29  ;;  %v6069_v20 = vld [vmem:[#allocation4 + $0x68] sm:$0xf]  ;;  %v7266_v22 = vld [vmem:[#allocation4 + $0x74] sm:$0xf0]  ;;  %v7264_v29 = vld [vmem:[#allocation4 + $0x6c] sm:$0xf] }
  0xcd   :  { %v6070_v28 = vor.u32 %v7266_v22, %v6069_v20 }
  0xce   :  { %832 = vmatpush.bf16.msra.mxu2 %v6102_v26  ;;  %845 = vmatpush.bf16.msra.mxu3 %v6106_v30  ;;  %v6066_v26 = vor.u32 %v7263_v63, %v6063_v19  ;;  %v6071_v30 = vld [vmem:[#allocation4 + $0x78] sm:$0xf0]  ;;  %v7255_v19 = vld [vmem:[#allocation4 + $0x24] sm:$0xf] }
  0xcf   :  { %v6074_v32 = vor.u32 %v7264_v29, %v6071_v30 }
  0xd0   :  { %821 = vmatpush.bf16.msra.mxu1 %v6066_v26  ;;  %v6037_v26 = vld [vmem:[#allocation4 + $0x28] sm:$0xf] }
  0xd1   :  { %v224_v59 = vpop.f32.mrf.mxu2  ;;  %v253_v11 = vpop.f32.mrf.mxu3 }
  0xd2   :  { %v8226_v9 = vadd.f32 %v224_v59, %v8181_v61  ;;  %v8228_v13 = vpop.f32.mrf.mxu0  ;;  %v8231_v23 = vadd.f32 %v253_v11, %v8183_v62  ;;  %v8233_v24 = vpop.f32.mrf.mxu1  ;;  %833 = vmatpush.bf16.msra.mxu2 %v6086_v40  ;;  %v7265_v59 = vld [vmem:[#allocation4 + $0x6c] sm:$0xf0]  ;;  %846 = vmatpush.bf16.msra.mxu3 %v6090_v43  ;;  %v6050_v40 = vor.u32 %v7259_v38, %v6047_v39  ;;  %v7260_v43 = vld [vmem:[#allocation4 + $0x4c] sm:$0xf] }
  0xd3   :  { %v6062_v18 = vor.u32 %v7265_v59, %v6061_v57  ;;  %v6055_v57 = vld [vmem:[#allocation4 + $0x58] sm:$0xf0]  ;;  %v239_v59 = vadd.f32 %v8158_v49, %v8183_v62  ;;  %v7253_v38 = vld [vmem:[#allocation4 + $0xc] sm:$0xf0] }
  0xd4   :  { %822 = vmatpush.bf16.msra.mxu1 %v6050_v40  ;;  %v6039_v49 = vld [vmem:[#allocation4 + $0x38] sm:$0xf0] }
  0xd5   :  { %808 = vmatpush.bf16.msra.mxu0 %v6062_v18  ;;  %v7257_v18 = vld [vmem:[#allocation4 + $0x2c] sm:$0xf0] }
  0xd6   :  { %834 = vmatpush.bf16.msra.mxu2 %v6070_v28  ;;  %847 = vmatpush.bf16.msra.mxu3 %v6074_v32  ;;  %v7258_v28 = vld [vmem:[#allocation4 + $0x34] sm:$0xf0] }
  0xd7   :  { %v6038_v32 = vor.u32 %v7258_v28, %v6037_v26 }
  0xd9   :  { %v8237_v52 = vpop.f32.mrf.mxu2  ;;  %v8241_v7 = vpop.f32.mrf.mxu3  ;;  %809 = vmatpush.bf16.msra.mxu0 %v6046_v37  ;;  %v6013_v37 = vld [vmem:[#allocation4] sm:$0xf] }
  0xda   :  { %v495_v11 = vpop.f32.mrf.mxu0  ;;  %v508_v46 = vpop.f32.mrf.mxu1 }
  0xdb   :  { %v538_v25 = vadd.f32 %v495_v11, %v152_v44  ;;  %v539_v31 = vadd.f32 %v508_v46, %v181_v1  ;;  %v6054_v44 = vor.u32 %v7262_v42, %v6053_v41  ;;  %v6058_v1 = vor.u32 %v7260_v43, %v6055_v57  ;;  %v6029_v11 = vld [vmem:[#allocation4 + $0x20] sm:$0xf]  ;;  %v6031_v46 = vld [vmem:[#allocation4 + $0x30] sm:$0xf0]  ;;  %v7251_v42 = vld [vmem:[#allocation4 + $0x4] sm:$0xf] }
  0xdc   :  { %v6014_v41 = vor.u32 %v7253_v38, %v6013_v37  ;;  %v6015_v43 = vld [vmem:[#allocation4 + $0x10] sm:$0xf0] }
  0xdd   :  { %v6008_v34 = vmul.f32 -1.442695, %v538_v25  ;;  %v6009_v36 = vmul.f32 -1.442695, %v539_v31  ;;  %835 = vmatpush.bf16.msra.mxu2 %v6054_v44  ;;  %v6030_v25 = vor.u32 %v7257_v18, %v6029_v11  ;;  %848 = vmatpush.bf16.msra.mxu3 %v6058_v1  ;;  %v6034_v31 = vor.u32 %v7255_v19, %v6031_v46  ;;  %v7254_v1 = vld [vmem:[#allocation4 + $0x14] sm:$0xf0] }
  0xde   :  { %v6018_v57 = vor.u32 %v7251_v42, %v6015_v43  ;;  %v7252_v11 = vld [vmem:[#allocation4 + $0xc] sm:$0xf]  ;;  %v6023_v19 = vld [vmem:[#allocation4 + $0x18] sm:$0xf0]  ;;  %v210_v46 = vadd.f32 %v8156_v48, %v8181_v61 }
  0xdf   :  { %7695 = vpow2.f32 %v6008_v34  ;;  %v7256_v34 = vld [vmem:[#allocation4 + $0x2c] sm:$0xf]  ;;  %810 = vmatpush.bf16.msra.mxu0 %v6030_v25  ;;  %823 = vmatpush.bf16.msra.mxu1 %v6034_v31  ;;  %v6026_v25 = vor.u32 %v7252_v11, %v6023_v19 }
  0xe0   :  { %7697 = vpow2.f32 %v6009_v36  ;;  %v6042_v47 = vor.u32 %v7256_v34, %v6039_v49 }
  0xe1   :  { %v521_v63 = vpop.f32.mrf.mxu2  ;;  %v534_v20 = vpop.f32.mrf.mxu3  ;;  %836 = vmatpush.bf16.msra.mxu2 %v6038_v32 }
  0xe2   :  { %v497_v22 = vpop.f32.mrf.mxu0  ;;  %v541_v29 = vadd.f32 %v534_v20, %v239_v59  ;;  %v510_v30 = vpop.f32.mrf.mxu1  ;;  %849 = vmatpush.bf16.msra.mxu3 %v6042_v47  ;;  %v6021_v59 = vld [vmem:[#allocation4 + $0x8] sm:$0xf] }
  0xe3   :  { %811 = vmatpush.bf16.msra.mxu0 %v6014_v41  ;;  %824 = vmatpush.bf16.msra.mxu1 %v6018_v57  ;;  %v6022_v22 = vor.u32 %v7254_v1, %v6021_v59 }
  0xe4   :  { %v6010_v36 = vmul.f32 -1.442695, %v541_v29  ;;  %v540_v29 = vadd.f32 %v521_v63, %v210_v46 }
  0xe5   :  { %v7696_v35 = vpop.eup %7695  ;;  %837 = vmatpush.bf16.msra.mxu2 %v6022_v22 }
  0xe6   :  { %v7698_v39 = vpop.eup %7697  ;;  %v545_v40 = vadd.f32 1.0, %v7696_v35  ;;  %7699 = vpow2.f32 %v6010_v36  ;;  %850 = vmatpush.bf16.msra.mxu3 %v6026_v25 }
  0xe7   :  { %v564_v44 = vadd.f32 1.0, %v7698_v39 }
  0xe8   :  { %7701 = vrcp.f32 %v545_v40  ;;  %v557_v35 = vand.u32 2147483648, %v545_v40  ;;  %v555_v38 = vand.u32 2147483647, %v545_v40  ;;  %vm551_vm4 = vweird.f32 %v545_v40 }
  0xe9   :  { %7703 = vrcp.f32 %v564_v44  ;;  %v523_v18 = vpop.f32.mrf.mxu2  ;;  %v536_v20 = vpop.f32.mrf.mxu3  ;;  %v576_v36 = vand.u32 2147483648, %v564_v44  ;;  %v574_v48 = vand.u32 2147483647, %v564_v44  ;;  %vm570_vm5 = vweird.f32 %v564_v44 }
  0xea   :  { %v558_v63 = vor.u32 1.1754944e-38, %v557_v35  ;;  %vm556_vm7 = vcmp.eq.f32.partialorder %v555_v38, 8.507059e+37  ;;  %v7311_v38 = vld [vmem:[#allocation4 + $0xe4] sm:$0xf] }
  0xeb   :  { %v577_v57 = vor.u32 1.1754944e-38, %v576_v36  ;;  %vm575_vm9 = vcmp.eq.f32.partialorder %v574_v48, 8.507059e+37  ;;  %v6256_v36 = vld [vmem:[#allocation4 + $0xe0] sm:$0xf]  ;;  %v6264_v48 = vld [vmem:[#allocation4 + $0xe8] sm:$0xf] }
  0xec   :  { %v7700_v26 = vpop.eup %7699 }
  0xed   :  { %v584_v30 = vadd.f32 1.0, %v7700_v26 }
  0xee   :  { %v7702_v28 = vpop.eup %7701 }
  0xef   :  { %v7704_v31 = vpop.eup %7703  ;;  %v547_v32 = vmul.f32 %v7702_v28, %v545_v40  ;;  %7705 = vrcp.f32 %v584_v30  ;;  %vm552_vm2 = vweird.f32 %v7702_v28  ;;  %vm590_vm11 = vweird.f32 %v584_v30 }
  0xf0   :  { %v566_v34 = vmul.f32 %v7704_v31, %v564_v44  ;;  %7707 = vtanh.f32 %v540_v29  ;;  %vm571_vm3 = vweird.f32 %v7704_v31  ;;  %vm553_vm6 = vmor %vm551_vm4, %vm552_vm2  ;;  %v596_v29 = vand.u32 2147483648, %v584_v30 }
  0xf1   :  { %v548_v49 = vsub.f32 1.0, %v547_v32  ;;  %vm572_vm8 = vmor %vm570_vm5, %vm571_vm3 }
  0xf2   :  { %v567_v47 = vsub.f32 1.0, %v566_v34  ;;  %v597_v34 = vor.u32 1.1754944e-38, %v596_v29  ;;  %v6250_v29 = vld [vmem:[#allocation4 + $0xd8] sm:$0xf0] }
  0xf3   :  { %v549_v37 = vmul.f32 %v7702_v28, %v548_v49 }
  0xf4   :  { %v568_v39 = vmul.f32 %v7704_v31, %v567_v47 }
  0xf5   :  { %v550_v41 = vadd.f32 %v7702_v28, %v549_v37  ;;  %v7706_v42 = vpop.eup %7705  ;;  %v7313_v37 = vld [vmem:[#allocation4 + $0xec] sm:$0xf0] }
  0xf6   :  { %v569_v43 = vadd.f32 %v7704_v31, %v568_v39  ;;  %v586_v1 = vmul.f32 %v7706_v42, %v584_v30  ;;  %v7708_v11 = vpop.eup %7707  ;;  %vm591_vm10 = vweird.f32 %v7706_v42  ;;  %v6257_v39 = vor.u32 %v7313_v37, %v6256_v36  ;;  %v6232_v36 = vld [vmem:[#allocation4 + $0xa8] sm:$0xf]  ;;  %v7306_v37 = vld [vmem:[#allocation4 + $0xb4] sm:$0xf0] }
  0xf7   :  { %v554_v59 = vsel %vm553_vm6, %v7702_v28, %v550_v41  ;;  %v594_v28 = vand.u32 2147483647, %v584_v30  ;;  %vm592_vm12 = vmor %vm590_vm11, %vm591_vm10  ;;  %v6258_v30 = vld [vmem:[#allocation4 + $0xf0] sm:$0xf0]  ;;  %v7314_v41 = vld [vmem:[#allocation4 + $0xf4] sm:$0xf0] }
  0xf8   :  { %v559_v18 = vsel %vm556_vm7, %v558_v63, %v554_v59  ;;  %v573_v19 = vsel %vm572_vm8, %v7704_v31, %v569_v43  ;;  %v587_v25 = vsub.f32 1.0, %v586_v1  ;;  %v6265_v63 = vor.u32 %v7314_v41, %v6264_v48  ;;  %v7312_v43 = vld [vmem:[#allocation4 + $0xec] sm:$0xf]  ;;  %1123 = vmatpush.bf16.msrb.mxu0 %v6257_v39  ;;  %v6240_v1 = vld [vmem:[#allocation4 + $0xc0] sm:$0xf] }
  0xf9   :  { %v578_v20 = vsel %vm575_vm9, %v577_v57, %v573_v19  ;;  %v601_v22 = vmul.f32 %v7708_v11, %v559_v18  ;;  %vm595_vm13 = vcmp.eq.f32.partialorder %v594_v28, 8.507059e+37  ;;  %v6266_v57 = vld [vmem:[#allocation4 + $0xf8] sm:$0xf0]  ;;  %v7309_v11 = vld [vmem:[#allocation4 + $0xcc] sm:$0xf0]  ;;  %v6233_v39 = vor.u32 %v7306_v37, %v6232_v36 }
  0xfa   :  { %v600_v46 = vmul.f32 0.0, %v578_v20  ;;  %v588_v26 = vmul.f32 %v7706_v42, %v587_v25  ;;  %v6269_v59 = vor.u32 %v7312_v43, %v6266_v57  ;;  %1149 = vmatpush.bf16.msrb.mxu2 %v6265_v63  ;;  %v7307_v18 = vld [vmem:[#allocation4 + $0xc4] sm:$0xf]  ;;  %v6241_v19 = vor.u32 %v7309_v11, %v6240_v1  ;;  %v6242_v20 = vld [vmem:[#allocation4 + $0xd0] sm:$0xf0] }
  0xfb   :  { %v7310_v25 = vld [vmem:[#allocation4 + $0xd4] sm:$0xf0]  ;;  %v6234_v48 = vld [vmem:[#allocation4 + $0xb8] sm:$0xf0]  ;;  %v7301_v63 = vld [vmem:[#allocation4 + $0x8c] sm:$0xf0] }
  0xfc   :  { %v8247_v40 = vadd.f32 %v601_v22, %v600_v46  ;;  %v589_v44 = vadd.f32 %v7706_v42, %v588_v26  ;;  %1162 = vmatpush.bf16.msrb.mxu3 %v6269_v59  ;;  %v6248_v22 = vld [vmem:[#allocation4 + $0xc8] sm:$0xf]  ;;  %v6245_v46 = vor.u32 %v7307_v18, %v6242_v20  ;;  %1124 = vmatpush.bf16.msrb.mxu0 %v6241_v19  ;;  %v7299_v43 = vld [vmem:[#allocation4 + $0x84] sm:$0xf]  ;;  %v6210_v59 = vld [vmem:[#allocation4 + $0x90] sm:$0xf0] }
  0xfd   :  { %v6249_v26 = vor.u32 %v7310_v25, %v6248_v22  ;;  %v6216_v1 = vld [vmem:[#allocation4 + $0x88] sm:$0xf]  ;;  %v7302_v11 = vld [vmem:[#allocation4 + $0x94] sm:$0xf0]  ;;  %v6213_v18 = vor.u32 %v7299_v43, %v6210_v59  ;;  %v7300_v20 = vld [vmem:[#allocation4 + $0x8c] sm:$0xf] }
  0xfe   :  { %7709 = vtanh.f32 %v8247_v40  ;;  %v593_v32 = vsel %vm592_vm12, %v7706_v42, %v589_v44  ;;  %v6261_v42 = vor.u32 %v7311_v38, %v6258_v30  ;;  %v7308_v44 = vld [vmem:[#allocation4 + $0xcc] sm:$0xf]  ;;  %v6217_v19 = vor.u32 %v7302_v11, %v6216_v1  ;;  %v6218_v22 = vld [vmem:[#allocation4 + $0x98] sm:$0xf0]  ;;  %v6178_v1 = vld [vmem:[#allocation4 + $0x50] sm:$0xf0] }
  0xff   :  { %v598_v49 = vsel %vm595_vm13, %v597_v34, %v593_v32  ;;  %v6253_v28 = vor.u32 %v7308_v44, %v6250_v29  ;;  %1150 = vmatpush.bf16.msrb.mxu2 %v6249_v26  ;;  %v6224_v32 = vld [vmem:[#allocation4 + $0xa0] sm:$0xf]  ;;  %v7305_v34 = vld [vmem:[#allocation4 + $0xac] sm:$0xf0]  ;;  %v7304_v30 = vld [vmem:[#allocation4 + $0xac] sm:$0xf]  ;;  %v6221_v25 = vor.u32 %v7300_v20, %v6218_v22  ;;  %v154_v29 = vadd.f32 %v8160_v50, %v8167_v53 }
 0x100   :  { %1136 = vmatpush.bf16.msrb.mxu1 %v6261_v42  ;;  %v6237_v41 = vor.u32 %v7304_v30, %v6234_v48  ;;  %v6208_v42 = vld [vmem:[#allocation4 + $0x80] sm:$0xf]  ;;  %v7297_v26 = vld [vmem:[#allocation4 + $0x6c] sm:$0xf0]  ;;  %v7295_v44 = vld [vmem:[#allocation4 + $0x64] sm:$0xf] }
 0x101   :  { %1163 = vmatpush.bf16.msrb.mxu3 %v6253_v28  ;;  %v6209_v57 = vor.u32 %v7301_v63, %v6208_v42  ;;  %v183_v28 = vadd.f32 %v8162_v51, %v8171_v55  ;;  %v6202_v30 = vld [vmem:[#allocation4 + $0x78] sm:$0xf0]  ;;  %v6176_v50 = vld [vmem:[#allocation4 + $0x40] sm:$0xf]  ;;  %v7293_v63 = vld [vmem:[#allocation4 + $0x4c] sm:$0xf0] }
 0x102   :  { %v7291_v51 = vld [vmem:[#allocation4 + $0x44] sm:$0xf]  ;;  %v6177_v59 = vor.u32 %v7293_v63, %v6176_v50  ;;  %v7292_v20 = vld [vmem:[#allocation4 + $0x4c] sm:$0xf]  ;;  %v6144_v63 = vld [vmem:[#allocation4] sm:$0xf] }
 0x103   :  { %1151 = vmatpush.bf16.msrb.mxu2 %v6233_v39  ;;  %v7296_v39 = vld [vmem:[#allocation4 + $0x6c] sm:$0xf]  ;;  %v6181_v11 = vor.u32 %v7291_v51, %v6178_v1  ;;  %v7285_v51 = vld [vmem:[#allocation4 + $0xc] sm:$0xf0]  ;;  %v6146_v1 = vld [vmem:[#allocation4 + $0x10] sm:$0xf0] }
 0x104   :  { %v7710_v31 = vpop.eup %7709  ;;  %1137 = vmatpush.bf16.msrb.mxu1 %v6245_v46  ;;  %v6192_v46 = vld [vmem:[#allocation4 + $0x60] sm:$0xf]  ;;  %v6205_v42 = vor.u32 %v7296_v39, %v6202_v30 }
 0x105   :  { %v8250_v47 = vmul.f32 %v7710_v31, %v598_v49  ;;  %v7303_v31 = vld [vmem:[#allocation4 + $0xa4] sm:$0xf]  ;;  %v6225_v49 = vor.u32 %v7305_v34, %v6224_v32  ;;  %1164 = vmatpush.bf16.msrb.mxu3 %v6237_v41  ;;  %v6193_v32 = vor.u32 %v7297_v26, %v6192_v46  ;;  %v6194_v34 = vld [vmem:[#allocation4 + $0x70] sm:$0xf0]  ;;  %v241_v46 = vadd.f32 %v8173_v56, %v8183_v62  ;;  %v7288_v56 = vld [vmem:[#allocation4 + $0x2c] sm:$0xf] }
 0x106   :  { %v6197_v37 = vor.u32 %v7295_v44, %v6194_v34  ;;  %v6160_v44 = vld [vmem:[#allocation4 + $0x20] sm:$0xf] }
 0x107   :  { %9807 = vst [vmem:[#allocation14_spill] sm:$0xff] %v8250_v47  ;;  %v611_v35 = vpack.c.bf16 %v8250_v47, %v8250_v47  ;;  %1125 = vmatpush.bf16.msrb.mxu0 %v6225_v49  ;;  %1152 = vmatpush.bf16.msrb.mxu2 %v6217_v19  ;;  %v7298_v49 = vld [vmem:[#allocation4 + $0x74] sm:$0xf0] }
 0x108   :  { %v7294_v19 = vld [vmem:[#allocation4 + $0x54] sm:$0xf0] }
 0x109   :  { %812 = vmatmul.bf16.vlgmr.msra.gmra.mxu0 %v611_v35  ;;  %825 = vmatmul.bf16.vlgmr.msra.gmra.mxu1 %v611_v35  ;;  %v7494_v47 = vld [vmem:[#allocation7 + $0x94] sm:$0xf0] }
 0x10a   :  { %838 = vmatmul.bf16.vlgmr.msra.gmra.mxu2 %v611_v35  ;;  %851 = vmatmul.bf16.vlgmr.msra.gmra.mxu3 %v611_v35  ;;  %v6226_v35 = vld [vmem:[#allocation4 + $0xb0] sm:$0xf0] }
 0x10b   :  { %v6229_v38 = vor.u32 %v7303_v31, %v6226_v35  ;;  %1126 = vmatpush.bf16.msrb.mxu0 %v6209_v57  ;;  %1165 = vmatpush.bf16.msrb.mxu3 %v6221_v25  ;;  %v6200_v31 = vld [vmem:[#allocation4 + $0x68] sm:$0xf]  ;;  %v6186_v25 = vld [vmem:[#allocation4 + $0x58] sm:$0xf0] }
 0x10c   :  { %v6189_v26 = vor.u32 %v7292_v20, %v6186_v25 }
 0x10d   :  { %1138 = vmatpush.bf16.msrb.mxu1 %v6229_v38  ;;  %v6201_v38 = vor.u32 %v7298_v49, %v6200_v31  ;;  %v6162_v49 = vld [vmem:[#allocation4 + $0x30] sm:$0xf0] }
 0x10f   :  { %1127 = vmatpush.bf16.msrb.mxu0 %v6193_v32  ;;  %1153 = vmatpush.bf16.msrb.mxu2 %v6201_v38 }
 0x110   :  { %1166 = vmatpush.bf16.msrb.mxu3 %v6205_v42 }
 0x111   :  { %1139 = vmatpush.bf16.msrb.mxu1 %v6213_v18  ;;  %v6184_v18 = vld [vmem:[#allocation4 + $0x48] sm:$0xf] }
 0x112   :  { %v6185_v22 = vor.u32 %v7294_v19, %v6184_v18 }
 0x113   :  { %1128 = vmatpush.bf16.msrb.mxu0 %v6177_v59  ;;  %v7283_v59 = vld [vmem:[#allocation4 + $0x4] sm:$0xf] }
 0x114   :  { %1154 = vmatpush.bf16.msrb.mxu2 %v6185_v22  ;;  %1167 = vmatpush.bf16.msrb.mxu3 %v6189_v26  ;;  %v6149_v20 = vor.u32 %v7283_v59, %v6146_v1  ;;  %v7286_v22 = vld [vmem:[#allocation4 + $0x14] sm:$0xf0]  ;;  %v7284_v26 = vld [vmem:[#allocation4 + $0xc] sm:$0xf] }
 0x115   :  { %1140 = vmatpush.bf16.msrb.mxu1 %v6197_v37 }
 0x119   :  { %1141 = vmatpush.bf16.msrb.mxu1 %v6181_v11  ;;  %v6152_v11 = vld [vmem:[#allocation4 + $0x8] sm:$0xf] }
 0x186   :  { %v813_v35 = vpop.f32.mrf.mxu0  ;;  %v826_v36 = vpop.f32.mrf.mxu1 }
 0x187   :  { %v856_v48 = vadd.f32 %v813_v35, %v154_v29  ;;  %v857_v41 = vadd.f32 %v826_v36, %v183_v28  ;;  %v7289_v29 = vld [vmem:[#allocation4 + $0x2c] sm:$0xf0]  ;;  %v7287_v28 = vld [vmem:[#allocation4 + $0x24] sm:$0xf]  ;;  %v6168_v35 = vld [vmem:[#allocation4 + $0x28] sm:$0xf] }
 0x188   :  { %v6161_v31 = vor.u32 %v7289_v29, %v6160_v44  ;;  %v7290_v36 = vld [vmem:[#allocation4 + $0x34] sm:$0xf0]  ;;  %v6165_v30 = vor.u32 %v7287_v28, %v6162_v49  ;;  %v6154_v44 = vld [vmem:[#allocation4 + $0x18] sm:$0xf0]  ;;  %v212_v49 = vadd.f32 %v8169_v54, %v8181_v61 }
 0x189   :  { %v6139_v43 = vmul.f32 -1.442695, %v856_v48  ;;  %v6140_v57 = vmul.f32 -1.442695, %v857_v41  ;;  %v6169_v48 = vor.u32 %v7290_v36, %v6168_v35  ;;  %v6170_v41 = vld [vmem:[#allocation4 + $0x38] sm:$0xf0] }
 0x18a   :  { %1129 = vmatpush.bf16.msrb.mxu0 %v6161_v31  ;;  %v6173_v42 = vor.u32 %v7288_v56, %v6170_v41  ;;  %1142 = vmatpush.bf16.msrb.mxu1 %v6165_v30 }
 0x18b   :  { %7711 = vpow2.f32 %v6139_v43  ;;  %1155 = vmatpush.bf16.msrb.mxu2 %v6169_v48 }
 0x18c   :  { %7713 = vpow2.f32 %v6140_v57  ;;  %v6145_v57 = vor.u32 %v7285_v51, %v6144_v63  ;;  %1168 = vmatpush.bf16.msrb.mxu3 %v6173_v42 }
 0x18d   :  { %v839_v32 = vpop.f32.mrf.mxu2  ;;  %v852_v34 = vpop.f32.mrf.mxu3 }
 0x18e   :  { %v859_v37 = vadd.f32 %v852_v34, %v241_v46  ;;  %v815_v38 = vpop.f32.mrf.mxu0  ;;  %v828_v39 = vpop.f32.mrf.mxu1  ;;  %1130 = vmatpush.bf16.msrb.mxu0 %v6145_v57  ;;  %v6153_v46 = vor.u32 %v7286_v22, %v6152_v11  ;;  %1143 = vmatpush.bf16.msrb.mxu1 %v6149_v20  ;;  %v6157_v34 = vor.u32 %v7284_v26, %v6154_v44 }
 0x190   :  { %v6141_v50 = vmul.f32 -1.442695, %v859_v37  ;;  %1156 = vmatpush.bf16.msrb.mxu2 %v6153_v46  ;;  %1169 = vmatpush.bf16.msrb.mxu3 %v6157_v34  ;;  %v858_v37 = vadd.f32 %v839_v32, %v212_v49 }
 0x191   :  { %v7712_v43 = vpop.eup %7711 }
 0x192   :  { %v7714_v18 = vpop.eup %7713  ;;  %v863_v19 = vadd.f32 1.0, %v7712_v43  ;;  %7715 = vpow2.f32 %v6141_v50 }
 0x193   :  { %v882_v25 = vadd.f32 1.0, %v7714_v18 }
 0x194   :  { %7717 = vrcp.f32 %v863_v19  ;;  %v875_v41 = vand.u32 2147483648, %v863_v19  ;;  %v873_v63 = vand.u32 2147483647, %v863_v19  ;;  %vm869_vm0 = vweird.f32 %v863_v19 }
 0x195   :  { %7719 = vrcp.f32 %v882_v25  ;;  %v841_v29 = vpop.f32.mrf.mxu2  ;;  %v854_v28 = vpop.f32.mrf.mxu3  ;;  %v894_v42 = vand.u32 2147483648, %v882_v25  ;;  %v892_v43 = vand.u32 2147483647, %v882_v25  ;;  %vm888_vm1 = vweird.f32 %v882_v25 }
 0x196   :  { %v876_v32 = vor.u32 1.1754944e-38, %v875_v41  ;;  %vm874_vm4 = vcmp.eq.f32.partialorder %v873_v63, 8.507059e+37  ;;  %v7343_v41 = vld [vmem:[#allocation4 + $0xe4] sm:$0xf]  ;;  %v7346_v63 = vld [vmem:[#allocation4 + $0xf4] sm:$0xf0] }
 0x197   :  { %v895_v11 = vor.u32 1.1754944e-38, %v894_v42  ;;  %vm893_vm5 = vcmp.eq.f32.partialorder %v892_v43, 8.507059e+37 }
 0x198   :  { %v7716_v31 = vpop.eup %7715 }
 0x199   :  { %v902_v35 = vadd.f32 1.0, %v7716_v31 }
 0x19a   :  { %v7718_v36 = vpop.eup %7717 }
 0x19b   :  { %v7720_v38 = vpop.eup %7719  ;;  %v865_v39 = vmul.f32 %v7718_v36, %v863_v19  ;;  %7721 = vrcp.f32 %v902_v35  ;;  %vm870_vm14 = vweird.f32 %v7718_v36  ;;  %v914_v31 = vand.u32 2147483648, %v902_v35 }
 0x19c   :  { %v884_v30 = vmul.f32 %v7720_v38, %v882_v25  ;;  %7723 = vtanh.f32 %v858_v37  ;;  %vm889_vm15 = vweird.f32 %v7720_v38  ;;  %vm871_vm2 = vmor %vm869_vm0, %vm870_vm14  ;;  %vm908_vm7 = vweird.f32 %v902_v35 }
 0x19d   :  { %v866_v48 = vsub.f32 1.0, %v865_v39  ;;  %vm890_vm3 = vmor %vm888_vm1, %vm889_vm15  ;;  %v912_v49 = vand.u32 2147483647, %v902_v35  ;;  %v915_v37 = vor.u32 1.1754944e-38, %v914_v31  ;;  %v7337_v31 = vld [vmem:[#allocation4 + $0xac] sm:$0xf0] }
 0x19e   :  { %v885_v56 = vsub.f32 1.0, %v884_v30 }
 0x19f   :  { %v867_v50 = vmul.f32 %v7718_v36, %v866_v48  ;;  %vm913_vm9 = vcmp.eq.f32.partialorder %v912_v49, 8.507059e+37  ;;  %v6387_v48 = vld [vmem:[#allocation4 + $0xe0] sm:$0xf]  ;;  %v7335_v49 = vld [vmem:[#allocation4 + $0xa4] sm:$0xf] }
 0x1a0   :  { %v886_v51 = vmul.f32 %v7720_v38, %v885_v56  ;;  %v7345_v56 = vld [vmem:[#allocation4 + $0xec] sm:$0xf0] }
 0x1a1   :  { %v7722_v54 = vpop.eup %7721  ;;  %v868_v57 = vadd.f32 %v7718_v36, %v867_v50  ;;  %v6388_v42 = vor.u32 %v7345_v56, %v6387_v48  ;;  %v6395_v50 = vld [vmem:[#allocation4 + $0xe8] sm:$0xf]  ;;  %v7336_v56 = vld [vmem:[#allocation4 + $0xac] sm:$0xf] }
 0x1a2   :  { %v887_v59 = vadd.f32 %v7720_v38, %v886_v51  ;;  %v904_v1 = vmul.f32 %v7722_v54, %v902_v35  ;;  %v7724_v20 = vpop.eup %7723  ;;  %vm909_vm6 = vweird.f32 %v7722_v54  ;;  %v6389_v35 = vld [vmem:[#allocation4 + $0xf0] sm:$0xf0]  ;;  %v6396_v43 = vor.u32 %v7346_v63, %v6395_v50  ;;  %v7333_v50 = vld [vmem:[#allocation4 + $0x8c] sm:$0xf0]  ;;  %v7331_v63 = vld [vmem:[#allocation4 + $0x84] sm:$0xf] }
 0x1a3   :  { %v872_v18 = vsel %vm871_vm2, %v7718_v36, %v868_v57  ;;  %vm910_vm8 = vmor %vm908_vm7, %vm909_vm6  ;;  %v6392_v51 = vor.u32 %v7343_v41, %v6389_v35  ;;  %v6397_v57 = vld [vmem:[#allocation4 + $0xf8] sm:$0xf0]  ;;  %1442 = vmatpush.bf16.msra.mxu0 %v6388_v42  ;;  %v6339_v35 = vld [vmem:[#allocation4 + $0x80] sm:$0xf] }
 0x1a4   :  { %v877_v22 = vsel %vm874_vm4, %v876_v32, %v872_v18  ;;  %v891_v46 = vsel %vm890_vm3, %v7720_v38, %v887_v59  ;;  %v905_v26 = vsub.f32 1.0, %v904_v1  ;;  %1468 = vmatpush.bf16.msra.mxu2 %v6396_v43  ;;  %v6371_v59 = vld [vmem:[#allocation4 + $0xc0] sm:$0xf]  ;;  %v7341_v1 = vld [vmem:[#allocation4 + $0xcc] sm:$0xf0] }
 0x1a5   :  { %v896_v44 = vsel %vm893_vm5, %v895_v11, %v891_v46  ;;  %v919_v29 = vmul.f32 %v7724_v20, %v877_v22  ;;  %1455 = vmatpush.bf16.msra.mxu1 %v6392_v51  ;;  %v7339_v11 = vld [vmem:[#allocation4 + $0xc4] sm:$0xf]  ;;  %v6372_v18 = vor.u32 %v7341_v1, %v6371_v59  ;;  %v6373_v20 = vld [vmem:[#allocation4 + $0xd0] sm:$0xf0]  ;;  %v6379_v22 = vld [vmem:[#allocation4 + $0xc8] sm:$0xf]  ;;  %v6340_v51 = vor.u32 %v7333_v50, %v6339_v35 }
 0x1a6   :  { %v918_v28 = vmul.f32 %v896_v44, %v8247_v40  ;;  %v906_v34 = vmul.f32 %v7722_v54, %v905_v26  ;;  %v7342_v46 = vld [vmem:[#allocation4 + $0xd4] sm:$0xf0]  ;;  %v6376_v26 = vor.u32 %v7339_v11, %v6373_v20  ;;  %v6365_v41 = vld [vmem:[#allocation4 + $0xb8] sm:$0xf0]  ;;  %v6341_v43 = vld [vmem:[#allocation4 + $0x90] sm:$0xf0] }
 0x1a7   :  { %v6380_v44 = vor.u32 %v7342_v46, %v6379_v22  ;;  %1443 = vmatpush.bf16.msra.mxu0 %v6372_v18  ;;  %v6368_v42 = vor.u32 %v7336_v56, %v6365_v41  ;;  %v7332_v1 = vld [vmem:[#allocation4 + $0x8c] sm:$0xf]  ;;  %v6349_v11 = vld [vmem:[#allocation4 + $0x98] sm:$0xf0]  ;;  %v6323_v20 = vld [vmem:[#allocation4 + $0x60] sm:$0xf] }
 0x1a8   :  { %v8263_v19 = vadd.f32 %v919_v29, %v918_v28  ;;  %v907_v25 = vadd.f32 %v7722_v54, %v906_v34  ;;  %v7340_v29 = vld [vmem:[#allocation4 + $0xcc] sm:$0xf]  ;;  %v6381_v28 = vld [vmem:[#allocation4 + $0xd8] sm:$0xf0]  ;;  %v6352_v18 = vor.u32 %v7332_v1, %v6349_v11  ;;  %v7329_v22 = vld [vmem:[#allocation4 + $0x6c] sm:$0xf0] }
 0x1a9   :  { %v6384_v34 = vor.u32 %v7340_v29, %v6381_v28  ;;  %1456 = vmatpush.bf16.msra.mxu1 %v6376_v26  ;;  %1469 = vmatpush.bf16.msra.mxu2 %v6380_v44  ;;  %v7327_v46 = vld [vmem:[#allocation4 + $0x64] sm:$0xf]  ;;  %v6324_v26 = vor.u32 %v7329_v22, %v6323_v20  ;;  %v6325_v44 = vld [vmem:[#allocation4 + $0x70] sm:$0xf0]  ;;  %v6331_v29 = vld [vmem:[#allocation4 + $0x68] sm:$0xf] }
 0x1aa   :  { %7725 = vtanh.f32 %v8263_v19  ;;  %v911_v36 = vsel %vm910_vm8, %v7722_v54, %v907_v25  ;;  %v7344_v54 = vld [vmem:[#allocation4 + $0xec] sm:$0xf]  ;;  %v6355_v25 = vld [vmem:[#allocation4 + $0xa0] sm:$0xf]  ;;  %v7330_v28 = vld [vmem:[#allocation4 + $0x74] sm:$0xf0] }
 0x1ab   :  { %v916_v39 = vsel %vm913_vm9, %v915_v37, %v911_v36  ;;  %v6400_v32 = vor.u32 %v7344_v54, %v6397_v57  ;;  %v6356_v36 = vor.u32 %v7337_v31, %v6355_v25  ;;  %v6357_v37 = vld [vmem:[#allocation4 + $0xb0] sm:$0xf0]  ;;  %v6347_v54 = vld [vmem:[#allocation4 + $0x88] sm:$0xf]  ;;  %v7334_v57 = vld [vmem:[#allocation4 + $0x94] sm:$0xf0]  ;;  %v6328_v31 = vor.u32 %v7327_v46, %v6325_v44 }
 0x1ac   :  { %v6348_v59 = vor.u32 %v7334_v57, %v6347_v54  ;;  %v7325_v56 = vld [vmem:[#allocation4 + $0x4c] sm:$0xf0]  ;;  %v7323_v41 = vld [vmem:[#allocation4 + $0x44] sm:$0xf]  ;;  %v7326_v54 = vld [vmem:[#allocation4 + $0x54] sm:$0xf0] }
 0x1ad   :  { %1481 = vmatpush.bf16.msra.mxu3 %v6400_v32  ;;  %1444 = vmatpush.bf16.msra.mxu0 %v6356_v36  ;;  %v6344_v32 = vor.u32 %v7331_v63, %v6341_v43  ;;  %v7328_v36 = vld [vmem:[#allocation4 + $0x6c] sm:$0xf]  ;;  %v6309_v63 = vld [vmem:[#allocation4 + $0x50] sm:$0xf0]  ;;  %v6315_v43 = vld [vmem:[#allocation4 + $0x48] sm:$0xf] }
 0x1ae   :  { %v7324_v57 = vld [vmem:[#allocation4 + $0x4c] sm:$0xf]  ;;  %v7321_v1 = vld [vmem:[#allocation4 + $0x2c] sm:$0xf0]  ;;  %v7319_v11 = vld [vmem:[#allocation4 + $0x24] sm:$0xf] }
 0x1af   :  { %v6293_v46 = vld [vmem:[#allocation4 + $0x30] sm:$0xf0]  ;;  %v7322_v44 = vld [vmem:[#allocation4 + $0x34] sm:$0xf0] }
 0x1b0   :  { %v7726_v38 = vpop.eup %7725 }
 0x1b1   :  { %v8266_v30 = vmul.f32 %v7726_v38, %v916_v39  ;;  %1482 = vmatpush.bf16.msra.mxu3 %v6384_v34  ;;  %v6363_v38 = vld [vmem:[#allocation4 + $0xa8] sm:$0xf]  ;;  %v7338_v39 = vld [vmem:[#allocation4 + $0xb4] sm:$0xf0]  ;;  %1445 = vmatpush.bf16.msra.mxu0 %v6340_v51  ;;  %v6312_v51 = vor.u32 %v7323_v41, %v6309_v63  ;;  %v7315_v41 = vld [vmem:[#allocation4 + $0x4] sm:$0xf] }
 0x1b2   :  { %v6364_v48 = vor.u32 %v7338_v39, %v6363_v38 }
 0x1b3   :  { %9808 = vst [vmem:[#allocation15_spill] sm:$0xff] %v8266_v30  ;;  %v930_v40 = vpack.c.bf16 %v8266_v30, %v8266_v30 }
 0x1b4   :  { %1470 = vmatpush.bf16.msra.mxu2 %v6364_v48  ;;  %v6307_v48 = vld [vmem:[#allocation4 + $0x40] sm:$0xf] }
 0x1b5   :  { %1131 = vmatmul.bf16.vlgmr.msrb.gmra.mxu0 %v930_v40  ;;  %1144 = vmatmul.bf16.vlgmr.msrb.gmra.mxu1 %v930_v40  ;;  %v6308_v50 = vor.u32 %v7325_v56, %v6307_v48 }
 0x1b6   :  { %1157 = vmatmul.bf16.vlgmr.msrb.gmra.mxu2 %v930_v40  ;;  %1170 = vmatmul.bf16.vlgmr.msrb.gmra.mxu3 %v930_v40  ;;  %v6360_v40 = vor.u32 %v7335_v49, %v6357_v37  ;;  %v6332_v49 = vor.u32 %v7330_v28, %v6331_v29  ;;  %v6333_v37 = vld [vmem:[#allocation4 + $0x78] sm:$0xf0] }
 0x1b7   :  { %1483 = vmatpush.bf16.msra.mxu3 %v6368_v42  ;;  %1446 = vmatpush.bf16.msra.mxu0 %v6324_v26  ;;  %v6299_v26 = vld [vmem:[#allocation4 + $0x28] sm:$0xf] }
 0x1b8   :  { %1457 = vmatpush.bf16.msra.mxu1 %v6360_v40  ;;  %1471 = vmatpush.bf16.msra.mxu2 %v6348_v59  ;;  %v6336_v40 = vor.u32 %v7328_v36, %v6333_v37  ;;  %v6291_v59 = vld [vmem:[#allocation4 + $0x20] sm:$0xf]  ;;  %v6301_v36 = vld [vmem:[#allocation4 + $0x38] sm:$0xf0] }
 0x1b9   :  { %v6292_v22 = vor.u32 %v7321_v1, %v6291_v59 }
 0x1bb   :  { %1484 = vmatpush.bf16.msra.mxu3 %v6352_v18  ;;  %1447 = vmatpush.bf16.msra.mxu0 %v6308_v50 }
 0x1bc   :  { %1458 = vmatpush.bf16.msra.mxu1 %v6344_v32  ;;  %1472 = vmatpush.bf16.msra.mxu2 %v6332_v49  ;;  %v7320_v49 = vld [vmem:[#allocation4 + $0x2c] sm:$0xf] }
 0x1bd   :  { %v6304_v37 = vor.u32 %v7320_v49, %v6301_v36 }
 0x1bf   :  { %1485 = vmatpush.bf16.msra.mxu3 %v6336_v40  ;;  %1448 = vmatpush.bf16.msra.mxu0 %v6292_v22  ;;  %v7317_v40 = vld [vmem:[#allocation4 + $0xc] sm:$0xf0] }
 0x1c0   :  { %1459 = vmatpush.bf16.msra.mxu1 %v6328_v31  ;;  %v6300_v31 = vor.u32 %v7322_v44, %v6299_v26 }
 0x1c4   :  { %1460 = vmatpush.bf16.msra.mxu1 %v6312_v51  ;;  %v7318_v51 = vld [vmem:[#allocation4 + $0x14] sm:$0xf0] }
 0x232   :  { %v1132_v34 = vpop.f32.mrf.mxu0  ;;  %v1145_v25 = vpop.f32.mrf.mxu1 }
 0x233   :  { %v1175_v38 = vadd.f32 %v1132_v34, %v8176_v58  ;;  %v1176_v39 = vadd.f32 %v1145_v25, %v8179_v60  ;;  %v6316_v58 = vor.u32 %v7326_v54, %v6315_v43  ;;  %v6317_v60 = vld [vmem:[#allocation4 + $0x58] sm:$0xf0]  ;;  %v6296_v25 = vor.u32 %v7319_v11, %v6293_v46 }
 0x234   :  { %v6320_v32 = vor.u32 %v7324_v57, %v6317_v60  ;;  %v7316_v57 = vld [vmem:[#allocation4 + $0xc] sm:$0xf] }
 0x235   :  { %v6270_v42 = vmul.f32 -1.442695, %v1175_v38  ;;  %v6271_v35 = vmul.f32 -1.442695, %v1176_v39  ;;  %1473 = vmatpush.bf16.msra.mxu2 %v6316_v58  ;;  %1461 = vmatpush.bf16.msra.mxu1 %v6296_v25  ;;  %v6275_v39 = vld [vmem:[#allocation4] sm:$0xf] }
 0x236   :  { %1486 = vmatpush.bf16.msra.mxu3 %v6320_v32  ;;  %v6276_v56 = vor.u32 %v7317_v40, %v6275_v39  ;;  %v6285_v58 = vld [vmem:[#allocation4 + $0x18] sm:$0xf0] }
 0x237   :  { %7727 = vpow2.f32 %v6270_v42  ;;  %v6277_v42 = vld [vmem:[#allocation4 + $0x10] sm:$0xf0]  ;;  %v6288_v59 = vor.u32 %v7316_v57, %v6285_v58 }
 0x238   :  { %7729 = vpow2.f32 %v6271_v35  ;;  %v6283_v35 = vld [vmem:[#allocation4 + $0x8] sm:$0xf]  ;;  %v6280_v63 = vor.u32 %v7315_v41, %v6277_v42  ;;  %1449 = vmatpush.bf16.msra.mxu0 %v6276_v56 }
 0x239   :  { %v1158_v18 = vpop.f32.mrf.mxu2  ;;  %v1171_v20 = vpop.f32.mrf.mxu3  ;;  %1474 = vmatpush.bf16.msra.mxu2 %v6300_v31  ;;  %v6284_v54 = vor.u32 %v7318_v51, %v6283_v35 }
 0x23a   :  { %v1178_v29 = vadd.f32 %v1171_v20, %v8191_v3  ;;  %v1134_v28 = vpop.f32.mrf.mxu0  ;;  %v1147_v34 = vpop.f32.mrf.mxu1  ;;  %1487 = vmatpush.bf16.msra.mxu3 %v6304_v37  ;;  %1462 = vmatpush.bf16.msra.mxu1 %v6280_v63  ;;  %v1177_v22 = vadd.f32 %v1158_v18, %v8186_v0 }
 0x23c   :  { %v6272_v38 = vmul.f32 -1.442695, %v1178_v29 }
 0x23d   :  { %v7728_v48 = vpop.eup %7727  ;;  %1475 = vmatpush.bf16.msra.mxu2 %v6284_v54 }
 0x23e   :  { %v7730_v3 = vpop.eup %7729  ;;  %v1182_v50 = vadd.f32 1.0, %v7728_v48  ;;  %7731 = vpow2.f32 %v6272_v38  ;;  %1488 = vmatpush.bf16.msra.mxu3 %v6288_v59 }
 0x23f   :  { %v1201_v43 = vadd.f32 1.0, %v7730_v3 }
 0x240   :  { %7733 = vrcp.f32 %v1182_v50  ;;  %v1194_v34 = vand.u32 2147483648, %v1182_v50  ;;  %v1192_v49 = vand.u32 2147483647, %v1182_v50  ;;  %vm1188_vm12 = vweird.f32 %v1182_v50 }
 0x241   :  { %7735 = vrcp.f32 %v1201_v43  ;;  %v1160_v60 = vpop.f32.mrf.mxu2  ;;  %v1173_v32 = vpop.f32.mrf.mxu3  ;;  %v1213_v25 = vand.u32 2147483648, %v1201_v43  ;;  %v1211_v37 = vand.u32 2147483647, %v1201_v43  ;;  %vm1207_vm13 = vweird.f32 %v1201_v43 }
 0x242   :  { %v1195_v0 = vor.u32 1.1754944e-38, %v1194_v34  ;;  %vm1193_vm0 = vcmp.eq.f32.partialorder %v1192_v49, 8.507059e+37  ;;  %v7378_v34 = vld [vmem:[#allocation4 + $0xf4] sm:$0xf0]  ;;  %v7376_v49 = vld [vmem:[#allocation4 + $0xec] sm:$0xf] }
 0x243   :  { %v1214_v48 = vor.u32 1.1754944e-38, %v1213_v25  ;;  %vm1212_vm1 = vcmp.eq.f32.partialorder %v1211_v37, 8.507059e+37 }
 0x244   :  { %v7732_v1 = vpop.eup %7731 }
 0x245   :  { %v1221_v11 = vadd.f32 1.0, %v7732_v1 }
 0x246   :  { %v7734_v20 = vpop.eup %7733 }
 0x247   :  { %v7736_v46 = vpop.eup %7735  ;;  %v1184_v26 = vmul.f32 %v7734_v20, %v1182_v50  ;;  %7737 = vrcp.f32 %v1221_v11  ;;  %vm1189_vm10 = vweird.f32 %v7734_v20  ;;  %v1233_v58 = vand.u32 2147483648, %v1221_v11 }
 0x248   :  { %v1203_v44 = vmul.f32 %v7736_v46, %v1201_v43  ;;  %7739 = vtanh.f32 %v1177_v22  ;;  %vm1208_vm11 = vweird.f32 %v7736_v46  ;;  %vm1190_vm14 = vmor %vm1188_vm12, %vm1189_vm10  ;;  %vm1227_vm3 = vweird.f32 %v1221_v11 }
 0x249   :  { %v1185_v29 = vsub.f32 1.0, %v1184_v26  ;;  %vm1209_vm15 = vmor %vm1207_vm13, %vm1208_vm11  ;;  %v1231_v60 = vand.u32 2147483647, %v1221_v11  ;;  %v1234_v59 = vor.u32 1.1754944e-38, %v1233_v58  ;;  %v7377_v26 = vld [vmem:[#allocation4 + $0xec] sm:$0xf0] }
 0x24a   :  { %v1204_v28 = vsub.f32 1.0, %v1203_v44  ;;  %v7375_v44 = vld [vmem:[#allocation4 + $0xe4] sm:$0xf]  ;;  %v6488_v58 = vld [vmem:[#allocation4 + $0xb0] sm:$0xf0] }
 0x24b   :  { %v1186_v31 = vmul.f32 %v7734_v20, %v1185_v29  ;;  %vm1232_vm5 = vcmp.eq.f32.partialorder %v1231_v60, 8.507059e+37  ;;  %v6494_v60 = vld [vmem:[#allocation4 + $0xa8] sm:$0xf] }
 0x24c   :  { %v1205_v36 = vmul.f32 %v7736_v46, %v1204_v28  ;;  %v6526_v28 = vld [vmem:[#allocation4 + $0xe8] sm:$0xf] }
 0x24d   :  { %v7738_v38 = vpop.eup %7737  ;;  %v1187_v39 = vadd.f32 %v7734_v20, %v1186_v31  ;;  %v6527_v31 = vor.u32 %v7378_v34, %v6526_v28  ;;  %v6472_v28 = vld [vmem:[#allocation4 + $0x90] sm:$0xf0]  ;;  %v6478_v34 = vld [vmem:[#allocation4 + $0x88] sm:$0xf] }
 0x24e   :  { %v1206_v18 = vadd.f32 %v7736_v46, %v1205_v36  ;;  %v1223_v40 = vmul.f32 %v7738_v38, %v1221_v11  ;;  %v7740_v41 = vpop.eup %7739  ;;  %vm1228_vm2 = vweird.f32 %v7738_v38  ;;  %v6520_v11 = vld [vmem:[#allocation4 + $0xf0] sm:$0xf0]  ;;  %v6528_v36 = vld [vmem:[#allocation4 + $0xf8] sm:$0xf0] }
 0x24f   :  { %v1191_v56 = vsel %vm1190_vm14, %v7734_v20, %v1187_v39  ;;  %vm1229_vm4 = vmor %vm1227_vm3, %vm1228_vm2  ;;  %v6523_v25 = vor.u32 %v7375_v44, %v6520_v11  ;;  %v6531_v37 = vor.u32 %v7376_v49, %v6528_v36  ;;  %1787 = vmatpush.bf16.msrb.mxu2 %v6527_v31  ;;  %v7373_v39 = vld [vmem:[#allocation4 + $0xcc] sm:$0xf0]  ;;  %v7364_v36 = vld [vmem:[#allocation4 + $0x8c] sm:$0xf] }
 0x250   :  { %v1196_v42 = vsel %vm1193_vm0, %v1195_v0, %v1191_v56  ;;  %v1210_v35 = vsel %vm1209_vm15, %v7736_v46, %v1206_v18  ;;  %v1224_v3 = vsub.f32 1.0, %v1223_v40  ;;  %v6518_v46 = vld [vmem:[#allocation4 + $0xe0] sm:$0xf]  ;;  %v7371_v0 = vld [vmem:[#allocation4 + $0xc4] sm:$0xf] }
 0x251   :  { %v1215_v63 = vsel %vm1212_vm1, %v1214_v48, %v1210_v35  ;;  %v1238_v51 = vmul.f32 %v7740_v41, %v1196_v42  ;;  %v6519_v29 = vor.u32 %v7377_v26, %v6518_v46  ;;  %1774 = vmatpush.bf16.msrb.mxu1 %v6523_v25  ;;  %1800 = vmatpush.bf16.msrb.mxu3 %v6531_v37  ;;  %v6504_v40 = vld [vmem:[#allocation4 + $0xd0] sm:$0xf0]  ;;  %v6510_v48 = vld [vmem:[#allocation4 + $0xc8] sm:$0xf]  ;;  %v7374_v56 = vld [vmem:[#allocation4 + $0xd4] sm:$0xf0] }
 0x252   :  { %v1237_v54 = vmul.f32 %v1215_v63, %v8263_v19  ;;  %v1225_v57 = vmul.f32 %v7738_v38, %v1224_v3  ;;  %v6507_v41 = vor.u32 %v7371_v0, %v6504_v40  ;;  %v6511_v42 = vor.u32 %v7374_v56, %v6510_v48  ;;  %v7372_v35 = vld [vmem:[#allocation4 + $0xcc] sm:$0xf]  ;;  %v6512_v3 = vld [vmem:[#allocation4 + $0xd8] sm:$0xf0]  ;;  %v6470_v26 = vld [vmem:[#allocation4 + $0x80] sm:$0xf] }
 0x253   :  { %1761 = vmatpush.bf16.msrb.mxu0 %v6519_v29  ;;  %v6515_v63 = vor.u32 %v7372_v35, %v6512_v3  ;;  %v7365_v44 = vld [vmem:[#allocation4 + $0x8c] sm:$0xf0]  ;;  %v7363_v29 = vld [vmem:[#allocation4 + $0x84] sm:$0xf]  ;;  %v7366_v25 = vld [vmem:[#allocation4 + $0x94] sm:$0xf0]  ;;  %v159_v40 = vadd.f32 %v8188_v2, %v8167_v53  ;;  %v188_v48 = vadd.f32 %v8193_v4, %v8171_v55 }
 0x254   :  { %v8275_v50 = vadd.f32 %v1238_v51, %v1237_v54  ;;  %v1226_v43 = vadd.f32 %v7738_v38, %v1225_v57  ;;  %1788 = vmatpush.bf16.msrb.mxu2 %v6511_v42  ;;  %v6486_v51 = vld [vmem:[#allocation4 + $0xa0] sm:$0xf]  ;;  %v7369_v54 = vld [vmem:[#allocation4 + $0xac] sm:$0xf0]  ;;  %v7367_v57 = vld [vmem:[#allocation4 + $0xa4] sm:$0xf]  ;;  %v6471_v11 = vor.u32 %v7365_v44, %v6470_v26  ;;  %v6475_v31 = vor.u32 %v7363_v29, %v6472_v28 }
 0x255   :  { %1775 = vmatpush.bf16.msrb.mxu1 %v6507_v41  ;;  %1801 = vmatpush.bf16.msrb.mxu3 %v6515_v63  ;;  %v6479_v49 = vor.u32 %v7366_v25, %v6478_v34  ;;  %v6480_v37 = vld [vmem:[#allocation4 + $0x98] sm:$0xf0]  ;;  %v7361_v0 = vld [vmem:[#allocation4 + $0x6c] sm:$0xf0]  ;;  %v6456_v41 = vld [vmem:[#allocation4 + $0x70] sm:$0xf0]  ;;  %v246_v25 = vadd.f32 %v8197_v6, %v8183_v62 }
 0x256   :  { %7741 = vtanh.f32 %v8275_v50  ;;  %v1230_v32 = vsel %vm1229_vm4, %v7738_v38, %v1226_v43  ;;  %v6502_v38 = vld [vmem:[#allocation4 + $0xc0] sm:$0xf]  ;;  %v6487_v43 = vor.u32 %v7369_v54, %v6486_v51  ;;  %v6462_v42 = vld [vmem:[#allocation4 + $0x68] sm:$0xf]  ;;  %v7362_v35 = vld [vmem:[#allocation4 + $0x74] sm:$0xf0] }
 0x257   :  { %v1235_v20 = vsel %vm1232_vm5, %v1234_v59, %v1230_v32  ;;  %v6503_v18 = vor.u32 %v7373_v39, %v6502_v38  ;;  %v7370_v32 = vld [vmem:[#allocation4 + $0xb4] sm:$0xf0]  ;;  %v6491_v59 = vor.u32 %v7367_v57, %v6488_v58  ;;  %v6483_v38 = vor.u32 %v7364_v36, %v6480_v37  ;;  %v6454_v39 = vld [vmem:[#allocation4 + $0x60] sm:$0xf]  ;;  %v7360_v57 = vld [vmem:[#allocation4 + $0x6c] sm:$0xf] }
 0x258   :  { %v6455_v56 = vor.u32 %v7361_v0, %v6454_v39  ;;  %v6463_v54 = vor.u32 %v7362_v35, %v6462_v42  ;;  %v6438_v2 = vld [vmem:[#allocation4 + $0x40] sm:$0xf]  ;;  %v7355_v4 = vld [vmem:[#allocation4 + $0x44] sm:$0xf]  ;;  %v6446_v44 = vld [vmem:[#allocation4 + $0x48] sm:$0xf] }
 0x259   :  { %1762 = vmatpush.bf16.msrb.mxu0 %v6503_v18  ;;  %1776 = vmatpush.bf16.msrb.mxu1 %v6491_v59  ;;  %v7359_v18 = vld [vmem:[#allocation4 + $0x64] sm:$0xf]  ;;  %v7357_v59 = vld [vmem:[#allocation4 + $0x4c] sm:$0xf0]  ;;  %v7358_v29 = vld [vmem:[#allocation4 + $0x54] sm:$0xf0] }
 0x25a   :  { %v6459_v51 = vor.u32 %v7359_v18, %v6456_v41  ;;  %v6447_v28 = vor.u32 %v7358_v29, %v6446_v44  ;;  %v6448_v34 = vld [vmem:[#allocation4 + $0x58] sm:$0xf0]  ;;  %v7353_v36 = vld [vmem:[#allocation4 + $0x2c] sm:$0xf0]  ;;  %v7351_v37 = vld [vmem:[#allocation4 + $0x24] sm:$0xf] }
 0x25b   :  { %v6424_v18 = vld [vmem:[#allocation4 + $0x30] sm:$0xf0]  ;;  %v7352_v6 = vld [vmem:[#allocation4 + $0x2c] sm:$0xf]  ;;  %v6416_v29 = vld [vmem:[#allocation4 + $0x18] sm:$0xf0] }
 0x25c   :  { %v7742_v1 = vpop.eup %7741  ;;  %v6427_v35 = vor.u32 %v7351_v37, %v6424_v18  ;;  %v7348_v44 = vld [vmem:[#allocation4 + $0xc] sm:$0xf] }
 0x25d   :  { %v8278_v22 = vmul.f32 %v7742_v1, %v1235_v20  ;;  %v6495_v1 = vor.u32 %v7370_v32, %v6494_v60  ;;  %v7368_v20 = vld [vmem:[#allocation4 + $0xac] sm:$0xf]  ;;  %1763 = vmatpush.bf16.msrb.mxu0 %v6487_v43  ;;  %1777 = vmatpush.bf16.msrb.mxu1 %v6475_v31  ;;  %v6464_v43 = vld [vmem:[#allocation4 + $0x78] sm:$0xf0] }
 0x25e   :  { %v6467_v32 = vor.u32 %v7360_v57, %v6464_v43  ;;  %v6406_v57 = vld [vmem:[#allocation4] sm:$0xf]  ;;  %v7349_v43 = vld [vmem:[#allocation4 + $0xc] sm:$0xf0] }
 0x25f   :  { %9809 = vst [vmem:[#allocation16_spill] sm:$0xff] %v8278_v22  ;;  %v1249_v19 = vpack.c.bf16 %v8278_v22, %v8278_v22  ;;  %1789 = vmatpush.bf16.msrb.mxu2 %v6495_v1  ;;  %v7484_v22 = vld [vmem:[#allocation7 + $0x4c] sm:$0xf] }
 0x261   :  { %1450 = vmatmul.bf16.vlgmr.msra.gmra.mxu0 %v1249_v19  ;;  %1463 = vmatmul.bf16.vlgmr.msra.gmra.mxu1 %v1249_v19 }
 0x262   :  { %1476 = vmatmul.bf16.vlgmr.msra.gmra.mxu2 %v1249_v19  ;;  %1489 = vmatmul.bf16.vlgmr.msra.gmra.mxu3 %v1249_v19  ;;  %v6496_v19 = vld [vmem:[#allocation4 + $0xb8] sm:$0xf0] }
 0x263   :  { %v6499_v46 = vor.u32 %v7368_v20, %v6496_v19  ;;  %1764 = vmatpush.bf16.msrb.mxu0 %v6471_v11  ;;  %1790 = vmatpush.bf16.msrb.mxu2 %v6479_v49  ;;  %v6439_v19 = vor.u32 %v7357_v59, %v6438_v2  ;;  %v7356_v11 = vld [vmem:[#allocation4 + $0x4c] sm:$0xf]  ;;  %v6422_v49 = vld [vmem:[#allocation4 + $0x20] sm:$0xf]  ;;  %v6408_v2 = vld [vmem:[#allocation4 + $0x10] sm:$0xf0] }
 0x264   :  { %1778 = vmatpush.bf16.msrb.mxu1 %v6459_v51  ;;  %v6451_v31 = vor.u32 %v7356_v11, %v6448_v34  ;;  %v6423_v0 = vor.u32 %v7353_v36, %v6422_v49  ;;  %v6414_v59 = vld [vmem:[#allocation4 + $0x8] sm:$0xf]  ;;  %v6419_v34 = vor.u32 %v7348_v44, %v6416_v29 }
 0x265   :  { %1802 = vmatpush.bf16.msrb.mxu3 %v6499_v46  ;;  %v6440_v46 = vld [vmem:[#allocation4 + $0x50] sm:$0xf0] }
 0x266   :  { %v6443_v26 = vor.u32 %v7355_v4, %v6440_v46 }
 0x267   :  { %1765 = vmatpush.bf16.msrb.mxu0 %v6455_v56  ;;  %1791 = vmatpush.bf16.msrb.mxu2 %v6463_v54 }
 0x268   :  { %1779 = vmatpush.bf16.msrb.mxu1 %v6443_v26 }
 0x269   :  { %1803 = vmatpush.bf16.msrb.mxu3 %v6483_v38 }
 0x26b   :  { %1766 = vmatpush.bf16.msrb.mxu0 %v6439_v19  ;;  %1792 = vmatpush.bf16.msrb.mxu2 %v6447_v28  ;;  %v7350_v19 = vld [vmem:[#allocation4 + $0x14] sm:$0xf0] }
 0x26c   :  { %1780 = vmatpush.bf16.msrb.mxu1 %v6427_v35  ;;  %v6415_v26 = vor.u32 %v7350_v19, %v6414_v59 }
 0x26d   :  { %1804 = vmatpush.bf16.msrb.mxu3 %v6467_v32  ;;  %v7347_v32 = vld [vmem:[#allocation4 + $0x4] sm:$0xf] }
 0x26f   :  { %1767 = vmatpush.bf16.msrb.mxu0 %v6423_v0 }
 0x271   :  { %1805 = vmatpush.bf16.msrb.mxu3 %v6451_v31  ;;  %v217_v31 = vadd.f32 %v8195_v5, %v8181_v61 }
 0x2de   :  { %v1451_v3 = vpop.f32.mrf.mxu0  ;;  %v1464_v63 = vpop.f32.mrf.mxu1 }
 0x2df   :  { %v1494_v58 = vadd.f32 %v1451_v3, %v159_v40  ;;  %v1495_v60 = vadd.f32 %v1464_v63, %v188_v48  ;;  %v6430_v40 = vld [vmem:[#allocation4 + $0x28] sm:$0xf]  ;;  %v7354_v48 = vld [vmem:[#allocation4 + $0x34] sm:$0xf0]  ;;  %v6432_v63 = vld [vmem:[#allocation4 + $0x38] sm:$0xf0] }
 0x2e0   :  { %v6431_v3 = vor.u32 %v7354_v48, %v6430_v40  ;;  %v6435_v51 = vor.u32 %v7352_v6, %v6432_v63 }
 0x2e1   :  { %v6401_v1 = vmul.f32 -1.442695, %v1494_v58  ;;  %v6402_v20 = vmul.f32 -1.442695, %v1495_v60  ;;  %v6407_v60 = vor.u32 %v7349_v43, %v6406_v57 }
 0x2e2   :  { %1793 = vmatpush.bf16.msrb.mxu2 %v6431_v3  ;;  %1806 = vmatpush.bf16.msrb.mxu3 %v6435_v51 }
 0x2e3   :  { %7743 = vpow2.f32 %v6401_v1  ;;  %1768 = vmatpush.bf16.msrb.mxu0 %v6407_v60 }
 0x2e4   :  { %7745 = vpow2.f32 %v6402_v20  ;;  %v6411_v20 = vor.u32 %v7347_v32, %v6408_v2 }
 0x2e5   :  { %v1477_v38 = vpop.f32.mrf.mxu2  ;;  %v1490_v39 = vpop.f32.mrf.mxu3 }
 0x2e6   :  { %v1497_v56 = vadd.f32 %v1490_v39, %v246_v25  ;;  %v1453_v41 = vpop.f32.mrf.mxu0  ;;  %v1466_v42 = vpop.f32.mrf.mxu1  ;;  %1781 = vmatpush.bf16.msrb.mxu1 %v6411_v20  ;;  %1794 = vmatpush.bf16.msrb.mxu2 %v6415_v26  ;;  %v1496_v37 = vadd.f32 %v1477_v38, %v217_v31  ;;  %v6649_v31 = vld [vmem:[#allocation4 + $0xe0] sm:$0xf] }
 0x2e7   :  { %1807 = vmatpush.bf16.msrb.mxu3 %v6419_v34 }
 0x2e8   :  { %v6403_v54 = vmul.f32 -1.442695, %v1497_v56 }
 0x2e9   :  { %v7744_v58 = vpop.eup %7743 }
 0x2ea   :  { %v7746_v4 = vpop.eup %7745  ;;  %v1501_v1 = vadd.f32 1.0, %v7744_v58  ;;  %7747 = vpow2.f32 %v6403_v54 }
 0x2eb   :  { %v1520_v46 = vadd.f32 1.0, %v7746_v4 }
 0x2ec   :  { %7749 = vrcp.f32 %v1501_v1  ;;  %v1513_v56 = vand.u32 2147483648, %v1501_v1  ;;  %v1511_v35 = vand.u32 2147483647, %v1501_v1  ;;  %vm1507_vm8 = vweird.f32 %v1501_v1 }
 0x2ed   :  { %7751 = vrcp.f32 %v1520_v46  ;;  %v1479_v11 = vpop.f32.mrf.mxu2  ;;  %v1492_v28 = vpop.f32.mrf.mxu3  ;;  %v1532_v41 = vand.u32 2147483648, %v1520_v46  ;;  %v1530_v6 = vand.u32 2147483647, %v1520_v46  ;;  %vm1526_vm9 = vweird.f32 %v1520_v46 }
 0x2ee   :  { %v1514_v38 = vor.u32 1.1754944e-38, %v1513_v56  ;;  %vm1512_vm12 = vcmp.eq.f32.partialorder %v1511_v35, 8.507059e+37  ;;  %v7408_v56 = vld [vmem:[#allocation4 + $0xec] sm:$0xf]  ;;  %v6633_v35 = vld [vmem:[#allocation4 + $0xc0] sm:$0xf] }
 0x2ef   :  { %v1533_v57 = vor.u32 1.1754944e-38, %v1532_v41  ;;  %vm1531_vm13 = vcmp.eq.f32.partialorder %v1530_v6, 8.507059e+37  ;;  %v6659_v41 = vld [vmem:[#allocation4 + $0xf8] sm:$0xf0]  ;;  %v7403_v6 = vld [vmem:[#allocation4 + $0xc4] sm:$0xf] }
 0x2f0   :  { %v7748_v25 = vpop.eup %7747 }
 0x2f1   :  { %v1540_v49 = vadd.f32 1.0, %v7748_v25 }
 0x2f2   :  { %v7750_v36 = vpop.eup %7749 }
 0x2f3   :  { %v7752_v39 = vpop.eup %7751  ;;  %v1503_v0 = vmul.f32 %v7750_v36, %v1501_v1  ;;  %7753 = vrcp.f32 %v1540_v49  ;;  %vm1508_vm6 = vweird.f32 %v7750_v36  ;;  %v1552_v26 = vand.u32 2147483648, %v1540_v49 }
 0x2f4   :  { %v1522_v18 = vmul.f32 %v7752_v39, %v1520_v46  ;;  %7755 = vtanh.f32 %v1496_v37  ;;  %vm1527_vm7 = vweird.f32 %v7752_v39  ;;  %vm1509_vm10 = vmor %vm1507_vm8, %vm1508_vm6  ;;  %vm1546_vm15 = vweird.f32 %v1540_v49  ;;  %v7407_v37 = vld [vmem:[#allocation4 + $0xe4] sm:$0xf] }
 0x2f5   :  { %v1504_v40 = vsub.f32 1.0, %v1503_v0  ;;  %vm1528_vm11 = vmor %vm1526_vm9, %vm1527_vm7  ;;  %v1550_v44 = vand.u32 2147483647, %v1540_v49  ;;  %v1553_v11 = vor.u32 1.1754944e-38, %v1552_v26  ;;  %v6657_v0 = vld [vmem:[#allocation4 + $0xe8] sm:$0xf] }
 0x2f6   :  { %v1523_v48 = vsub.f32 1.0, %v1522_v18  ;;  %v7410_v18 = vld [vmem:[#allocation4 + $0xf4] sm:$0xf0] }
 0x2f7   :  { %v1505_v42 = vmul.f32 %v7750_v36, %v1504_v40  ;;  %vm1551_vm1 = vcmp.eq.f32.partialorder %v1550_v44, 8.507059e+37 }
 0x2f8   :  { %v1524_v3 = vmul.f32 %v7752_v39, %v1523_v48  ;;  %v6658_v48 = vor.u32 %v7410_v18, %v6657_v0 }
 0x2f9   :  { %v7754_v5 = vpop.eup %7753  ;;  %v1506_v63 = vadd.f32 %v7750_v36, %v1505_v42  ;;  %v6662_v42 = vor.u32 %v7408_v56, %v6659_v41  ;;  %v6585_v41 = vld [vmem:[#allocation4 + $0x60] sm:$0xf] }
 0x2fa   :  { %v1525_v51 = vadd.f32 %v7752_v39, %v1524_v3  ;;  %v1542_v54 = vmul.f32 %v7754_v5, %v1540_v49  ;;  %v7756_v58 = vpop.eup %7755  ;;  %vm1547_vm14 = vweird.f32 %v7754_v5  ;;  %v6651_v49 = vld [vmem:[#allocation4 + $0xf0] sm:$0xf0]  ;;  %2106 = vmatpush.bf16.msra.mxu2 %v6658_v48  ;;  %v7405_v3 = vld [vmem:[#allocation4 + $0xcc] sm:$0xf0]  ;;  %v6611_v48 = vld [vmem:[#allocation4 + $0x98] sm:$0xf0] }
 0x2fb   :  { %v1510_v43 = vsel %vm1509_vm10, %v7750_v36, %v1506_v63  ;;  %vm1548_vm0 = vmor %vm1546_vm15, %vm1547_vm14  ;;  %v7409_v36 = vld [vmem:[#allocation4 + $0xec] sm:$0xf0]  ;;  %v6654_v40 = vor.u32 %v7407_v37, %v6651_v49  ;;  %2119 = vmatpush.bf16.msra.mxu3 %v6662_v42  ;;  %v6635_v63 = vld [vmem:[#allocation4 + $0xd0] sm:$0xf0] }
 0x2fc   :  { %v1515_v60 = vsel %vm1512_vm12, %v1514_v38, %v1510_v43  ;;  %v1529_v32 = vsel %vm1528_vm11, %v7752_v39, %v1525_v51  ;;  %v1543_v2 = vsub.f32 1.0, %v1542_v54  ;;  %v6650_v39 = vor.u32 %v7409_v36, %v6649_v31  ;;  %v6641_v38 = vld [vmem:[#allocation4 + $0xc8] sm:$0xf]  ;;  %v7406_v51 = vld [vmem:[#allocation4 + $0xd4] sm:$0xf0] }
 0x2fd   :  { %v1534_v59 = vsel %vm1531_vm13, %v1533_v57, %v1529_v32  ;;  %v1557_v4 = vmul.f32 %v7756_v58, %v1515_v60  ;;  %2093 = vmatpush.bf16.msra.mxu1 %v6654_v40  ;;  %v6638_v54 = vor.u32 %v7403_v6, %v6635_v63  ;;  %v6642_v57 = vor.u32 %v7406_v51, %v6641_v38  ;;  %v7404_v43 = vld [vmem:[#allocation4 + $0xcc] sm:$0xf]  ;;  %v6643_v58 = vld [vmem:[#allocation4 + $0xd8] sm:$0xf0]  ;;  %v6617_v32 = vld [vmem:[#allocation4 + $0xa0] sm:$0xf] }
 0x2fe   :  { %v1556_v20 = vmul.f32 %v1534_v59, %v8275_v50  ;;  %v1544_v19 = vmul.f32 %v7754_v5, %v1543_v2  ;;  %2080 = vmatpush.bf16.msra.mxu0 %v6650_v39  ;;  %v6646_v60 = vor.u32 %v7404_v43, %v6643_v58  ;;  %v7401_v2 = vld [vmem:[#allocation4 + $0xac] sm:$0xf0]  ;;  %v7399_v59 = vld [vmem:[#allocation4 + $0xa4] sm:$0xf]  ;;  %v6603_v37 = vld [vmem:[#allocation4 + $0x90] sm:$0xf0] }
 0x2ff   :  { %2107 = vmatpush.bf16.msra.mxu2 %v6642_v57  ;;  %v7395_v31 = vld [vmem:[#allocation4 + $0x84] sm:$0xf]  ;;  %v6609_v39 = vld [vmem:[#allocation4 + $0x88] sm:$0xf]  ;;  %v7398_v49 = vld [vmem:[#allocation4 + $0x94] sm:$0xf0] }
 0x300   :  { %v8291_v1 = vadd.f32 %v1557_v4, %v1556_v20  ;;  %v1545_v46 = vadd.f32 %v7754_v5, %v1544_v19  ;;  %2120 = vmatpush.bf16.msra.mxu3 %v6646_v60  ;;  %v6618_v4 = vor.u32 %v7401_v2, %v6617_v32  ;;  %v6619_v20 = vld [vmem:[#allocation4 + $0xb0] sm:$0xf0]  ;;  %v6625_v19 = vld [vmem:[#allocation4 + $0xa8] sm:$0xf]  ;;  %v6606_v0 = vor.u32 %v7395_v31, %v6603_v37  ;;  %v7396_v40 = vld [vmem:[#allocation4 + $0x8c] sm:$0xf] }
 0x301   :  { %2094 = vmatpush.bf16.msra.mxu1 %v6638_v54  ;;  %v6622_v26 = vor.u32 %v7399_v59, %v6619_v20  ;;  %v6610_v18 = vor.u32 %v7398_v49, %v6609_v39  ;;  %v6614_v56 = vor.u32 %v7396_v40, %v6611_v48  ;;  %v7393_v42 = vld [vmem:[#allocation4 + $0x6c] sm:$0xf0]  ;;  %v6587_v6 = vld [vmem:[#allocation4 + $0x70] sm:$0xf0]  ;;  %v7394_v63 = vld [vmem:[#allocation4 + $0x74] sm:$0xf0] }
 0x302   :  { %7757 = vtanh.f32 %v8291_v1  ;;  %v1549_v29 = vsel %vm1548_vm0, %v7754_v5, %v1545_v46  ;;  %v6634_v5 = vor.u32 %v7405_v3, %v6633_v35  ;;  %v7402_v46 = vld [vmem:[#allocation4 + $0xb4] sm:$0xf0]  ;;  %v7391_v35 = vld [vmem:[#allocation4 + $0x64] sm:$0xf]  ;;  %v6586_v3 = vor.u32 %v7393_v42, %v6585_v41  ;;  %v7392_v43 = vld [vmem:[#allocation4 + $0x6c] sm:$0xf] }
 0x303   :  { %v1554_v34 = vsel %vm1551_vm1, %v1553_v11, %v1549_v29  ;;  %v6626_v44 = vor.u32 %v7402_v46, %v6625_v19  ;;  %v7400_v29 = vld [vmem:[#allocation4 + $0xac] sm:$0xf]  ;;  %v6627_v11 = vld [vmem:[#allocation4 + $0xb8] sm:$0xf0]  ;;  %v6590_v54 = vor.u32 %v7391_v35, %v6587_v6  ;;  %v6569_v59 = vld [vmem:[#allocation4 + $0x40] sm:$0xf] }
 0x304   :  { %2081 = vmatpush.bf16.msra.mxu0 %v6634_v5  ;;  %v6593_v5 = vld [vmem:[#allocation4 + $0x68] sm:$0xf]  ;;  %v6595_v58 = vld [vmem:[#allocation4 + $0x78] sm:$0xf0]  ;;  %v7387_v20 = vld [vmem:[#allocation4 + $0x44] sm:$0xf] }
 0x305   :  { %2095 = vmatpush.bf16.msra.mxu1 %v6622_v26  ;;  %2108 = vmatpush.bf16.msra.mxu2 %v6626_v44  ;;  %v6594_v57 = vor.u32 %v7394_v63, %v6593_v5  ;;  %v6598_v2 = vor.u32 %v7392_v43, %v6595_v58  ;;  %v6571_v44 = vld [vmem:[#allocation4 + $0x50] sm:$0xf0]  ;;  %v6553_v31 = vld [vmem:[#allocation4 + $0x20] sm:$0xf]  ;;  %v7383_v37 = vld [vmem:[#allocation4 + $0x24] sm:$0xf] }
 0x306   :  { %v6561_v40 = vld [vmem:[#allocation4 + $0x28] sm:$0xf]  ;;  %v7386_v48 = vld [vmem:[#allocation4 + $0x34] sm:$0xf0]  ;;  %v7384_v6 = vld [vmem:[#allocation4 + $0x2c] sm:$0xf] }
 0x307   :  { %v6563_v5 = vld [vmem:[#allocation4 + $0x38] sm:$0xf0]  ;;  %v7379_v58 = vld [vmem:[#allocation4 + $0x4] sm:$0xf] }
 0x308   :  { %v7758_v28 = vpop.eup %7757  ;;  %2082 = vmatpush.bf16.msra.mxu0 %v6618_v4  ;;  %v7389_v4 = vld [vmem:[#allocation4 + $0x4c] sm:$0xf0]  ;;  %v6566_v63 = vor.u32 %v7384_v6, %v6563_v5 }
 0x309   :  { %v8294_v25 = vmul.f32 %v7758_v28, %v1554_v34  ;;  %v6630_v28 = vor.u32 %v7400_v29, %v6627_v11  ;;  %v6601_v34 = vld [vmem:[#allocation4 + $0x80] sm:$0xf]  ;;  %2096 = vmatpush.bf16.msra.mxu1 %v6606_v0  ;;  %2109 = vmatpush.bf16.msra.mxu2 %v6610_v18  ;;  %v6570_v26 = vor.u32 %v7389_v4, %v6569_v59  ;;  %v6577_v11 = vld [vmem:[#allocation4 + $0x48] sm:$0xf]  ;;  %v6555_v18 = vld [vmem:[#allocation4 + $0x30] sm:$0xf0] }
 0x30a   :  { %v6574_v29 = vor.u32 %v7387_v20, %v6571_v44  ;;  %v6558_v35 = vor.u32 %v7383_v37, %v6555_v18  ;;  %v7382_v4 = vld [vmem:[#allocation4 + $0x14] sm:$0xf0] }
 0x30b   :  { %9810 = vst [vmem:[#allocation17_spill] sm:$0xff] %v8294_v25  ;;  %v1568_v50 = vpack.c.bf16 %v8294_v25, %v8294_v25  ;;  %2121 = vmatpush.bf16.msra.mxu3 %v6630_v28  ;;  %v7390_v28 = vld [vmem:[#allocation4 + $0x54] sm:$0xf0] }
 0x30d   :  { %1769 = vmatmul.bf16.vlgmr.msrb.gmra.mxu0 %v1568_v50  ;;  %1782 = vmatmul.bf16.vlgmr.msrb.gmra.mxu1 %v1568_v50 }
 0x30e   :  { %1795 = vmatmul.bf16.vlgmr.msrb.gmra.mxu2 %v1568_v50  ;;  %1808 = vmatmul.bf16.vlgmr.msrb.gmra.mxu3 %v1568_v50  ;;  %v7397_v50 = vld [vmem:[#allocation4 + $0x8c] sm:$0xf0] }
 0x30f   :  { %v6602_v36 = vor.u32 %v7397_v50, %v6601_v34  ;;  %2122 = vmatpush.bf16.msra.mxu3 %v6614_v56  ;;  %2097 = vmatpush.bf16.msra.mxu1 %v6590_v54  ;;  %v7388_v34 = vld [vmem:[#allocation4 + $0x4c] sm:$0xf]  ;;  %v7381_v54 = vld [vmem:[#allocation4 + $0xc] sm:$0xf0] }
 0x310   :  { %2110 = vmatpush.bf16.msra.mxu2 %v6594_v57 }
 0x311   :  { %2083 = vmatpush.bf16.msra.mxu0 %v6602_v36  ;;  %v7385_v36 = vld [vmem:[#allocation4 + $0x2c] sm:$0xf0] }
 0x312   :  { %v6554_v0 = vor.u32 %v7385_v36, %v6553_v31 }
 0x313   :  { %2123 = vmatpush.bf16.msra.mxu3 %v6598_v2  ;;  %2098 = vmatpush.bf16.msra.mxu1 %v6574_v29 }
 0x315   :  { %2084 = vmatpush.bf16.msra.mxu0 %v6586_v3  ;;  %v6562_v3 = vor.u32 %v7386_v48, %v6561_v40 }
 0x317   :  { %2099 = vmatpush.bf16.msra.mxu1 %v6558_v35 }
 0x319   :  { %2085 = vmatpush.bf16.msra.mxu0 %v6570_v26  ;;  %v6547_v26 = vld [vmem:[#allocation4 + $0x18] sm:$0xf0] }
 0x31d   :  { %2086 = vmatpush.bf16.msra.mxu0 %v6554_v0 }
 0x38a   :  { %v1770_v38 = vpop.f32.mrf.mxu0  ;;  %v1783_v51 = vpop.f32.mrf.mxu1 }
 0x38b   :  { %v1813_v60 = vadd.f32 %v1770_v38, %v8200_v8  ;;  %v1814_v32 = vadd.f32 %v1783_v51, %v8203_v10  ;;  %v6578_v8 = vor.u32 %v7390_v28, %v6577_v11  ;;  %v6579_v10 = vld [vmem:[#allocation4 + $0x58] sm:$0xf0]  ;;  %v6537_v51 = vld [vmem:[#allocation4] sm:$0xf] }
 0x38c   :  { %v6582_v50 = vor.u32 %v7388_v34, %v6579_v10  ;;  %v6538_v43 = vor.u32 %v7381_v54, %v6537_v51 }
 0x38d   :  { %v6532_v19 = vmul.f32 -1.442695, %v1813_v60  ;;  %v6533_v46 = vmul.f32 -1.442695, %v1814_v32  ;;  %2111 = vmatpush.bf16.msra.mxu2 %v6578_v8  ;;  %v6539_v60 = vld [vmem:[#allocation4 + $0x10] sm:$0xf0] }
 0x38e   :  { %2124 = vmatpush.bf16.msra.mxu3 %v6582_v50  ;;  %v6545_v32 = vld [vmem:[#allocation4 + $0x8] sm:$0xf]  ;;  %v6542_v59 = vor.u32 %v7379_v58, %v6539_v60  ;;  %2087 = vmatpush.bf16.msra.mxu0 %v6538_v43 }
 0x38f   :  { %7759 = vpow2.f32 %v6532_v19  ;;  %v6546_v19 = vor.u32 %v7382_v4, %v6545_v32 }
 0x390   :  { %7761 = vpow2.f32 %v6533_v46  ;;  %v7380_v46 = vld [vmem:[#allocation4 + $0xc] sm:$0xf]  ;;  %2100 = vmatpush.bf16.msra.mxu1 %v6542_v59 }
 0x391   :  { %v1796_v39 = vpop.f32.mrf.mxu2  ;;  %v1809_v49 = vpop.f32.mrf.mxu3  ;;  %2112 = vmatpush.bf16.msra.mxu2 %v6562_v3  ;;  %v6550_v11 = vor.u32 %v7380_v46, %v6547_v26 }
 0x392   :  { %v1816_v56 = vadd.f32 %v1809_v49, %v8211_v15  ;;  %v1772_v41 = vpop.f32.mrf.mxu0  ;;  %v1785_v42 = vpop.f32.mrf.mxu1  ;;  %2125 = vmatpush.bf16.msra.mxu3 %v6566_v63  ;;  %v1815_v10 = vadd.f32 %v1796_v39, %v8206_v12 }
 0x394   :  { %v6534_v38 = vmul.f32 -1.442695, %v1816_v56 }
 0x395   :  { %v7760_v57 = vpop.eup %7759  ;;  %2113 = vmatpush.bf16.msra.mxu2 %v6546_v19 }
 0x396   :  { %v7762_v15 = vpop.eup %7761  ;;  %v1820_v2 = vadd.f32 1.0, %v7760_v57  ;;  %7763 = vpow2.f32 %v6534_v38  ;;  %2126 = vmatpush.bf16.msra.mxu3 %v6550_v11  ;;  %v7439_v11 = vld [vmem:[#allocation4 + $0xe4] sm:$0xf] }
 0x397   :  { %v1839_v20 = vadd.f32 1.0, %v7762_v15 }
 0x398   :  { %7765 = vrcp.f32 %v1820_v2  ;;  %v1832_v0 = vand.u32 2147483648, %v1820_v2  ;;  %v1830_v48 = vand.u32 2147483647, %v1820_v2  ;;  %vm1826_vm4 = vweird.f32 %v1820_v2 }
 0x399   :  { %7767 = vrcp.f32 %v1839_v20  ;;  %v1798_v44 = vpop.f32.mrf.mxu2  ;;  %v1811_v29 = vpop.f32.mrf.mxu3  ;;  %v1851_v18 = vand.u32 2147483648, %v1839_v20  ;;  %v1849_v41 = vand.u32 2147483647, %v1839_v20  ;;  %vm1845_vm5 = vweird.f32 %v1839_v20 }
 0x39a   :  { %v1833_v12 = vor.u32 1.1754944e-38, %v1832_v0  ;;  %vm1831_vm8 = vcmp.eq.f32.partialorder %v1830_v48, 8.507059e+37  ;;  %v6780_v44 = vld [vmem:[#allocation4 + $0xe0] sm:$0xf]  ;;  %v7441_v29 = vld [vmem:[#allocation4 + $0xec] sm:$0xf0] }
 0x39b   :  { %v1852_v6 = vor.u32 1.1754944e-38, %v1851_v18  ;;  %vm1850_vm9 = vcmp.eq.f32.partialorder %v1849_v41, 8.507059e+37  ;;  %v6764_v0 = vld [vmem:[#allocation4 + $0xc0] sm:$0xf]  ;;  %v7437_v18 = vld [vmem:[#allocation4 + $0xcc] sm:$0xf0] }
 0x39c   :  { %v7764_v28 = vpop.eup %7763  ;;  %v6765_v48 = vor.u32 %v7437_v18, %v6764_v0  ;;  %v6772_v41 = vld [vmem:[#allocation4 + $0xc8] sm:$0xf]  ;;  %v6718_v18 = vld [vmem:[#allocation4 + $0x70] sm:$0xf0] }
 0x39d   :  { %v1859_v34 = vadd.f32 1.0, %v7764_v28  ;;  %v6781_v28 = vor.u32 %v7441_v29, %v6780_v44  ;;  %v6740_v44 = vld [vmem:[#allocation4 + $0x88] sm:$0xf]  ;;  %v7430_v29 = vld [vmem:[#allocation4 + $0x94] sm:$0xf0] }
 0x39e   :  { %v7766_v8 = vpop.eup %7765 }
 0x39f   :  { %v7768_v50 = vpop.eup %7767  ;;  %v1822_v31 = vmul.f32 %v7766_v8, %v1820_v2  ;;  %7769 = vrcp.f32 %v1859_v34  ;;  %vm1827_vm2 = vweird.f32 %v7766_v8  ;;  %v1871_v2 = vand.u32 2147483648, %v1859_v34  ;;  %2399 = vmatpush.bf16.msrb.mxu0 %v6781_v28 }
 0x3a0   :  { %v1841_v36 = vmul.f32 %v7768_v50, %v1839_v20  ;;  %7771 = vtanh.f32 %v1815_v10  ;;  %vm1846_vm3 = vweird.f32 %v7768_v50  ;;  %vm1828_vm6 = vmor %vm1826_vm4, %vm1827_vm2  ;;  %vm1865_vm11 = vweird.f32 %v1859_v34  ;;  %v7442_v10 = vld [vmem:[#allocation4 + $0xf4] sm:$0xf0] }
 0x3a1   :  { %v1823_v37 = vsub.f32 1.0, %v1822_v31  ;;  %vm1847_vm7 = vmor %vm1845_vm5, %vm1846_vm3  ;;  %v1869_v59 = vand.u32 2147483647, %v1859_v34  ;;  %v1872_v20 = vor.u32 1.1754944e-38, %v1871_v2  ;;  %v6758_v2 = vld [vmem:[#allocation4 + $0xb8] sm:$0xf0]  ;;  %v6741_v28 = vor.u32 %v7430_v29, %v6740_v44 }
 0x3a2   :  { %v1842_v49 = vsub.f32 1.0, %v1841_v36  ;;  %v7440_v36 = vld [vmem:[#allocation4 + $0xec] sm:$0xf] }
 0x3a3   :  { %v1824_v40 = vmul.f32 %v7766_v8, %v1823_v37  ;;  %vm1870_vm13 = vcmp.eq.f32.partialorder %v1869_v59, 8.507059e+37  ;;  %v6790_v37 = vld [vmem:[#allocation4 + $0xf8] sm:$0xf0]  ;;  %2400 = vmatpush.bf16.msrb.mxu0 %v6765_v48  ;;  %v7426_v48 = vld [vmem:[#allocation4 + $0x74] sm:$0xf0] }
 0x3a4   :  { %v1843_v56 = vmul.f32 %v7768_v50, %v1842_v49  ;;  %v6793_v49 = vor.u32 %v7440_v36, %v6790_v37  ;;  %v7423_v36 = vld [vmem:[#allocation4 + $0x64] sm:$0xf]  ;;  %v164_v37 = vadd.f32 %v8208_v14, %v8167_v53  ;;  %v6700_v14 = vld [vmem:[#allocation4 + $0x40] sm:$0xf] }
 0x3a5   :  { %v7770_v42 = vpop.eup %7769  ;;  %v1825_v35 = vadd.f32 %v7766_v8, %v1824_v40  ;;  %v7435_v40 = vld [vmem:[#allocation4 + $0xc4] sm:$0xf] }
 0x3a6   :  { %v1844_v39 = vadd.f32 %v7768_v50, %v1843_v56  ;;  %v1861_v3 = vmul.f32 %v7770_v42, %v1859_v34  ;;  %v7772_v63 = vpop.eup %7771  ;;  %vm1866_vm10 = vweird.f32 %v7770_v42  ;;  %v6782_v34 = vld [vmem:[#allocation4 + $0xf0] sm:$0xf0]  ;;  %2438 = vmatpush.bf16.msrb.mxu3 %v6793_v49  ;;  %v193_v49 = vadd.f32 %v8213_v16, %v8171_v55  ;;  %v7419_v16 = vld [vmem:[#allocation4 + $0x44] sm:$0xf] }
 0x3a7   :  { %v1829_v5 = vsel %vm1828_vm6, %v7766_v8, %v1825_v35  ;;  %vm1867_vm12 = vmor %vm1865_vm11, %vm1866_vm10  ;;  %v6788_v8 = vld [vmem:[#allocation4 + $0xe8] sm:$0xf]  ;;  %v6766_v56 = vld [vmem:[#allocation4 + $0xd0] sm:$0xf0] }
 0x3a8   :  { %v1834_v38 = vsel %vm1831_vm8, %v1833_v12, %v1829_v5  ;;  %v1848_v51 = vsel %vm1847_vm7, %v7768_v50, %v1844_v39  ;;  %v1862_v54 = vsub.f32 1.0, %v1861_v3  ;;  %v6785_v50 = vor.u32 %v7439_v11, %v6782_v34  ;;  %v7436_v39 = vld [vmem:[#allocation4 + $0xcc] sm:$0xf]  ;;  %v6774_v3 = vld [vmem:[#allocation4 + $0xd8] sm:$0xf0] }
 0x3a9   :  { %v1853_v57 = vsel %vm1850_vm9, %v1852_v6, %v1848_v51  ;;  %v1876_v43 = vmul.f32 %v7772_v63, %v1834_v38  ;;  %v6789_v31 = vor.u32 %v7442_v10, %v6788_v8  ;;  %v6769_v35 = vor.u32 %v7435_v40, %v6766_v56  ;;  %v6748_v5 = vld [vmem:[#allocation4 + $0xa0] sm:$0xf]  ;;  %v7433_v63 = vld [vmem:[#allocation4 + $0xac] sm:$0xf0]  ;;  %v7431_v38 = vld [vmem:[#allocation4 + $0xa4] sm:$0xf] }
 0x3aa   :  { %v1875_v58 = vmul.f32 %v1853_v57, %v8291_v1  ;;  %v1863_v60 = vmul.f32 %v7770_v42, %v1862_v54  ;;  %2412 = vmatpush.bf16.msrb.mxu1 %v6785_v50  ;;  %v6777_v6 = vor.u32 %v7436_v39, %v6774_v3  ;;  %v6749_v51 = vor.u32 %v7433_v63, %v6748_v5  ;;  %v6750_v54 = vld [vmem:[#allocation4 + $0xb0] sm:$0xf0]  ;;  %v6756_v57 = vld [vmem:[#allocation4 + $0xa8] sm:$0xf]  ;;  %v7428_v34 = vld [vmem:[#allocation4 + $0x8c] sm:$0xf] }
 0x3ab   :  { %2425 = vmatpush.bf16.msrb.mxu2 %v6789_v31  ;;  %v6742_v8 = vld [vmem:[#allocation4 + $0x98] sm:$0xf0]  ;;  %v6716_v50 = vld [vmem:[#allocation4 + $0x60] sm:$0xf]  ;;  %v7425_v31 = vld [vmem:[#allocation4 + $0x6c] sm:$0xf0] }
 0x3ac   :  { %v8303_v32 = vadd.f32 %v1876_v43, %v1875_v58  ;;  %v1864_v15 = vadd.f32 %v7770_v42, %v1863_v60  ;;  %2439 = vmatpush.bf16.msrb.mxu3 %v6777_v6  ;;  %v7434_v43 = vld [vmem:[#allocation4 + $0xb4] sm:$0xf0]  ;;  %v6753_v58 = vor.u32 %v7431_v38, %v6750_v54  ;;  %2401 = vmatpush.bf16.msrb.mxu0 %v6749_v51  ;;  %v6724_v40 = vld [vmem:[#allocation4 + $0x68] sm:$0xf]  ;;  %v6726_v39 = vld [vmem:[#allocation4 + $0x78] sm:$0xf0] }
 0x3ad   :  { %v6757_v60 = vor.u32 %v7434_v43, %v6756_v57  ;;  %v6745_v10 = vor.u32 %v7428_v34, %v6742_v8  ;;  %v6717_v0 = vor.u32 %v7425_v31, %v6716_v50  ;;  %v7421_v63 = vld [vmem:[#allocation4 + $0x4c] sm:$0xf0]  ;;  %v6702_v57 = vld [vmem:[#allocation4 + $0x50] sm:$0xf0]  ;;  %v6692_v34 = vld [vmem:[#allocation4 + $0x28] sm:$0xf] }
 0x3ae   :  { %7773 = vtanh.f32 %v8303_v32  ;;  %v1868_v4 = vsel %vm1867_vm12, %v7770_v42, %v1864_v15  ;;  %v7438_v42 = vld [vmem:[#allocation4 + $0xd4] sm:$0xf0]  ;;  %2413 = vmatpush.bf16.msrb.mxu1 %v6769_v35  ;;  %v7432_v15 = vld [vmem:[#allocation4 + $0xac] sm:$0xf]  ;;  %v6725_v35 = vor.u32 %v7426_v48, %v6724_v40  ;;  %v6701_v54 = vor.u32 %v7421_v63, %v6700_v14  ;;  %v6668_v40 = vld [vmem:[#allocation4] sm:$0xf] }
 0x3af   :  { %v1873_v46 = vsel %vm1870_vm13, %v1872_v20, %v1868_v4  ;;  %v6773_v12 = vor.u32 %v7438_v42, %v6772_v41  ;;  %v6761_v59 = vor.u32 %v7432_v15, %v6758_v2  ;;  %v6732_v4 = vld [vmem:[#allocation4 + $0x80] sm:$0xf]  ;;  %v7429_v20 = vld [vmem:[#allocation4 + $0x8c] sm:$0xf0]  ;;  %v6721_v42 = vor.u32 %v7423_v36, %v6718_v18  ;;  %v7420_v15 = vld [vmem:[#allocation4 + $0x4c] sm:$0xf] }
 0x3b0   :  { %v6705_v43 = vor.u32 %v7419_v16, %v6702_v57  ;;  %v7418_v8 = vld [vmem:[#allocation4 + $0x34] sm:$0xf0]  ;;  %v7413_v48 = vld [vmem:[#allocation4 + $0xc] sm:$0xf0]  ;;  %v7412_v16 = vld [vmem:[#allocation4 + $0xc] sm:$0xf] }
 0x3b1   :  { %2426 = vmatpush.bf16.msrb.mxu2 %v6773_v12  ;;  %2440 = vmatpush.bf16.msrb.mxu3 %v6761_v59  ;;  %v7424_v12 = vld [vmem:[#allocation4 + $0x6c] sm:$0xf]  ;;  %v6710_v59 = vld [vmem:[#allocation4 + $0x58] sm:$0xf0] }
 0x3b2   :  { %2414 = vmatpush.bf16.msrb.mxu1 %v6753_v58  ;;  %v6729_v5 = vor.u32 %v7424_v12, %v6726_v39  ;;  %v6708_v58 = vld [vmem:[#allocation4 + $0x48] sm:$0xf] }
 0x3b3   :  { %v6676_v12 = vld [vmem:[#allocation4 + $0x8] sm:$0xf] }
 0x3b4   :  { %v7774_v19 = vpop.eup %7773 }
 0x3b5   :  { %v8306_v26 = vmul.f32 %v7774_v19, %v1873_v46  ;;  %2427 = vmatpush.bf16.msrb.mxu2 %v6757_v60  ;;  %v7427_v19 = vld [vmem:[#allocation4 + $0x84] sm:$0xf]  ;;  %v6733_v46 = vor.u32 %v7429_v20, %v6732_v4  ;;  %2441 = vmatpush.bf16.msrb.mxu3 %v6745_v10  ;;  %v7422_v60 = vld [vmem:[#allocation4 + $0x54] sm:$0xf0]  ;;  %v251_v4 = vadd.f32 %v8217_v21, %v8183_v62  ;;  %v7416_v21 = vld [vmem:[#allocation4 + $0x2c] sm:$0xf] }
 0x3b6   :  { %v6709_v2 = vor.u32 %v7422_v60, %v6708_v58  ;;  %v6713_v20 = vor.u32 %v7420_v15, %v6710_v59  ;;  %v222_v58 = vadd.f32 %v8215_v17, %v8181_v61 }
 0x3b7   :  { %9811 = vst [vmem:[#allocation18_spill] sm:$0xff] %v8306_v26  ;;  %v1887_v1 = vpack.c.bf16 %v8306_v26, %v8306_v26  ;;  %2402 = vmatpush.bf16.msrb.mxu0 %v6733_v46  ;;  %v7417_v46 = vld [vmem:[#allocation4 + $0x2c] sm:$0xf0] }
 0x3b9   :  { %2088 = vmatmul.bf16.vlgmr.msra.gmra.mxu0 %v1887_v1  ;;  %2101 = vmatmul.bf16.vlgmr.msra.gmra.mxu1 %v1887_v1 }
 0x3ba   :  { %2114 = vmatmul.bf16.vlgmr.msra.gmra.mxu2 %v1887_v1  ;;  %2127 = vmatmul.bf16.vlgmr.msra.gmra.mxu3 %v1887_v1  ;;  %v6734_v1 = vld [vmem:[#allocation4 + $0x90] sm:$0xf0] }
 0x3bb   :  { %v6737_v11 = vor.u32 %v7427_v19, %v6734_v1  ;;  %2428 = vmatpush.bf16.msrb.mxu2 %v6741_v28  ;;  %2403 = vmatpush.bf16.msrb.mxu0 %v6717_v0  ;;  %v6684_v19 = vld [vmem:[#allocation4 + $0x20] sm:$0xf]  ;;  %v7415_v1 = vld [vmem:[#allocation4 + $0x24] sm:$0xf]  ;;  %v6686_v28 = vld [vmem:[#allocation4 + $0x30] sm:$0xf0] }
 0x3bc   :  { %2442 = vmatpush.bf16.msrb.mxu3 %v6729_v5  ;;  %v6689_v36 = vor.u32 %v7415_v1, %v6686_v28  ;;  %v7414_v5 = vld [vmem:[#allocation4 + $0x14] sm:$0xf0] }
 0x3bd   :  { %2415 = vmatpush.bf16.msrb.mxu1 %v6737_v11  ;;  %v6685_v11 = vor.u32 %v7417_v46, %v6684_v19  ;;  %v6677_v63 = vor.u32 %v7414_v5, %v6676_v12 }
 0x3bf   :  { %2429 = vmatpush.bf16.msrb.mxu2 %v6725_v35  ;;  %2404 = vmatpush.bf16.msrb.mxu0 %v6701_v54  ;;  %v6670_v35 = vld [vmem:[#allocation4 + $0x10] sm:$0xf0] }
 0x3c0   :  { %2443 = vmatpush.bf16.msrb.mxu3 %v6713_v20 }
 0x3c1   :  { %2416 = vmatpush.bf16.msrb.mxu1 %v6721_v42  ;;  %v7411_v42 = vld [vmem:[#allocation4 + $0x4] sm:$0xf] }
 0x3c3   :  { %2430 = vmatpush.bf16.msrb.mxu2 %v6709_v2  ;;  %2405 = vmatpush.bf16.msrb.mxu0 %v6685_v11 }
 0x3c5   :  { %2417 = vmatpush.bf16.msrb.mxu1 %v6705_v43 }
 0x3c9   :  { %2418 = vmatpush.bf16.msrb.mxu1 %v6689_v36 }
 0x436   :  { %v2089_v56 = vpop.f32.mrf.mxu0  ;;  %v2102_v41 = vpop.f32.mrf.mxu1 }
 0x437   :  { %v2132_v3 = vadd.f32 %v2089_v56, %v164_v37  ;;  %v2133_v6 = vadd.f32 %v2102_v41, %v193_v49  ;;  %v6693_v37 = vor.u32 %v7418_v8, %v6692_v34  ;;  %v6694_v49 = vld [vmem:[#allocation4 + $0x38] sm:$0xf0]  ;;  %v6669_v41 = vor.u32 %v7413_v48, %v6668_v40 }
 0x438   :  { %v6697_v0 = vor.u32 %v7416_v21, %v6694_v49 }
 0x439   :  { %v6663_v38 = vmul.f32 -1.442695, %v2132_v3  ;;  %v6664_v51 = vmul.f32 -1.442695, %v2133_v6  ;;  %2431 = vmatpush.bf16.msrb.mxu2 %v6693_v37  ;;  %v6673_v6 = vor.u32 %v7411_v42, %v6670_v35  ;;  %2406 = vmatpush.bf16.msrb.mxu0 %v6669_v41 }
 0x43a   :  { %2444 = vmatpush.bf16.msrb.mxu3 %v6697_v0 }
 0x43b   :  { %7775 = vpow2.f32 %v6663_v38  ;;  %v6678_v38 = vld [vmem:[#allocation4 + $0x18] sm:$0xf0]  ;;  %2419 = vmatpush.bf16.msrb.mxu1 %v6673_v6 }
 0x43c   :  { %7777 = vpow2.f32 %v6664_v51  ;;  %v6681_v57 = vor.u32 %v7412_v16, %v6678_v38  ;;  %v6911_v16 = vld [vmem:[#allocation4 + $0xe0] sm:$0xf]  ;;  %v7473_v38 = vld [vmem:[#allocation4 + $0xec] sm:$0xf0] }
 0x43d   :  { %v2115_v44 = vpop.f32.mrf.mxu2  ;;  %v2128_v29 = vpop.f32.mrf.mxu3  ;;  %2432 = vmatpush.bf16.msrb.mxu2 %v6677_v63 }
 0x43e   :  { %v2135_v10 = vadd.f32 %v2128_v29, %v251_v4  ;;  %v2091_v50 = vpop.f32.mrf.mxu0  ;;  %v2104_v31 = vpop.f32.mrf.mxu1  ;;  %2445 = vmatpush.bf16.msrb.mxu3 %v6681_v57  ;;  %v2134_v2 = vadd.f32 %v2115_v44, %v222_v58  ;;  %v6913_v57 = vld [vmem:[#allocation4 + $0xf0] sm:$0xf0]  ;;  %v7474_v58 = vld [vmem:[#allocation4 + $0xf4] sm:$0xf0] }
 0x440   :  { %v6665_v18 = vmul.f32 -1.442695, %v2135_v10 }
 0x441   :  { %v7776_v56 = vpop.eup %7775 }
 0x442   :  { %v7778_v39 = vpop.eup %7777  ;;  %v2139_v3 = vadd.f32 1.0, %v7776_v56  ;;  %7779 = vpow2.f32 %v6665_v18 }
 0x443   :  { %v2158_v14 = vadd.f32 1.0, %v7778_v39 }
 0x444   :  { %7781 = vrcp.f32 %v2139_v3  ;;  %v2151_v1 = vand.u32 2147483648, %v2139_v3  ;;  %v2149_v28 = vand.u32 2147483647, %v2139_v3  ;;  %vm2145_vm0 = vweird.f32 %v2139_v3 }
 0x445   :  { %7783 = vrcp.f32 %v2158_v14  ;;  %v2117_v51 = vpop.f32.mrf.mxu2  ;;  %v2130_v54 = vpop.f32.mrf.mxu3  ;;  %v2170_v29 = vand.u32 2147483648, %v2158_v14  ;;  %v2168_v8 = vand.u32 2147483647, %v2158_v14  ;;  %vm2164_vm1 = vweird.f32 %v2158_v14 }
 0x446   :  { %v2152_v44 = vor.u32 1.1754944e-38, %v2151_v1  ;;  %vm2150_vm4 = vcmp.eq.f32.partialorder %v2149_v28, 8.507059e+37  ;;  %v7471_v51 = vld [vmem:[#allocation4 + $0xe4] sm:$0xf]  ;;  %v6912_v54 = vor.u32 %v7473_v38, %v6911_v16  ;;  %v7470_v28 = vld [vmem:[#allocation4 + $0xd4] sm:$0xf0] }
 0x447   :  { %v2171_v36 = vor.u32 1.1754944e-38, %v2170_v29  ;;  %vm2169_vm5 = vcmp.eq.f32.partialorder %v2168_v8, 8.507059e+37  ;;  %v6897_v29 = vld [vmem:[#allocation4 + $0xd0] sm:$0xf0]  ;;  %v7460_v38 = vld [vmem:[#allocation4 + $0x8c] sm:$0xf] }
 0x448   :  { %v7780_v43 = vpop.eup %7779  ;;  %2718 = vmatpush.bf16.msra.mxu0 %v6912_v54 }
 0x449   :  { %v2178_v60 = vadd.f32 1.0, %v7780_v43  ;;  %v6919_v43 = vld [vmem:[#allocation4 + $0xe8] sm:$0xf] }
 0x44a   :  { %v7782_v15 = vpop.eup %7781 }
 0x44b   :  { %v7784_v59 = vpop.eup %7783  ;;  %v2141_v4 = vmul.f32 %v7782_v15, %v2139_v3  ;;  %7785 = vrcp.f32 %v2178_v60  ;;  %vm2146_vm14 = vweird.f32 %v7782_v15  ;;  %v2190_v12 = vand.u32 2147483648, %v2178_v60 }
 0x44c   :  { %v2160_v20 = vmul.f32 %v7784_v59, %v2158_v14  ;;  %7787 = vtanh.f32 %v2134_v2  ;;  %vm2165_vm15 = vweird.f32 %v7784_v59  ;;  %vm2147_vm2 = vmor %vm2145_vm0, %vm2146_vm14  ;;  %vm2184_vm7 = vweird.f32 %v2178_v60  ;;  %v7472_v2 = vld [vmem:[#allocation4 + $0xec] sm:$0xf] }
 0x44d   :  { %v2142_v19 = vsub.f32 1.0, %v2141_v4  ;;  %vm2166_vm3 = vmor %vm2164_vm1, %vm2165_vm15  ;;  %v2188_v39 = vand.u32 2147483647, %v2178_v60  ;;  %v2191_v6 = vor.u32 1.1754944e-38, %v2190_v12  ;;  %v7461_v12 = vld [vmem:[#allocation4 + $0x8c] sm:$0xf0] }
 0x44e   :  { %v2161_v46 = vsub.f32 1.0, %v2160_v20  ;;  %v6895_v20 = vld [vmem:[#allocation4 + $0xc0] sm:$0xf] }
 0x44f   :  { %v2143_v11 = vmul.f32 %v7782_v15, %v2142_v19  ;;  %vm2189_vm9 = vcmp.eq.f32.partialorder %v2188_v39, 8.507059e+37  ;;  %v7469_v19 = vld [vmem:[#allocation4 + $0xcc] sm:$0xf0]  ;;  %v7459_v39 = vld [vmem:[#allocation4 + $0x84] sm:$0xf] }
 0x450   :  { %v2162_v34 = vmul.f32 %v7784_v59, %v2161_v46  ;;  %v7467_v46 = vld [vmem:[#allocation4 + $0xc4] sm:$0xf]  ;;  %v6896_v1 = vor.u32 %v7469_v19, %v6895_v20 }
 0x451   :  { %v7786_v17 = vpop.eup %7785  ;;  %v2144_v10 = vadd.f32 %v7782_v15, %v2143_v11  ;;  %v6903_v11 = vld [vmem:[#allocation4 + $0xc8] sm:$0xf] }
 0x452   :  { %v2163_v50 = vadd.f32 %v7784_v59, %v2162_v34  ;;  %v2180_v31 = vmul.f32 %v7786_v17, %v2178_v60  ;;  %v7788_v21 = vpop.eup %7787  ;;  %vm2185_vm6 = vweird.f32 %v7786_v17  ;;  %v6916_v60 = vor.u32 %v7471_v51, %v6913_v57  ;;  %2719 = vmatpush.bf16.msra.mxu0 %v6896_v1  ;;  %v6873_v51 = vld [vmem:[#allocation4 + $0x98] sm:$0xf0]  ;;  %v6847_v57 = vld [vmem:[#allocation4 + $0x60] sm:$0xf]  ;;  %v7456_v1 = vld [vmem:[#allocation4 + $0x6c] sm:$0xf] }
 0x453   :  { %v2148_v37 = vsel %vm2147_vm2, %v7782_v15, %v2144_v10  ;;  %vm2186_vm8 = vmor %vm2184_vm7, %vm2185_vm6  ;;  %v6920_v15 = vor.u32 %v7474_v58, %v6919_v43  ;;  %v6900_v34 = vor.u32 %v7467_v46, %v6897_v29  ;;  %v6904_v8 = vor.u32 %v7470_v28, %v6903_v11  ;;  %v6905_v10 = vld [vmem:[#allocation4 + $0xd8] sm:$0xf0]  ;;  %v7457_v43 = vld [vmem:[#allocation4 + $0x6c] sm:$0xf0] }
 0x454   :  { %v2153_v49 = vsel %vm2150_vm4, %v2152_v44, %v2148_v37  ;;  %v2167_v0 = vsel %vm2166_vm3, %v7784_v59, %v2163_v50  ;;  %v2181_v18 = vsub.f32 1.0, %v2180_v31  ;;  %v6921_v59 = vld [vmem:[#allocation4 + $0xf8] sm:$0xf0]  ;;  %2731 = vmatpush.bf16.msra.mxu1 %v6916_v60  ;;  %v6879_v50 = vld [vmem:[#allocation4 + $0xa0] sm:$0xf]  ;;  %v6876_v54 = vor.u32 %v7460_v38, %v6873_v51 }
 0x455   :  { %v2172_v40 = vsel %vm2169_vm5, %v2171_v36, %v2167_v0  ;;  %v2195_v48 = vmul.f32 %v7788_v21, %v2153_v49  ;;  %v6924_v4 = vor.u32 %v7472_v2, %v6921_v59  ;;  %2744 = vmatpush.bf16.msra.mxu2 %v6920_v15  ;;  %v7465_v31 = vld [vmem:[#allocation4 + $0xac] sm:$0xf0]  ;;  %v7463_v36 = vld [vmem:[#allocation4 + $0xa4] sm:$0xf]  ;;  %v6881_v21 = vld [vmem:[#allocation4 + $0xb0] sm:$0xf0]  ;;  %v6848_v60 = vor.u32 %v7457_v43, %v6847_v57 }
 0x456   :  { %v2194_v56 = vmul.f32 %v2172_v40, %v8303_v32  ;;  %v2182_v41 = vmul.f32 %v7786_v17, %v2181_v18  ;;  %v6880_v37 = vor.u32 %v7465_v31, %v6879_v50  ;;  %v6887_v49 = vld [vmem:[#allocation4 + $0xa8] sm:$0xf]  ;;  %v7466_v0 = vld [vmem:[#allocation4 + $0xb4] sm:$0xf0]  ;;  %v6884_v18 = vor.u32 %v7463_v36, %v6881_v21  ;;  %v7455_v58 = vld [vmem:[#allocation4 + $0x64] sm:$0xf] }
 0x457   :  { %2757 = vmatpush.bf16.msra.mxu3 %v6924_v4  ;;  %v6888_v40 = vor.u32 %v7466_v0, %v6887_v49  ;;  %v6849_v15 = vld [vmem:[#allocation4 + $0x70] sm:$0xf0]  ;;  %v6855_v2 = vld [vmem:[#allocation4 + $0x68] sm:$0xf]  ;;  %v7458_v59 = vld [vmem:[#allocation4 + $0x74] sm:$0xf0] }
 0x458   :  { %v8319_v42 = vadd.f32 %v2195_v48, %v2194_v56  ;;  %v2183_v35 = vadd.f32 %v7786_v17, %v2182_v41  ;;  %2732 = vmatpush.bf16.msra.mxu1 %v6900_v34  ;;  %v7464_v48 = vld [vmem:[#allocation4 + $0xac] sm:$0xf]  ;;  %v6889_v56 = vld [vmem:[#allocation4 + $0xb8] sm:$0xf0]  ;;  %2720 = vmatpush.bf16.msra.mxu0 %v6880_v37  ;;  %v6852_v19 = vor.u32 %v7455_v58, %v6849_v15  ;;  %v6833_v36 = vld [vmem:[#allocation4 + $0x50] sm:$0xf0] }
 0x459   :  { %2745 = vmatpush.bf16.msra.mxu2 %v6904_v8  ;;  %v6892_v41 = vor.u32 %v7464_v48, %v6889_v56  ;;  %v6856_v46 = vor.u32 %v7458_v59, %v6855_v2  ;;  %v6857_v29 = vld [vmem:[#allocation4 + $0x78] sm:$0xf0]  ;;  %v6831_v8 = vld [vmem:[#allocation4 + $0x40] sm:$0xf]  ;;  %v6839_v21 = vld [vmem:[#allocation4 + $0x48] sm:$0xf] }
 0x45a   :  { %7789 = vtanh.f32 %v8319_v42  ;;  %v2187_v3 = vsel %vm2186_vm8, %v7786_v17, %v2183_v35  ;;  %v7468_v17 = vld [vmem:[#allocation4 + $0xcc] sm:$0xf]  ;;  %v6863_v35 = vld [vmem:[#allocation4 + $0x80] sm:$0xf]  ;;  %v6860_v34 = vor.u32 %v7456_v1, %v6857_v29  ;;  %v7454_v49 = vld [vmem:[#allocation4 + $0x54] sm:$0xf0] }
 0x45b   :  { %v2192_v14 = vsel %vm2189_vm9, %v2191_v6, %v2187_v3  ;;  %v6908_v44 = vor.u32 %v7468_v17, %v6905_v10  ;;  %v6864_v3 = vor.u32 %v7461_v12, %v6863_v35  ;;  %v6865_v6 = vld [vmem:[#allocation4 + $0x90] sm:$0xf0]  ;;  %v7453_v17 = vld [vmem:[#allocation4 + $0x4c] sm:$0xf0]  ;;  %v7451_v10 = vld [vmem:[#allocation4 + $0x44] sm:$0xf] }
 0x45c   :  { %2733 = vmatpush.bf16.msra.mxu1 %v6884_v18  ;;  %v6832_v31 = vor.u32 %v7453_v17, %v6831_v8  ;;  %v6836_v37 = vor.u32 %v7451_v10, %v6833_v36  ;;  %v7452_v0 = vld [vmem:[#allocation4 + $0x4c] sm:$0xf]  ;;  %v7449_v48 = vld [vmem:[#allocation4 + $0x2c] sm:$0xf0]  ;;  %v7447_v56 = vld [vmem:[#allocation4 + $0x24] sm:$0xf] }
 0x45d   :  { %2758 = vmatpush.bf16.msra.mxu3 %v6908_v44  ;;  %2746 = vmatpush.bf16.msra.mxu2 %v6888_v40  ;;  %v6815_v40 = vld [vmem:[#allocation4 + $0x20] sm:$0xf]  ;;  %v7448_v51 = vld [vmem:[#allocation4 + $0x2c] sm:$0xf]  ;;  %v7443_v59 = vld [vmem:[#allocation4 + $0x4] sm:$0xf] }
 0x45e   :  { %2721 = vmatpush.bf16.msra.mxu0 %v6864_v3  ;;  %v6816_v12 = vor.u32 %v7449_v48, %v6815_v40  ;;  %v6823_v3 = vld [vmem:[#allocation4 + $0x28] sm:$0xf]  ;;  %v6799_v58 = vld [vmem:[#allocation4] sm:$0xf]  ;;  %v7446_v1 = vld [vmem:[#allocation4 + $0x14] sm:$0xf0] }
 0x45f   :  { %v7499_v36 = vld [vmem:[#allocation7 + $0xc4] sm:$0xf] }
 0x460   :  { %v7790_v5 = vpop.eup %7789 }
 0x461   :  { %v8322_v63 = vmul.f32 %v7790_v5, %v2192_v14  ;;  %2759 = vmatpush.bf16.msra.mxu3 %v6892_v41  ;;  %v6871_v5 = vld [vmem:[#allocation4 + $0x88] sm:$0xf]  ;;  %v7462_v14 = vld [vmem:[#allocation4 + $0x94] sm:$0xf0] }
 0x462   :  { %v6872_v16 = vor.u32 %v7462_v14, %v6871_v5  ;;  %2722 = vmatpush.bf16.msra.mxu0 %v6848_v60  ;;  %v7445_v60 = vld [vmem:[#allocation4 + $0xc] sm:$0xf0] }
 0x463   :  { %9812 = vst [vmem:[#allocation19_spill] sm:$0xff] %v8322_v63  ;;  %v2206_v32 = vpack.c.bf16 %v8322_v63, %v8322_v63  ;;  %v6800_v2 = vor.u32 %v7445_v60, %v6799_v58 }
 0x464   :  { %2747 = vmatpush.bf16.msra.mxu2 %v6872_v16 }
 0x465   :  { %2407 = vmatmul.bf16.vlgmr.msrb.gmra.mxu0 %v2206_v32  ;;  %2420 = vmatmul.bf16.vlgmr.msrb.gmra.mxu1 %v2206_v32 }
 0x466   :  { %2433 = vmatmul.bf16.vlgmr.msrb.gmra.mxu2 %v2206_v32  ;;  %2446 = vmatmul.bf16.vlgmr.msrb.gmra.mxu3 %v2206_v32  ;;  %v6868_v32 = vor.u32 %v7459_v39, %v6865_v6  ;;  %v6817_v39 = vld [vmem:[#allocation4 + $0x30] sm:$0xf0]  ;;  %v7450_v6 = vld [vmem:[#allocation4 + $0x34] sm:$0xf0] }
 0x467   :  { %2760 = vmatpush.bf16.msra.mxu3 %v6876_v54  ;;  %2723 = vmatpush.bf16.msra.mxu0 %v6832_v31  ;;  %v6820_v16 = vor.u32 %v7447_v56, %v6817_v39  ;;  %v6824_v38 = vor.u32 %v7450_v6, %v6823_v3  ;;  %v6825_v54 = vld [vmem:[#allocation4 + $0x38] sm:$0xf0] }
 0x468   :  { %2734 = vmatpush.bf16.msra.mxu1 %v6868_v32  ;;  %2748 = vmatpush.bf16.msra.mxu2 %v6856_v46  ;;  %v6828_v57 = vor.u32 %v7448_v51, %v6825_v54 }
 0x46b   :  { %2761 = vmatpush.bf16.msra.mxu3 %v6860_v34  ;;  %2724 = vmatpush.bf16.msra.mxu0 %v6816_v12  ;;  %v6809_v34 = vld [vmem:[#allocation4 + $0x18] sm:$0xf0] }
 0x46c   :  { %2735 = vmatpush.bf16.msra.mxu1 %v6852_v19 }
 0x46f   :  { %2725 = vmatpush.bf16.msra.mxu0 %v6800_v2 }
 0x470   :  { %2736 = vmatpush.bf16.msra.mxu1 %v6836_v37  ;;  %v7028_v37 = vld [vmem:[#allocation7 + $0xd0] sm:$0xf0] }
 0x474   :  { %2737 = vmatpush.bf16.msra.mxu1 %v6820_v16 }
 0x4e2   :  { %v2408_v4 = vpop.f32.mrf.mxu0  ;;  %v2421_v20 = vpop.f32.mrf.mxu1 }
 0x4e3   :  { %v2451_v11 = vadd.f32 %v2408_v4, %v8220_v27  ;;  %v2452_v28 = vadd.f32 %v2421_v20, %v8223_v33  ;;  %v6840_v27 = vor.u32 %v7454_v49, %v6839_v21  ;;  %v6841_v33 = vld [vmem:[#allocation4 + $0x58] sm:$0xf0]  ;;  %v6801_v4 = vld [vmem:[#allocation4 + $0x10] sm:$0xf0]  ;;  %v6807_v20 = vld [vmem:[#allocation4 + $0x8] sm:$0xf] }
 0x4e4   :  { %v6844_v18 = vor.u32 %v7452_v0, %v6841_v33  ;;  %v6804_v46 = vor.u32 %v7443_v59, %v6801_v4  ;;  %v8332_v0 = vor.u32 %v7499_v36, %v7028_v37  ;;  %v7170_v37 = vld [vmem:[#allocation7 + $0x1e0] sm:$0xf] }
 0x4e5   :  { %v6794_v44 = vmul.f32 -1.442695, %v2451_v11  ;;  %v6795_v50 = vmul.f32 -1.442695, %v2452_v28  ;;  %2749 = vmatpush.bf16.msra.mxu2 %v6840_v27  ;;  %v6808_v11 = vor.u32 %v7446_v1, %v6807_v20  ;;  %v7444_v28 = vld [vmem:[#allocation4 + $0xc] sm:$0xf] }
 0x4e6   :  { %2762 = vmatpush.bf16.msra.mxu3 %v6844_v18  ;;  %2738 = vmatpush.bf16.msra.mxu1 %v6804_v46  ;;  %v6812_v10 = vor.u32 %v7444_v28, %v6809_v34 }
 0x4e7   :  { %7791 = vpow2.f32 %v6794_v44  ;;  %v7503_v44 = vld [vmem:[#allocation7 + $0xe4] sm:$0xf] }
 0x4e8   :  { %7793 = vpow2.f32 %v6795_v50  ;;  %v7044_v50 = vld [vmem:[#allocation7 + $0xf0] sm:$0xf0] }
 0x4e9   :  { %v2434_v41 = vpop.f32.mrf.mxu2  ;;  %v2447_v35 = vpop.f32.mrf.mxu3  ;;  %2750 = vmatpush.bf16.msra.mxu2 %v6824_v38  ;;  %v8329_v31 = vor.u32 %v7503_v44, %v7044_v50  ;;  %v7012_v50 = vld [vmem:[#allocation7 + $0xb0] sm:$0xf0] }
 0x4ea   :  { %v2454_v5 = vadd.f32 %v2447_v35, %v8231_v23  ;;  %v2410_v14 = vpop.f32.mrf.mxu0  ;;  %v2423_v32 = vpop.f32.mrf.mxu1  ;;  %2763 = vmatpush.bf16.msra.mxu3 %v6828_v57  ;;  %v2453_v33 = vadd.f32 %v2434_v41, %v8226_v9 }
 0x4eb   :  { %9813 = vst [vmem:[#allocation20_spill] sm:$0xff] %v8329_v31 }
 0x4ec   :  { %v6796_v43 = vmul.f32 -1.442695, %v2454_v5 }
 0x4ed   :  { %v7792_v15 = vpop.eup %7791  ;;  %2751 = vmatpush.bf16.msra.mxu2 %v6808_v11 }
 0x4ee   :  { %v7794_v23 = vpop.eup %7793  ;;  %v2458_v19 = vadd.f32 1.0, %v7792_v15  ;;  %7795 = vpow2.f32 %v6796_v43  ;;  %2764 = vmatpush.bf16.msra.mxu3 %v6812_v10  ;;  %v7495_v10 = vld [vmem:[#allocation7 + $0xa4] sm:$0xf] }
 0x4ef   :  { %v2477_v29 = vadd.f32 1.0, %v7794_v23  ;;  %v8346_v36 = vor.u32 %v7495_v10, %v7012_v50  ;;  %v6978_v50 = vld [vmem:[#allocation7 + $0x60] sm:$0xf] }
 0x4f0   :  { %7797 = vrcp.f32 %v2458_v19  ;;  %v2470_v12 = vand.u32 2147483648, %v2458_v19  ;;  %v2468_v6 = vand.u32 2147483647, %v2458_v19  ;;  %vm2464_vm12 = vweird.f32 %v2458_v19 }
 0x4f1   :  { %7799 = vrcp.f32 %v2477_v29  ;;  %v2436_v8 = vpop.f32.mrf.mxu2  ;;  %v2449_v17 = vpop.f32.mrf.mxu3  ;;  %3263 = vmatpush.bf16.msrb.mxu2 %v8329_v31  ;;  %v2489_v39 = vand.u32 2147483648, %v2477_v29  ;;  %v2487_v14 = vand.u32 2147483647, %v2477_v29  ;;  %vm2483_vm13 = vweird.f32 %v2477_v29  ;;  %9815 = vst [vmem:[#allocation22_spill] sm:$0xff] %v8346_v36 }
 0x4f2   :  { %v2471_v9 = vor.u32 1.1754944e-38, %v2470_v12  ;;  %vm2469_vm0 = vcmp.eq.f32.partialorder %v2468_v6, 8.507059e+37  ;;  %v7042_v8 = vld [vmem:[#allocation7 + $0xe0] sm:$0xf]  ;;  %v7505_v17 = vld [vmem:[#allocation7 + $0xec] sm:$0xf0] }
 0x4f3   :  { %v2490_v51 = vor.u32 1.1754944e-38, %v2489_v39  ;;  %vm2488_vm1 = vcmp.eq.f32.partialorder %v2487_v14, 8.507059e+37  ;;  %v8344_v44 = vor.u32 %v7505_v17, %v7042_v8  ;;  %v6996_v12 = vld [vmem:[#allocation7 + $0x90] sm:$0xf0]  ;;  %v7533_v6 = vld [vmem:[#allocation7 + $0x1cc] sm:$0xf0] }
 0x4f4   :  { %v7796_v21 = vpop.eup %7795  ;;  %v7124_v17 = vld [vmem:[#allocation7 + $0x190] sm:$0xf0] }
 0x4f5   :  { %v2497_v49 = vadd.f32 1.0, %v7796_v21  ;;  %3264 = vmatpush.bf16.msrb.mxu2 %v8332_v0  ;;  %v7537_v21 = vld [vmem:[#allocation7 + $0x1ec] sm:$0xf0]  ;;  %3237 = vmatpush.bf16.msrb.mxu0 %v8344_v44 }
 0x4f6   :  { %v7798_v27 = vpop.eup %7797 }
 0x4f7   :  { %v7800_v18 = vpop.eup %7799  ;;  %v2460_v40 = vmul.f32 %v7798_v27, %v2458_v19  ;;  %7801 = vrcp.f32 %v2497_v49  ;;  %vm2465_vm10 = vweird.f32 %v7798_v27  ;;  %v2509_v19 = vand.u32 2147483648, %v2497_v49 }
 0x4f8   :  { %v2479_v48 = vmul.f32 %v7800_v18, %v2477_v29  ;;  %7803 = vtanh.f32 %v2453_v33  ;;  %vm2484_vm11 = vweird.f32 %v7800_v18  ;;  %vm2466_vm14 = vmor %vm2464_vm12, %vm2465_vm10  ;;  %vm2503_vm3 = vweird.f32 %v2497_v49  ;;  %v7172_v33 = vld [vmem:[#allocation7 + $0x1f0] sm:$0xf0] }
 0x4f9   :  { %v2461_v56 = vsub.f32 1.0, %v2460_v40  ;;  %vm2485_vm15 = vmor %vm2483_vm13, %vm2484_vm11  ;;  %v2507_v46 = vand.u32 2147483647, %v2497_v49  ;;  %v2510_v29 = vor.u32 1.1754944e-38, %v2509_v19  ;;  %3265 = vmatpush.bf16.msrb.mxu2 %v8346_v36  ;;  %v7026_v40 = vld [vmem:[#allocation7 + $0xc0] sm:$0xf] }
 0x4fa   :  { %v2480_v35 = vsub.f32 1.0, %v2479_v48  ;;  %v7501_v48 = vld [vmem:[#allocation7 + $0xcc] sm:$0xf0]  ;;  %v7483_v19 = vld [vmem:[#allocation7 + $0x44] sm:$0xf] }
 0x4fb   :  { %v2462_v3 = vmul.f32 %v7798_v27, %v2461_v56  ;;  %vm2508_vm5 = vcmp.eq.f32.partialorder %v2507_v46, 8.507059e+37  ;;  %v7491_v56 = vld [vmem:[#allocation7 + $0x84] sm:$0xf] }
 0x4fc   :  { %v2481_v5 = vmul.f32 %v7800_v18, %v2480_v35  ;;  %v8355_v35 = vor.u32 %v7501_v48, %v7026_v40  ;;  %v8358_v39 = vor.u32 %v7491_v56, %v6996_v12  ;;  %v7106_v48 = vld [vmem:[#allocation7 + $0x160] sm:$0xf]  ;;  %v7521_v56 = vld [vmem:[#allocation7 + $0x16c] sm:$0xf0]  ;;  %v7519_v12 = vld [vmem:[#allocation7 + $0x164] sm:$0xf] }
 0x4fd   :  { %v7802_v32 = vpop.eup %7801  ;;  %v2463_v16 = vadd.f32 %v7798_v27, %v2462_v3  ;;  %v7154_v3 = vld [vmem:[#allocation7 + $0x1c0] sm:$0xf] }
 0x4fe   :  { %v2482_v41 = vadd.f32 %v7800_v18, %v2481_v5  ;;  %v2499_v38 = vmul.f32 %v7802_v32, %v2497_v49  ;;  %v7804_v57 = vpop.eup %7803  ;;  %vm2504_vm2 = vweird.f32 %v7802_v32  ;;  %v7535_v49 = vld [vmem:[#allocation7 + $0x1e4] sm:$0xf]  ;;  %9816 = vst [vmem:[#allocation23_spill] sm:$0xff] %v8358_v39  ;;  %3238 = vmatpush.bf16.msrb.mxu0 %v8355_v35  ;;  %3266 = vmatpush.bf16.msrb.mxu2 %v8358_v39 }
 0x4ff   :  { %v2467_v54 = vsel %vm2466_vm14, %v7798_v27, %v2463_v16  ;;  %vm2505_vm4 = vmor %vm2503_vm3, %vm2504_vm2  ;;  %v8349_v27 = vor.u32 %v7537_v21, %v7170_v37  ;;  %v7531_v5 = vld [vmem:[#allocation7 + $0x1c4] sm:$0xf]  ;;  %v8362_v14 = vor.u32 %v7533_v6, %v7154_v3  ;;  %v7489_v37 = vld [vmem:[#allocation7 + $0x6c] sm:$0xf0]  ;;  %v8397_v3 = vor.u32 %v7521_v56, %v7106_v48 }
 0x500   :  { %v2472_v43 = vsel %vm2469_vm0, %v2471_v9, %v2467_v54  ;;  %v2486_v58 = vsel %vm2485_vm15, %v7800_v18, %v2482_v41  ;;  %v2500_v60 = vsub.f32 1.0, %v2499_v38  ;;  %v8352_v18 = vor.u32 %v7535_v49, %v7172_v33  ;;  %v7010_v9 = vld [vmem:[#allocation7 + $0xa0] sm:$0xf]  ;;  %v7497_v41 = vld [vmem:[#allocation7 + $0xac] sm:$0xf0] }
 0x501   :  { %v2491_v15 = vsel %vm2488_vm1, %v2490_v51, %v2486_v58  ;;  %v2514_v2 = vmul.f32 %v7804_v57, %v2472_v43  ;;  %3250 = vmatpush.bf16.msrb.mxu1 %v8349_v27  ;;  %v7487_v38 = vld [vmem:[#allocation7 + $0x64] sm:$0xf]  ;;  %v8367_v51 = vor.u32 %v7497_v41, %v7010_v9  ;;  %v6980_v54 = vld [vmem:[#allocation7 + $0x70] sm:$0xf0]  ;;  %v7138_v43 = vld [vmem:[#allocation7 + $0x1a0] sm:$0xf]  ;;  %v8391_v49 = vor.u32 %v7489_v37, %v6978_v50 }
 0x502   :  { %v2513_v59 = vmul.f32 %v2491_v15, %v8319_v42  ;;  %v2501_v4 = vmul.f32 %v7802_v32, %v2500_v60  ;;  %3276 = vmatpush.bf16.msrb.mxu3 %v8352_v18  ;;  %v8370_v57 = vor.u32 %v7487_v38, %v6980_v54  ;;  %v7529_v58 = vld [vmem:[#allocation7 + $0x1ac] sm:$0xf0]  ;;  %v7527_v60 = vld [vmem:[#allocation7 + $0x1a4] sm:$0xf]  ;;  %v6948_v33 = vld [vmem:[#allocation7 + $0x30] sm:$0xf0] }
 0x503   :  { %9817 = vst [vmem:[#allocation24_spill] sm:$0xff] %v8367_v51  ;;  %3239 = vmatpush.bf16.msrb.mxu0 %v8367_v51  ;;  %v8373_v15 = vor.u32 %v7529_v58, %v7138_v43  ;;  %v7479_v21 = vld [vmem:[#allocation7 + $0x24] sm:$0xf]  ;;  %v7108_v6 = vld [vmem:[#allocation7 + $0x170] sm:$0xf0] }
 0x504   :  { %v8337_v20 = vadd.f32 %v2514_v2, %v2513_v59  ;;  %v2502_v23 = vadd.f32 %v7802_v32, %v2501_v4  ;;  %9818 = vst [vmem:[#allocation25_spill] sm:$0xff] %v8370_v57  ;;  %v7140_v2 = vld [vmem:[#allocation7 + $0x1b0] sm:$0xf0]  ;;  %3267 = vmatpush.bf16.msrb.mxu2 %v8370_v57  ;;  %v6994_v4 = vld [vmem:[#allocation7 + $0x80] sm:$0xf]  ;;  %v8394_v40 = vor.u32 %v7479_v21, %v6948_v33 }
 0x505   :  { %3251 = vmatpush.bf16.msrb.mxu1 %v8362_v14  ;;  %v8376_v59 = vor.u32 %v7527_v60, %v7140_v2  ;;  %9821 = vst [vmem:[#allocation28_spill] sm:$0xff] %v8391_v49  ;;  %v7485_v9 = vld [vmem:[#allocation7 + $0x4c] sm:$0xf0]  ;;  %v7475_v41 = vld [vmem:[#allocation7 + $0x4] sm:$0xf] }
 0x506   :  { %7805 = vtanh.f32 %v8337_v20  ;;  %v2506_v1 = vsel %vm2505_vm4, %v7802_v32, %v2502_v23  ;;  %v7156_v32 = vld [vmem:[#allocation7 + $0x1d0] sm:$0xf0]  ;;  %v7493_v23 = vld [vmem:[#allocation7 + $0x8c] sm:$0xf0]  ;;  %9822 = vst [vmem:[#allocation29_spill] sm:$0xff] %v8394_v40 }
 0x507   :  { %v2511_v28 = vsel %vm2508_vm5, %v2510_v29, %v2506_v1  ;;  %v8364_v16 = vor.u32 %v7531_v5, %v7156_v32  ;;  %v8379_v46 = vor.u32 %v7493_v23, %v6994_v4  ;;  %v6964_v1 = vld [vmem:[#allocation7 + $0x50] sm:$0xf0]  ;;  %v8400_v5 = vor.u32 %v7519_v12, %v7108_v6  ;;  %v6962_v32 = vld [vmem:[#allocation7 + $0x40] sm:$0xf]  ;;  %v7504_v43 = vld [vmem:[#allocation7 + $0xec] sm:$0xf] }
 0x508   :  { %v8382_v29 = vor.u32 %v7483_v19, %v6964_v1  ;;  %v8403_v38 = vor.u32 %v7485_v9, %v6962_v32  ;;  %v6932_v54 = vld [vmem:[#allocation7 + $0x10] sm:$0xf0]  ;;  %v7052_v58 = vld [vmem:[#allocation7 + $0xf8] sm:$0xf0]  ;;  %v7090_v4 = vld [vmem:[#allocation7 + $0x140] sm:$0xf] }
 0x509   :  { %3277 = vmatpush.bf16.msrb.mxu3 %v8364_v16  ;;  %3252 = vmatpush.bf16.msrb.mxu1 %v8373_v15  ;;  %9819 = vst [vmem:[#allocation26_spill] sm:$0xff] %v8379_v46  ;;  %v8406_v60 = vor.u32 %v7475_v41, %v6932_v54  ;;  %v8408_v2 = vor.u32 %v7504_v43, %v7052_v58  ;;  %v7517_v23 = vld [vmem:[#allocation7 + $0x14c] sm:$0xf0]  ;;  %v7515_v19 = vld [vmem:[#allocation7 + $0x144] sm:$0xf] }
 0x50a   :  { %9820 = vst [vmem:[#allocation27_spill] sm:$0xff] %v8382_v29  ;;  %3240 = vmatpush.bf16.msrb.mxu0 %v8379_v46  ;;  %3268 = vmatpush.bf16.msrb.mxu2 %v8382_v29  ;;  %v8411_v1 = vor.u32 %v7517_v23, %v7090_v4  ;;  %v7500_v37 = vld [vmem:[#allocation7 + $0xcc] sm:$0xf]  ;;  %v7036_v21 = vld [vmem:[#allocation7 + $0xd8] sm:$0xf0] }
 0x50b   :  { %9823 = vst [vmem:[#allocation30_spill] sm:$0xff] %v8403_v38  ;;  %v8421_v33 = vor.u32 %v7500_v37, %v7036_v21  ;;  %v7074_v48 = vld [vmem:[#allocation7 + $0x120] sm:$0xf]  ;;  %v7513_v56 = vld [vmem:[#allocation7 + $0x12c] sm:$0xf0] }
 0x50c   :  { %v7806_v11 = vpop.eup %7805  ;;  %9824 = vst [vmem:[#allocation31_spill] sm:$0xff] %v8406_v60  ;;  %v7511_v12 = vld [vmem:[#allocation7 + $0x124] sm:$0xf]  ;;  %v8424_v6 = vor.u32 %v7513_v56, %v7074_v48  ;;  %v7076_v32 = vld [vmem:[#allocation7 + $0x130] sm:$0xf0] }
 0x50d   :  { %v8340_v34 = vmul.f32 %v7806_v11, %v2511_v28  ;;  %3278 = vmatpush.bf16.msrb.mxu3 %v8376_v59  ;;  %v7122_v11 = vld [vmem:[#allocation7 + $0x180] sm:$0xf]  ;;  %v7525_v28 = vld [vmem:[#allocation7 + $0x18c] sm:$0xf0]  ;;  %9825 = vst [vmem:[#allocation32_spill] sm:$0xff] %v8408_v2  ;;  %v8426_v9 = vor.u32 %v7511_v12, %v7076_v32  ;;  %v169_v32 = vadd.f32 %v8228_v13, %v8167_v53 }
 0x50e   :  { %v8385_v8 = vor.u32 %v7525_v28, %v7122_v11  ;;  %3241 = vmatpush.bf16.msrb.mxu0 %v8391_v49  ;;  %3269 = vmatpush.bf16.msrb.mxu2 %v8394_v40  ;;  %v7092_v11 = vld [vmem:[#allocation7 + $0x150] sm:$0xf0]  ;;  %9827 = vst [vmem:[#allocation34_spill] sm:$0xff] %v8421_v33  ;;  %v6930_v41 = vld [vmem:[#allocation7] sm:$0xf] }
 0x50f   :  { %9814 = vst [vmem:[#allocation21_spill] sm:$0xff] %v8340_v34  ;;  %v2525_v42 = vpack.c.bf16 %v8340_v34, %v8340_v34  ;;  %v8414_v28 = vor.u32 %v7515_v19, %v7092_v11  ;;  %v7477_v54 = vld [vmem:[#allocation7 + $0xc] sm:$0xf0]  ;;  %v7050_v58 = vld [vmem:[#allocation7 + $0xe8] sm:$0xf] }
 0x510   :  { %3253 = vmatpush.bf16.msrb.mxu1 %v8385_v8  ;;  %9828 = vst [vmem:[#allocation35_spill] sm:$0xff] %v8424_v6  ;;  %v8430_v43 = vor.u32 %v7477_v54, %v6930_v41  ;;  %v7506_v4 = vld [vmem:[#allocation7 + $0xf4] sm:$0xf0]  ;;  %v7496_v23 = vld [vmem:[#allocation7 + $0xac] sm:$0xf]  ;;  %v198_v41 = vadd.f32 %v8233_v24, %v8171_v55 }
 0x511   :  { %2726 = vmatmul.bf16.vlgmr.msra.gmra.mxu0 %v2525_v42  ;;  %2739 = vmatmul.bf16.vlgmr.msra.gmra.mxu1 %v2525_v42  ;;  %9829 = vst [vmem:[#allocation36_spill] sm:$0xff] %v8426_v9  ;;  %v8433_v19 = vor.u32 %v7506_v4, %v7050_v58  ;;  %v7020_v11 = vld [vmem:[#allocation7 + $0xb8] sm:$0xf0]  ;;  %v7507_v48 = vld [vmem:[#allocation7 + $0x104] sm:$0xf] }
 0x512   :  { %2752 = vmatmul.bf16.vlgmr.msra.gmra.mxu2 %v2525_v42  ;;  %2765 = vmatmul.bf16.vlgmr.msra.gmra.mxu3 %v2525_v42  ;;  %v7523_v42 = vld [vmem:[#allocation7 + $0x184] sm:$0xf]  ;;  %9830 = vst [vmem:[#allocation37_spill] sm:$0xff] %v8430_v43  ;;  %v8436_v37 = vor.u32 %v7496_v23, %v7020_v11  ;;  %v7060_v56 = vld [vmem:[#allocation7 + $0x110] sm:$0xf0] }
 0x513   :  { %v8388_v10 = vor.u32 %v7523_v42, %v7124_v17  ;;  %3242 = vmatpush.bf16.msrb.mxu0 %v8403_v38  ;;  %3270 = vmatpush.bf16.msrb.mxu2 %v8406_v60  ;;  %v6946_v42 = vld [vmem:[#allocation7 + $0x20] sm:$0xf]  ;;  %v7481_v17 = vld [vmem:[#allocation7 + $0x2c] sm:$0xf0]  ;;  %9831 = vst [vmem:[#allocation38_spill] sm:$0xff] %v8433_v19  ;;  %v8445_v54 = vor.u32 %v7507_v48, %v7060_v56 }
 0x514   :  { %3254 = vmatpush.bf16.msrb.mxu1 %v8397_v3  ;;  %v8418_v50 = vor.u32 %v7481_v17, %v6946_v42  ;;  %v7058_v42 = vld [vmem:[#allocation7 + $0x100] sm:$0xf]  ;;  %v7509_v17 = vld [vmem:[#allocation7 + $0x10c] sm:$0xf0]  ;;  %9832 = vst [vmem:[#allocation39_spill] sm:$0xff] %v8436_v37 }
 0x515   :  { %3279 = vmatpush.bf16.msrb.mxu3 %v8388_v10  ;;  %v8438_v21 = vor.u32 %v7509_v17, %v7058_v42  ;;  %v7178_v12 = vld [vmem:[#allocation7 + $0x1e8] sm:$0xf]  ;;  %9834 = vst [vmem:[#allocation41_spill] sm:$0xff] %v8445_v54  ;;  %v7538_v58 = vld [vmem:[#allocation7 + $0x1f4] sm:$0xf0] }
 0x516   :  { %9826 = vst [vmem:[#allocation33_spill] sm:$0xff] %v8418_v50  ;;  %v7536_v4 = vld [vmem:[#allocation7 + $0x1ec] sm:$0xf]  ;;  %v8449_v42 = vor.u32 %v7538_v58, %v7178_v12  ;;  %v7034_v53 = vld [vmem:[#allocation7 + $0xc8] sm:$0xf] }
 0x517   :  { %3315 = vmatpush.bf16.msra.mxu2 %v8408_v2  ;;  %3243 = vmatpush.bf16.msrb.mxu0 %v8418_v50  ;;  %9833 = vst [vmem:[#allocation40_spill] sm:$0xff] %v8438_v21  ;;  %v8451_v17 = vor.u32 %v7536_v4, %v7180_v45  ;;  %v7502_v13 = vld [vmem:[#allocation7 + $0xd4] sm:$0xf0]  ;;  %v7492_v55 = vld [vmem:[#allocation7 + $0x8c] sm:$0xf] }
 0x518   :  { %3255 = vmatpush.bf16.msrb.mxu1 %v8411_v1  ;;  %9835 = vst [vmem:[#allocation42_spill] sm:$0xff] %v8449_v42  ;;  %v8454_v48 = vor.u32 %v7502_v13, %v7034_v53  ;;  %v7004_v56 = vld [vmem:[#allocation7 + $0x98] sm:$0xf0]  ;;  %v7162_v12 = vld [vmem:[#allocation7 + $0x1c8] sm:$0xf] }
 0x519   :  { %3280 = vmatpush.bf16.msrb.mxu3 %v8400_v5  ;;  %9836 = vst [vmem:[#allocation43_spill] sm:$0xff] %v8451_v17  ;;  %v8458_v30 = vor.u32 %v7492_v55, %v7004_v56  ;;  %v7534_v58 = vld [vmem:[#allocation7 + $0x1d4] sm:$0xf0]  ;;  %v7532_v45 = vld [vmem:[#allocation7 + $0x1cc] sm:$0xf] }
 0x51a   :  { %9837 = vst [vmem:[#allocation44_spill] sm:$0xff] %v8454_v48  ;;  %v7498_v53 = vld [vmem:[#allocation7 + $0xb4] sm:$0xf0]  ;;  %v7488_v13 = vld [vmem:[#allocation7 + $0x6c] sm:$0xf] }
 0x51b   :  { %3316 = vmatpush.bf16.msra.mxu2 %v8421_v33  ;;  %3244 = vmatpush.bf16.msrb.mxu0 %v8430_v43  ;;  %9838 = vst [vmem:[#allocation45_spill] sm:$0xff] %v8458_v30  ;;  %v6988_v56 = vld [vmem:[#allocation7 + $0x78] sm:$0xf0] }
 0x51c   :  { %3256 = vmatpush.bf16.msrb.mxu1 %v8424_v6 }
 0x51d   :  { %3281 = vmatpush.bf16.msrb.mxu3 %v8414_v28 }
 0x51f   :  { %3289 = vmatpush.bf16.msra.mxu0 %v8433_v19  ;;  %3317 = vmatpush.bf16.msra.mxu2 %v8436_v37 }
 0x520   :  { %3257 = vmatpush.bf16.msrb.mxu1 %v8438_v21 }
 0x521   :  { %3282 = vmatpush.bf16.msrb.mxu3 %v8426_v9 }
 0x523   :  { %3290 = vmatpush.bf16.msra.mxu0 %v8454_v48  ;;  %3318 = vmatpush.bf16.msra.mxu2 %v8458_v30 }
 0x524   :  { %3302 = vmatpush.bf16.msra.mxu1 %v8449_v42 }
 0x525   :  { %3283 = vmatpush.bf16.msrb.mxu3 %v8445_v54 }
 0x529   :  { %3328 = vmatpush.bf16.msra.mxu3 %v8451_v17  ;;  %v6970_v17 = vld [vmem:[#allocation7 + $0x48] sm:$0xf] }
 0x58e   :  { %v2727_v23 = vpop.f32.mrf.mxu0  ;;  %v2740_v11 = vpop.f32.mrf.mxu1 }
 0x58f   :  { %v2770_v24 = vadd.f32 %v2727_v23, %v169_v32  ;;  %v2771_v34 = vadd.f32 %v2740_v11, %v198_v41  ;;  %v8461_v32 = vor.u32 %v7534_v58, %v7162_v12  ;;  %v7164_v41 = vld [vmem:[#allocation7 + $0x1d8] sm:$0xf0]  ;;  %v7018_v11 = vld [vmem:[#allocation7 + $0xa8] sm:$0xf]  ;;  %v7530_v58 = vld [vmem:[#allocation7 + $0x1b4] sm:$0xf0] }
 0x590   :  { %v8464_v23 = vor.u32 %v7532_v45, %v7164_v41  ;;  %v8466_v55 = vor.u32 %v7498_v53, %v7018_v11  ;;  %v7146_v12 = vld [vmem:[#allocation7 + $0x1a8] sm:$0xf]  ;;  %v7528_v45 = vld [vmem:[#allocation7 + $0x1ac] sm:$0xf] }
 0x591   :  { %v6925_v4 = vmul.f32 -1.442695, %v2770_v24  ;;  %v6926_v25 = vmul.f32 -1.442695, %v2771_v34  ;;  %9839 = vst [vmem:[#allocation46_spill] sm:$0xff] %v8461_v32  ;;  %v256_v24 = vadd.f32 %v8241_v7, %v8183_v62  ;;  %3303 = vmatpush.bf16.msra.mxu1 %v8461_v32  ;;  %v8472_v34 = vor.u32 %v7488_v13, %v6988_v56 }
 0x592   :  { %9840 = vst [vmem:[#allocation47_spill] sm:$0xff] %v8464_v23  ;;  %3329 = vmatpush.bf16.msra.mxu3 %v8464_v23  ;;  %3291 = vmatpush.bf16.msra.mxu0 %v8466_v55  ;;  %v8478_v11 = vor.u32 %v7530_v58, %v7146_v12  ;;  %v7148_v62 = vld [vmem:[#allocation7 + $0x1b8] sm:$0xf0]  ;;  %v7002_v56 = vld [vmem:[#allocation7 + $0x88] sm:$0xf] }
 0x593   :  { %7807 = vpow2.f32 %v6925_v4  ;;  %9841 = vst [vmem:[#allocation48_spill] sm:$0xff] %v8466_v55  ;;  %v9668_v4 = vmov 0.0|0.0   ;;  %3319 = vmatpush.bf16.msra.mxu2 %v8472_v34  ;;  %v8481_v13 = vor.u32 %v7528_v45, %v7148_v62  ;;  %v8484_v26 = vor.u32 %v7494_v47, %v7002_v56  ;;  %v6972_v23 = vld [vmem:[#allocation7 + $0x58] sm:$0xf0]  ;;  %v7526_v12 = vld [vmem:[#allocation7 + $0x194] sm:$0xf0] }
 0x594   :  { %7809 = vpow2.f32 %v6926_v25  ;;  %9842 = vst [vmem:[#allocation49_spill] sm:$0xff] %v8472_v34  ;;  %3271 = vmatmul.bf16.vlgmr.msrb.gmra.mxu2 %v9668_v4  ;;  %3245 = vmatmul.bf16.vlgmr.msrb.gmra.mxu0 %v9668_v4  ;;  %v7524_v62 = vld [vmem:[#allocation7 + $0x18c] sm:$0xf] }
 0x595   :  { %v8474_v41 = vpop.f32.mrf.mxu2  ;;  %v2766_v63 = vpop.f32.mrf.mxu3  ;;  %9843 = vst [vmem:[#allocation50_spill] sm:$0xff] %v8478_v11  ;;  %3304 = vmatpush.bf16.msra.mxu1 %v8478_v11  ;;  %v6956_v11 = vld [vmem:[#allocation7 + $0x38] sm:$0xf0] }
 0x596   :  { %v2773_v7 = vadd.f32 %v2766_v63, %v256_v24  ;;  %v2729_v25 = vpop.f32.mrf.mxu0  ;;  %v2742_v53 = vpop.f32.mrf.mxu1  ;;  %9844 = vst [vmem:[#allocation51_spill] sm:$0xff] %v8481_v13  ;;  %3330 = vmatpush.bf16.msra.mxu3 %v8481_v13  ;;  %v8488_v63 = vor.u32 %v7484_v22, %v6972_v23  ;;  %v7130_v24 = vld [vmem:[#allocation7 + $0x188] sm:$0xf]  ;;  %3292 = vmatpush.bf16.msra.mxu0 %v8484_v26  ;;  %v7490_v22 = vld [vmem:[#allocation7 + $0x74] sm:$0xf0] }
 0x597   :  { %9845 = vst [vmem:[#allocation52_spill] sm:$0xff] %v8484_v26  ;;  %v8491_v45 = vor.u32 %v7526_v12, %v7130_v24  ;;  %v7132_v25 = vld [vmem:[#allocation7 + $0x198] sm:$0xf0]  ;;  %v6986_v53 = vld [vmem:[#allocation7 + $0x68] sm:$0xf] }
 0x598   :  { %v6927_v32 = vmul.f32 -1.442695, %v2773_v7  ;;  %9846 = vst [vmem:[#allocation53_spill] sm:$0xff] %v8488_v63  ;;  %3320 = vmatpush.bf16.msra.mxu2 %v8488_v63  ;;  %v8496_v7 = vor.u32 %v7524_v62, %v7132_v25  ;;  %v8500_v4 = vor.u32 %v7490_v22, %v6986_v53  ;;  %v7480_v13 = vld [vmem:[#allocation7 + $0x2c] sm:$0xf] }
 0x599   :  { %v7808_v58 = vpop.eup %7807  ;;  %9847 = vst [vmem:[#allocation54_spill] sm:$0xff] %v8491_v45  ;;  %3305 = vmatpush.bf16.msra.mxu1 %v8491_v45  ;;  %v7114_v24 = vld [vmem:[#allocation7 + $0x168] sm:$0xf]  ;;  %v8507_v62 = vor.u32 %v7480_v13, %v6956_v11  ;;  %v7520_v53 = vld [vmem:[#allocation7 + $0x16c] sm:$0xf] }
 0x59a   :  { %v7810_v47 = vpop.eup %7809  ;;  %v8493_v56 = vadd.f32 1.0, %v7808_v58  ;;  %7811 = vpow2.f32 %v6927_v32  ;;  %9848 = vst [vmem:[#allocation55_spill] sm:$0xff] %v8496_v7  ;;  %3331 = vmatpush.bf16.msra.mxu3 %v8496_v7  ;;  %3293 = vmatpush.bf16.msra.mxu0 %v8500_v4  ;;  %v7522_v58 = vld [vmem:[#allocation7 + $0x174] sm:$0xf0]  ;;  %v227_v7 = vadd.f32 %v8237_v52, %v8181_v61  ;;  %v7476_v11 = vld [vmem:[#allocation7 + $0xc] sm:$0xf] }
 0x59b   :  { %v8498_v23 = vadd.f32 1.0, %v7810_v47  ;;  %9849 = vst [vmem:[#allocation56_spill] sm:$0xff] %v8500_v4  ;;  %v8509_v25 = vor.u32 %v7522_v58, %v7114_v24  ;;  %v7116_v47 = vld [vmem:[#allocation7 + $0x178] sm:$0xf0]  ;;  %v7486_v45 = vld [vmem:[#allocation7 + $0x54] sm:$0xf0] }
 0x59c   :  { %7813 = vrcp.f32 %v8493_v56  ;;  %9850 = vst [vmem:[#allocation57_spill] sm:$0xff] %v8507_v62  ;;  %v8511_v22 = vor.u32 %v7520_v53, %v7116_v47  ;;  %3321 = vmatpush.bf16.msra.mxu2 %v8507_v62  ;;  %v6940_v13 = vld [vmem:[#allocation7 + $0x18] sm:$0xf0]  ;;  %v7098_v24 = vld [vmem:[#allocation7 + $0x148] sm:$0xf]  ;;  %v2772_v61 = vadd.f32 %v8474_v41, %v227_v7  ;;  %vm2783_vm8 = vweird.f32 %v8493_v56 }
 0x59d   :  { %7815 = vrcp.f32 %v8498_v23  ;;  %v2755_v32 = vpop.f32.mrf.mxu2  ;;  %v2768_v12 = vpop.f32.mrf.mxu3  ;;  %9851 = vst [vmem:[#allocation58_spill] sm:$0xff] %v8509_v25  ;;  %3306 = vmatpush.bf16.msra.mxu1 %v8509_v25  ;;  %v8522_v58 = vor.u32 %v7476_v11, %v6940_v13  ;;  %v7518_v53 = vld [vmem:[#allocation7 + $0x154] sm:$0xf0]  ;;  %v7516_v47 = vld [vmem:[#allocation7 + $0x14c] sm:$0xf]  ;;  %v2808_v6 = vand.u32 2147483648, %v8498_v23  ;;  %vm2802_vm9 = vweird.f32 %v8498_v23 }
 0x59e   :  { %9852 = vst [vmem:[#allocation59_spill] sm:$0xff] %v8511_v22  ;;  %v8517_v32 = vor.u32 %v7486_v45, %v6970_v17  ;;  %3332 = vmatpush.bf16.msra.mxu3 %v8511_v22  ;;  %v8528_v52 = vor.u32 %v7518_v53, %v7098_v24  ;;  %v7100_v17 = vld [vmem:[#allocation7 + $0x158] sm:$0xf0]  ;;  %v6954_v45 = vld [vmem:[#allocation7 + $0x28] sm:$0xf] }
 0x59f   :  { %9854 = vst [vmem:[#allocation61_spill] sm:$0xff] %v8522_v58  ;;  %v7482_v25 = vld [vmem:[#allocation7 + $0x34] sm:$0xf0]  ;;  %v7082_v11 = vld [vmem:[#allocation7 + $0x128] sm:$0xf]  ;;  %v8537_v53 = vor.u32 %v7516_v47, %v7100_v17  ;;  %v9859_v47 = vmov 0.0|0.0  }
 0x5a0   :  { %v7812_v42 = vpop.eup %7811  ;;  %9853 = vst [vmem:[#allocation60_spill] sm:$0xff] %v8517_v32  ;;  %3294 = vmatpush.bf16.msra.mxu0 %v8517_v32  ;;  %v7514_v13 = vld [vmem:[#allocation7 + $0x134] sm:$0xf0]  ;;  %v2787_v54 = vand.u32 2147483647, %v8493_v56  ;;  %3322 = vmatpush.bf16.msra.mxu2 %v8522_v58  ;;  %v8539_v32 = vor.u32 %v7482_v25, %v6954_v45  ;;  %v2789_v58 = vand.u32 2147483648, %v8493_v56 }
 0x5a1   :  { %v8519_v12 = vadd.f32 1.0, %v7812_v42  ;;  %9855 = vst [vmem:[#allocation62_spill] sm:$0xff] %v8528_v52  ;;  %3307 = vmatpush.bf16.msra.mxu1 %v8528_v52  ;;  %v7512_v41 = vld [vmem:[#allocation7 + $0x12c] sm:$0xf]  ;;  %v7084_v7 = vld [vmem:[#allocation7 + $0x138] sm:$0xf0]  ;;  %v8541_v21 = vor.u32 %v7514_v13, %v7082_v11 }
 0x5a2   :  { %v8524_v4 = vpop.eup %7813  ;;  %9856 = vst [vmem:[#allocation63_spill] sm:$0xff] %v8537_v53  ;;  %v6938_v63 = vld [vmem:[#allocation7 + $0x8] sm:$0xf]  ;;  %v7478_v26 = vld [vmem:[#allocation7 + $0x14] sm:$0xf0]  ;;  %3333 = vmatpush.bf16.msra.mxu3 %v8537_v53  ;;  %v8551_v17 = vor.u32 %v7512_v41, %v7084_v7  ;;  %vm2788_vm12 = vcmp.eq.f32.partialorder %v2787_v54, 8.507059e+37 }
 0x5a3   :  { %v7816_v62 = vpop.eup %7815  ;;  %v2779_v42 = vmul.f32 %v8524_v4, %v8493_v56  ;;  %7817 = vrcp.f32 %v8519_v12  ;;  %9857 = vst [vmem:[#allocation64_spill] sm:$0xff] %v8539_v32  ;;  %v7066_v52 = vld [vmem:[#allocation7 + $0x108] sm:$0xf]  ;;  %vm2784_vm6 = vweird.f32 %v8524_v4  ;;  %v2806_v25 = vand.u32 2147483647, %v8498_v23 }
 0x5a4   :  { %v2798_v22 = vmul.f32 %v7816_v62, %v8498_v23  ;;  %9858 = vst [vmem:[#allocation65_spill] sm:$0xff] %v8541_v21  ;;  %3705 = vmatpush.bf16.msrb.mxu2 %v8329_v31  ;;  %7819 = vtanh.f32 %v2772_v61  ;;  %v7510_v45 = vld [vmem:[#allocation7 + $0x114] sm:$0xf0]  ;;  %vm2803_vm7 = vweird.f32 %v7816_v62  ;;  %3295 = vmatpush.bf16.msra.mxu0 %v8539_v32  ;;  %v8555_v61 = vor.u32 %v7478_v26, %v6938_v63  ;;  %v7508_v11 = vld [vmem:[#allocation7 + $0x10c] sm:$0xf]  ;;  %vm2785_vm10 = vmor %vm2783_vm8, %vm2784_vm6 }
 0x5a5   :  { %v2780_v24 = vsub.f32 1.0, %v2779_v42  ;;  %3323 = vmatmul.bf16.vlgmr.msra.gmra.mxu2 %v9859_v47  ;;  %9860 = vst [vmem:[#allocation66_spill] sm:$0xff] %v8551_v17  ;;  %3308 = vmatpush.bf16.msra.mxu1 %v8541_v21  ;;  %v8557_v42 = vor.u32 %v7510_v45, %v7066_v52  ;;  %v7068_v13 = vld [vmem:[#allocation7 + $0x118] sm:$0xf0]  ;;  %vm2804_vm11 = vmor %vm2802_vm9, %vm2803_vm7  ;;  %v2809_v63 = vor.u32 1.1754944e-38, %v2808_v6  ;;  %vm2807_vm13 = vcmp.eq.f32.partialorder %v2806_v25, 8.507059e+37 }
 0x5a6   :  { %v2799_v9 = vsub.f32 1.0, %v2798_v22  ;;  %9861 = vst [vmem:[#allocation67_spill] sm:$0xff] %v8555_v61  ;;  %3334 = vmatpush.bf16.msra.mxu3 %v8551_v17  ;;  %vm2822_vm15 = vweird.f32 %v8519_v12 }
 0x5a7   :  { %v2781_v34 = vmul.f32 %v8524_v4, %v2780_v24  ;;  %9862 = vst [vmem:[#allocation68_spill] sm:$0xff] %v8557_v42 }
 0x5a8   :  { %v2800_v22 = vmul.f32 %v7816_v62, %v2799_v9  ;;  %3706 = vmatpush.bf16.msrb.mxu2 %v8332_v0  ;;  %v2790_v9 = vor.u32 1.1754944e-38, %v2789_v58  ;;  %3296 = vmatpush.bf16.msra.mxu0 %v8555_v61 }
 0x5a9   :  { %v7818_v24 = vpop.eup %7817  ;;  %v2782_v31 = vadd.f32 %v8524_v4, %v2781_v34  ;;  %v8569_v34 = vor.u32 %v7508_v11, %v7068_v13  ;;  %3309 = vmatpush.bf16.msra.mxu1 %v8557_v42 }
 0x5aa   :  { %v2801_v41 = vadd.f32 %v7816_v62, %v2800_v22  ;;  %v2818_v26 = vmul.f32 %v7818_v24, %v8519_v12  ;;  %v7820_v56 = vpop.eup %7819  ;;  %vm2823_vm14 = vweird.f32 %v7818_v24 }
 0x5ab   :  { %v2786_v52 = vsel %vm2785_vm10, %v8524_v4, %v2782_v31  ;;  %9863 = vst [vmem:[#allocation69_spill] sm:$0xff] %v8569_v34  ;;  %3335 = vmatpush.bf16.msra.mxu3 %v8569_v34  ;;  %3297 = vmatmul.bf16.vlgmr.msra.gmra.mxu0 %v9859_v47  ;;  %vm2824_vm0 = vmor %vm2822_vm15, %vm2823_vm14  ;;  %vm3519_vm14 = vcmask 7168  }
 0x5ac   :  { %v2791_v7 = vsel %vm2788_vm12, %v2790_v9, %v2786_v52  ;;  %v2805_v23 = vsel %vm2804_vm11, %v7816_v62, %v2801_v41  ;;  %v2819_v45 = vsub.f32 1.0, %v2818_v26  ;;  %3679 = vmatpush.bf16.msrb.mxu0 %v8344_v44  ;;  %3707 = vmatpush.bf16.msrb.mxu2 %v8346_v36  ;;  %v2828_v62 = vand.u32 2147483648, %v8519_v12  ;;  %v9866_v26 = vld [vmem:[#allocation36_spill] sm:$0xff]  ;;  %v9868_v52 = vld [vmem:[#allocation53_spill] sm:$0xff] }
 0x5ad   :  { %v2810_v58 = vsel %vm2807_vm13, %v2809_v63, %v2805_v23  ;;  %v2833_v22 = vmul.f32 %v7820_v56, %v2791_v7  ;;  %v9867_v63 = vld [vmem:[#allocation52_spill] sm:$0xff]  ;;  %v9870_v7 = vld [vmem:[#allocation41_spill] sm:$0xff]  ;;  %v9871_v23 = vld [vmem:[#allocation42_spill] sm:$0xff] }
 0x5ae   :  { %v2832_v31 = vmul.f32 %v2810_v58, %v8337_v20  ;;  %v2820_v6 = vmul.f32 %v7818_v24, %v2819_v45  ;;  %v2826_v20 = vand.u32 2147483647, %v8519_v12  ;;  %v2829_v47 = vor.u32 1.1754944e-38, %v2828_v62  ;;  %v9864_v12 = vld [vmem:[#allocation49_spill] sm:$0xff]  ;;  %v9869_v56 = vld [vmem:[#allocation40_spill] sm:$0xff]  ;;  %v9872_v45 = vld [vmem:[#allocation43_spill] sm:$0xff] }
 0x5af   :  { %v9873_v58 = vld [vmem:[#allocation56_spill] sm:$0xff]  ;;  %v9878_v62 = vld [vmem:[#allocation61_spill] sm:$0xff] }
 0x5b0   :  { %v8578_v54 = vadd.f32 %v2833_v22, %v2832_v31  ;;  %v2821_v4 = vadd.f32 %v7818_v24, %v2820_v6  ;;  %3680 = vmatpush.bf16.msrb.mxu0 %v8355_v35  ;;  %3708 = vmatpush.bf16.msrb.mxu2 %v8358_v39  ;;  %vm2827_vm1 = vcmp.eq.f32.partialorder %v2826_v20, 8.507059e+37  ;;  %v9874_v22 = vld [vmem:[#allocation57_spill] sm:$0xff]  ;;  %v9875_v31 = vld [vmem:[#allocation46_spill] sm:$0xff]  ;;  %v9876_v6 = vld [vmem:[#allocation47_spill] sm:$0xff] }
 0x5b1   :  { %v9879_v20 = vld [vmem:[#allocation50_spill] sm:$0xff] }
 0x5b2   :  { %7821 = vtanh.f32 %v8578_v54  ;;  %v2825_v25 = vsel %vm2824_vm0, %v7818_v24, %v2821_v4  ;;  %v9865_v24 = vld [vmem:[#allocation35_spill] sm:$0xff]  ;;  %v9877_v4 = vld [vmem:[#allocation60_spill] sm:$0xff] }
 0x5b3   :  { %v2830_v13 = vsel %vm2827_vm1, %v2829_v47, %v2825_v25  ;;  %v9880_v25 = vld [vmem:[#allocation51_spill] sm:$0xff]  ;;  %v9881_v47 = vld [vmem:[#allocation54_spill] sm:$0xff] }
 0x5b4   :  { %3681 = vmatpush.bf16.msrb.mxu0 %v8367_v51  ;;  %3709 = vmatpush.bf16.msrb.mxu2 %v8370_v57 }
 0x5b8   :  { %v7822_v11 = vpop.eup %7821  ;;  %3682 = vmatpush.bf16.msrb.mxu0 %v8379_v46  ;;  %3710 = vmatpush.bf16.msrb.mxu2 %v8382_v29 }
 0x5b9   :  { %v8588_v9 = vmul.f32 %v7822_v11, %v2830_v13  ;;  %v9882_v11 = vld [vmem:[#allocation55_spill] sm:$0xff]  ;;  %v9883_v13 = vld [vmem:[#allocation58_spill] sm:$0xff] }
 0x5bb   :  { %v2842_v41 = vpack.c.bf16 %v8588_v9, %v8588_v9 }
 0x5bc   :  { %3683 = vmatpush.bf16.msrb.mxu0 %v8391_v49  ;;  %3711 = vmatpush.bf16.msrb.mxu2 %v8394_v40 }
 0x5bd   :  { %3258 = vmatmul.bf16.vlgmr.msrb.gmra.mxu1 %v2842_v41  ;;  %3284 = vmatmul.bf16.vlgmr.msrb.gmra.mxu3 %v2842_v41 }
 0x5be   :  { %3692 = vmatpush.bf16.msrb.mxu1 %v8349_v27  ;;  %3718 = vmatpush.bf16.msrb.mxu3 %v8352_v18 }
 0x5c0   :  { %3684 = vmatpush.bf16.msrb.mxu0 %v8403_v38  ;;  %3712 = vmatpush.bf16.msrb.mxu2 %v8406_v60 }
 0x5c2   :  { %3693 = vmatpush.bf16.msrb.mxu1 %v8362_v14  ;;  %3719 = vmatpush.bf16.msrb.mxu3 %v8364_v16 }
 0x5c4   :  { %3757 = vmatpush.bf16.msra.mxu2 %v8408_v2  ;;  %3685 = vmatpush.bf16.msrb.mxu0 %v8418_v50 }
 0x5c6   :  { %3694 = vmatpush.bf16.msrb.mxu1 %v8373_v15  ;;  %3720 = vmatpush.bf16.msrb.mxu3 %v8376_v59 }
 0x5c8   :  { %3758 = vmatpush.bf16.msra.mxu2 %v8421_v33  ;;  %3686 = vmatpush.bf16.msrb.mxu0 %v8430_v43 }
 0x5ca   :  { %3695 = vmatpush.bf16.msrb.mxu1 %v8385_v8  ;;  %3721 = vmatpush.bf16.msrb.mxu3 %v8388_v10 }
 0x5cc   :  { %3731 = vmatpush.bf16.msra.mxu0 %v8433_v19  ;;  %3759 = vmatpush.bf16.msra.mxu2 %v8436_v37 }
 0x5cd   :  { %3310 = vmatmul.bf16.vlgmr.msra.gmra.mxu1 %v2842_v41  ;;  %3336 = vmatmul.bf16.vlgmr.msra.gmra.mxu3 %v2842_v41  ;;  %v9884_v41 = vld [vmem:[#allocation59_spill] sm:$0xff] }
 0x5ce   :  { %3696 = vmatpush.bf16.msrb.mxu1 %v8397_v3  ;;  %3722 = vmatpush.bf16.msrb.mxu3 %v8400_v5 }
 0x5d0   :  { %3732 = vmatpush.bf16.msra.mxu0 %v8454_v48  ;;  %3760 = vmatpush.bf16.msra.mxu2 %v8458_v30 }
 0x5d2   :  { %3697 = vmatpush.bf16.msrb.mxu1 %v8411_v1  ;;  %3723 = vmatpush.bf16.msrb.mxu3 %v8414_v28 }
 0x5d4   :  { %3733 = vmatpush.bf16.msra.mxu0 %v8466_v55  ;;  %3761 = vmatpush.bf16.msra.mxu2 %v9864_v12 }
 0x5d6   :  { %3698 = vmatpush.bf16.msrb.mxu1 %v9865_v24  ;;  %3724 = vmatpush.bf16.msrb.mxu3 %v9866_v26 }
 0x5d8   :  { %3734 = vmatpush.bf16.msra.mxu0 %v9867_v63  ;;  %3762 = vmatpush.bf16.msra.mxu2 %v9868_v52 }
 0x5da   :  { %3699 = vmatpush.bf16.msrb.mxu1 %v9869_v56  ;;  %3725 = vmatpush.bf16.msrb.mxu3 %v9870_v7 }
 0x5dc   :  { %3735 = vmatpush.bf16.msra.mxu0 %v9873_v58  ;;  %3763 = vmatpush.bf16.msra.mxu2 %v9874_v22  ;;  %v9885_v22 = vld [vmem:[#allocation62_spill] sm:$0xff]  ;;  %v8654_v58 = vld [vmem:[#allocation9] sm:$0xff] }
 0x5dd   :  { %v3447_v30 = vperm.slane %v8654_v58, 0 }
 0x5de   :  { %3744 = vmatpush.bf16.msra.mxu1 %v9871_v23  ;;  %3770 = vmatpush.bf16.msra.mxu3 %v9872_v45 }
 0x5e0   :  { %3736 = vmatpush.bf16.msra.mxu0 %v9877_v4  ;;  %3764 = vmatpush.bf16.msra.mxu2 %v9878_v62 }
 0x5e2   :  { %3745 = vmatpush.bf16.msra.mxu1 %v9875_v31  ;;  %3771 = vmatpush.bf16.msra.mxu3 %v9876_v6 }
 0x5e4   :  { %3737 = vmatpush.bf16.msra.mxu0 %v8539_v32 }
 0x5e6   :  { %3746 = vmatpush.bf16.msra.mxu1 %v9879_v20  ;;  %3772 = vmatpush.bf16.msra.mxu3 %v9880_v25 }
 0x5e8   :  { %3738 = vmatpush.bf16.msra.mxu0 %v8555_v61  ;;  %v9720_v61 = vlaneseq }
 0x5ea   :  { %3747 = vmatpush.bf16.msra.mxu1 %v9881_v47  ;;  %3773 = vmatpush.bf16.msra.mxu3 %v9882_v11  ;;  %v8649_v12 = vshrl.u32 %v9720_v61, 7 }
 0x5ec   :  { %9886 = vst [vmem:[#allocation35_spill] sm:$0xff] %v8649_v12  ;;  %7550 = vset.pattern.permute.xlu2 %v8649_v12  ;;  %7552 = vset.pattern.permute.xlu1 %v8649_v12 }
 0x5ed   :  { %7551 = vset.pattern.permute.xlu0 %v8649_v12 }
 0x5ee   :  { %3748 = vmatpush.bf16.msra.mxu1 %v9883_v13  ;;  %3774 = vmatpush.bf16.msra.mxu3 %v9884_v41 }
 0x5f2   :  { %3749 = vmatpush.bf16.msra.mxu1 %v9885_v22  ;;  %3775 = vmatpush.bf16.msra.mxu3 %v8537_v53 }
 0x5f4   :  { %3452 = vperm.xlu2 %7550, %v3447_v30  }
 0x5f6   :  { %3750 = vmatpush.bf16.msra.mxu1 %v8541_v21  ;;  %3776 = vmatpush.bf16.msra.mxu3 %v8551_v17 }
 0x5fa   :  { %3751 = vmatpush.bf16.msra.mxu1 %v8557_v42  ;;  %3777 = vmatpush.bf16.msra.mxu3 %v8569_v34 }
 0x611   :  { %v3246_v62 = vpop.f32.mrf.mxu0 }
 0x617   :  { %v3272_v32 = vpop.f32.mrf.mxu2 }
 0x619   :  { %v3248_v52 = vpop.f32.mrf.mxu0 }
 0x61a   :  { %v2907_v52 = vld [vmem:[%s9646_s5] sm:$0xf]  ;;  %s8063_s5 = smov [#allocation10]  }
 0x61b   :  { %v8660_v61 = vperm.slane %v2907_v52, 0  ;;  %v8663_v48 = vperm.slane %v2907_v52, 1  ;;  %s5835_s28 = sshll.u32 %s8063_s5, 4  ;;  %s5836_s28 = int_to_ptr.vmem [resolvable:$true] %s5835_s28 }
 0x61d   :  { %9887 = vst [vmem:[#allocation36_spill] sm:$0xff] %v8660_v61  ;;  %v3247_v33 = vadd.f32 %v3246_v62, %v8660_v61  ;;  %v3273_v60 = vadd.f32 %v3272_v32, %v8663_v48 }
 0x61e   :  { %9888 = vst [vmem:[#allocation70_spill] sm:$0xff] %v8663_v48 }
 0x61f   :  { %v3274_v4 = vpop.f32.mrf.mxu2 }
 0x628   :  { %v3324_v63 = vpop.f32.mrf.mxu2  ;;  %v3298_v37 = vpop.f32.mrf.mxu0 }
 0x630   :  { %v3326_v4 = vpop.f32.mrf.mxu2  ;;  %v3300_v55 = vpop.f32.mrf.mxu0 }
 0x631   :  { %v8666_v55 = vperm.slane %v2907_v52, 3 }
 0x633   :  { %9889 = vst [vmem:[#allocation71_spill] sm:$0xff] %v8666_v55 }
 0x63a   :  { %v3259_v2 = vpop.f32.mrf.mxu1 }
 0x63b   :  { %v3260_v19 = vadd.f32 %v3259_v2, %v3247_v33  ;;  %v3325_v2 = vadd.f32 %v3324_v63, %v8666_v55 }
 0x63d   :  { %v7184_v43 = vmul.f32 -1.442695, %v3260_v19 }
 0x63f   :  { %7823 = vpow2.f32 %v7184_v43  ;;  %v8669_v43 = vperm.slane %v2907_v52, 2 }
 0x640   :  { %v3285_v30 = vpop.f32.mrf.mxu3 }
 0x641   :  { %v3286_v40 = vadd.f32 %v3285_v30, %v3273_v60 }
 0x642   :  { %v3261_v50 = vpop.f32.mrf.mxu1 }
 0x643   :  { %v7185_v29 = vmul.f32 -1.442695, %v3286_v40 }
 0x645   :  { %v7824_v38 = vpop.eup %7823  ;;  %7825 = vpow2.f32 %v7185_v29  ;;  %v3299_v29 = vadd.f32 %v3298_v37, %v8669_v43 }
 0x646   :  { %v3344_v4 = vadd.f32 1.0, %v7824_v38 }
 0x648   :  { %7827 = vrcp.f32 %v3344_v4  ;;  %v3287_v57 = vpop.f32.mrf.mxu3  ;;  %v3356_v52 = vand.u32 2147483648, %v3344_v4  ;;  %vm3350_vm4 = vweird.f32 %v3344_v4 }
 0x64a   :  { %v3311_v62 = vpop.f32.mrf.mxu1 }
 0x64b   :  { %v7826_v61 = vpop.eup %7825 }
 0x64c   :  { %v3363_v49 = vadd.f32 1.0, %v7826_v61  ;;  %v3312_v61 = vadd.f32 %v3311_v62, %v3299_v29  ;;  %v3357_v62 = vor.u32 1.1754944e-38, %v3356_v52 }
 0x64e   :  { %v7828_v33 = vpop.eup %7827  ;;  %7829 = vrcp.f32 %v3363_v49  ;;  %v3375_v46 = vand.u32 2147483648, %v3363_v49  ;;  %v3373_v51 = vand.u32 2147483647, %v3363_v49  ;;  %vm3369_vm5 = vweird.f32 %v3363_v49 }
 0x64f   :  { %v3346_v19 = vmul.f32 %v7828_v33, %v3344_v4  ;;  %vm3351_vm2 = vweird.f32 %v7828_v33 }
 0x650   :  { %v3337_v60 = vpop.f32.mrf.mxu3  ;;  %vm3352_vm6 = vmor %vm3350_vm4, %vm3351_vm2  ;;  %vm3374_vm8 = vcmp.eq.f32.partialorder %v3373_v51, 8.507059e+37 }
 0x651   :  { %v3347_v50 = vsub.f32 1.0, %v3346_v19  ;;  %v3338_v40 = vadd.f32 %v3337_v60, %v3325_v2  ;;  %v3354_v2 = vand.u32 2147483647, %v3344_v4  ;;  %v3376_v60 = vor.u32 1.1754944e-38, %v3375_v46 }
 0x652   :  { %v3313_v32 = vpop.f32.mrf.mxu1 }
 0x653   :  { %v7186_v38 = vmul.f32 -1.442695, %v3338_v40  ;;  %v3348_v30 = vmul.f32 %v7828_v33, %v3347_v50  ;;  %vm3355_vm9 = vcmp.eq.f32.partialorder %v3354_v2, 8.507059e+37 }
 0x654   :  { %v7830_v57 = vpop.eup %7829 }
 0x655   :  { %v3365_v48 = vmul.f32 %v7830_v57, %v3363_v49  ;;  %7831 = vpow2.f32 %v7186_v38  ;;  %v3349_v63 = vadd.f32 %v7828_v33, %v3348_v30  ;;  %vm3370_vm3 = vweird.f32 %v7830_v57 }
 0x656   :  { %7833 = vtanh.f32 %v3312_v61  ;;  %vm3371_vm7 = vmor %vm3369_vm5, %vm3370_vm3 }
 0x657   :  { %v3366_v39 = vsub.f32 1.0, %v3365_v48  ;;  %v3353_v50 = vsel %vm3352_vm6, %v7828_v33, %v3349_v63 }
 0x658   :  { %v3339_v55 = vpop.f32.mrf.mxu3 }
 0x659   :  { %v3367_v36 = vmul.f32 %v7830_v57, %v3366_v39  ;;  %v3358_v39 = vsel %vm3355_vm9, %v3357_v62, %v3353_v50  ;;  %v9891_v50 = vld [vmem:[#allocation16_spill] sm:$0xff] }
 0x65b   :  { %v7832_v19 = vpop.eup %7831  ;;  %v3368_v37 = vadd.f32 %v7830_v57, %v3367_v36 }
 0x65c   :  { %v3383_v48 = vadd.f32 1.0, %v7832_v19  ;;  %v7834_v29 = vpop.eup %7833 }
 0x65d   :  { %v3372_v40 = vsel %vm3371_vm7, %v7830_v57, %v3368_v37  ;;  %v3400_v4 = vmul.f32 %v7834_v29, %v3358_v39  ;;  %v9890_v37 = vld [vmem:[#allocation18_spill] sm:$0xff] }
 0x65e   :  { %v3377_v55 = vsel %vm3374_vm8, %v3376_v60, %v3372_v40  ;;  %7835 = vrcp.f32 %v3383_v48  ;;  %v3395_v46 = vand.u32 2147483648, %v3383_v48  ;;  %v3393_v57 = vand.u32 2147483647, %v3383_v48  ;;  %v9892_v40 = vld [vmem:[#allocation14_spill] sm:$0xff] }
 0x65f   :  { %v3399_v32 = vmul.f32 %v3377_v55, %v8578_v54  ;;  %vm3389_vm11 = vweird.f32 %v3383_v48  ;;  %v9893_v55 = vld [vmem:[#allocation19_spill] sm:$0xff] }
 0x660   :  { %v3396_v61 = vor.u32 1.1754944e-38, %v3395_v46  ;;  %vm3394_vm13 = vcmp.eq.f32.partialorder %v3393_v57, 8.507059e+37  ;;  %v3468_v46 = vperm.slane %v8654_v58, 3  ;;  %v3454_v57 = vperm.slane %v8654_v58, 1 }
 0x661   :  { %v8673_v49 = vadd.f32 %v3400_v4, %v3399_v32  ;;  %v9894_v32 = vld [vmem:[#allocation17_spill] sm:$0xff]  ;;  %v9895_v4 = vld [vmem:[#allocation15_spill] sm:$0xff] }
 0x663   :  { %7837 = vtanh.f32 %v8673_v49 }
 0x664   :  { %v7836_v38 = vpop.eup %7835 }
 0x665   :  { %v3385_v36 = vmul.f32 %v7836_v38, %v3383_v48  ;;  %vm3390_vm10 = vweird.f32 %v7836_v38 }
 0x666   :  { %vm3391_vm12 = vmor %vm3389_vm11, %vm3390_vm10 }
 0x667   :  { %v3386_v30 = vsub.f32 1.0, %v3385_v36  ;;  %v9896_v36 = vld [vmem:[#allocation21_spill] sm:$0xff] }
 0x669   :  { %v3387_v33 = vmul.f32 %v7836_v38, %v3386_v30  ;;  %v7838_v54 = vpop.eup %7837 }
 0x66b   :  { %v3388_v51 = vadd.f32 %v7836_v38, %v3387_v33  ;;  %v3461_v33 = vperm.slane %v8654_v58, 2 }
 0x66d   :  { %v3392_v63 = vsel %vm3391_vm12, %v7836_v38, %v3388_v51  ;;  %v3475_v51 = vperm.slane %v8654_v58, 4 }
 0x66e   :  { %v3397_v52 = vsel %vm3394_vm13, %v3396_v61, %v3392_v63  ;;  %v3482_v61 = vperm.slane %v8654_v58, 5  ;;  %v3489_v63 = vperm.slane %v8654_v58, 6 }
 0x66f   :  { %v8676_v2 = vmul.f32 %v7838_v54, %v3397_v52  ;;  %v9897_v54 = vmov 0  }
 0x671   :  { %v3678_v19 = vpack.c.bf16 %v8676_v2, %v8676_v2  ;;  %v3416_v60 = vmul.f32 %v8676_v2, %v9890_v37  ;;  %v3414_v62 = vmul.f32 %v8676_v2, %v9891_v50  ;;  %v3412_v48 = vmul.f32 %v8676_v2, %v9892_v40 }
 0x672   :  { %v3417_v39 = vmul.f32 %v8676_v2, %v9893_v55  ;;  %v3415_v29 = vmul.f32 %v8676_v2, %v9894_v32  ;;  %v3413_v38 = vmul.f32 %v8676_v2, %v9895_v4  ;;  %v3418_v30 = vmul.f32 %v8676_v2, %v9896_v36 }
 0x673   :  { %3700 = vmatmul.bf16.vlgmr.msrb.gmra.mxu1 %v3678_v19  ;;  %3726 = vmatmul.bf16.vlgmr.msrb.gmra.mxu3 %v3678_v19  ;;  %v3419_v52 = vmul.f32 %v8676_v2, %v8588_v9 }
 0x674   :  { %3428 = vadd.xlane.f32.xlu2 %v3416_v60  ;;  %3424 = vadd.xlane.f32.xlu1 %v3414_v62 }
 0x675   :  { %3420 = vadd.xlane.f32.xlu0 %v3412_v48  ;;  %4011 = vmatpush.bf16.msrb.mxu1 %v8349_v27 }
 0x676   :  { %4037 = vmatpush.bf16.msrb.mxu3 %v8352_v18 }
 0x679   :  { %4012 = vmatpush.bf16.msrb.mxu1 %v8362_v14 }
 0x67a   :  { %4038 = vmatpush.bf16.msrb.mxu3 %v8364_v16 }
 0x67c   :  { %3430 = vadd.xlane.f32.xlu2 %v3417_v39  ;;  %3426 = vadd.xlane.f32.xlu1 %v3415_v29 }
 0x67d   :  { %3422 = vadd.xlane.f32.xlu0 %v3413_v38  ;;  %4013 = vmatpush.bf16.msrb.mxu1 %v8373_v15 }
 0x67e   :  { %4039 = vmatpush.bf16.msrb.mxu3 %v8376_v59 }
 0x681   :  { %4014 = vmatpush.bf16.msrb.mxu1 %v8385_v8 }
 0x682   :  { %4040 = vmatpush.bf16.msrb.mxu3 %v8388_v10 }
 0x683   :  { %3752 = vmatmul.bf16.vlgmr.msra.gmra.mxu1 %v3678_v19  ;;  %3778 = vmatmul.bf16.vlgmr.msra.gmra.mxu3 %v3678_v19  ;;  %v3496_v19 = vperm.slane %v8654_v58, 7 }
 0x685   :  { %3432 = vadd.xlane.f32.xlu0 %v3418_v30  ;;  %4015 = vmatpush.bf16.msrb.mxu1 %v8397_v3 }
 0x686   :  { %4041 = vmatpush.bf16.msrb.mxu3 %v8400_v5 }
 0x689   :  { %4016 = vmatpush.bf16.msrb.mxu1 %v8411_v1 }
 0x68a   :  { %4042 = vmatpush.bf16.msrb.mxu3 %v8414_v28 }
 0x68d   :  { %4017 = vmatpush.bf16.msrb.mxu1 %v9865_v24 }
 0x68e   :  { %4043 = vmatpush.bf16.msrb.mxu3 %v9866_v26 }
 0x691   :  { %4018 = vmatpush.bf16.msrb.mxu1 %v9869_v56 }
 0x692   :  { %4044 = vmatpush.bf16.msrb.mxu3 %v9870_v7 }
 0x694   :  { %3473 = vperm.xlu2 %7550, %v3468_v46  }
 0x695   :  { %4063 = vmatpush.bf16.msra.mxu1 %v9871_v23  ;;  %3466 = vperm.xlu1 %7552, %v3461_v33   ;;  %v3453_v33 = vpop.permute.xlu2 %3452 }
 0x696   :  { %4089 = vmatpush.bf16.msra.mxu3 %v9872_v45 }
 0x699   :  { %4064 = vmatpush.bf16.msra.mxu1 %v9875_v31  ;;  %3459 = vperm.xlu0 %7551, %v3454_v57  }
 0x69a   :  { %4090 = vmatpush.bf16.msra.mxu3 %v9876_v6 }
 0x69c   :  { %3480 = vperm.xlu2 %7550, %v3475_v51  }
 0x69d   :  { %4065 = vmatpush.bf16.msra.mxu1 %v9879_v20  ;;  %3487 = vperm.xlu1 %7552, %v3482_v61  }
 0x69e   :  { %4091 = vmatpush.bf16.msra.mxu3 %v9880_v25 }
 0x6a1   :  { %4066 = vmatpush.bf16.msra.mxu1 %v9881_v47  ;;  %7553 = vset.pattern.permute.xlu0 %v9897_v54 }
 0x6a2   :  { %4092 = vmatpush.bf16.msra.mxu3 %v9882_v11 }
 0x6a4   :  { %3494 = vperm.xlu2 %7550, %v3489_v63  }
 0x6a5   :  { %4067 = vmatpush.bf16.msra.mxu1 %v9883_v13 }
 0x6a6   :  { %4093 = vmatpush.bf16.msra.mxu3 %v9884_v41 }
 0x6a9   :  { %4068 = vmatpush.bf16.msra.mxu1 %v9885_v22 }
 0x6aa   :  { %4094 = vmatpush.bf16.msra.mxu3 %v8537_v53 }
 0x6ad   :  { %4069 = vmatpush.bf16.msra.mxu1 %v8541_v21 }
 0x6ae   :  { %4095 = vmatpush.bf16.msra.mxu3 %v8551_v17 }
 0x6b1   :  { %4070 = vmatpush.bf16.msra.mxu1 %v8557_v42 }
 0x6b2   :  { %4096 = vmatpush.bf16.msra.mxu3 %v8569_v34 }
 0x6c7   :  { %3434 = vadd.xlane.f32.xlu1 %v3419_v52 }
 0x6e0   :  { %3501 = vperm.xlu1 %7552, %v3496_v19  }
 0x6e7   :  { %v3429_v57 = vpop.xlane.xlu2 %3428  ;;  %v3425_v51 = vpop.xlane.xlu1 %3424 }
 0x6e8   :  { %v3421_v61 = vpop.xlane.xlu0 %3420 }
 0x6e9   :  { %v3511_v41 = vadd.f32 %v3453_v33, %v3421_v61 }
 0x6ef   :  { %v3431_v2 = vpop.xlane.xlu2 %3430  ;;  %v3427_v63 = vpop.xlane.xlu1 %3426 }
 0x6f0   :  { %v8736_v60 = vpop.f32.mrf.mxu1  ;;  %v3423_v52 = vpop.xlane.xlu0 %3422 }
 0x6f6   :  { %v8738_v62 = vpop.f32.mrf.mxu3 }
 0x6f7   :  { %v3474_v58 = vpop.permute.xlu2 %3473 }
 0x6f8   :  { %v3703_v48 = vpop.f32.mrf.mxu1  ;;  %v3433_v42 = vpop.xlane.xlu0 %3432  ;;  %v3514_v13 = vadd.f32 %v3474_v58, %v3427_v63  ;;  %v3546_v58 = vperm.slane %v8649_v12, 3 }
 0x6fe   :  { %v3729_v39 = vpop.f32.mrf.mxu3 }
 0x6ff   :  { %v3481_v19 = vpop.permute.xlu2 %3480 }
 0x700   :  { %v8740_v29 = vpop.f32.mrf.mxu1  ;;  %v3515_v53 = vadd.f32 %v3481_v19, %v3429_v57  ;;  %v3543_v19 = vperm.slane %v8649_v12, 0 }
 0x702   :  { %v3524_v47 = vsel %vm3519_vm14, %v3515_v53, -inf }
 0x706   :  { %v8742_v38 = vpop.f32.mrf.mxu3 }
 0x707   :  { %v3467_v54 = vpop.permute.xlu1 %3466  ;;  %v3495_v39 = vpop.permute.xlu2 %3494 }
 0x708   :  { %v3755_v30 = vpop.f32.mrf.mxu1  ;;  %v3517_v22 = vadd.f32 %v3495_v39, %v3433_v42  ;;  %v3520_v42 = vsel %vm3519_vm14, %v3511_v41, -inf }
 0x709   :  { %v3513_v30 = vadd.f32 %v3467_v54, %v3425_v51  ;;  %v3525_v57 = vmax.f32 %v3520_v42, %v3524_v47  ;;  %v3550_v54 = vperm.slane %v8649_v12, 7 }
 0x70a   :  { %v3528_v20 = vsel %vm3519_vm14, %v3517_v22, -inf }
 0x70b   :  { %v3460_v17 = vpop.permute.xlu0 %3459  ;;  %v3522_v6 = vsel %vm3519_vm14, %v3513_v30, -inf }
 0x70c   :  { %v3529_v51 = vmax.f32 %v3522_v6, %v3528_v20  ;;  %v3549_v6 = vperm.slane %v8649_v12, 6 }
 0x70e   :  { %v3781_v46 = vpop.f32.mrf.mxu3 }
 0x70f   :  { %v3488_v34 = vpop.permute.xlu1 %3487  ;;  %v3512_v46 = vadd.f32 %v3460_v17, %v3423_v52  ;;  %v3523_v17 = vsel %vm3519_vm14, %v3514_v13, -inf }
 0x710   :  { %v3516_v21 = vadd.f32 %v3488_v34, %v3431_v2 }
 0x711   :  { %v3521_v31 = vsel %vm3519_vm14, %v3512_v46, -inf }
 0x712   :  { %v3526_v11 = vsel %vm3519_vm14, %v3516_v21, -inf }
 0x713   :  { %v3527_v34 = vmax.f32 %v3521_v31, %v3526_v11  ;;  %v3544_v31 = vperm.slane %v8649_v12, 1  ;;  %v3547_v11 = vperm.slane %v8649_v12, 4 }
 0x715   :  { %v3532_v61 = vmax.f32 %v3525_v57, %v3527_v34 }
 0x73a   :  { %v3435_v48 = vpop.xlane.xlu1 %3434 }
 0x752   :  { %v3502_v25 = vpop.permute.xlu1 %3501 }
 0x753   :  { %v3518_v45 = vadd.f32 %v3502_v25, %v3435_v48  ;;  %v3545_v25 = vperm.slane %v8649_v12, 2  ;;  %v3548_v48 = vperm.slane %v8649_v12, 5 }
 0x755   :  { %v3530_v33 = vsel %vm3519_vm14, %v3518_v45, -inf }
 0x756   :  { %v3531_v2 = vmax.f32 %v3523_v17, %v3530_v33 }
 0x758   :  { %v3533_v63 = vmax.f32 %v3529_v51, %v3531_v2 }
 0x75a   :  { %v3534_v52 = vmax.f32 %v3532_v61, %v3533_v63 }
 0x75c   :  { %vm3538_vm15 = vcmp.eq.f32.partialorder %v3514_v13, %v3534_v52  ;;  %vm3542_vm0 = vcmp.eq.f32.partialorder %v3518_v45, %v3534_v52  ;;  %vm3535_vm1 = vcmp.eq.f32.partialorder %v3511_v41, %v3534_v52  ;;  %vm3536_vm2 = vcmp.eq.f32.partialorder %v3512_v46, %v3534_v52 }
 0x75d   :  { %v3554_v20 = vsel %vm3538_vm15, %v3546_v58, 8  ;;  %v3558_v47 = vsel %vm3542_vm0, %v3550_v54, 8  ;;  %vm3537_vm3 = vcmp.eq.f32.partialorder %v3513_v30, %v3534_v52  ;;  %vm3539_vm4 = vcmp.eq.f32.partialorder %v3515_v53, %v3534_v52 }
 0x75e   :  { %v3562_v39 = vsel %vm3519_vm14, %v3554_v20, 2147483647  ;;  %v3572_v34 = vsel %vm3519_vm14, %v3558_v47, 2147483647  ;;  %vm3540_vm5 = vcmp.eq.f32.partialorder %v3516_v21, %v3534_v52  ;;  %vm3541_vm6 = vcmp.eq.f32.partialorder %v3517_v22, %v3534_v52 }
 0x75f   :  { %vm3573_vm7 = vcmp.lt.s32.totalorder %v3562_v39, %v3572_v34  ;;  %v3551_v42 = vsel %vm3535_vm1, %v3543_v19, 8  ;;  %v3552_v17 = vsel %vm3536_vm2, %v3544_v31, 8  ;;  %v3553_v33 = vsel %vm3537_vm3, %v3545_v25, 8 }
 0x760   :  { %v3555_v57 = vsel %vm3539_vm4, %v3547_v11, 8  ;;  %v3556_v51 = vsel %vm3540_vm5, %v3548_v48, 8  ;;  %v3557_v13 = vsel %vm3541_vm6, %v3549_v6, 8  ;;  %v3559_v45 = vsel %vm3519_vm14, %v3551_v42, 2147483647 }
 0x761   :  { %v3560_v41 = vsel %vm3519_vm14, %v3552_v17, 2147483647  ;;  %v3561_v30 = vsel %vm3519_vm14, %v3553_v33, 2147483647  ;;  %v3563_v53 = vsel %vm3519_vm14, %v3555_v57, 2147483647  ;;  %v3574_v22 = vsel %vm3573_vm7, %v3562_v39, %v3572_v34 }
 0x762   :  { %vm3564_vm8 = vcmp.lt.s32.totalorder %v3559_v45, %v3563_v53  ;;  %v3566_v46 = vsel %vm3519_vm14, %v3556_v51, 2147483647  ;;  %v3569_v21 = vsel %vm3519_vm14, %v3557_v13, 2147483647  ;;  %v9898_v19 = vlaneseq }
 0x763   :  { %v3565_v2 = vsel %vm3564_vm8, %v3559_v45, %v3563_v53  ;;  %vm3567_vm9 = vcmp.lt.s32.totalorder %v3560_v41, %v3566_v46  ;;  %vm3570_vm10 = vcmp.lt.s32.totalorder %v3561_v30, %v3569_v21  ;;  %v9781_v48 = vmov 0.0  }
 0x764   :  { %v3568_v61 = vsel %vm3567_vm9, %v3560_v41, %v3566_v46  ;;  %v3571_v63 = vsel %vm3570_vm10, %v3561_v30, %v3569_v21  ;;  %v8770_v31 = vand.u32 127, %v9898_v19 }
 0x765   :  { %vm3575_vm11 = vcmp.lt.s32.totalorder %v3565_v2, %v3568_v61  ;;  %vm3577_vm12 = vcmp.lt.s32.totalorder %v3571_v63, %v3574_v22 }
 0x766   :  { %v3576_v58 = vsel %vm3575_vm11, %v3565_v2, %v3568_v61  ;;  %v3578_v54 = vsel %vm3577_vm12, %v3571_v63, %v3574_v22  ;;  %9899 = vst [vmem:[#allocation18_spill] sm:$0xff] %v8770_v31  ;;  %vm3587_vm11 = vcmask 1041409   ;;  %vm3588_vm12 = vcmask 1042434  }
 0x767   :  { %vm3579_vm13 = vcmp.lt.s32.totalorder %v3576_v58, %v3578_v54 }
 0x768   :  { %v3580_v52 = vsel %vm3579_vm13, %v3576_v58, %v3578_v54  ;;  %vm3590_vm13 = vcmask 1043459  }
 0x769   :  { %3582 = vperm.xlu0 %7553, %v3580_v52  }
 0x771   :  { %7584 = vset.pattern.permute.xlu0 %v8649_v12 }
 0x7db   :  { %v3583_v25 = vpop.permute.xlu0 %3582 }
 0x7dc   :  { %v8773_v11 = vperm.slane %v3583_v25, %v8770_v31 }
 0x7de   :  { %vm3600_vm14 = vcmp.eq.s32.totalorder %v8649_v12, %v8773_v11 }
 0x7df   :  { %v8778_v6 = vsel %vm3600_vm14, 1.0, %v9781_v48  ;;  %v9926_v48 = vld [vmem:[#allocation64_spill] sm:$0xff]  ;;  %vm3592_vm14 = vcmask 1044484  }
 0x7e0   :  { %9900 = vst [vmem:[#allocation16_spill] sm:$0xff] %v8778_v6  ;;  %v3618_v20 = vperm.slane %v8778_v6, 2  ;;  %v3625_v47 = vperm.slane %v8778_v6, 3  ;;  %v3604_v39 = vperm.slane %v8778_v6, 0  ;;  %v3611_v34 = vperm.slane %v8778_v6, 1 }
 0x7e1   :  { %v3646_v33 = vperm.slane %v8778_v6, 6  ;;  %v3653_v57 = vperm.slane %v8778_v6, 7  ;;  %v3632_v51 = vperm.slane %v8778_v6, 4  ;;  %v3639_v13 = vperm.slane %v8778_v6, 5 }
 0x7e2   :  { %v7559_v42 = vpack.i.bf16 %v3625_v47, %v3618_v20  ;;  %v7554_v17 = vpack.i.bf16 %v3611_v34, %v3604_v39 }
 0x7e3   :  { %v7569_v45 = vpack.i.bf16 %v3653_v57, %v3646_v33  ;;  %v7564_v41 = vpack.i.bf16 %v3639_v13, %v3632_v51 }
 0x7e4   :  { %7560 = vperm.xlu1 %7552, %v7559_v42   ;;  %7555 = vperm.xlu2 %7550, %v7554_v17  }
 0x7ec   :  { %7570 = vperm.xlu1 %7552, %v7569_v45   ;;  %7565 = vperm.xlu2 %7550, %v7564_v41  }
 0x83e   :  { %v7556_v30 = vpop.permute.xlu2 %7555 }
 0x83f   :  { %v7558_v53 = vunpack.i.h.bf16 %v7556_v30  ;;  %v7557_v46 = vunpack.i.l.bf16 %v7556_v30 }
 0x841   :  { %v3661_v21 = vmul.f32 %v7558_v53, %v9895_v4  ;;  %v3660_v22 = vmul.f32 %v7557_v46, %v9892_v40 }
 0x843   :  { %v3668_v54 = vadd.f32 %v3661_v21, %v3660_v22  ;;  %v9901_v21 = vld [vmem:[#allocation20_spill] sm:$0xff] }
 0x844   :  { %v9902_v22 = vld [vmem:[#allocation24_spill] sm:$0xff] }
 0x846   :  { %v7566_v2 = vpop.permute.xlu2 %7565 }
 0x847   :  { %v7567_v52 = vunpack.i.l.bf16 %v7566_v2  ;;  %v7568_v25 = vunpack.i.h.bf16 %v7566_v2  ;;  %v9903_v2 = vld [vmem:[#allocation22_spill] sm:$0xff] }
 0x849   :  { %v3664_v39 = vmul.f32 %v7567_v52, %v9890_v37  ;;  %v3665_v17 = vmul.f32 %v7568_v25, %v9893_v55  ;;  %v9908_v52 = vld [vmem:[#allocation30_spill] sm:$0xff]  ;;  %v9910_v25 = vld [vmem:[#allocation33_spill] sm:$0xff] }
 0x856   :  { %v7561_v61 = vpop.permute.xlu1 %7560 }
 0x857   :  { %v7563_v63 = vunpack.i.h.bf16 %v7561_v61  ;;  %v7562_v58 = vunpack.i.l.bf16 %v7561_v61  ;;  %v9904_v61 = vld [vmem:[#allocation26_spill] sm:$0xff] }
 0x859   :  { %v3662_v19 = vmul.f32 %v7562_v58, %v9891_v50  ;;  %v3663_v20 = vmul.f32 %v7563_v63, %v9894_v32  ;;  %v9905_v63 = vld [vmem:[#allocation23_spill] sm:$0xff]  ;;  %v9906_v58 = vld [vmem:[#allocation28_spill] sm:$0xff] }
 0x85b   :  { %v3669_v47 = vadd.f32 %v3668_v54, %v3662_v19  ;;  %v9907_v54 = vld [vmem:[#allocation25_spill] sm:$0xff]  ;;  %v9909_v19 = vld [vmem:[#allocation27_spill] sm:$0xff] }
 0x85d   :  { %v3670_v34 = vadd.f32 %v3669_v47, %v3663_v20  ;;  %v9911_v20 = vld [vmem:[#allocation29_spill] sm:$0xff] }
 0x85e   :  { %v7571_v42 = vpop.permute.xlu1 %7570  ;;  %v9912_v47 = vld [vmem:[#allocation37_spill] sm:$0xff] }
 0x85f   :  { %v3671_v33 = vadd.f32 %v3670_v34, %v3664_v39  ;;  %v7573_v57 = vunpack.i.h.bf16 %v7571_v42  ;;  %v7572_v51 = vunpack.i.l.bf16 %v7571_v42  ;;  %v9913_v39 = vld [vmem:[#allocation31_spill] sm:$0xff]  ;;  %v9914_v34 = vld [vmem:[#allocation38_spill] sm:$0xff]  ;;  %v9915_v42 = vld [vmem:[#allocation32_spill] sm:$0xff] }
 0x861   :  { %v3666_v13 = vmul.f32 %v7572_v51, %v9896_v36  ;;  %v3672_v45 = vadd.f32 %v3671_v33, %v3665_v17  ;;  %v3667_v41 = vmul.f32 %v7573_v57, %v8588_v9  ;;  %v9916_v17 = vld [vmem:[#allocation44_spill] sm:$0xff]  ;;  %v9917_v33 = vld [vmem:[#allocation34_spill] sm:$0xff]  ;;  %v9919_v51 = vld [vmem:[#allocation39_spill] sm:$0xff] }
 0x862   :  { %v9918_v57 = vld [vmem:[#allocation48_spill] sm:$0xff] }
 0x863   :  { %v3673_v30 = vadd.f32 %v3672_v45, %v3666_v13  ;;  %v9920_v13 = vld [vmem:[#allocation52_spill] sm:$0xff]  ;;  %v9921_v45 = vld [vmem:[#allocation45_spill] sm:$0xff] }
 0x865   :  { %v3674_v53 = vadd.f32 %v3673_v30, %v3667_v41  ;;  %v9922_v41 = vld [vmem:[#allocation56_spill] sm:$0xff]  ;;  %v9923_v30 = vld [vmem:[#allocation49_spill] sm:$0xff] }
 0x867   :  { %v3677_v46 = vpack.c.bf16 %v3674_v53, %v3674_v53  ;;  %v9924_v53 = vld [vmem:[#allocation60_spill] sm:$0xff] }
 0x869   :  { %3687 = vmatmul.bf16.vlgmr.msrb.gmra.mxu0 %v3677_v46  ;;  %3713 = vmatmul.bf16.vlgmr.msrb.gmra.mxu2 %v3677_v46 }
 0x86a   :  { %3998 = vmatpush.bf16.msrb.mxu0 %v8344_v44  ;;  %4024 = vmatpush.bf16.msrb.mxu2 %v9901_v21 }
 0x86e   :  { %3999 = vmatpush.bf16.msrb.mxu0 %v8355_v35  ;;  %4025 = vmatpush.bf16.msrb.mxu2 %v8332_v0 }
 0x872   :  { %4000 = vmatpush.bf16.msrb.mxu0 %v9902_v22  ;;  %4026 = vmatpush.bf16.msrb.mxu2 %v9903_v2 }
 0x876   :  { %4001 = vmatpush.bf16.msrb.mxu0 %v9904_v61  ;;  %4027 = vmatpush.bf16.msrb.mxu2 %v9905_v63 }
 0x879   :  { %3739 = vmatmul.bf16.vlgmr.msra.gmra.mxu0 %v3677_v46  ;;  %3765 = vmatmul.bf16.vlgmr.msra.gmra.mxu2 %v3677_v46  ;;  %v9925_v46 = vld [vmem:[#allocation53_spill] sm:$0xff] }
 0x87a   :  { %4002 = vmatpush.bf16.msrb.mxu0 %v9906_v58  ;;  %4028 = vmatpush.bf16.msrb.mxu2 %v9907_v54 }
 0x87e   :  { %4003 = vmatpush.bf16.msrb.mxu0 %v9908_v52  ;;  %4029 = vmatpush.bf16.msrb.mxu2 %v9909_v19 }
 0x882   :  { %4004 = vmatpush.bf16.msrb.mxu0 %v9910_v25  ;;  %4030 = vmatpush.bf16.msrb.mxu2 %v9911_v20 }
 0x886   :  { %4005 = vmatpush.bf16.msrb.mxu0 %v9912_v47  ;;  %4031 = vmatpush.bf16.msrb.mxu2 %v9913_v39 }
 0x88a   :  { %4050 = vmatpush.bf16.msra.mxu0 %v9914_v34  ;;  %4076 = vmatpush.bf16.msra.mxu2 %v9915_v42 }
 0x88e   :  { %4051 = vmatpush.bf16.msra.mxu0 %v9916_v17  ;;  %4077 = vmatpush.bf16.msra.mxu2 %v9917_v33  ;;  %v9927_v17 = vld [vmem:[#allocation57_spill] sm:$0xff]  ;;  %v9928_v33 = vld [vmem:[#allocation67_spill] sm:$0xff] }
 0x892   :  { %4052 = vmatpush.bf16.msra.mxu0 %v9918_v57  ;;  %4078 = vmatpush.bf16.msra.mxu2 %v9919_v51  ;;  %v9929_v57 = vld [vmem:[#allocation61_spill] sm:$0xff] }
 0x896   :  { %4053 = vmatpush.bf16.msra.mxu0 %v9920_v13  ;;  %4079 = vmatpush.bf16.msra.mxu2 %v9921_v45  ;;  %v9930_v13 = vld [vmem:[#allocation36_spill] sm:$0xff] }
 0x89a   :  { %4054 = vmatpush.bf16.msra.mxu0 %v9922_v41  ;;  %4080 = vmatpush.bf16.msra.mxu2 %v9923_v30  ;;  %v9931_v30 = vld [vmem:[#allocation70_spill] sm:$0xff] }
 0x89e   :  { %4055 = vmatpush.bf16.msra.mxu0 %v9924_v53  ;;  %4081 = vmatpush.bf16.msra.mxu2 %v9925_v46 }
 0x8a2   :  { %4056 = vmatpush.bf16.msra.mxu0 %v9926_v48  ;;  %4082 = vmatpush.bf16.msra.mxu2 %v9927_v17 }
 0x8a6   :  { %4057 = vmatpush.bf16.msra.mxu0 %v9928_v33  ;;  %4083 = vmatpush.bf16.msra.mxu2 %v9929_v57 }
 0x8e6   :  { %v3688_v51 = vpop.f32.mrf.mxu0 }
 0x8e7   :  { %v3689_v42 = vadd.f32 %v3688_v51, %v9930_v13 }
 0x8e9   :  { %v3702_v45 = vadd.f32 %v8736_v60, %v3689_v42 }
 0x8eb   :  { %v7188_v41 = vmul.f32 -1.442695, %v3702_v45  ;;  %v9932_v45 = vld [vmem:[#allocation71_spill] sm:$0xff] }
 0x8ec   :  { %v3714_v34 = vpop.f32.mrf.mxu2 }
 0x8ed   :  { %7839 = vpow2.f32 %v7188_v41  ;;  %v3715_v53 = vadd.f32 %v3714_v34, %v9931_v30 }
 0x8ee   :  { %v3690_v39 = vpop.f32.mrf.mxu0 }
 0x8ef   :  { %v3728_v46 = vadd.f32 %v8738_v62, %v3715_v53 }
 0x8f1   :  { %v7189_v48 = vmul.f32 -1.442695, %v3728_v46 }
 0x8f3   :  { %v7840_v47 = vpop.eup %7839  ;;  %7841 = vpow2.f32 %v7189_v48 }
 0x8f4   :  { %v3786_v17 = vadd.f32 1.0, %v7840_v47  ;;  %v3716_v33 = vpop.f32.mrf.mxu2 }
 0x8f6   :  { %7843 = vrcp.f32 %v3786_v17  ;;  %v3740_v57 = vpop.f32.mrf.mxu0  ;;  %vm3792_vm1 = vweird.f32 %v3786_v17 }
 0x8f7   :  { %v3741_v62 = vadd.f32 %v3740_v57, %v8669_v43 }
 0x8f9   :  { %v7842_v20 = vpop.eup %7841 }
 0x8fa   :  { %v3805_v25 = vadd.f32 1.0, %v7842_v20  ;;  %v3754_v20 = vadd.f32 %v8740_v29, %v3741_v62 }
 0x8fc   :  { %v7844_v51 = vpop.eup %7843  ;;  %7845 = vrcp.f32 %v3805_v25  ;;  %v3766_v60 = vpop.f32.mrf.mxu2  ;;  %v3817_v19 = vand.u32 2147483648, %v3805_v25  ;;  %vm3811_vm2 = vweird.f32 %v3805_v25 }
 0x8fd   :  { %v3788_v42 = vmul.f32 %v7844_v51, %v3786_v17  ;;  %v3767_v41 = vadd.f32 %v3766_v60, %v9932_v45  ;;  %vm3793_vm15 = vweird.f32 %v7844_v51  ;;  %v3815_v60 = vand.u32 2147483647, %v3805_v25 }
 0x8fe   :  { %v3742_v13 = vpop.f32.mrf.mxu0  ;;  %vm3794_vm3 = vmor %vm3792_vm1, %vm3793_vm15  ;;  %vm3594_vm15 = vcmask 1045509   ;;  %vm3598_vm1 = vcmask 1047559  }
 0x8ff   :  { %v3789_v34 = vsub.f32 1.0, %v3788_v42  ;;  %v3780_v39 = vadd.f32 %v8742_v38, %v3767_v41  ;;  %v3798_v13 = vand.u32 2147483648, %v3786_v17  ;;  %v3796_v38 = vand.u32 2147483647, %v3786_v17 }
 0x900   :  { %v3818_v41 = vor.u32 1.1754944e-38, %v3817_v19  ;;  %vm3816_vm5 = vcmp.eq.f32.partialorder %v3815_v60, 8.507059e+37 }
 0x901   :  { %v7190_v53 = vmul.f32 -1.442695, %v3780_v39  ;;  %v3790_v47 = vmul.f32 %v7844_v51, %v3789_v34  ;;  %vm3797_vm6 = vcmp.eq.f32.partialorder %v3796_v38, 8.507059e+37 }
 0x902   :  { %v7846_v48 = vpop.eup %7845 }
 0x903   :  { %v3807_v33 = vmul.f32 %v7846_v48, %v3805_v25  ;;  %7847 = vpow2.f32 %v7190_v53  ;;  %v3791_v52 = vadd.f32 %v7844_v51, %v3790_v47  ;;  %vm3812_vm0 = vweird.f32 %v7846_v48 }
 0x904   :  { %v3768_v46 = vpop.f32.mrf.mxu2  ;;  %7849 = vtanh.f32 %v3754_v20  ;;  %vm3813_vm4 = vmor %vm3811_vm2, %vm3812_vm0  ;;  %v3799_v53 = vor.u32 1.1754944e-38, %v3798_v13  ;;  %vm3596_vm0 = vcmask 1046534  }
 0x905   :  { %v3808_v30 = vsub.f32 1.0, %v3807_v33  ;;  %v3795_v34 = vsel %vm3794_vm3, %v7844_v51, %v3791_v52  ;;  %vm3899_vm3 = vcmask 64512  }
 0x907   :  { %v3809_v54 = vmul.f32 %v7846_v48, %v3808_v30  ;;  %v3800_v30 = vsel %vm3797_vm6, %v3799_v53, %v3795_v34 }
 0x909   :  { %v7848_v42 = vpop.eup %7847  ;;  %v3810_v57 = vadd.f32 %v7846_v48, %v3809_v54 }
 0x90a   :  { %v3825_v39 = vadd.f32 1.0, %v7848_v42  ;;  %v7850_v33 = vpop.eup %7849 }
 0x90b   :  { %v3814_v29 = vsel %vm3813_vm4, %v7846_v48, %v3810_v57  ;;  %v3842_v17 = vmul.f32 %v7850_v33, %v3800_v30  ;;  %v9933_v33 = vld [vmem:[#allocation43_spill] sm:$0xff] }
 0x90c   :  { %v3819_v62 = vsel %vm3816_vm5, %v3818_v41, %v3814_v29  ;;  %7851 = vrcp.f32 %v3825_v39  ;;  %v3837_v52 = vand.u32 2147483648, %v3825_v39  ;;  %v3835_v51 = vand.u32 2147483647, %v3825_v39 }
 0x90d   :  { %v3841_v47 = vmul.f32 %v3819_v62, %v8673_v49  ;;  %vm3831_vm8 = vweird.f32 %v3825_v39 }
 0x90e   :  { %v3838_v13 = vor.u32 1.1754944e-38, %v3837_v52  ;;  %vm3836_vm10 = vcmp.eq.f32.partialorder %v3835_v51, 8.507059e+37  ;;  %v9938_v52 = vld [vmem:[#allocation54_spill] sm:$0xff] }
 0x90f   :  { %v8837_v25 = vadd.f32 %v3842_v17, %v3841_v47  ;;  %v9934_v17 = vld [vmem:[#allocation46_spill] sm:$0xff] }
 0x910   :  { %v9940_v51 = vld [vmem:[#allocation58_spill] sm:$0xff] }
 0x911   :  { %7853 = vtanh.f32 %v8837_v25 }
 0x912   :  { %v7852_v46 = vpop.eup %7851 }
 0x913   :  { %v3827_v54 = vmul.f32 %v7852_v46, %v3825_v39  ;;  %vm3832_vm7 = vweird.f32 %v7852_v46 }
 0x914   :  { %vm3833_vm9 = vmor %vm3831_vm8, %vm3832_vm7  ;;  %vm3675_vm7 = vcmp.eq.s32.totalorder %v8649_v12, 0  ;;  %vm3994_vm8 = vcmp.eq.s32.totalorder %v8649_v12, 1 }
 0x915   :  { %v3828_v20 = vsub.f32 1.0, %v3827_v54  ;;  %v9936_v54 = vld [vmem:[#allocation50_spill] sm:$0xff] }
 0x917   :  { %v3829_v19 = vmul.f32 %v7852_v46, %v3828_v20  ;;  %v7854_v49 = vpop.eup %7853  ;;  %v9937_v20 = vld [vmem:[#allocation51_spill] sm:$0xff] }
 0x919   :  { %v3830_v48 = vadd.f32 %v7852_v46, %v3829_v19  ;;  %v9939_v19 = vld [vmem:[#allocation55_spill] sm:$0xff] }
 0x91b   :  { %v3834_v60 = vsel %vm3833_vm9, %v7852_v46, %v3830_v48  ;;  %v9935_v46 = vld [vmem:[#allocation47_spill] sm:$0xff] }
 0x91c   :  { %v3839_v38 = vsel %vm3836_vm10, %v3838_v13, %v3834_v60  ;;  %v9941_v48 = vld [vmem:[#allocation59_spill] sm:$0xff]  ;;  %v9942_v13 = vld [vmem:[#allocation62_spill] sm:$0xff] }
 0x91d   :  { %v3845_v42 = vmul.f32 %v7854_v49, %v3839_v38  ;;  %v9943_v60 = vld [vmem:[#allocation63_spill] sm:$0xff]  ;;  %v9944_v49 = vld [vmem:[#allocation65_spill] sm:$0xff]  ;;  %v9945_v38 = vld [vmem:[#allocation66_spill] sm:$0xff] }
 0x91f   :  { %v3997_v57 = vpack.c.bf16 %v3845_v42, %v3845_v42  ;;  %v3848_v41 = vmul.f32 %v3845_v42, %v9891_v50  ;;  %v3847_v34 = vmul.f32 %v3845_v42, %v9895_v4  ;;  %v3846_v53 = vmul.f32 %v3845_v42, %v9892_v40 }
 0x920   :  { %v3851_v39 = vmul.f32 %v3845_v42, %v9893_v55  ;;  %v3849_v29 = vmul.f32 %v3845_v42, %v9894_v32  ;;  %v3850_v62 = vmul.f32 %v3845_v42, %v9890_v37  ;;  %v3852_v30 = vmul.f32 %v3845_v42, %v9896_v36 }
 0x921   :  { %4019 = vmatmul.bf16.vlgmr.msrb.gmra.mxu1 %v3997_v57  ;;  %4045 = vmatmul.bf16.vlgmr.msrb.gmra.mxu3 %v3997_v57  ;;  %v3853_v47 = vmul.f32 %v3845_v42, %v8588_v9  ;;  %v9946_v42 = vld [vmem:[#allocation68_spill] sm:$0xff] }
 0x922   :  { %3858 = vadd.xlane.f32.xlu1 %v3848_v41  ;;  %3856 = vadd.xlane.f32.xlu2 %v3847_v34 }
 0x923   :  { %3854 = vadd.xlane.f32.xlu0 %v3846_v53  ;;  %4329 = vmatpush.bf16.msrb.mxu1 %v8349_v27 }
 0x924   :  { %4355 = vmatpush.bf16.msrb.mxu3 %v8352_v18 }
 0x927   :  { %4330 = vmatpush.bf16.msrb.mxu1 %v8362_v14 }
 0x928   :  { %4356 = vmatpush.bf16.msrb.mxu3 %v8364_v16 }
 0x92a   :  { %3864 = vadd.xlane.f32.xlu1 %v3851_v39  ;;  %3860 = vadd.xlane.f32.xlu2 %v3849_v29 }
 0x92b   :  { %3862 = vadd.xlane.f32.xlu0 %v3850_v62  ;;  %4331 = vmatpush.bf16.msrb.mxu1 %v8373_v15 }
 0x92c   :  { %4357 = vmatpush.bf16.msrb.mxu3 %v8376_v59 }
 0x92f   :  { %4332 = vmatpush.bf16.msrb.mxu1 %v8385_v8 }
 0x930   :  { %4358 = vmatpush.bf16.msrb.mxu3 %v8388_v10 }
 0x931   :  { %4071 = vmatmul.bf16.vlgmr.msra.gmra.mxu1 %v3997_v57  ;;  %4097 = vmatmul.bf16.vlgmr.msra.gmra.mxu3 %v3997_v57  ;;  %v9947_v57 = vld [vmem:[#allocation69_spill] sm:$0xff] }
 0x932   :  { %3866 = vadd.xlane.f32.xlu2 %v3852_v30 }
 0x933   :  { %3868 = vadd.xlane.f32.xlu0 %v3853_v47  ;;  %4333 = vmatpush.bf16.msrb.mxu1 %v8397_v3 }
 0x934   :  { %4359 = vmatpush.bf16.msrb.mxu3 %v8400_v5 }
 0x937   :  { %4334 = vmatpush.bf16.msrb.mxu1 %v8411_v1 }
 0x938   :  { %4360 = vmatpush.bf16.msrb.mxu3 %v8414_v28 }
 0x93b   :  { %4335 = vmatpush.bf16.msrb.mxu1 %v9865_v24 }
 0x93c   :  { %4361 = vmatpush.bf16.msrb.mxu3 %v9866_v26 }
 0x93f   :  { %4336 = vmatpush.bf16.msrb.mxu1 %v9869_v56 }
 0x940   :  { %4362 = vmatpush.bf16.msrb.mxu3 %v9870_v7 }
 0x943   :  { %4381 = vmatpush.bf16.msra.mxu1 %v9871_v23 }
 0x944   :  { %4407 = vmatpush.bf16.msra.mxu3 %v9933_v33 }
 0x947   :  { %4382 = vmatpush.bf16.msra.mxu1 %v9934_v17 }
 0x948   :  { %4408 = vmatpush.bf16.msra.mxu3 %v9935_v46 }
 0x94b   :  { %4383 = vmatpush.bf16.msra.mxu1 %v9936_v54 }
 0x94c   :  { %4409 = vmatpush.bf16.msra.mxu3 %v9937_v20 }
 0x94f   :  { %4384 = vmatpush.bf16.msra.mxu1 %v9938_v52 }
 0x950   :  { %4410 = vmatpush.bf16.msra.mxu3 %v9939_v19 }
 0x953   :  { %4385 = vmatpush.bf16.msra.mxu1 %v9940_v51 }
 0x954   :  { %4411 = vmatpush.bf16.msra.mxu3 %v9941_v48 }
 0x957   :  { %4386 = vmatpush.bf16.msra.mxu1 %v9942_v13 }
 0x958   :  { %4412 = vmatpush.bf16.msra.mxu3 %v9943_v60 }
 0x95b   :  { %4387 = vmatpush.bf16.msra.mxu1 %v9944_v49 }
 0x95c   :  { %4413 = vmatpush.bf16.msra.mxu3 %v9945_v38 }
 0x95f   :  { %4388 = vmatpush.bf16.msra.mxu1 %v9946_v42 }
 0x960   :  { %4414 = vmatpush.bf16.msra.mxu3 %v9947_v57 }
 0x995   :  { %v3857_v41 = vpop.xlane.xlu2 %3856  ;;  %v3859_v53 = vpop.xlane.xlu1 %3858 }
 0x996   :  { %v3855_v34 = vpop.xlane.xlu0 %3854  ;;  %v3880_v39 = vperm.slane %v3857_v41, %v8770_v31  ;;  %v3881_v62 = vperm.slane %v3859_v53, %v8770_v31 }
 0x997   :  { %v3879_v29 = vperm.slane %v3855_v34, %v8770_v31 }
 0x999   :  { %v3887_v30 = vsel %vm3587_vm11, %v3880_v39, %v3879_v29 }
 0x99a   :  { %v3888_v57 = vsel %vm3588_vm12, %v3881_v62, %v3887_v30  ;;  %v3897_v30 = vld [vmem:[#allocation9 + $0x8] sm:$0xff] }
 0x99d   :  { %v3861_v47 = vpop.xlane.xlu2 %3860  ;;  %v3865_v34 = vpop.xlane.xlu1 %3864 }
 0x99e   :  { %v3882_v38 = vperm.slane %v3861_v47, %v8770_v31  ;;  %v3863_v42 = vpop.xlane.xlu0 %3862  ;;  %v8885_v49 = vpop.f32.mrf.mxu1  ;;  %v3884_v39 = vperm.slane %v3865_v34, %v8770_v31  ;;  %v9786_v47 = vmax.f32 %v8778_v6, 0.0 }
 0x99f   :  { %v3883_v60 = vperm.slane %v3863_v42, %v8770_v31 }
 0x9a0   :  { %v3889_v41 = vsel %vm3590_vm13, %v3882_v38, %v3888_v57  ;;  %vm3870_vm2 = vcmp.gt.f32.partialorder %v9786_v47, 0.5 }
 0x9a1   :  { %v3890_v53 = vsel %vm3592_vm14, %v3883_v60, %v3889_v41 }
 0x9a2   :  { %v3891_v38 = vsel %vm3594_vm15, %v3884_v39, %v3890_v53 }
 0x9a4   :  { %v8891_v13 = vpop.f32.mrf.mxu3 }
 0x9a5   :  { %v3867_v29 = vpop.xlane.xlu2 %3866 }
 0x9a6   :  { %v3885_v48 = vperm.slane %v3867_v29, %v8770_v31  ;;  %v3869_v62 = vpop.xlane.xlu0 %3868  ;;  %v4022_v42 = vpop.f32.mrf.mxu1 }
 0x9a7   :  { %v3886_v57 = vperm.slane %v3869_v62, %v8770_v31 }
 0x9a8   :  { %v3892_v60 = vsel %vm3596_vm0, %v3885_v48, %v3891_v38 }
 0x9a9   :  { %v3893_v41 = vsel %vm3598_vm1, %v3886_v57, %v3892_v60 }
 0x9aa   :  { %v3895_v34 = vsel %vm3870_vm2, -1e+30, %v3893_v41 }
 0x9ab   :  { %v3898_v51 = vadd.f32 %v3897_v30, %v3895_v34 }
 0x9ac   :  { %v4048_v19 = vpop.f32.mrf.mxu3 }
 0x9ad   :  { %v3900_v29 = vsel %vm3899_vm3, %v3898_v51, -inf }
 0x9ae   :  { %v3901_v52 = vrot.slane %v3900_v29, 4  ;;  %v8903_v42 = vpop.f32.mrf.mxu1 }
 0x9b0   :  { %v3902_v53 = vmax.f32 %v3900_v29, %v3901_v52  ;;  %v3676_v29 = vsel %vm3675_vm7, %v8773_v11, 0 }
 0x9b2   :  { %v3903_v39 = vrot.slane %v3902_v53, 2 }
 0x9b4   :  { %v3904_v62 = vmax.f32 %v3902_v53, %v3903_v39  ;;  %v8905_v31 = vpop.f32.mrf.mxu3  ;;  %v9949_v53 = vmov 0.0  }
 0x9b6   :  { %v3905_v48 = vrot.slane %v3904_v62, 1  ;;  %v4074_v38 = vpop.f32.mrf.mxu1 }
 0x9b8   :  { %v3906_v6 = vmax.f32 %v3904_v62, %v3905_v48 }
 0x9ba   :  { %vm3907_vm4 = vcmp.eq.f32.partialorder %v3898_v51, %v3906_v6 }
 0x9bb   :  { %v3908_v57 = vsel %vm3907_vm4, %v8649_v12, 8 }
 0x9bc   :  { %v3909_v60 = vsel %vm3899_vm3, %v3908_v57, 2147483647  ;;  %v4100_v30 = vpop.f32.mrf.mxu3 }
 0x9bd   :  { %v3910_v19 = vrot.slane %v3909_v60, 4 }
 0x9bf   :  { %vm3911_vm5 = vcmp.lt.s32.totalorder %v3909_v60, %v3910_v19 }
 0x9c0   :  { %v3912_v41 = vsel %vm3911_vm5, %v3909_v60, %v3910_v19 }
 0x9c1   :  { %v3913_v34 = vrot.slane %v3912_v41, 2 }
 0x9c3   :  { %vm3914_vm6 = vcmp.lt.s32.totalorder %v3912_v41, %v3913_v34 }
 0x9c4   :  { %v3915_v47 = vsel %vm3914_vm6, %v3912_v41, %v3913_v34 }
 0x9c5   :  { %v3916_v52 = vrot.slane %v3915_v47, 1 }
 0x9c7   :  { %vm3917_vm9 = vcmp.lt.s32.totalorder %v3915_v47, %v3916_v52 }
 0x9c8   :  { %v3918_v6 = vsel %vm3917_vm9, %v3915_v47, %v3916_v52 }
 0x9c9   :  { %vm3919_vm10 = vcmp.eq.s32.totalorder %v8649_v12, %v3918_v6  ;;  %v8913_v51 = vsel %vm3994_vm8, %v3918_v6, %v3676_v29 }
 0x9ca   :  { %9948 = vst [vmem:[#allocation14_spill] sm:$0xff] %v8913_v51  ;;  %v8916_v39 = vsel %vm3919_vm10, 1.0, %v9949_v53 }
 0x9cb   :  { %9950 = vst [vmem:[#allocation19_spill] sm:$0xff] %v8916_v39  ;;  %v3951_v62 = vperm.slane %v8916_v39, 4  ;;  %v3958_v48 = vperm.slane %v8916_v39, 5  ;;  %v3937_v38 = vperm.slane %v8916_v39, 2  ;;  %v3944_v57 = vperm.slane %v8916_v39, 3 }
 0x9cc   :  { %v3923_v60 = vperm.slane %v8916_v39, 0  ;;  %v3930_v11 = vperm.slane %v8916_v39, 1  ;;  %v3965_v41 = vperm.slane %v8916_v39, 6  ;;  %v3972_v34 = vperm.slane %v8916_v39, 7 }
 0x9cd   :  { %v7585_v47 = vpack.i.bf16 %v3958_v48, %v3951_v62  ;;  %v7579_v30 = vpack.i.bf16 %v3944_v57, %v3937_v38 }
 0x9ce   :  { %v7574_v19 = vpack.i.bf16 %v3930_v11, %v3923_v60  ;;  %v7590_v52 = vpack.i.bf16 %v3972_v34, %v3965_v41 }
 0x9cf   :  { %7586 = vperm.xlu0 %7584, %v7585_v47   ;;  %7580 = vperm.xlu2 %7550, %v7579_v30  }
 0x9d0   :  { %7575 = vperm.xlu1 %7552, %v7574_v19  }
 0x9d8   :  { %7591 = vperm.xlu1 %7552, %v7590_v52  }
 0xa29   :  { %v7581_v29 = vpop.permute.xlu2 %7580 }
 0xa2a   :  { %v7582_v53 = vunpack.i.l.bf16 %v7581_v29  ;;  %v7583_v54 = vunpack.i.h.bf16 %v7581_v29 }
 0xa2c   :  { %v3981_v38 = vmul.f32 %v7582_v53, %v9891_v50  ;;  %v3982_v11 = vmul.f32 %v7583_v54, %v9894_v32  ;;  %v9952_v54 = vld [vmem:[#allocation30_spill] sm:$0xff] }
 0xa41   :  { %v7587_v20 = vpop.permute.xlu0 %7586 }
 0xa42   :  { %v7576_v6 = vpop.permute.xlu1 %7575  ;;  %v7588_v57 = vunpack.i.l.bf16 %v7587_v20  ;;  %v7589_v47 = vunpack.i.h.bf16 %v7587_v20  ;;  %v9953_v20 = vld [vmem:[#allocation27_spill] sm:$0xff] }
 0xa43   :  { %v7578_v51 = vunpack.i.h.bf16 %v7576_v6  ;;  %v7577_v12 = vunpack.i.l.bf16 %v7576_v6 }
 0xa44   :  { %v3983_v41 = vmul.f32 %v7588_v57, %v9890_v37  ;;  %v3984_v6 = vmul.f32 %v7589_v47, %v9893_v55  ;;  %v9956_v57 = vld [vmem:[#allocation37_spill] sm:$0xff]  ;;  %v9959_v47 = vld [vmem:[#allocation32_spill] sm:$0xff] }
 0xa45   :  { %v3980_v62 = vmul.f32 %v7578_v51, %v9895_v4  ;;  %v3979_v48 = vmul.f32 %v7577_v12, %v9892_v40 }
 0xa47   :  { %v3987_v60 = vadd.f32 %v3980_v62, %v3979_v48 }
 0xa49   :  { %v3988_v30 = vadd.f32 %v3987_v60, %v3981_v38  ;;  %v9955_v38 = vld [vmem:[#allocation29_spill] sm:$0xff]  ;;  %v9957_v60 = vld [vmem:[#allocation31_spill] sm:$0xff] }
 0xa4a   :  { %v7592_v19 = vpop.permute.xlu1 %7591 }
 0xa4b   :  { %v3989_v34 = vadd.f32 %v3988_v30, %v3982_v11  ;;  %v7593_v52 = vunpack.i.l.bf16 %v7592_v19  ;;  %v7594_v29 = vunpack.i.h.bf16 %v7592_v19  ;;  %v9958_v11 = vld [vmem:[#allocation38_spill] sm:$0xff]  ;;  %v9960_v30 = vld [vmem:[#allocation44_spill] sm:$0xff] }
 0xa4c   :  { %v9961_v19 = vld [vmem:[#allocation34_spill] sm:$0xff] }
 0xa4d   :  { %v3990_v39 = vadd.f32 %v3989_v34, %v3983_v41  ;;  %v3985_v51 = vmul.f32 %v7593_v52, %v9896_v36  ;;  %v3986_v53 = vmul.f32 %v7594_v29, %v8588_v9  ;;  %v9962_v41 = vld [vmem:[#allocation48_spill] sm:$0xff]  ;;  %v9963_v34 = vld [vmem:[#allocation39_spill] sm:$0xff] }
 0xa4e   :  { %v9964_v52 = vld [vmem:[#allocation52_spill] sm:$0xff] }
 0xa4f   :  { %v3991_v12 = vadd.f32 %v3990_v39, %v3984_v6  ;;  %v9954_v39 = vld [vmem:[#allocation33_spill] sm:$0xff]  ;;  %v9966_v29 = vld [vmem:[#allocation56_spill] sm:$0xff] }
 0xa50   :  { %v9965_v6 = vld [vmem:[#allocation45_spill] sm:$0xff] }
 0xa51   :  { %v3992_v46 = vadd.f32 %v3991_v12, %v3985_v51  ;;  %v9967_v51 = vld [vmem:[#allocation49_spill] sm:$0xff]  ;;  %v9968_v12 = vld [vmem:[#allocation60_spill] sm:$0xff] }
 0xa53   :  { %v3993_v62 = vadd.f32 %v3992_v46, %v3986_v53  ;;  %v9951_v46 = vld [vmem:[#allocation25_spill] sm:$0xff] }
 0xa54   :  { %v9969_v53 = vld [vmem:[#allocation53_spill] sm:$0xff] }
 0xa55   :  { %v3996_v48 = vpack.c.bf16 %v3993_v62, %v3993_v62  ;;  %v9970_v62 = vld [vmem:[#allocation64_spill] sm:$0xff] }
 0xa57   :  { %4006 = vmatmul.bf16.vlgmr.msrb.gmra.mxu0 %v3996_v48  ;;  %4032 = vmatmul.bf16.vlgmr.msrb.gmra.mxu2 %v3996_v48 }
 0xa58   :  { %4316 = vmatpush.bf16.msrb.mxu0 %v8344_v44  ;;  %4342 = vmatpush.bf16.msrb.mxu2 %v9901_v21 }
 0xa5c   :  { %4317 = vmatpush.bf16.msrb.mxu0 %v8355_v35  ;;  %4343 = vmatpush.bf16.msrb.mxu2 %v8332_v0 }
 0xa60   :  { %4318 = vmatpush.bf16.msrb.mxu0 %v9902_v22  ;;  %4344 = vmatpush.bf16.msrb.mxu2 %v9903_v2 }
 0xa64   :  { %4319 = vmatpush.bf16.msrb.mxu0 %v9904_v61  ;;  %4345 = vmatpush.bf16.msrb.mxu2 %v9905_v63 }
 0xa67   :  { %4058 = vmatmul.bf16.vlgmr.msra.gmra.mxu0 %v3996_v48  ;;  %4084 = vmatmul.bf16.vlgmr.msra.gmra.mxu2 %v3996_v48  ;;  %v9971_v48 = vld [vmem:[#allocation57_spill] sm:$0xff] }
 0xa68   :  { %4320 = vmatpush.bf16.msrb.mxu0 %v9906_v58  ;;  %4346 = vmatpush.bf16.msrb.mxu2 %v9951_v46 }
 0xa6c   :  { %4321 = vmatpush.bf16.msrb.mxu0 %v9952_v54  ;;  %4347 = vmatpush.bf16.msrb.mxu2 %v9953_v20 }
 0xa70   :  { %4322 = vmatpush.bf16.msrb.mxu0 %v9954_v39  ;;  %4348 = vmatpush.bf16.msrb.mxu2 %v9955_v38 }
 0xa74   :  { %4323 = vmatpush.bf16.msrb.mxu0 %v9956_v57  ;;  %4349 = vmatpush.bf16.msrb.mxu2 %v9957_v60 }
 0xa78   :  { %4368 = vmatpush.bf16.msra.mxu0 %v9958_v11  ;;  %4394 = vmatpush.bf16.msra.mxu2 %v9959_v47 }
 0xa7c   :  { %4369 = vmatpush.bf16.msra.mxu0 %v9960_v30  ;;  %4395 = vmatpush.bf16.msra.mxu2 %v9961_v19  ;;  %v9972_v19 = vld [vmem:[#allocation67_spill] sm:$0xff] }
 0xa80   :  { %4370 = vmatpush.bf16.msra.mxu0 %v9962_v41  ;;  %4396 = vmatpush.bf16.msra.mxu2 %v9963_v34  ;;  %v9973_v41 = vld [vmem:[#allocation61_spill] sm:$0xff] }
 0xa84   :  { %4371 = vmatpush.bf16.msra.mxu0 %v9964_v52  ;;  %4397 = vmatpush.bf16.msra.mxu2 %v9965_v6  ;;  %v9974_v52 = vld [vmem:[#allocation36_spill] sm:$0xff] }
 0xa88   :  { %4372 = vmatpush.bf16.msra.mxu0 %v9966_v29  ;;  %4398 = vmatpush.bf16.msra.mxu2 %v9967_v51  ;;  %v9975_v51 = vld [vmem:[#allocation70_spill] sm:$0xff] }
 0xa8c   :  { %4373 = vmatpush.bf16.msra.mxu0 %v9968_v12  ;;  %4399 = vmatpush.bf16.msra.mxu2 %v9969_v53 }
 0xa90   :  { %4374 = vmatpush.bf16.msra.mxu0 %v9970_v62  ;;  %4400 = vmatpush.bf16.msra.mxu2 %v9971_v48 }
 0xa94   :  { %4375 = vmatpush.bf16.msra.mxu0 %v9972_v19  ;;  %4401 = vmatpush.bf16.msra.mxu2 %v9973_v41 }
 0xad4   :  { %v4007_v34 = vpop.f32.mrf.mxu0 }
 0xad5   :  { %v4008_v30 = vadd.f32 %v4007_v34, %v9974_v52 }
 0xad7   :  { %v4021_v6 = vadd.f32 %v8885_v49, %v4008_v30 }
 0xad9   :  { %v7192_v29 = vmul.f32 -1.442695, %v4021_v6 }
 0xada   :  { %v4033_v47 = vpop.f32.mrf.mxu2 }
 0xadb   :  { %7855 = vpow2.f32 %v7192_v29  ;;  %v4034_v12 = vadd.f32 %v4033_v47, %v9975_v51 }
 0xadc   :  { %v4009_v11 = vpop.f32.mrf.mxu0 }
 0xadd   :  { %v4047_v53 = vadd.f32 %v8891_v13, %v4034_v12 }
 0xadf   :  { %v7193_v62 = vmul.f32 -1.442695, %v4047_v53 }
 0xae1   :  { %v7856_v60 = vpop.eup %7855  ;;  %7857 = vpow2.f32 %v7193_v62 }
 0xae2   :  { %v4105_v48 = vadd.f32 1.0, %v7856_v60  ;;  %v4035_v19 = vpop.f32.mrf.mxu2 }
 0xae4   :  { %7859 = vrcp.f32 %v4105_v48  ;;  %v4059_v41 = vpop.f32.mrf.mxu0  ;;  %vm4111_vm5 = vweird.f32 %v4105_v48 }
 0xae5   :  { %v4060_v13 = vadd.f32 %v4059_v41, %v8669_v43 }
 0xae7   :  { %v7858_v57 = vpop.eup %7857 }
 0xae8   :  { %v4124_v38 = vadd.f32 1.0, %v7858_v57  ;;  %v4073_v57 = vadd.f32 %v8903_v42, %v4060_v13 }
 0xaea   :  { %v7860_v34 = vpop.eup %7859  ;;  %7861 = vrcp.f32 %v4124_v38  ;;  %v4085_v49 = vpop.f32.mrf.mxu2  ;;  %v4136_v52 = vand.u32 2147483648, %v4124_v38  ;;  %vm4130_vm6 = vweird.f32 %v4124_v38 }
 0xaeb   :  { %v4107_v30 = vmul.f32 %v7860_v34, %v4105_v48  ;;  %v4086_v6 = vadd.f32 %v4085_v49, %v9932_v45  ;;  %vm4112_vm2 = vweird.f32 %v7860_v34  ;;  %v4117_v49 = vand.u32 2147483648, %v4105_v48 }
 0xaec   :  { %v4061_v29 = vpop.f32.mrf.mxu0  ;;  %vm4113_vm7 = vmor %vm4111_vm5, %vm4112_vm2 }
 0xaed   :  { %v4108_v47 = vsub.f32 1.0, %v4107_v30  ;;  %v4099_v11 = vadd.f32 %v8905_v31, %v4086_v6  ;;  %v4134_v30 = vand.u32 2147483647, %v4124_v38  ;;  %v4115_v31 = vand.u32 2147483647, %v4105_v48 }
 0xaee   :  { %v4137_v29 = vor.u32 1.1754944e-38, %v4136_v52 }
 0xaef   :  { %v7194_v12 = vmul.f32 -1.442695, %v4099_v11  ;;  %v4109_v60 = vmul.f32 %v7860_v34, %v4108_v47  ;;  %vm4135_vm9 = vcmp.eq.f32.partialorder %v4134_v30, 8.507059e+37  ;;  %vm4116_vm10 = vcmp.eq.f32.partialorder %v4115_v31, 8.507059e+37 }
 0xaf0   :  { %v7862_v53 = vpop.eup %7861 }
 0xaf1   :  { %v4126_v19 = vmul.f32 %v7862_v53, %v4124_v38  ;;  %7863 = vpow2.f32 %v7194_v12  ;;  %v4110_v39 = vadd.f32 %v7860_v34, %v4109_v60  ;;  %vm4131_vm4 = vweird.f32 %v7862_v53 }
 0xaf2   :  { %v4087_v62 = vpop.f32.mrf.mxu2  ;;  %7865 = vtanh.f32 %v4073_v57  ;;  %vm4132_vm8 = vmor %vm4130_vm6, %vm4131_vm4  ;;  %v4118_v12 = vor.u32 1.1754944e-38, %v4117_v49 }
 0xaf3   :  { %v4127_v51 = vsub.f32 1.0, %v4126_v19  ;;  %v4114_v47 = vsel %vm4113_vm7, %v7860_v34, %v4110_v39 }
 0xaf5   :  { %v4128_v20 = vmul.f32 %v7862_v53, %v4127_v51  ;;  %v4119_v51 = vsel %vm4116_vm10, %v4118_v12, %v4114_v47 }
 0xaf7   :  { %v7864_v6 = vpop.eup %7863  ;;  %v4129_v41 = vadd.f32 %v7862_v53, %v4128_v20 }
 0xaf8   :  { %v4144_v11 = vadd.f32 1.0, %v7864_v6  ;;  %v7866_v19 = vpop.eup %7865 }
 0xaf9   :  { %v4133_v42 = vsel %vm4132_vm8, %v7862_v53, %v4129_v41  ;;  %v4161_v48 = vmul.f32 %v7866_v19, %v4119_v51  ;;  %v9976_v19 = vld [vmem:[#allocation47_spill] sm:$0xff] }
 0xafa   :  { %v4138_v13 = vsel %vm4135_vm9, %v4137_v29, %v4133_v42  ;;  %7867 = vrcp.f32 %v4144_v11  ;;  %v4156_v39 = vand.u32 2147483648, %v4144_v11  ;;  %v4154_v34 = vand.u32 2147483647, %v4144_v11 }
 0xafb   :  { %v4160_v60 = vmul.f32 %v4138_v13, %v8837_v25  ;;  %vm4150_vm4 = vweird.f32 %v4144_v11 }
 0xafc   :  { %v4157_v49 = vor.u32 1.1754944e-38, %v4156_v39  ;;  %vm4155_vm6 = vcmp.eq.f32.partialorder %v4154_v34, 8.507059e+37  ;;  %v9981_v39 = vld [vmem:[#allocation58_spill] sm:$0xff] }
 0xafd   :  { %v8975_v38 = vadd.f32 %v4161_v48, %v4160_v60  ;;  %v9977_v48 = vld [vmem:[#allocation50_spill] sm:$0xff] }
 0xafe   :  { %v9983_v34 = vld [vmem:[#allocation62_spill] sm:$0xff] }
 0xaff   :  { %7869 = vtanh.f32 %v8975_v38 }
 0xb00   :  { %v7868_v62 = vpop.eup %7867 }
 0xb01   :  { %v4146_v20 = vmul.f32 %v7868_v62, %v4144_v11  ;;  %vm4151_vm2 = vweird.f32 %v7868_v62 }
 0xb02   :  { %vm4152_vm5 = vmor %vm4150_vm4, %vm4151_vm2 }
 0xb03   :  { %v4147_v57 = vsub.f32 1.0, %v4146_v20  ;;  %v9979_v20 = vld [vmem:[#allocation54_spill] sm:$0xff] }
 0xb05   :  { %v4148_v52 = vmul.f32 %v7868_v62, %v4147_v57  ;;  %v7870_v25 = vpop.eup %7869  ;;  %v9980_v57 = vld [vmem:[#allocation55_spill] sm:$0xff] }
 0xb07   :  { %v4149_v53 = vadd.f32 %v7868_v62, %v4148_v52  ;;  %v9982_v52 = vld [vmem:[#allocation59_spill] sm:$0xff] }
 0xb09   :  { %v4153_v30 = vsel %vm4152_vm5, %v7868_v62, %v4149_v53  ;;  %v9978_v62 = vld [vmem:[#allocation51_spill] sm:$0xff] }
 0xb0a   :  { %v4158_v31 = vsel %vm4155_vm6, %v4157_v49, %v4153_v30  ;;  %v9984_v53 = vld [vmem:[#allocation63_spill] sm:$0xff]  ;;  %v9985_v49 = vld [vmem:[#allocation65_spill] sm:$0xff]  ;;  %v9986_v30 = vld [vmem:[#allocation66_spill] sm:$0xff] }
 0xb0b   :  { %v4164_v6 = vmul.f32 %v7870_v25, %v4158_v31  ;;  %v9987_v25 = vld [vmem:[#allocation68_spill] sm:$0xff]  ;;  %v9988_v31 = vld [vmem:[#allocation69_spill] sm:$0xff] }
 0xb0d   :  { %v4315_v41 = vpack.c.bf16 %v4164_v6, %v4164_v6  ;;  %v4167_v29 = vmul.f32 %v4164_v6, %v9891_v50  ;;  %v4166_v47 = vmul.f32 %v4164_v6, %v9895_v4  ;;  %v4165_v12 = vmul.f32 %v4164_v6, %v9892_v40 }
 0xb0e   :  { %v4169_v11 = vmul.f32 %v4164_v6, %v9890_v37  ;;  %v4168_v42 = vmul.f32 %v4164_v6, %v9894_v32  ;;  %v4171_v13 = vmul.f32 %v4164_v6, %v9896_v36  ;;  %v4170_v51 = vmul.f32 %v4164_v6, %v9893_v55 }
 0xb0f   :  { %4337 = vmatmul.bf16.vlgmr.msrb.gmra.mxu1 %v4315_v41  ;;  %4363 = vmatmul.bf16.vlgmr.msrb.gmra.mxu3 %v4315_v41  ;;  %v4172_v60 = vmul.f32 %v4164_v6, %v8588_v9 }
 0xb10   :  { %4177 = vadd.xlane.f32.xlu0 %v4167_v29  ;;  %4175 = vadd.xlane.f32.xlu1 %v4166_v47 }
 0xb11   :  { %4173 = vadd.xlane.f32.xlu2 %v4165_v12  ;;  %4647 = vmatpush.bf16.msrb.mxu1 %v8349_v27 }
 0xb12   :  { %4673 = vmatpush.bf16.msrb.mxu3 %v8352_v18 }
 0xb15   :  { %4648 = vmatpush.bf16.msrb.mxu1 %v8362_v14 }
 0xb16   :  { %4674 = vmatpush.bf16.msrb.mxu3 %v8364_v16 }
 0xb18   :  { %4181 = vadd.xlane.f32.xlu1 %v4169_v11 }
 0xb19   :  { %4179 = vadd.xlane.f32.xlu2 %v4168_v42  ;;  %4649 = vmatpush.bf16.msrb.mxu1 %v8373_v15  ;;  %v9989_v42 = vld [vmem:[#allocation18_spill] sm:$0xff] }
 0xb1a   :  { %4675 = vmatpush.bf16.msrb.mxu3 %v8376_v59 }
 0xb1d   :  { %4650 = vmatpush.bf16.msrb.mxu1 %v8385_v8 }
 0xb1e   :  { %4676 = vmatpush.bf16.msrb.mxu3 %v8388_v10 }
 0xb1f   :  { %4389 = vmatmul.bf16.vlgmr.msra.gmra.mxu1 %v4315_v41  ;;  %4415 = vmatmul.bf16.vlgmr.msra.gmra.mxu3 %v4315_v41 }
 0xb20   :  { %4185 = vadd.xlane.f32.xlu1 %v4171_v13 }
 0xb21   :  { %4183 = vadd.xlane.f32.xlu2 %v4170_v51  ;;  %4651 = vmatpush.bf16.msrb.mxu1 %v8397_v3 }
 0xb22   :  { %4677 = vmatpush.bf16.msrb.mxu3 %v8400_v5 }
 0xb25   :  { %4652 = vmatpush.bf16.msrb.mxu1 %v8411_v1 }
 0xb26   :  { %4678 = vmatpush.bf16.msrb.mxu3 %v8414_v28 }
 0xb29   :  { %4187 = vadd.xlane.f32.xlu2 %v4172_v60  ;;  %4653 = vmatpush.bf16.msrb.mxu1 %v9865_v24 }
 0xb2a   :  { %4679 = vmatpush.bf16.msrb.mxu3 %v9866_v26 }
 0xb2d   :  { %4654 = vmatpush.bf16.msrb.mxu1 %v9869_v56 }
 0xb2e   :  { %4680 = vmatpush.bf16.msrb.mxu3 %v9870_v7 }
 0xb31   :  { %4699 = vmatpush.bf16.msra.mxu1 %v9871_v23 }
 0xb32   :  { %4725 = vmatpush.bf16.msra.mxu3 %v9933_v33 }
 0xb35   :  { %4700 = vmatpush.bf16.msra.mxu1 %v9934_v17 }
 0xb36   :  { %4726 = vmatpush.bf16.msra.mxu3 %v9976_v19 }
 0xb39   :  { %4701 = vmatpush.bf16.msra.mxu1 %v9977_v48 }
 0xb3a   :  { %4727 = vmatpush.bf16.msra.mxu3 %v9978_v62 }
 0xb3d   :  { %4702 = vmatpush.bf16.msra.mxu1 %v9979_v20 }
 0xb3e   :  { %4728 = vmatpush.bf16.msra.mxu3 %v9980_v57 }
 0xb41   :  { %4703 = vmatpush.bf16.msra.mxu1 %v9981_v39 }
 0xb42   :  { %4729 = vmatpush.bf16.msra.mxu3 %v9982_v52 }
 0xb45   :  { %4704 = vmatpush.bf16.msra.mxu1 %v9983_v34 }
 0xb46   :  { %4730 = vmatpush.bf16.msra.mxu3 %v9984_v53 }
 0xb49   :  { %4705 = vmatpush.bf16.msra.mxu1 %v9985_v49 }
 0xb4a   :  { %4731 = vmatpush.bf16.msra.mxu3 %v9986_v30 }
 0xb4d   :  { %4706 = vmatpush.bf16.msra.mxu1 %v9987_v25 }
 0xb4e   :  { %4732 = vmatpush.bf16.msra.mxu3 %v9988_v31 }
 0xb83   :  { %v4176_v6 = vpop.xlane.xlu1 %4175  ;;  %v4178_v11 = vpop.xlane.xlu0 %4177 }
 0xb84   :  { %v4174_v41 = vpop.xlane.xlu2 %4173  ;;  %v4199_v13 = vperm.slane %v4176_v6, %v9989_v42  ;;  %v4200_v60 = vperm.slane %v4178_v11, %v9989_v42 }
 0xb85   :  { %v4198_v51 = vperm.slane %v4174_v41, %v9989_v42 }
 0xb87   :  { %v4206_v30 = vsel %vm3587_vm11, %v4199_v13, %v4198_v51  ;;  %v9990_v51 = vld [vmem:[#allocation19_spill] sm:$0xff] }
 0xb88   :  { %v4207_v52 = vsel %vm3588_vm12, %v4200_v60, %v4206_v30 }
 0xb8b   :  { %v4182_v12 = vpop.xlane.xlu1 %4181 }
 0xb8c   :  { %v4180_v29 = vpop.xlane.xlu2 %4179  ;;  %v9018_v47 = vpop.f32.mrf.mxu1  ;;  %v4202_v34 = vperm.slane %v4182_v12, %v9989_v42 }
 0xb8d   :  { %v4201_v25 = vperm.slane %v4180_v29, %v9989_v42  ;;  %v9991_v29 = vld [vmem:[#allocation16_spill] sm:$0xff] }
 0xb8e   :  { %v9992_v62 = vmax.f32 %v9991_v29, 0.0 }
 0xb8f   :  { %v4208_v39 = vsel %vm3590_vm13, %v4201_v25, %v4207_v52  ;;  %v4216_v25 = vld [vmem:[#allocation9 + $0x10] sm:$0xff] }
 0xb90   :  { %v4209_v11 = vsel %vm3592_vm14, %v4202_v34, %v4208_v39 }
 0xb92   :  { %v9023_v49 = vpop.f32.mrf.mxu3 }
 0xb93   :  { %v4186_v57 = vpop.xlane.xlu1 %4185 }
 0xb94   :  { %v4184_v31 = vpop.xlane.xlu2 %4183  ;;  %v4340_v53 = vpop.f32.mrf.mxu1  ;;  %v4204_v41 = vperm.slane %v4186_v57, %v9989_v42 }
 0xb95   :  { %v4203_v6 = vperm.slane %v4184_v31, %v9989_v42  ;;  %v9037_v53 = vmax.f32 %v9992_v62, %v9990_v51 }
 0xb97   :  { %v4210_v13 = vsel %vm3594_vm15, %v4203_v6, %v4209_v11  ;;  %9993 = vst [vmem:[#allocation17_spill] sm:$0xff] %v9037_v53  ;;  %vm4189_vm7 = vcmp.gt.f32.partialorder %v9037_v53, 0.5 }
 0xb98   :  { %v4211_v30 = vsel %vm3596_vm0, %v4204_v41, %v4210_v13  ;;  %v9994_v41 = vld [vmem:[#allocation35_spill] sm:$0xff] }
 0xb99   :  { %vm4312_vm2 = vcmp.eq.s32.totalorder %v9994_v41, 2 }
 0xb9a   :  { %v4366_v20 = vpop.f32.mrf.mxu3 }
 0xb9c   :  { %v4188_v12 = vpop.xlane.xlu2 %4187  ;;  %v9039_v48 = vpop.f32.mrf.mxu1 }
 0xb9d   :  { %v4205_v52 = vperm.slane %v4188_v12, %v9989_v42 }
 0xb9f   :  { %v4212_v57 = vsel %vm3598_vm1, %v4205_v52, %v4211_v30 }
 0xba0   :  { %v4214_v20 = vsel %vm4189_vm7, -1e+30, %v4212_v57 }
 0xba1   :  { %v4217_v39 = vadd.f32 %v4216_v25, %v4214_v20 }
 0xba2   :  { %v9045_v34 = vpop.f32.mrf.mxu3 }
 0xba3   :  { %v4218_v31 = vsel %vm3899_vm3, %v4217_v39, -inf }
 0xba4   :  { %v4219_v62 = vrot.slane %v4218_v31, 4  ;;  %v4392_v60 = vpop.f32.mrf.mxu1 }
 0xba6   :  { %v4220_v6 = vmax.f32 %v4218_v31, %v4219_v62  ;;  %v9995_v62 = vld [vmem:[#allocation14_spill] sm:$0xff] }
 0xba8   :  { %v4221_v11 = vrot.slane %v4220_v6, 2 }
 0xbaa   :  { %v4222_v51 = vmax.f32 %v4220_v6, %v4221_v11  ;;  %v4418_v29 = vpop.f32.mrf.mxu3 }
 0xbac   :  { %v4223_v12 = vrot.slane %v4222_v51, 1 }
 0xbae   :  { %v4224_v42 = vmax.f32 %v4222_v51, %v4223_v12 }
 0xbb0   :  { %vm4225_vm8 = vcmp.eq.f32.partialorder %v4217_v39, %v4224_v42  ;;  %v9997_v42 = vmov 0.0  }
 0xbb1   :  { %v4226_v13 = vsel %vm4225_vm8, %v9994_v41, 8 }
 0xbb2   :  { %v4227_v53 = vsel %vm3899_vm3, %v4226_v13, 2147483647 }
 0xbb3   :  { %v4228_v52 = vrot.slane %v4227_v53, 4 }
 0xbb5   :  { %vm4229_vm9 = vcmp.lt.s32.totalorder %v4227_v53, %v4228_v52 }
 0xbb6   :  { %v4230_v30 = vsel %vm4229_vm9, %v4227_v53, %v4228_v52 }
 0xbb7   :  { %v4231_v25 = vrot.slane %v4230_v30, 2 }
 0xbb9   :  { %vm4232_vm10 = vcmp.lt.s32.totalorder %v4230_v30, %v4231_v25 }
 0xbba   :  { %v4233_v57 = vsel %vm4232_vm10, %v4230_v30, %v4231_v25 }
 0xbbb   :  { %v4234_v20 = vrot.slane %v4233_v57, 1 }
 0xbbd   :  { %vm4235_vm4 = vcmp.lt.s32.totalorder %v4233_v57, %v4234_v20 }
 0xbbe   :  { %v4236_v31 = vsel %vm4235_vm4, %v4233_v57, %v4234_v20 }
 0xbbf   :  { %vm4237_vm5 = vcmp.eq.s32.totalorder %v9994_v41, %v4236_v31  ;;  %v9053_v60 = vsel %vm4312_vm2, %v4236_v31, %v9995_v62 }
 0xbc0   :  { %9996 = vst [vmem:[#allocation15_spill] sm:$0xff] %v9053_v60  ;;  %v9056_v39 = vsel %vm4237_vm5, 1.0, %v9997_v42 }
 0xbc1   :  { %9998 = vst [vmem:[#allocation21_spill] sm:$0xff] %v9056_v39  ;;  %v4269_v6 = vperm.slane %v9056_v39, 4  ;;  %v4276_v53 = vperm.slane %v9056_v39, 5  ;;  %v4255_v11 = vperm.slane %v9056_v39, 2  ;;  %v4262_v51 = vperm.slane %v9056_v39, 3 }
 0xbc2   :  { %v4241_v29 = vperm.slane %v9056_v39, 0  ;;  %v4248_v12 = vperm.slane %v9056_v39, 1  ;;  %v4283_v25 = vperm.slane %v9056_v39, 6  ;;  %v4290_v57 = vperm.slane %v9056_v39, 7 }
 0xbc3   :  { %v7605_v13 = vpack.i.bf16 %v4276_v53, %v4269_v6  ;;  %v7600_v52 = vpack.i.bf16 %v4262_v51, %v4255_v11 }
 0xbc4   :  { %v7595_v30 = vpack.i.bf16 %v4248_v12, %v4241_v29  ;;  %v7610_v20 = vpack.i.bf16 %v4290_v57, %v4283_v25 }
 0xbc5   :  { %7606 = vperm.xlu2 %7550, %v7605_v13   ;;  %7601 = vperm.xlu1 %7552, %v7600_v52  }
 0xbc6   :  { %7596 = vperm.xlu0 %7584, %v7595_v30  }
 0xbce   :  { %7611 = vperm.xlu0 %7584, %v7610_v20  }
 0xc1f   :  { %v7607_v19 = vpop.permute.xlu2 %7606 }
 0xc20   :  { %v7608_v11 = vunpack.i.l.bf16 %v7607_v19  ;;  %v7609_v12 = vunpack.i.h.bf16 %v7607_v19 }
 0xc22   :  { %v4301_v25 = vmul.f32 %v7608_v11, %v9890_v37  ;;  %v10003_v11 = vld [vmem:[#allocation31_spill] sm:$0xff] }
 0xc37   :  { %v7602_v31 = vpop.permute.xlu1 %7601 }
 0xc38   :  { %v7597_v62 = vpop.permute.xlu0 %7596  ;;  %v7603_v42 = vunpack.i.l.bf16 %v7602_v31  ;;  %v7604_v17 = vunpack.i.h.bf16 %v7602_v31 }
 0xc39   :  { %v7599_v60 = vunpack.i.h.bf16 %v7597_v62  ;;  %v7598_v41 = vunpack.i.l.bf16 %v7597_v62  ;;  %v4302_v62 = vmul.f32 %v7609_v12, %v9893_v55  ;;  %v10006_v12 = vld [vmem:[#allocation44_spill] sm:$0xff] }
 0xc3a   :  { %v4299_v51 = vmul.f32 %v7603_v42, %v9891_v50  ;;  %v4300_v13 = vmul.f32 %v7604_v17, %v9894_v32  ;;  %v10000_v17 = vld [vmem:[#allocation33_spill] sm:$0xff] }
 0xc3b   :  { %v4298_v6 = vmul.f32 %v7599_v60, %v9895_v4  ;;  %v4297_v53 = vmul.f32 %v7598_v41, %v9892_v40 }
 0xc3d   :  { %v4305_v29 = vadd.f32 %v4298_v6, %v4297_v53  ;;  %v10002_v53 = vld [vmem:[#allocation37_spill] sm:$0xff] }
 0xc3f   :  { %v4306_v52 = vadd.f32 %v4305_v29, %v4299_v51  ;;  %v10004_v51 = vld [vmem:[#allocation38_spill] sm:$0xff]  ;;  %v10005_v29 = vld [vmem:[#allocation32_spill] sm:$0xff] }
 0xc40   :  { %v7612_v30 = vpop.permute.xlu0 %7611 }
 0xc41   :  { %v4307_v57 = vadd.f32 %v4306_v52, %v4300_v13  ;;  %v7613_v20 = vunpack.i.l.bf16 %v7612_v30  ;;  %v7614_v31 = vunpack.i.h.bf16 %v7612_v30  ;;  %v10007_v13 = vld [vmem:[#allocation34_spill] sm:$0xff]  ;;  %v10008_v52 = vld [vmem:[#allocation48_spill] sm:$0xff]  ;;  %v10009_v30 = vld [vmem:[#allocation39_spill] sm:$0xff] }
 0xc43   :  { %v4308_v39 = vadd.f32 %v4307_v57, %v4301_v25  ;;  %v4303_v60 = vmul.f32 %v7613_v20, %v9896_v36  ;;  %v4304_v33 = vmul.f32 %v7614_v31, %v8588_v9  ;;  %v10010_v25 = vld [vmem:[#allocation52_spill] sm:$0xff]  ;;  %v10011_v57 = vld [vmem:[#allocation45_spill] sm:$0xff] }
 0xc44   :  { %v10012_v20 = vld [vmem:[#allocation56_spill] sm:$0xff] }
 0xc45   :  { %v4309_v41 = vadd.f32 %v4308_v39, %v4302_v62  ;;  %v10001_v39 = vld [vmem:[#allocation29_spill] sm:$0xff]  ;;  %v10014_v31 = vld [vmem:[#allocation60_spill] sm:$0xff] }
 0xc46   :  { %v10013_v62 = vld [vmem:[#allocation49_spill] sm:$0xff] }
 0xc47   :  { %v4310_v42 = vadd.f32 %v4309_v41, %v4303_v60  ;;  %v10015_v60 = vld [vmem:[#allocation53_spill] sm:$0xff]  ;;  %v10016_v41 = vld [vmem:[#allocation64_spill] sm:$0xff] }
 0xc49   :  { %v4311_v6 = vadd.f32 %v4310_v42, %v4304_v33  ;;  %v9999_v33 = vld [vmem:[#allocation27_spill] sm:$0xff]  ;;  %v10017_v42 = vld [vmem:[#allocation57_spill] sm:$0xff] }
 0xc4b   :  { %v4314_v19 = vpack.c.bf16 %v4311_v6, %v4311_v6  ;;  %v10018_v6 = vld [vmem:[#allocation67_spill] sm:$0xff] }
 0xc4d   :  { %4324 = vmatmul.bf16.vlgmr.msrb.gmra.mxu0 %v4314_v19  ;;  %4350 = vmatmul.bf16.vlgmr.msrb.gmra.mxu2 %v4314_v19 }
 0xc4e   :  { %4634 = vmatpush.bf16.msrb.mxu0 %v8344_v44  ;;  %4660 = vmatpush.bf16.msrb.mxu2 %v9901_v21 }
 0xc52   :  { %4635 = vmatpush.bf16.msrb.mxu0 %v8355_v35  ;;  %4661 = vmatpush.bf16.msrb.mxu2 %v8332_v0 }
 0xc56   :  { %4636 = vmatpush.bf16.msrb.mxu0 %v9902_v22  ;;  %4662 = vmatpush.bf16.msrb.mxu2 %v9903_v2 }
 0xc5a   :  { %4637 = vmatpush.bf16.msrb.mxu0 %v9904_v61  ;;  %4663 = vmatpush.bf16.msrb.mxu2 %v9905_v63 }
 0xc5d   :  { %4376 = vmatmul.bf16.vlgmr.msra.gmra.mxu0 %v4314_v19  ;;  %4402 = vmatmul.bf16.vlgmr.msra.gmra.mxu2 %v4314_v19  ;;  %v10019_v19 = vld [vmem:[#allocation61_spill] sm:$0xff] }
 0xc5e   :  { %4638 = vmatpush.bf16.msrb.mxu0 %v9906_v58  ;;  %4664 = vmatpush.bf16.msrb.mxu2 %v9951_v46 }
 0xc62   :  { %4639 = vmatpush.bf16.msrb.mxu0 %v9952_v54  ;;  %4665 = vmatpush.bf16.msrb.mxu2 %v9999_v33 }
 0xc66   :  { %4640 = vmatpush.bf16.msrb.mxu0 %v10000_v17  ;;  %4666 = vmatpush.bf16.msrb.mxu2 %v10001_v39 }
 0xc6a   :  { %4641 = vmatpush.bf16.msrb.mxu0 %v10002_v53  ;;  %4667 = vmatpush.bf16.msrb.mxu2 %v10003_v11 }
 0xc6e   :  { %4686 = vmatpush.bf16.msra.mxu0 %v10004_v51  ;;  %4712 = vmatpush.bf16.msra.mxu2 %v10005_v29 }
 0xc72   :  { %4687 = vmatpush.bf16.msra.mxu0 %v10006_v12  ;;  %4713 = vmatpush.bf16.msra.mxu2 %v10007_v13 }
 0xc76   :  { %4688 = vmatpush.bf16.msra.mxu0 %v10008_v52  ;;  %4714 = vmatpush.bf16.msra.mxu2 %v10009_v30 }
 0xc7a   :  { %4689 = vmatpush.bf16.msra.mxu0 %v10010_v25  ;;  %4715 = vmatpush.bf16.msra.mxu2 %v10011_v57  ;;  %v10020_v25 = vld [vmem:[#allocation36_spill] sm:$0xff] }
 0xc7e   :  { %4690 = vmatpush.bf16.msra.mxu0 %v10012_v20  ;;  %4716 = vmatpush.bf16.msra.mxu2 %v10013_v62  ;;  %v10021_v62 = vld [vmem:[#allocation70_spill] sm:$0xff] }
 0xc82   :  { %4691 = vmatpush.bf16.msra.mxu0 %v10014_v31  ;;  %4717 = vmatpush.bf16.msra.mxu2 %v10015_v60 }
 0xc86   :  { %4692 = vmatpush.bf16.msra.mxu0 %v10016_v41  ;;  %4718 = vmatpush.bf16.msra.mxu2 %v10017_v42 }
 0xc8a   :  { %4693 = vmatpush.bf16.msra.mxu0 %v10018_v6  ;;  %4719 = vmatpush.bf16.msra.mxu2 %v10019_v19 }
 0xcca   :  { %v4325_v30 = vpop.f32.mrf.mxu0 }
 0xccb   :  { %v4326_v52 = vadd.f32 %v4325_v30, %v10020_v25 }
 0xccd   :  { %v4339_v57 = vadd.f32 %v9018_v47, %v4326_v52 }
 0xccf   :  { %v7196_v20 = vmul.f32 -1.442695, %v4339_v57 }
 0xcd0   :  { %v4351_v13 = vpop.f32.mrf.mxu2 }
 0xcd1   :  { %7871 = vpow2.f32 %v7196_v20  ;;  %v4352_v31 = vadd.f32 %v4351_v13, %v10021_v62 }
 0xcd2   :  { %v4327_v12 = vpop.f32.mrf.mxu0 }
 0xcd3   :  { %v4365_v60 = vadd.f32 %v9023_v49, %v4352_v31 }
 0xcd5   :  { %v7197_v41 = vmul.f32 -1.442695, %v4365_v60 }
 0xcd7   :  { %v7872_v29 = vpop.eup %7871  ;;  %7873 = vpow2.f32 %v7197_v41 }
 0xcd8   :  { %v4423_v42 = vadd.f32 1.0, %v7872_v29  ;;  %v4353_v6 = vpop.f32.mrf.mxu2 }
 0xcda   :  { %7875 = vrcp.f32 %v4423_v42  ;;  %v4377_v19 = vpop.f32.mrf.mxu0  ;;  %vm4429_vm8 = vweird.f32 %v4423_v42 }
 0xcdb   :  { %v4378_v49 = vadd.f32 %v4377_v19, %v8669_v43 }
 0xcdd   :  { %v7874_v51 = vpop.eup %7873 }
 0xcde   :  { %v4442_v11 = vadd.f32 1.0, %v7874_v51  ;;  %v4391_v51 = vadd.f32 %v9039_v48, %v4378_v49 }
 0xce0   :  { %v7876_v30 = vpop.eup %7875  ;;  %7877 = vrcp.f32 %v4442_v11  ;;  %v4403_v47 = vpop.f32.mrf.mxu2  ;;  %v4454_v25 = vand.u32 2147483648, %v4442_v11  ;;  %vm4448_vm9 = vweird.f32 %v4442_v11 }
 0xce1   :  { %v4425_v52 = vmul.f32 %v7876_v30, %v4423_v42  ;;  %v4404_v57 = vadd.f32 %v4403_v47, %v9932_v45  ;;  %vm4430_vm6 = vweird.f32 %v7876_v30  ;;  %v4435_v47 = vand.u32 2147483648, %v4423_v42 }
 0xce2   :  { %v4379_v20 = vpop.f32.mrf.mxu0  ;;  %vm4431_vm10 = vmor %vm4429_vm8, %vm4430_vm6 }
 0xce3   :  { %v4426_v13 = vsub.f32 1.0, %v4425_v52  ;;  %v4417_v12 = vadd.f32 %v9045_v34, %v4404_v57  ;;  %v4452_v52 = vand.u32 2147483647, %v4442_v11  ;;  %v4433_v34 = vand.u32 2147483647, %v4423_v42 }
 0xce4   :  { %v4455_v20 = vor.u32 1.1754944e-38, %v4454_v25 }
 0xce5   :  { %v7198_v31 = vmul.f32 -1.442695, %v4417_v12  ;;  %v4427_v29 = vmul.f32 %v7876_v30, %v4426_v13  ;;  %vm4453_vm4 = vcmp.eq.f32.partialorder %v4452_v52, 8.507059e+37  ;;  %vm4434_vm5 = vcmp.eq.f32.partialorder %v4433_v34, 8.507059e+37 }
 0xce6   :  { %v7878_v60 = vpop.eup %7877 }
 0xce7   :  { %v4444_v41 = vmul.f32 %v7878_v60, %v4442_v11  ;;  %7879 = vpow2.f32 %v7198_v31  ;;  %v4428_v53 = vadd.f32 %v7876_v30, %v4427_v29  ;;  %vm4449_vm7 = vweird.f32 %v7878_v60 }
 0xce8   :  { %v4405_v6 = vpop.f32.mrf.mxu2  ;;  %7881 = vtanh.f32 %v4391_v51  ;;  %vm4450_vm2 = vmor %vm4448_vm9, %vm4449_vm7  ;;  %v4436_v31 = vor.u32 1.1754944e-38, %v4435_v47 }
 0xce9   :  { %v4445_v62 = vsub.f32 1.0, %v4444_v41  ;;  %v4432_v13 = vsel %vm4431_vm10, %v7876_v30, %v4428_v53 }
 0xceb   :  { %v4446_v39 = vmul.f32 %v7878_v60, %v4445_v62  ;;  %v4437_v62 = vsel %vm4434_vm5, %v4436_v31, %v4432_v13 }
 0xced   :  { %v7880_v57 = vpop.eup %7879  ;;  %v4447_v19 = vadd.f32 %v7878_v60, %v4446_v39 }
 0xcee   :  { %v4462_v12 = vadd.f32 1.0, %v7880_v57  ;;  %v7882_v41 = vpop.eup %7881 }
 0xcef   :  { %v4451_v48 = vsel %vm4450_vm2, %v7878_v60, %v4447_v19  ;;  %v4479_v42 = vmul.f32 %v7882_v41, %v4437_v62  ;;  %v10022_v41 = vld [vmem:[#allocation43_spill] sm:$0xff] }
 0xcf0   :  { %v4456_v49 = vsel %vm4453_vm4, %v4455_v20, %v4451_v48  ;;  %7883 = vrcp.f32 %v4462_v12  ;;  %v4474_v53 = vand.u32 2147483648, %v4462_v12  ;;  %v4472_v30 = vand.u32 2147483647, %v4462_v12 }
 0xcf1   :  { %v4478_v29 = vmul.f32 %v4456_v49, %v8975_v38  ;;  %vm4468_vm7 = vweird.f32 %v4462_v12 }
 0xcf2   :  { %v4475_v47 = vor.u32 1.1754944e-38, %v4474_v53  ;;  %vm4473_vm9 = vcmp.eq.f32.partialorder %v4472_v30, 8.507059e+37  ;;  %v10027_v53 = vld [vmem:[#allocation54_spill] sm:$0xff] }
 0xcf3   :  { %v9115_v11 = vadd.f32 %v4479_v42, %v4478_v29  ;;  %v10023_v42 = vld [vmem:[#allocation46_spill] sm:$0xff] }
 0xcf4   :  { %v10029_v30 = vld [vmem:[#allocation58_spill] sm:$0xff] }
 0xcf5   :  { %7885 = vtanh.f32 %v9115_v11 }
 0xcf6   :  { %v7884_v6 = vpop.eup %7883 }
 0xcf7   :  { %v4464_v39 = vmul.f32 %v7884_v6, %v4462_v12  ;;  %vm4469_vm6 = vweird.f32 %v7884_v6 }
 0xcf8   :  { %vm4470_vm8 = vmor %vm4468_vm7, %vm4469_vm6 }
 0xcf9   :  { %v4465_v51 = vsub.f32 1.0, %v4464_v39  ;;  %v10025_v39 = vld [vmem:[#allocation50_spill] sm:$0xff] }
 0xcfb   :  { %v4466_v25 = vmul.f32 %v7884_v6, %v4465_v51  ;;  %v7886_v38 = vpop.eup %7885  ;;  %v10026_v51 = vld [vmem:[#allocation51_spill] sm:$0xff] }
 0xcfd   :  { %v4467_v60 = vadd.f32 %v7884_v6, %v4466_v25  ;;  %v10028_v25 = vld [vmem:[#allocation55_spill] sm:$0xff] }
 0xcff   :  { %v4471_v52 = vsel %vm4470_vm8, %v7884_v6, %v4467_v60  ;;  %v10024_v6 = vld [vmem:[#allocation47_spill] sm:$0xff] }
 0xd00   :  { %v4476_v34 = vsel %vm4473_vm9, %v4475_v47, %v4471_v52  ;;  %v10030_v60 = vld [vmem:[#allocation59_spill] sm:$0xff]  ;;  %v10031_v47 = vld [vmem:[#allocation62_spill] sm:$0xff] }
 0xd01   :  { %v4482_v57 = vmul.f32 %v7886_v38, %v4476_v34  ;;  %v10032_v52 = vld [vmem:[#allocation63_spill] sm:$0xff]  ;;  %v10033_v38 = vld [vmem:[#allocation65_spill] sm:$0xff]  ;;  %v10034_v34 = vld [vmem:[#allocation66_spill] sm:$0xff] }
 0xd03   :  { %v4633_v19 = vpack.c.bf16 %v4482_v57, %v4482_v57  ;;  %v4485_v20 = vmul.f32 %v4482_v57, %v9891_v50  ;;  %v4484_v13 = vmul.f32 %v4482_v57, %v9895_v4  ;;  %v4483_v31 = vmul.f32 %v4482_v57, %v9892_v40 }
 0xd04   :  { %v4488_v12 = vmul.f32 %v4482_v57, %v9893_v55  ;;  %v4487_v48 = vmul.f32 %v4482_v57, %v9890_v37  ;;  %v4486_v49 = vmul.f32 %v4482_v57, %v9894_v32  ;;  %v4490_v62 = vmul.f32 %v4482_v57, %v8588_v9 }
 0xd05   :  { %4655 = vmatmul.bf16.vlgmr.msrb.gmra.mxu1 %v4633_v19  ;;  %4681 = vmatmul.bf16.vlgmr.msrb.gmra.mxu3 %v4633_v19  ;;  %v4489_v29 = vmul.f32 %v4482_v57, %v9896_v36  ;;  %v10035_v57 = vld [vmem:[#allocation68_spill] sm:$0xff] }
 0xd06   :  { %4495 = vadd.xlane.f32.xlu2 %v4485_v20  ;;  %4493 = vadd.xlane.f32.xlu0 %v4484_v13 }
 0xd07   :  { %4491 = vadd.xlane.f32.xlu1 %v4483_v31  ;;  %4965 = vmatpush.bf16.msrb.mxu1 %v8349_v27 }
 0xd08   :  { %4991 = vmatpush.bf16.msrb.mxu3 %v8352_v18 }
 0xd0b   :  { %4966 = vmatpush.bf16.msrb.mxu1 %v8362_v14 }
 0xd0c   :  { %4992 = vmatpush.bf16.msrb.mxu3 %v8364_v16 }
 0xd0e   :  { %4501 = vadd.xlane.f32.xlu2 %v4488_v12  ;;  %4499 = vadd.xlane.f32.xlu0 %v4487_v48  ;;  %v10037_v12 = vld [vmem:[#allocation18_spill] sm:$0xff] }
 0xd0f   :  { %4497 = vadd.xlane.f32.xlu1 %v4486_v49  ;;  %4967 = vmatpush.bf16.msrb.mxu1 %v8373_v15 }
 0xd10   :  { %4993 = vmatpush.bf16.msrb.mxu3 %v8376_v59 }
 0xd13   :  { %4968 = vmatpush.bf16.msrb.mxu1 %v8385_v8 }
 0xd14   :  { %4994 = vmatpush.bf16.msrb.mxu3 %v8388_v10 }
 0xd15   :  { %4707 = vmatmul.bf16.vlgmr.msra.gmra.mxu1 %v4633_v19  ;;  %4733 = vmatmul.bf16.vlgmr.msra.gmra.mxu3 %v4633_v19  ;;  %v10036_v19 = vld [vmem:[#allocation69_spill] sm:$0xff] }
 0xd16   :  { %4505 = vadd.xlane.f32.xlu0 %v4490_v62 }
 0xd17   :  { %4503 = vadd.xlane.f32.xlu1 %v4489_v29  ;;  %4969 = vmatpush.bf16.msrb.mxu1 %v8397_v3 }
 0xd18   :  { %4995 = vmatpush.bf16.msrb.mxu3 %v8400_v5 }
 0xd1b   :  { %4970 = vmatpush.bf16.msrb.mxu1 %v8411_v1 }
 0xd1c   :  { %4996 = vmatpush.bf16.msrb.mxu3 %v8414_v28 }
 0xd1f   :  { %4971 = vmatpush.bf16.msrb.mxu1 %v9865_v24 }
 0xd20   :  { %4997 = vmatpush.bf16.msrb.mxu3 %v9866_v26 }
 0xd23   :  { %4972 = vmatpush.bf16.msrb.mxu1 %v9869_v56 }
 0xd24   :  { %4998 = vmatpush.bf16.msrb.mxu3 %v9870_v7 }
 0xd27   :  { %5017 = vmatpush.bf16.msra.mxu1 %v9871_v23 }
 0xd28   :  { %5043 = vmatpush.bf16.msra.mxu3 %v10022_v41 }
 0xd2b   :  { %5018 = vmatpush.bf16.msra.mxu1 %v10023_v42 }
 0xd2c   :  { %5044 = vmatpush.bf16.msra.mxu3 %v10024_v6 }
 0xd2f   :  { %5019 = vmatpush.bf16.msra.mxu1 %v10025_v39 }
 0xd30   :  { %5045 = vmatpush.bf16.msra.mxu3 %v10026_v51 }
 0xd33   :  { %5020 = vmatpush.bf16.msra.mxu1 %v10027_v53  ;;  %v10039_v53 = vld [vmem:[#allocation17_spill] sm:$0xff] }
 0xd34   :  { %5046 = vmatpush.bf16.msra.mxu3 %v10028_v25  ;;  %v10038_v25 = vld [vmem:[#allocation21_spill] sm:$0xff] }
 0xd37   :  { %5021 = vmatpush.bf16.msra.mxu1 %v10029_v30 }
 0xd38   :  { %5047 = vmatpush.bf16.msra.mxu3 %v10030_v60 }
 0xd3b   :  { %5022 = vmatpush.bf16.msra.mxu1 %v10031_v47 }
 0xd3c   :  { %5048 = vmatpush.bf16.msra.mxu3 %v10032_v52 }
 0xd3f   :  { %5023 = vmatpush.bf16.msra.mxu1 %v10033_v38 }
 0xd40   :  { %5049 = vmatpush.bf16.msra.mxu3 %v10034_v34 }
 0xd43   :  { %5024 = vmatpush.bf16.msra.mxu1 %v10035_v57 }
 0xd44   :  { %5050 = vmatpush.bf16.msra.mxu3 %v10036_v19 }
 0xd79   :  { %v4494_v20 = vpop.xlane.xlu0 %4493  ;;  %v4496_v31 = vpop.xlane.xlu2 %4495 }
 0xd7a   :  { %v4492_v13 = vpop.xlane.xlu1 %4491  ;;  %v4517_v48 = vperm.slane %v4494_v20, %v10037_v12  ;;  %v4518_v62 = vperm.slane %v4496_v31, %v10037_v12 }
 0xd7b   :  { %v4516_v49 = vperm.slane %v4492_v13, %v10037_v12 }
 0xd7d   :  { %v4524_v52 = vsel %vm3587_vm11, %v4517_v48, %v4516_v49  ;;  %v9173_v48 = vmax.f32 %v10039_v53, %v10038_v25 }
 0xd7e   :  { %v4525_v19 = vsel %vm3588_vm12, %v4518_v62, %v4524_v52 }
 0xd7f   :  { %10040 = vst [vmem:[#allocation20_spill] sm:$0xff] %v9173_v48  ;;  %vm4507_vm10 = vcmp.gt.f32.partialorder %v9173_v48, 0.5 }
 0xd81   :  { %v4500_v29 = vpop.xlane.xlu0 %4499  ;;  %v4502_v30 = vpop.xlane.xlu2 %4501 }
 0xd82   :  { %v4498_v47 = vpop.xlane.xlu1 %4497  ;;  %v9162_v38 = vpop.f32.mrf.mxu1  ;;  %v4520_v57 = vperm.slane %v4500_v29, %v10037_v12  ;;  %v4521_v49 = vperm.slane %v4502_v30, %v10037_v12 }
 0xd83   :  { %v4519_v34 = vperm.slane %v4498_v47, %v10037_v12 }
 0xd85   :  { %v4526_v60 = vsel %vm3590_vm13, %v4519_v34, %v4525_v19  ;;  %v4534_v19 = vld [vmem:[#allocation9 + $0x18] sm:$0xff] }
 0xd86   :  { %v4527_v13 = vsel %vm3592_vm14, %v4520_v57, %v4526_v60 }
 0xd87   :  { %v4528_v34 = vsel %vm3594_vm15, %v4521_v49, %v4527_v13 }
 0xd88   :  { %v9168_v20 = vpop.f32.mrf.mxu3 }
 0xd89   :  { %v4506_v31 = vpop.xlane.xlu0 %4505 }
 0xd8a   :  { %v4523_v47 = vperm.slane %v4506_v31, %v10037_v12  ;;  %v4504_v51 = vpop.xlane.xlu1 %4503  ;;  %v4658_v29 = vpop.f32.mrf.mxu1 }
 0xd8b   :  { %v4522_v52 = vperm.slane %v4504_v51, %v10037_v12 }
 0xd8d   :  { %v4529_v62 = vsel %vm3596_vm0, %v4522_v52, %v4528_v34  ;;  %v10041_v34 = vld [vmem:[#allocation35_spill] sm:$0xff] }
 0xd8e   :  { %v4530_v60 = vsel %vm3598_vm1, %v4523_v47, %v4529_v62  ;;  %vm4630_vm6 = vcmp.eq.s32.totalorder %v10041_v34, 3 }
 0xd8f   :  { %v4532_v57 = vsel %vm4507_vm10, -1e+30, %v4530_v60 }
 0xd90   :  { %v4535_v53 = vadd.f32 %v4534_v19, %v4532_v57  ;;  %v4684_v25 = vpop.f32.mrf.mxu3 }
 0xd92   :  { %v4536_v30 = vsel %vm3899_vm3, %v4535_v53, -inf  ;;  %v9183_v39 = vpop.f32.mrf.mxu1 }
 0xd93   :  { %v4537_v31 = vrot.slane %v4536_v30, 4 }
 0xd95   :  { %v4538_v29 = vmax.f32 %v4536_v30, %v4537_v31  ;;  %v10044_v31 = vmov 0.0  }
 0xd97   :  { %v4539_v6 = vrot.slane %v4538_v29, 2 }
 0xd98   :  { %v9185_v51 = vpop.f32.mrf.mxu3 }
 0xd99   :  { %v4540_v13 = vmax.f32 %v4538_v29, %v4539_v6 }
 0xd9a   :  { %v4710_v49 = vpop.f32.mrf.mxu1 }
 0xd9b   :  { %v4541_v12 = vrot.slane %v4540_v13, 1 }
 0xd9d   :  { %v4542_v52 = vmax.f32 %v4540_v13, %v4541_v12  ;;  %v10042_v12 = vld [vmem:[#allocation15_spill] sm:$0xff] }
 0xd9f   :  { %vm4543_vm2 = vcmp.eq.f32.partialorder %v4535_v53, %v4542_v52 }
 0xda0   :  { %v4544_v48 = vsel %vm4543_vm2, %v10041_v34, 8  ;;  %v4736_v47 = vpop.f32.mrf.mxu3 }
 0xda1   :  { %v4545_v19 = vsel %vm3899_vm3, %v4544_v48, 2147483647 }
 0xda2   :  { %v4546_v62 = vrot.slane %v4545_v19, 4 }
 0xda4   :  { %vm4547_vm4 = vcmp.lt.s32.totalorder %v4545_v19, %v4546_v62 }
 0xda5   :  { %v4548_v60 = vsel %vm4547_vm4, %v4545_v19, %v4546_v62 }
 0xda6   :  { %v4549_v57 = vrot.slane %v4548_v60, 2 }
 0xda8   :  { %vm4550_vm5 = vcmp.lt.s32.totalorder %v4548_v60, %v4549_v57 }
 0xda9   :  { %v4551_v25 = vsel %vm4550_vm5, %v4548_v60, %v4549_v57 }
 0xdaa   :  { %v4552_v30 = vrot.slane %v4551_v25, 1 }
 0xdac   :  { %vm4553_vm7 = vcmp.lt.s32.totalorder %v4551_v25, %v4552_v30 }
 0xdad   :  { %v4554_v6 = vsel %vm4553_vm7, %v4551_v25, %v4552_v30 }
 0xdae   :  { %vm4555_vm8 = vcmp.eq.s32.totalorder %v10041_v34, %v4554_v6  ;;  %v9192_v53 = vsel %vm4630_vm6, %v4554_v6, %v10042_v12 }
 0xdaf   :  { %10043 = vst [vmem:[#allocation24_spill] sm:$0xff] %v9192_v53  ;;  %v9195_v29 = vsel %vm4555_vm8, 1.0, %v10044_v31 }
 0xdb0   :  { %10045 = vst [vmem:[#allocation22_spill] sm:$0xff] %v9195_v29  ;;  %v4587_v48 = vperm.slane %v9195_v29, 4  ;;  %v4594_v13 = vperm.slane %v9195_v29, 5  ;;  %v4573_v49 = vperm.slane %v9195_v29, 2  ;;  %v4580_v52 = vperm.slane %v9195_v29, 3 }
 0xdb1   :  { %v4559_v47 = vperm.slane %v9195_v29, 0  ;;  %v4566_v19 = vperm.slane %v9195_v29, 1  ;;  %v4601_v25 = vperm.slane %v9195_v29, 6  ;;  %v4608_v30 = vperm.slane %v9195_v29, 7 }
 0xdb2   :  { %v7625_v62 = vpack.i.bf16 %v4594_v13, %v4587_v48  ;;  %v7620_v60 = vpack.i.bf16 %v4580_v52, %v4573_v49 }
 0xdb3   :  { %v7615_v57 = vpack.i.bf16 %v4566_v19, %v4559_v47  ;;  %v7630_v6 = vpack.i.bf16 %v4608_v30, %v4601_v25 }
 0xdb4   :  { %7626 = vperm.xlu0 %7584, %v7625_v62   ;;  %7621 = vperm.xlu1 %7552, %v7620_v60  }
 0xdb5   :  { %7616 = vperm.xlu2 %7550, %v7615_v57  }
 0xdbd   :  { %7631 = vperm.xlu2 %7550, %v7630_v6  }
 0xe0f   :  { %v7617_v12 = vpop.permute.xlu2 %7616 }
 0xe10   :  { %v7619_v31 = vunpack.i.h.bf16 %v7617_v12  ;;  %v7618_v53 = vunpack.i.l.bf16 %v7617_v12 }
 0xe12   :  { %v4616_v34 = vmul.f32 %v7619_v31, %v9895_v4  ;;  %v4615_v42 = vmul.f32 %v7618_v53, %v9892_v40 }
 0xe14   :  { %v4623_v52 = vadd.f32 %v4616_v34, %v4615_v42 }
 0xe17   :  { %v7632_v62 = vpop.permute.xlu2 %7631 }
 0xe18   :  { %v7633_v30 = vunpack.i.l.bf16 %v7632_v62  ;;  %v7634_v31 = vunpack.i.h.bf16 %v7632_v62  ;;  %v10054_v62 = vld [vmem:[#allocation39_spill] sm:$0xff] }
 0xe1a   :  { %v4621_v23 = vmul.f32 %v7633_v30, %v9896_v36  ;;  %v4622_v42 = vmul.f32 %v7634_v31, %v8588_v9  ;;  %v10058_v30 = vld [vmem:[#allocation49_spill] sm:$0xff]  ;;  %v10061_v31 = vld [vmem:[#allocation64_spill] sm:$0xff] }
 0xe26   :  { %v7627_v41 = vpop.permute.xlu0 %7626  ;;  %v7622_v48 = vpop.permute.xlu1 %7621 }
 0xe27   :  { %v7624_v13 = vunpack.i.h.bf16 %v7622_v48  ;;  %v7623_v49 = vunpack.i.l.bf16 %v7622_v48  ;;  %v7628_v47 = vunpack.i.l.bf16 %v7627_v41  ;;  %v7629_v60 = vunpack.i.h.bf16 %v7627_v41  ;;  %v10047_v41 = vld [vmem:[#allocation37_spill] sm:$0xff] }
 0xe29   :  { %v4617_v19 = vmul.f32 %v7623_v49, %v9891_v50  ;;  %v4618_v57 = vmul.f32 %v7624_v13, %v9894_v32  ;;  %v4619_v6 = vmul.f32 %v7628_v47, %v9890_v37  ;;  %v4620_v53 = vmul.f32 %v7629_v60, %v9893_v55  ;;  %v10049_v13 = vld [vmem:[#allocation38_spill] sm:$0xff]  ;;  %v10055_v60 = vld [vmem:[#allocation52_spill] sm:$0xff] }
 0xe2a   :  { %v10052_v47 = vld [vmem:[#allocation34_spill] sm:$0xff] }
 0xe2b   :  { %v4624_v25 = vadd.f32 %v4623_v52, %v4617_v19  ;;  %v10050_v52 = vld [vmem:[#allocation32_spill] sm:$0xff] }
 0xe2c   :  { %v10053_v19 = vld [vmem:[#allocation48_spill] sm:$0xff] }
 0xe2d   :  { %v4625_v12 = vadd.f32 %v4624_v25, %v4618_v57  ;;  %v10056_v57 = vld [vmem:[#allocation45_spill] sm:$0xff]  ;;  %v10057_v25 = vld [vmem:[#allocation56_spill] sm:$0xff] }
 0xe2f   :  { %v4626_v29 = vadd.f32 %v4625_v12, %v4619_v6  ;;  %v10059_v6 = vld [vmem:[#allocation60_spill] sm:$0xff]  ;;  %v10060_v12 = vld [vmem:[#allocation53_spill] sm:$0xff] }
 0xe31   :  { %v4627_v48 = vadd.f32 %v4626_v29, %v4620_v53  ;;  %v10048_v29 = vld [vmem:[#allocation31_spill] sm:$0xff]  ;;  %v10062_v53 = vld [vmem:[#allocation57_spill] sm:$0xff] }
 0xe33   :  { %v4628_v34 = vadd.f32 %v4627_v48, %v4621_v23  ;;  %v10046_v23 = vld [vmem:[#allocation29_spill] sm:$0xff]  ;;  %v10063_v48 = vld [vmem:[#allocation67_spill] sm:$0xff] }
 0xe35   :  { %v4629_v49 = vadd.f32 %v4628_v34, %v4622_v42  ;;  %v10064_v42 = vld [vmem:[#allocation61_spill] sm:$0xff] }
 0xe37   :  { %v4632_v7 = vpack.c.bf16 %v4629_v49, %v4629_v49  ;;  %v10065_v49 = vld [vmem:[#allocation36_spill] sm:$0xff] }
 0xe39   :  { %4642 = vmatmul.bf16.vlgmr.msrb.gmra.mxu0 %v4632_v7  ;;  %4668 = vmatmul.bf16.vlgmr.msrb.gmra.mxu2 %v4632_v7 }
 0xe3a   :  { %4952 = vmatpush.bf16.msrb.mxu0 %v8344_v44  ;;  %4978 = vmatpush.bf16.msrb.mxu2 %v9901_v21 }
 0xe3e   :  { %4953 = vmatpush.bf16.msrb.mxu0 %v8355_v35  ;;  %4979 = vmatpush.bf16.msrb.mxu2 %v8332_v0 }
 0xe42   :  { %4954 = vmatpush.bf16.msrb.mxu0 %v9902_v22  ;;  %4980 = vmatpush.bf16.msrb.mxu2 %v9903_v2 }
 0xe46   :  { %4955 = vmatpush.bf16.msrb.mxu0 %v9904_v61  ;;  %4981 = vmatpush.bf16.msrb.mxu2 %v9905_v63 }
 0xe49   :  { %4694 = vmatmul.bf16.vlgmr.msra.gmra.mxu0 %v4632_v7  ;;  %4720 = vmatmul.bf16.vlgmr.msra.gmra.mxu2 %v4632_v7  ;;  %v10051_v7 = vld [vmem:[#allocation44_spill] sm:$0xff] }
 0xe4a   :  { %4956 = vmatpush.bf16.msrb.mxu0 %v9906_v58  ;;  %4982 = vmatpush.bf16.msrb.mxu2 %v9951_v46 }
 0xe4e   :  { %4957 = vmatpush.bf16.msrb.mxu0 %v9952_v54  ;;  %4983 = vmatpush.bf16.msrb.mxu2 %v9999_v33 }
 0xe52   :  { %4958 = vmatpush.bf16.msrb.mxu0 %v10000_v17  ;;  %4984 = vmatpush.bf16.msrb.mxu2 %v10046_v23 }
 0xe56   :  { %4959 = vmatpush.bf16.msrb.mxu0 %v10047_v41  ;;  %4985 = vmatpush.bf16.msrb.mxu2 %v10048_v29 }
 0xe5a   :  { %5004 = vmatpush.bf16.msra.mxu0 %v10049_v13  ;;  %5030 = vmatpush.bf16.msra.mxu2 %v10050_v52 }
 0xe5e   :  { %5005 = vmatpush.bf16.msra.mxu0 %v10051_v7  ;;  %5031 = vmatpush.bf16.msra.mxu2 %v10052_v47 }
 0xe62   :  { %5006 = vmatpush.bf16.msra.mxu0 %v10053_v19  ;;  %5032 = vmatpush.bf16.msra.mxu2 %v10054_v62 }
 0xe66   :  { %5007 = vmatpush.bf16.msra.mxu0 %v10055_v60  ;;  %5033 = vmatpush.bf16.msra.mxu2 %v10056_v57 }
 0xe6a   :  { %5008 = vmatpush.bf16.msra.mxu0 %v10057_v25  ;;  %5034 = vmatpush.bf16.msra.mxu2 %v10058_v30  ;;  %v10066_v30 = vld [vmem:[#allocation70_spill] sm:$0xff] }
 0xe6e   :  { %5009 = vmatpush.bf16.msra.mxu0 %v10059_v6  ;;  %5035 = vmatpush.bf16.msra.mxu2 %v10060_v12 }
 0xe72   :  { %5010 = vmatpush.bf16.msra.mxu0 %v10061_v31  ;;  %5036 = vmatpush.bf16.msra.mxu2 %v10062_v53 }
 0xe76   :  { %5011 = vmatpush.bf16.msra.mxu0 %v10063_v48  ;;  %5037 = vmatpush.bf16.msra.mxu2 %v10064_v42 }
 0xeb6   :  { %v4643_v34 = vpop.f32.mrf.mxu0 }
 0xeb7   :  { %v4644_v60 = vadd.f32 %v4643_v34, %v10065_v49 }
 0xeb9   :  { %v4657_v57 = vadd.f32 %v9162_v38, %v4644_v60 }
 0xebb   :  { %v7200_v25 = vmul.f32 -1.442695, %v4657_v57 }
 0xebc   :  { %v4669_v62 = vpop.f32.mrf.mxu2 }
 0xebd   :  { %7887 = vpow2.f32 %v7200_v25  ;;  %v4670_v6 = vadd.f32 %v4669_v62, %v10066_v30 }
 0xebe   :  { %v4645_v19 = vpop.f32.mrf.mxu0 }
 0xebf   :  { %v4683_v12 = vadd.f32 %v9168_v20, %v4670_v6 }
 0xec1   :  { %v7201_v31 = vmul.f32 -1.442695, %v4683_v12 }
 0xec3   :  { %v7888_v47 = vpop.eup %7887  ;;  %7889 = vpow2.f32 %v7201_v31 }
 0xec4   :  { %v4741_v53 = vadd.f32 1.0, %v7888_v47  ;;  %v4671_v48 = vpop.f32.mrf.mxu2 }
 0xec6   :  { %7891 = vrcp.f32 %v4741_v53  ;;  %v4695_v42 = vpop.f32.mrf.mxu0  ;;  %vm4747_vm2 = vweird.f32 %v4741_v53 }
 0xec7   :  { %v4696_v20 = vadd.f32 %v4695_v42, %v8669_v43 }
 0xec9   :  { %v7890_v7 = vpop.eup %7889 }
 0xeca   :  { %v4760_v52 = vadd.f32 1.0, %v7890_v7  ;;  %v4709_v7 = vadd.f32 %v9183_v39, %v4696_v20 }
 0xecc   :  { %v7892_v34 = vpop.eup %7891  ;;  %7893 = vrcp.f32 %v4760_v52  ;;  %v4721_v38 = vpop.f32.mrf.mxu2  ;;  %v4772_v49 = vand.u32 2147483648, %v4760_v52  ;;  %vm4766_vm4 = vweird.f32 %v4760_v52 }
 0xecd   :  { %v4743_v60 = vmul.f32 %v7892_v34, %v4741_v53  ;;  %v4722_v57 = vadd.f32 %v4721_v38, %v9932_v45  ;;  %vm4748_vm9 = vweird.f32 %v7892_v34  ;;  %v4753_v38 = vand.u32 2147483648, %v4741_v53 }
 0xece   :  { %v4697_v25 = vpop.f32.mrf.mxu0  ;;  %vm4749_vm5 = vmor %vm4747_vm2, %vm4748_vm9 }
 0xecf   :  { %v4744_v62 = vsub.f32 1.0, %v4743_v60  ;;  %v4735_v19 = vadd.f32 %v9185_v51, %v4722_v57  ;;  %v4770_v60 = vand.u32 2147483647, %v4760_v52  ;;  %v4751_v51 = vand.u32 2147483647, %v4741_v53 }
 0xed0   :  { %v4773_v25 = vor.u32 1.1754944e-38, %v4772_v49 }
 0xed1   :  { %v7202_v6 = vmul.f32 -1.442695, %v4735_v19  ;;  %v4745_v47 = vmul.f32 %v7892_v34, %v4744_v62  ;;  %vm4771_vm7 = vcmp.eq.f32.partialorder %v4770_v60, 8.507059e+37  ;;  %vm4752_vm8 = vcmp.eq.f32.partialorder %v4751_v51, 8.507059e+37 }
 0xed2   :  { %v7894_v12 = vpop.eup %7893 }
 0xed3   :  { %v4762_v31 = vmul.f32 %v7894_v12, %v4760_v52  ;;  %7895 = vpow2.f32 %v7202_v6  ;;  %v4746_v13 = vadd.f32 %v7892_v34, %v4745_v47  ;;  %vm4767_vm10 = vweird.f32 %v7894_v12 }
 0xed4   :  { %v4723_v48 = vpop.f32.mrf.mxu2  ;;  %7897 = vtanh.f32 %v4709_v7  ;;  %vm4768_vm6 = vmor %vm4766_vm4, %vm4767_vm10  ;;  %v4754_v6 = vor.u32 1.1754944e-38, %v4753_v38 }
 0xed5   :  { %v4763_v30 = vsub.f32 1.0, %v4762_v31  ;;  %v4750_v62 = vsel %vm4749_vm5, %v7892_v34, %v4746_v13 }
 0xed7   :  { %v4764_v29 = vmul.f32 %v7894_v12, %v4763_v30  ;;  %v4755_v30 = vsel %vm4752_vm8, %v4754_v6, %v4750_v62 }
 0xed9   :  { %v7896_v57 = vpop.eup %7895  ;;  %v4765_v42 = vadd.f32 %v7894_v12, %v4764_v29 }
 0xeda   :  { %v4780_v19 = vadd.f32 1.0, %v7896_v57  ;;  %v7898_v31 = vpop.eup %7897 }
 0xedb   :  { %v4769_v39 = vsel %vm4768_vm6, %v7894_v12, %v4765_v42  ;;  %v4797_v53 = vmul.f32 %v7898_v31, %v4755_v30  ;;  %v10067_v31 = vld [vmem:[#allocation41_spill] sm:$0xff] }
 0xedc   :  { %v4774_v20 = vsel %vm4771_vm7, %v4773_v25, %v4769_v39  ;;  %7899 = vrcp.f32 %v4780_v19  ;;  %v4792_v13 = vand.u32 2147483648, %v4780_v19  ;;  %v4790_v34 = vand.u32 2147483647, %v4780_v19 }
 0xedd   :  { %v4796_v47 = vmul.f32 %v4774_v20, %v9115_v11  ;;  %vm4786_vm10 = vweird.f32 %v4780_v19 }
 0xede   :  { %v4793_v38 = vor.u32 1.1754944e-38, %v4792_v13  ;;  %vm4791_vm4 = vcmp.eq.f32.partialorder %v4790_v34, 8.507059e+37  ;;  %v10072_v13 = vld [vmem:[#allocation50_spill] sm:$0xff] }
 0xedf   :  { %v9254_v52 = vadd.f32 %v4797_v53, %v4796_v47  ;;  %v10068_v53 = vld [vmem:[#allocation42_spill] sm:$0xff] }
 0xee0   :  { %v10074_v34 = vld [vmem:[#allocation54_spill] sm:$0xff] }
 0xee1   :  { %7901 = vtanh.f32 %v9254_v52 }
 0xee2   :  { %v7900_v48 = vpop.eup %7899 }
 0xee3   :  { %v4782_v29 = vmul.f32 %v7900_v48, %v4780_v19  ;;  %vm4787_vm9 = vweird.f32 %v7900_v48 }
 0xee4   :  { %vm4788_vm2 = vmor %vm4786_vm10, %vm4787_vm9 }
 0xee5   :  { %v4783_v7 = vsub.f32 1.0, %v4782_v29  ;;  %v10070_v29 = vld [vmem:[#allocation46_spill] sm:$0xff] }
 0xee7   :  { %v4784_v49 = vmul.f32 %v7900_v48, %v4783_v7  ;;  %v7902_v11 = vpop.eup %7901  ;;  %v10071_v7 = vld [vmem:[#allocation47_spill] sm:$0xff] }
 0xee9   :  { %v4785_v12 = vadd.f32 %v7900_v48, %v4784_v49  ;;  %v10073_v49 = vld [vmem:[#allocation51_spill] sm:$0xff] }
 0xeeb   :  { %v4789_v60 = vsel %vm4788_vm2, %v7900_v48, %v4785_v12  ;;  %v10069_v48 = vld [vmem:[#allocation43_spill] sm:$0xff] }
 0xeec   :  { %v4794_v51 = vsel %vm4791_vm4, %v4793_v38, %v4789_v60  ;;  %v10075_v12 = vld [vmem:[#allocation55_spill] sm:$0xff]  ;;  %v10076_v38 = vld [vmem:[#allocation58_spill] sm:$0xff] }
 0xeed   :  { %v4800_v57 = vmul.f32 %v7902_v11, %v4794_v51  ;;  %v10077_v60 = vld [vmem:[#allocation59_spill] sm:$0xff]  ;;  %v10078_v11 = vld [vmem:[#allocation62_spill] sm:$0xff] }
 0xeee   :  { %v10079_v51 = vld [vmem:[#allocation63_spill] sm:$0xff] }
 0xeef   :  { %v4951_v42 = vpack.c.bf16 %v4800_v57, %v4800_v57  ;;  %v4803_v25 = vmul.f32 %v4800_v57, %v9891_v50  ;;  %v4802_v62 = vmul.f32 %v4800_v57, %v9895_v4  ;;  %v4801_v6 = vmul.f32 %v4800_v57, %v9892_v40 }
 0xef0   :  { %v4806_v19 = vmul.f32 %v4800_v57, %v9893_v55  ;;  %v4805_v39 = vmul.f32 %v4800_v57, %v9890_v37  ;;  %v4804_v20 = vmul.f32 %v4800_v57, %v9894_v32  ;;  %v4808_v30 = vmul.f32 %v4800_v57, %v8588_v9 }
 0xef1   :  { %4973 = vmatmul.bf16.vlgmr.msrb.gmra.mxu1 %v4951_v42  ;;  %4999 = vmatmul.bf16.vlgmr.msrb.gmra.mxu3 %v4951_v42  ;;  %v4807_v47 = vmul.f32 %v4800_v57, %v9896_v36  ;;  %v10080_v57 = vld [vmem:[#allocation65_spill] sm:$0xff] }
 0xef2   :  { %4813 = vadd.xlane.f32.xlu2 %v4803_v25  ;;  %4811 = vadd.xlane.f32.xlu1 %v4802_v62  ;;  %v10082_v25 = vld [vmem:[#allocation68_spill] sm:$0xff]  ;;  %v10083_v62 = vld [vmem:[#allocation69_spill] sm:$0xff] }
 0xef3   :  { %4809 = vadd.xlane.f32.xlu0 %v4801_v6  ;;  %5283 = vmatpush.bf16.msrb.mxu1 %v8349_v27 }
 0xef4   :  { %5309 = vmatpush.bf16.msrb.mxu3 %v8352_v18 }
 0xef7   :  { %5284 = vmatpush.bf16.msrb.mxu1 %v8362_v14 }
 0xef8   :  { %5310 = vmatpush.bf16.msrb.mxu3 %v8364_v16 }
 0xefa   :  { %4819 = vadd.xlane.f32.xlu2 %v4806_v19  ;;  %4817 = vadd.xlane.f32.xlu1 %v4805_v39 }
 0xefb   :  { %4815 = vadd.xlane.f32.xlu0 %v4804_v20  ;;  %5285 = vmatpush.bf16.msrb.mxu1 %v8373_v15  ;;  %v10084_v20 = vld [vmem:[#allocation18_spill] sm:$0xff] }
 0xefc   :  { %5311 = vmatpush.bf16.msrb.mxu3 %v8376_v59 }
 0xeff   :  { %5286 = vmatpush.bf16.msrb.mxu1 %v8385_v8 }
 0xf00   :  { %5312 = vmatpush.bf16.msrb.mxu3 %v8388_v10 }
 0xf01   :  { %5025 = vmatmul.bf16.vlgmr.msra.gmra.mxu1 %v4951_v42  ;;  %5051 = vmatmul.bf16.vlgmr.msra.gmra.mxu3 %v4951_v42  ;;  %v10081_v42 = vld [vmem:[#allocation66_spill] sm:$0xff] }
 0xf02   :  { %4823 = vadd.xlane.f32.xlu1 %v4808_v30 }
 0xf03   :  { %4821 = vadd.xlane.f32.xlu0 %v4807_v47  ;;  %5287 = vmatpush.bf16.msrb.mxu1 %v8397_v3 }
 0xf04   :  { %5313 = vmatpush.bf16.msrb.mxu3 %v8400_v5 }
 0xf07   :  { %5288 = vmatpush.bf16.msrb.mxu1 %v8411_v1 }
 0xf08   :  { %5314 = vmatpush.bf16.msrb.mxu3 %v8414_v28 }
 0xf0b   :  { %5289 = vmatpush.bf16.msrb.mxu1 %v9865_v24 }
 0xf0c   :  { %5315 = vmatpush.bf16.msrb.mxu3 %v9866_v26 }
 0xf0f   :  { %5290 = vmatpush.bf16.msrb.mxu1 %v9869_v56 }
 0xf10   :  { %5316 = vmatpush.bf16.msrb.mxu3 %v10067_v31 }
 0xf13   :  { %5335 = vmatpush.bf16.msra.mxu1 %v10068_v53 }
 0xf14   :  { %5361 = vmatpush.bf16.msra.mxu3 %v10069_v48 }
 0xf17   :  { %5336 = vmatpush.bf16.msra.mxu1 %v10070_v29 }
 0xf18   :  { %5362 = vmatpush.bf16.msra.mxu3 %v10071_v7  ;;  %v10086_v7 = vld [vmem:[#allocation20_spill] sm:$0xff] }
 0xf1b   :  { %5337 = vmatpush.bf16.msra.mxu1 %v10072_v13  ;;  %v10085_v13 = vld [vmem:[#allocation22_spill] sm:$0xff] }
 0xf1c   :  { %5363 = vmatpush.bf16.msra.mxu3 %v10073_v49 }
 0xf1f   :  { %5338 = vmatpush.bf16.msra.mxu1 %v10074_v34 }
 0xf20   :  { %5364 = vmatpush.bf16.msra.mxu3 %v10075_v12 }
 0xf23   :  { %5339 = vmatpush.bf16.msra.mxu1 %v10076_v38 }
 0xf24   :  { %5365 = vmatpush.bf16.msra.mxu3 %v10077_v60 }
 0xf27   :  { %5340 = vmatpush.bf16.msra.mxu1 %v10078_v11 }
 0xf28   :  { %5366 = vmatpush.bf16.msra.mxu3 %v10079_v51 }
 0xf2b   :  { %5341 = vmatpush.bf16.msra.mxu1 %v10080_v57 }
 0xf2c   :  { %5367 = vmatpush.bf16.msra.mxu3 %v10081_v42 }
 0xf2f   :  { %5342 = vmatpush.bf16.msra.mxu1 %v10082_v25 }
 0xf30   :  { %5368 = vmatpush.bf16.msra.mxu3 %v10083_v62 }
 0xf65   :  { %v4812_v6 = vpop.xlane.xlu1 %4811  ;;  %v4814_v39 = vpop.xlane.xlu2 %4813 }
 0xf66   :  { %v4810_v19 = vpop.xlane.xlu0 %4809  ;;  %v4835_v30 = vperm.slane %v4812_v6, %v10084_v20  ;;  %v4836_v60 = vperm.slane %v4814_v39, %v10084_v20 }
 0xf67   :  { %v4834_v47 = vperm.slane %v4810_v19, %v10084_v20 }
 0xf69   :  { %v4842_v51 = vsel %vm3587_vm11, %v4835_v30, %v4834_v47 }
 0xf6a   :  { %v4843_v62 = vsel %vm3588_vm12, %v4836_v60, %v4842_v51 }
 0xf6d   :  { %v4818_v11 = vpop.xlane.xlu1 %4817  ;;  %v4820_v34 = vpop.xlane.xlu2 %4819 }
 0xf6e   :  { %v4816_v38 = vpop.xlane.xlu0 %4815  ;;  %v9301_v57 = vpop.f32.mrf.mxu1  ;;  %v4838_v25 = vperm.slane %v4818_v11, %v10084_v20  ;;  %v4839_v49 = vperm.slane %v4820_v34, %v10084_v20 }
 0xf6f   :  { %v4837_v42 = vperm.slane %v4816_v38, %v10084_v20  ;;  %v9314_v38 = vmax.f32 %v10086_v7, %v10085_v13 }
 0xf71   :  { %v4844_v12 = vsel %vm3590_vm13, %v4837_v42, %v4843_v62  ;;  %10087 = vst [vmem:[#allocation26_spill] sm:$0xff] %v9314_v38  ;;  %v4852_v42 = vld [vmem:[#allocation9 + $0x20] sm:$0xff]  ;;  %vm4825_vm5 = vcmp.gt.f32.partialorder %v9314_v38, 0.5 }
 0xf72   :  { %v4845_v19 = vsel %vm3592_vm14, %v4838_v25, %v4844_v12 }
 0xf73   :  { %v4846_v51 = vsel %vm3594_vm15, %v4839_v49, %v4845_v19 }
 0xf74   :  { %v9307_v6 = vpop.f32.mrf.mxu3 }
 0xf75   :  { %v4824_v39 = vpop.xlane.xlu1 %4823 }
 0xf76   :  { %v4841_v30 = vperm.slane %v4824_v39, %v10084_v20  ;;  %v4822_v47 = vpop.xlane.xlu0 %4821  ;;  %v4976_v11 = vpop.f32.mrf.mxu1 }
 0xf77   :  { %v4840_v60 = vperm.slane %v4822_v47, %v10084_v20 }
 0xf79   :  { %v4847_v62 = vsel %vm3596_vm0, %v4840_v60, %v4846_v51  ;;  %v10088_v51 = vld [vmem:[#allocation35_spill] sm:$0xff] }
 0xf7a   :  { %v4848_v12 = vsel %vm3598_vm1, %v4841_v30, %v4847_v62  ;;  %vm4948_vm9 = vcmp.eq.s32.totalorder %v10088_v51, 4 }
 0xf7b   :  { %v4850_v34 = vsel %vm4825_vm5, -1e+30, %v4848_v12 }
 0xf7c   :  { %v4853_v25 = vadd.f32 %v4852_v42, %v4850_v34  ;;  %v5002_v39 = vpop.f32.mrf.mxu3 }
 0xf7e   :  { %v4854_v29 = vsel %vm3899_vm3, %v4853_v25, -inf  ;;  %v9322_v48 = vpop.f32.mrf.mxu1 }
 0xf7f   :  { %v4855_v7 = vrot.slane %v4854_v29, 4 }
 0xf81   :  { %v4856_v13 = vmax.f32 %v4854_v29, %v4855_v7 }
 0xf83   :  { %v4857_v11 = vrot.slane %v4856_v13, 2 }
 0xf84   :  { %v9324_v47 = vpop.f32.mrf.mxu3 }
 0xf85   :  { %v4858_v49 = vmax.f32 %v4856_v13, %v4857_v11  ;;  %v10091_v13 = vmov 0.0  }
 0xf86   :  { %v5028_v19 = vpop.f32.mrf.mxu1 }
 0xf87   :  { %v4859_v20 = vrot.slane %v4858_v49, 1 }
 0xf89   :  { %v4860_v60 = vmax.f32 %v4858_v49, %v4859_v20  ;;  %v10089_v20 = vld [vmem:[#allocation24_spill] sm:$0xff] }
 0xf8b   :  { %vm4861_vm6 = vcmp.eq.f32.partialorder %v4853_v25, %v4860_v60 }
 0xf8c   :  { %v4862_v38 = vsel %vm4861_vm6, %v10088_v51, 8  ;;  %v5054_v30 = vpop.f32.mrf.mxu3 }
 0xf8d   :  { %v4863_v42 = vsel %vm3899_vm3, %v4862_v38, 2147483647 }
 0xf8e   :  { %v4864_v62 = vrot.slane %v4863_v42, 4 }
 0xf90   :  { %vm4865_vm7 = vcmp.lt.s32.totalorder %v4863_v42, %v4864_v62 }
 0xf91   :  { %v4866_v12 = vsel %vm4865_vm7, %v4863_v42, %v4864_v62 }
 0xf92   :  { %v4867_v34 = vrot.slane %v4866_v12, 2 }
 0xf94   :  { %vm4868_vm8 = vcmp.lt.s32.totalorder %v4866_v12, %v4867_v34 }
 0xf95   :  { %v4869_v39 = vsel %vm4868_vm8, %v4866_v12, %v4867_v34 }
 0xf96   :  { %v4870_v29 = vrot.slane %v4869_v39, 1 }
 0xf98   :  { %vm4871_vm10 = vcmp.lt.s32.totalorder %v4869_v39, %v4870_v29 }
 0xf99   :  { %v4872_v7 = vsel %vm4871_vm10, %v4869_v39, %v4870_v29 }
 0xf9a   :  { %vm4873_vm2 = vcmp.eq.s32.totalorder %v10088_v51, %v4872_v7  ;;  %v9331_v25 = vsel %vm4948_vm9, %v4872_v7, %v10089_v20 }
 0xf9b   :  { %10090 = vst [vmem:[#allocation23_spill] sm:$0xff] %v9331_v25  ;;  %v9334_v11 = vsel %vm4873_vm2, 1.0, %v10091_v13 }
 0xf9c   :  { %10092 = vst [vmem:[#allocation28_spill] sm:$0xff] %v9334_v11  ;;  %v4905_v38 = vperm.slane %v9334_v11, 4  ;;  %v4912_v49 = vperm.slane %v9334_v11, 5  ;;  %v4891_v19 = vperm.slane %v9334_v11, 2  ;;  %v4898_v60 = vperm.slane %v9334_v11, 3 }
 0xf9d   :  { %v4877_v30 = vperm.slane %v9334_v11, 0  ;;  %v4884_v42 = vperm.slane %v9334_v11, 1  ;;  %v4919_v39 = vperm.slane %v9334_v11, 6  ;;  %v4926_v29 = vperm.slane %v9334_v11, 7 }
 0xf9e   :  { %v7645_v62 = vpack.i.bf16 %v4912_v49, %v4905_v38  ;;  %v7640_v12 = vpack.i.bf16 %v4898_v60, %v4891_v19 }
 0xf9f   :  { %v7635_v34 = vpack.i.bf16 %v4884_v42, %v4877_v30  ;;  %v7650_v7 = vpack.i.bf16 %v4926_v29, %v4919_v39 }
 0xfa0   :  { %7646 = vperm.xlu1 %7552, %v7645_v62   ;;  %7641 = vperm.xlu0 %7584, %v7640_v12  }
 0xfa1   :  { %7636 = vperm.xlu2 %7550, %v7635_v34  }
 0xfa8   :  { %7651 = vperm.xlu0 %7584, %v7650_v7  }
 0xffb   :  { %v7637_v20 = vpop.permute.xlu2 %7636 }
 0xffc   :  { %v7639_v13 = vunpack.i.h.bf16 %v7637_v20  ;;  %v7638_v25 = vunpack.i.l.bf16 %v7637_v20 }
 0xffe   :  { %v4934_v51 = vmul.f32 %v7639_v13, %v9895_v4  ;;  %v4933_v53 = vmul.f32 %v7638_v25, %v9892_v40 }
0x1000   :  { %v4941_v60 = vadd.f32 %v4934_v51, %v4933_v53 }
0x1012   :  { %v7647_v31 = vpop.permute.xlu1 %7646  ;;  %v7642_v38 = vpop.permute.xlu0 %7641 }
0x1013   :  { %v7644_v49 = vunpack.i.h.bf16 %v7642_v38  ;;  %v7643_v19 = vunpack.i.l.bf16 %v7642_v38  ;;  %v7648_v30 = vunpack.i.l.bf16 %v7647_v31  ;;  %v7649_v62 = vunpack.i.h.bf16 %v7647_v31 }
0x1015   :  { %v4935_v42 = vmul.f32 %v7643_v19, %v9891_v50  ;;  %v4936_v12 = vmul.f32 %v7644_v49, %v9894_v32  ;;  %v4937_v39 = vmul.f32 %v7648_v30, %v9890_v37  ;;  %v4938_v13 = vmul.f32 %v7649_v62, %v9893_v55  ;;  %v10095_v49 = vld [vmem:[#allocation32_spill] sm:$0xff]  ;;  %v10097_v30 = vld [vmem:[#allocation34_spill] sm:$0xff]  ;;  %v10099_v62 = vld [vmem:[#allocation39_spill] sm:$0xff] }
0x1017   :  { %v4942_v34 = vadd.f32 %v4941_v60, %v4935_v42  ;;  %v10096_v60 = vld [vmem:[#allocation44_spill] sm:$0xff] }
0x1018   :  { %v10098_v42 = vld [vmem:[#allocation48_spill] sm:$0xff] }
0x1019   :  { %v4943_v29 = vadd.f32 %v4942_v34, %v4936_v12  ;;  %v10100_v12 = vld [vmem:[#allocation52_spill] sm:$0xff]  ;;  %v10101_v34 = vld [vmem:[#allocation45_spill] sm:$0xff] }
0x101a   :  { %v7652_v7 = vpop.permute.xlu0 %7651 }
0x101b   :  { %v4944_v20 = vadd.f32 %v4943_v29, %v4937_v39  ;;  %v7654_v25 = vunpack.i.h.bf16 %v7652_v7  ;;  %v7653_v11 = vunpack.i.l.bf16 %v7652_v7  ;;  %v10102_v39 = vld [vmem:[#allocation56_spill] sm:$0xff]  ;;  %v10103_v29 = vld [vmem:[#allocation49_spill] sm:$0xff] }
0x101c   :  { %v10104_v7 = vld [vmem:[#allocation60_spill] sm:$0xff] }
0x101d   :  { %v4939_v56 = vmul.f32 %v7653_v11, %v9896_v36  ;;  %v4945_v38 = vadd.f32 %v4944_v20, %v4938_v13  ;;  %v4940_v53 = vmul.f32 %v7654_v25, %v8588_v9  ;;  %v10094_v11 = vld [vmem:[#allocation38_spill] sm:$0xff]  ;;  %v10105_v13 = vld [vmem:[#allocation53_spill] sm:$0xff]  ;;  %v10106_v20 = vld [vmem:[#allocation64_spill] sm:$0xff] }
0x101e   :  { %v10107_v25 = vld [vmem:[#allocation57_spill] sm:$0xff] }
0x101f   :  { %v4946_v51 = vadd.f32 %v4945_v38, %v4939_v56  ;;  %v10093_v56 = vld [vmem:[#allocation31_spill] sm:$0xff] }
0x1020   :  { %v10108_v38 = vld [vmem:[#allocation67_spill] sm:$0xff] }
0x1021   :  { %v4947_v19 = vadd.f32 %v4946_v51, %v4940_v53  ;;  %v10109_v53 = vld [vmem:[#allocation61_spill] sm:$0xff] }
0x1023   :  { %v4950_v31 = vpack.c.bf16 %v4947_v19, %v4947_v19  ;;  %v10110_v19 = vld [vmem:[#allocation36_spill] sm:$0xff] }
0x1025   :  { %4960 = vmatmul.bf16.vlgmr.msrb.gmra.mxu0 %v4950_v31  ;;  %4986 = vmatmul.bf16.vlgmr.msrb.gmra.mxu2 %v4950_v31 }
0x1026   :  { %5270 = vmatpush.bf16.msrb.mxu0 %v8344_v44  ;;  %5296 = vmatpush.bf16.msrb.mxu2 %v9901_v21 }
0x102a   :  { %5271 = vmatpush.bf16.msrb.mxu0 %v8355_v35  ;;  %5297 = vmatpush.bf16.msrb.mxu2 %v8332_v0 }
0x102e   :  { %5272 = vmatpush.bf16.msrb.mxu0 %v9902_v22  ;;  %5298 = vmatpush.bf16.msrb.mxu2 %v9903_v2 }
0x1032   :  { %5273 = vmatpush.bf16.msrb.mxu0 %v9904_v61  ;;  %5299 = vmatpush.bf16.msrb.mxu2 %v9905_v63 }
0x1035   :  { %5012 = vmatmul.bf16.vlgmr.msra.gmra.mxu0 %v4950_v31  ;;  %5038 = vmatmul.bf16.vlgmr.msra.gmra.mxu2 %v4950_v31 }
0x1036   :  { %5274 = vmatpush.bf16.msrb.mxu0 %v9906_v58  ;;  %5300 = vmatpush.bf16.msrb.mxu2 %v9951_v46 }
0x103a   :  { %5275 = vmatpush.bf16.msrb.mxu0 %v9952_v54  ;;  %5301 = vmatpush.bf16.msrb.mxu2 %v9999_v33 }
0x103e   :  { %5276 = vmatpush.bf16.msrb.mxu0 %v10000_v17  ;;  %5302 = vmatpush.bf16.msrb.mxu2 %v10046_v23 }
0x1042   :  { %5277 = vmatpush.bf16.msrb.mxu0 %v10047_v41  ;;  %5303 = vmatpush.bf16.msrb.mxu2 %v10093_v56 }
0x1046   :  { %5322 = vmatpush.bf16.msra.mxu0 %v10094_v11  ;;  %5348 = vmatpush.bf16.msra.mxu2 %v10095_v49 }
0x104a   :  { %5323 = vmatpush.bf16.msra.mxu0 %v10096_v60  ;;  %5349 = vmatpush.bf16.msra.mxu2 %v10097_v30 }
0x104e   :  { %5324 = vmatpush.bf16.msra.mxu0 %v10098_v42  ;;  %5350 = vmatpush.bf16.msra.mxu2 %v10099_v62 }
0x1052   :  { %5325 = vmatpush.bf16.msra.mxu0 %v10100_v12  ;;  %5351 = vmatpush.bf16.msra.mxu2 %v10101_v34 }
0x1056   :  { %5326 = vmatpush.bf16.msra.mxu0 %v10102_v39  ;;  %5352 = vmatpush.bf16.msra.mxu2 %v10103_v29  ;;  %v10111_v29 = vld [vmem:[#allocation70_spill] sm:$0xff] }
0x105a   :  { %5327 = vmatpush.bf16.msra.mxu0 %v10104_v7  ;;  %5353 = vmatpush.bf16.msra.mxu2 %v10105_v13 }
0x105e   :  { %5328 = vmatpush.bf16.msra.mxu0 %v10106_v20  ;;  %5354 = vmatpush.bf16.msra.mxu2 %v10107_v25 }
0x1062   :  { %5329 = vmatpush.bf16.msra.mxu0 %v10108_v38  ;;  %5355 = vmatpush.bf16.msra.mxu2 %v10109_v53 }
0x10a2   :  { %v4961_v51 = vpop.f32.mrf.mxu0 }
0x10a3   :  { %v4962_v31 = vadd.f32 %v4961_v51, %v10110_v19 }
0x10a5   :  { %v4975_v34 = vadd.f32 %v9301_v57, %v4962_v31 }
0x10a7   :  { %v7204_v39 = vmul.f32 -1.442695, %v4975_v34 }
0x10a8   :  { %v4987_v12 = vpop.f32.mrf.mxu2 }
0x10a9   :  { %7903 = vpow2.f32 %v7204_v39  ;;  %v4988_v7 = vadd.f32 %v4987_v12, %v10111_v29 }
0x10aa   :  { %v4963_v62 = vpop.f32.mrf.mxu0 }
0x10ab   :  { %v5001_v13 = vadd.f32 %v9307_v6, %v4988_v7 }
0x10ad   :  { %v7205_v20 = vmul.f32 -1.442695, %v5001_v13 }
0x10af   :  { %v7904_v42 = vpop.eup %7903  ;;  %7905 = vpow2.f32 %v7205_v20 }
0x10b0   :  { %v5059_v25 = vadd.f32 1.0, %v7904_v42  ;;  %v4989_v38 = vpop.f32.mrf.mxu2 }
0x10b2   :  { %7907 = vrcp.f32 %v5059_v25  ;;  %v5013_v53 = vpop.f32.mrf.mxu0  ;;  %vm5065_vm6 = vweird.f32 %v5059_v25 }
0x10b3   :  { %v5014_v6 = vadd.f32 %v5013_v53, %v8669_v43 }
0x10b5   :  { %v7906_v30 = vpop.eup %7905 }
0x10b6   :  { %v5078_v60 = vadd.f32 1.0, %v7906_v30  ;;  %v5027_v30 = vadd.f32 %v9322_v48, %v5014_v6 }
0x10b8   :  { %v7908_v51 = vpop.eup %7907  ;;  %7909 = vrcp.f32 %v5078_v60  ;;  %v5039_v57 = vpop.f32.mrf.mxu2  ;;  %v5090_v19 = vand.u32 2147483648, %v5078_v60  ;;  %vm5084_vm7 = vweird.f32 %v5078_v60 }
0x10b9   :  { %v5061_v34 = vmul.f32 %v7908_v51, %v5059_v25  ;;  %v5040_v39 = vadd.f32 %v5039_v57, %v9932_v45  ;;  %vm5066_vm4 = vweird.f32 %v7908_v51  ;;  %v5071_v57 = vand.u32 2147483648, %v5059_v25 }
0x10ba   :  { %v5015_v31 = vpop.f32.mrf.mxu0  ;;  %vm5067_vm8 = vmor %vm5065_vm6, %vm5066_vm4 }
0x10bb   :  { %v5062_v12 = vsub.f32 1.0, %v5061_v34  ;;  %v5053_v62 = vadd.f32 %v9324_v47, %v5040_v39  ;;  %v5088_v34 = vand.u32 2147483647, %v5078_v60  ;;  %v5069_v47 = vand.u32 2147483647, %v5059_v25 }
0x10bc   :  { %v5091_v31 = vor.u32 1.1754944e-38, %v5090_v19 }
0x10bd   :  { %v7206_v7 = vmul.f32 -1.442695, %v5053_v62  ;;  %v5063_v42 = vmul.f32 %v7908_v51, %v5062_v12  ;;  %vm5089_vm10 = vcmp.eq.f32.partialorder %v5088_v34, 8.507059e+37  ;;  %vm5070_vm2 = vcmp.eq.f32.partialorder %v5069_v47, 8.507059e+37 }
0x10be   :  { %v7910_v13 = vpop.eup %7909 }
0x10bf   :  { %v5080_v20 = vmul.f32 %v7910_v13, %v5078_v60  ;;  %7911 = vpow2.f32 %v7206_v7  ;;  %v5064_v49 = vadd.f32 %v7908_v51, %v5063_v42  ;;  %vm5085_vm5 = vweird.f32 %v7910_v13 }
0x10c0   :  { %v5041_v38 = vpop.f32.mrf.mxu2  ;;  %7913 = vtanh.f32 %v5027_v30  ;;  %vm5086_vm9 = vmor %vm5084_vm7, %vm5085_vm5  ;;  %v5072_v7 = vor.u32 1.1754944e-38, %v5071_v57 }
0x10c1   :  { %v5081_v29 = vsub.f32 1.0, %v5080_v20  ;;  %v5068_v12 = vsel %vm5067_vm8, %v7908_v51, %v5064_v49 }
0x10c3   :  { %v5082_v11 = vmul.f32 %v7910_v13, %v5081_v29  ;;  %v5073_v29 = vsel %vm5070_vm2, %v5072_v7, %v5068_v12 }
0x10c5   :  { %v7912_v39 = vpop.eup %7911  ;;  %v5083_v53 = vadd.f32 %v7910_v13, %v5082_v11 }
0x10c6   :  { %v5098_v62 = vadd.f32 1.0, %v7912_v39  ;;  %v7914_v20 = vpop.eup %7913 }
0x10c7   :  { %v5087_v48 = vsel %vm5086_vm9, %v7910_v13, %v5083_v53  ;;  %v5115_v25 = vmul.f32 %v7914_v20, %v5073_v29  ;;  %v10124_v29 = vld [vmem:[#allocation62_spill] sm:$0xff]  ;;  %v10126_v20 = vld [vmem:[#allocation65_spill] sm:$0xff] }
0x10c8   :  { %v5092_v6 = vsel %vm5089_vm10, %v5091_v31, %v5087_v48  ;;  %7915 = vrcp.f32 %v5098_v62  ;;  %v5110_v49 = vand.u32 2147483648, %v5098_v62  ;;  %v5108_v51 = vand.u32 2147483647, %v5098_v62 }
0x10c9   :  { %v5114_v42 = vmul.f32 %v5092_v6, %v9254_v52  ;;  %vm5104_vm5 = vweird.f32 %v5098_v62 }
0x10ca   :  { %v5111_v57 = vor.u32 1.1754944e-38, %v5110_v49  ;;  %vm5109_vm7 = vcmp.eq.f32.partialorder %v5108_v51, 8.507059e+37 }
0x10cb   :  { %v9393_v60 = vadd.f32 %v5115_v25, %v5114_v42  ;;  %v10125_v42 = vld [vmem:[#allocation63_spill] sm:$0xff]  ;;  %v10127_v25 = vld [vmem:[#allocation66_spill] sm:$0xff] }
0x10cd   :  { %7917 = vtanh.f32 %v9393_v60 }
0x10ce   :  { %v7916_v38 = vpop.eup %7915 }
0x10cf   :  { %v5100_v11 = vmul.f32 %v7916_v38, %v5098_v62  ;;  %vm5105_vm4 = vweird.f32 %v7916_v38 }
0x10d0   :  { %vm5106_vm6 = vmor %vm5104_vm5, %vm5105_vm4 }
0x10d1   :  { %v5101_v30 = vsub.f32 1.0, %v5100_v11  ;;  %v10129_v11 = vld [vmem:[#allocation69_spill] sm:$0xff] }
0x10d3   :  { %v5102_v19 = vmul.f32 %v7916_v38, %v5101_v30  ;;  %v7918_v52 = vpop.eup %7917 }
0x10d5   :  { %v5103_v13 = vadd.f32 %v7916_v38, %v5102_v19 }
0x10d7   :  { %v5107_v34 = vsel %vm5106_vm6, %v7916_v38, %v5103_v13  ;;  %v10128_v38 = vld [vmem:[#allocation68_spill] sm:$0xff] }
0x10d8   :  { %v5112_v47 = vsel %vm5109_vm7, %v5111_v57, %v5107_v34  ;;  %v10130_v57 = vld [vmem:[#allocation18_spill] sm:$0xff] }
0x10d9   :  { %v5118_v39 = vmul.f32 %v7918_v52, %v5112_v47 }
0x10db   :  { %v5269_v53 = vpack.c.bf16 %v5118_v39, %v5118_v39  ;;  %v5121_v31 = vmul.f32 %v5118_v39, %v9891_v50  ;;  %v5120_v12 = vmul.f32 %v5118_v39, %v9895_v4  ;;  %v5119_v7 = vmul.f32 %v5118_v39, %v9892_v40 }
0x10dc   :  { %v5125_v62 = vmul.f32 %v5118_v39, %v9896_v36  ;;  %v5124_v48 = vmul.f32 %v5118_v39, %v9893_v55  ;;  %v5122_v6 = vmul.f32 %v5118_v39, %v9894_v32 }
0x10dd   :  { %5291 = vmatmul.bf16.vlgmr.msrb.gmra.mxu1 %v5269_v53  ;;  %5317 = vmatmul.bf16.vlgmr.msrb.gmra.mxu3 %v5269_v53 }
0x10de   :  { %5131 = vadd.xlane.f32.xlu1 %v5121_v31  ;;  %5129 = vadd.xlane.f32.xlu0 %v5120_v12 }
0x10df   :  { %5127 = vadd.xlane.f32.xlu2 %v5119_v7  ;;  %5601 = vmatpush.bf16.msrb.mxu1 %v8349_v27  ;;  %v5123_v27 = vmul.f32 %v5118_v39, %v9890_v37 }
0x10e0   :  { %5627 = vmatpush.bf16.msrb.mxu3 %v8352_v18  ;;  %v5126_v18 = vmul.f32 %v5118_v39, %v8588_v9 }
0x10e3   :  { %5602 = vmatpush.bf16.msrb.mxu1 %v8362_v14  ;;  %v10112_v14 = vld [vmem:[#allocation40_spill] sm:$0xff] }
0x10e4   :  { %5628 = vmatpush.bf16.msrb.mxu3 %v8364_v16  ;;  %v10113_v16 = vld [vmem:[#allocation41_spill] sm:$0xff] }
0x10e6   :  { %5139 = vadd.xlane.f32.xlu1 %v5125_v62  ;;  %5137 = vadd.xlane.f32.xlu0 %v5124_v48 }
0x10e7   :  { %5133 = vadd.xlane.f32.xlu2 %v5122_v6  ;;  %5603 = vmatpush.bf16.msrb.mxu1 %v8373_v15  ;;  %v10114_v15 = vld [vmem:[#allocation42_spill] sm:$0xff] }
0x10e8   :  { %5629 = vmatpush.bf16.msrb.mxu3 %v8376_v59  ;;  %v10115_v59 = vld [vmem:[#allocation43_spill] sm:$0xff] }
0x10eb   :  { %5604 = vmatpush.bf16.msrb.mxu1 %v8385_v8  ;;  %v10116_v8 = vld [vmem:[#allocation46_spill] sm:$0xff] }
0x10ec   :  { %5630 = vmatpush.bf16.msrb.mxu3 %v8388_v10  ;;  %v10117_v10 = vld [vmem:[#allocation47_spill] sm:$0xff] }
0x10ed   :  { %5343 = vmatmul.bf16.vlgmr.msra.gmra.mxu1 %v5269_v53  ;;  %5369 = vmatmul.bf16.vlgmr.msra.gmra.mxu3 %v5269_v53 }
0x10ef   :  { %5135 = vadd.xlane.f32.xlu2 %v5123_v27  ;;  %5605 = vmatpush.bf16.msrb.mxu1 %v8397_v3  ;;  %v10118_v3 = vld [vmem:[#allocation50_spill] sm:$0xff] }
0x10f0   :  { %5631 = vmatpush.bf16.msrb.mxu3 %v8400_v5  ;;  %v10119_v5 = vld [vmem:[#allocation51_spill] sm:$0xff] }
0x10f3   :  { %5606 = vmatpush.bf16.msrb.mxu1 %v8411_v1  ;;  %v10120_v1 = vld [vmem:[#allocation54_spill] sm:$0xff] }
0x10f4   :  { %5632 = vmatpush.bf16.msrb.mxu3 %v8414_v28  ;;  %v10121_v28 = vld [vmem:[#allocation55_spill] sm:$0xff] }
0x10f7   :  { %5141 = vadd.xlane.f32.xlu2 %v5126_v18  ;;  %5607 = vmatpush.bf16.msrb.mxu1 %v9865_v24  ;;  %v10122_v24 = vld [vmem:[#allocation58_spill] sm:$0xff] }
0x10f8   :  { %5633 = vmatpush.bf16.msrb.mxu3 %v9866_v26  ;;  %v10123_v26 = vld [vmem:[#allocation59_spill] sm:$0xff] }
0x10fb   :  { %5608 = vmatpush.bf16.msrb.mxu1 %v10112_v14 }
0x10fc   :  { %5634 = vmatpush.bf16.msrb.mxu3 %v10113_v16 }
0x10ff   :  { %5653 = vmatpush.bf16.msra.mxu1 %v10114_v15 }
0x1100   :  { %5679 = vmatpush.bf16.msra.mxu3 %v10115_v59 }
0x1103   :  { %5654 = vmatpush.bf16.msra.mxu1 %v10116_v8  ;;  %v10131_v8 = vld [vmem:[#allocation28_spill] sm:$0xff] }
0x1104   :  { %5680 = vmatpush.bf16.msra.mxu3 %v10117_v10  ;;  %v10132_v10 = vld [vmem:[#allocation26_spill] sm:$0xff] }
0x1107   :  { %5655 = vmatpush.bf16.msra.mxu1 %v10118_v3  ;;  %v9453_v3 = vmax.f32 %v10132_v10, %v10131_v8 }
0x1108   :  { %5681 = vmatpush.bf16.msra.mxu3 %v10119_v5 }
0x1109   :  { %vm5143_vm8 = vcmp.gt.f32.partialorder %v9453_v3, 0.5 }
0x110b   :  { %5656 = vmatpush.bf16.msra.mxu1 %v10120_v1 }
0x110c   :  { %5682 = vmatpush.bf16.msra.mxu3 %v10121_v28 }
0x110f   :  { %5657 = vmatpush.bf16.msra.mxu1 %v10122_v24 }
0x1110   :  { %5683 = vmatpush.bf16.msra.mxu3 %v10123_v26 }
0x1113   :  { %5658 = vmatpush.bf16.msra.mxu1 %v10124_v29  ;;  %v5170_v29 = vld [vmem:[#allocation9 + $0x28] sm:$0xff] }
0x1114   :  { %5684 = vmatpush.bf16.msra.mxu3 %v10125_v42 }
0x1117   :  { %5659 = vmatpush.bf16.msra.mxu1 %v10126_v20 }
0x1118   :  { %5685 = vmatpush.bf16.msra.mxu3 %v10127_v25 }
0x111b   :  { %5660 = vmatpush.bf16.msra.mxu1 %v10128_v38 }
0x111c   :  { %5686 = vmatpush.bf16.msra.mxu3 %v10129_v11 }
0x1151   :  { %v5130_v49 = vpop.xlane.xlu0 %5129  ;;  %v5132_v13 = vpop.xlane.xlu1 %5131 }
0x1152   :  { %v5128_v30 = vpop.xlane.xlu2 %5127  ;;  %v5153_v34 = vperm.slane %v5130_v49, %v10130_v57  ;;  %v5154_v47 = vperm.slane %v5132_v13, %v10130_v57 }
0x1153   :  { %v5152_v52 = vperm.slane %v5128_v30, %v10130_v57 }
0x1155   :  { %v5160_v53 = vsel %vm3587_vm11, %v5153_v34, %v5152_v52 }
0x1156   :  { %v5161_v6 = vsel %vm3588_vm12, %v5154_v47, %v5160_v53 }
0x1159   :  { %v5138_v48 = vpop.xlane.xlu0 %5137  ;;  %v5140_v14 = vpop.xlane.xlu1 %5139 }
0x115a   :  { %v5134_v19 = vpop.xlane.xlu2 %5133  ;;  %v9436_v51 = vpop.f32.mrf.mxu1  ;;  %v5157_v16 = vperm.slane %v5138_v48, %v10130_v57  ;;  %v5158_v5 = vperm.slane %v5140_v14, %v10130_v57 }
0x115b   :  { %v5155_v31 = vperm.slane %v5134_v19, %v10130_v57 }
0x115d   :  { %v5162_v27 = vsel %vm3590_vm13, %v5155_v31, %v5161_v6  ;;  %v10133_v31 = vld [vmem:[#allocation35_spill] sm:$0xff] }
0x115e   :  { %vm5266_vm4 = vcmp.eq.s32.totalorder %v10133_v31, 5 }
0x1160   :  { %v9441_v39 = vpop.f32.mrf.mxu3 }
0x1162   :  { %v5136_v12 = vpop.xlane.xlu2 %5135  ;;  %v5294_v7 = vpop.f32.mrf.mxu1 }
0x1163   :  { %v5156_v62 = vperm.slane %v5136_v12, %v10130_v57 }
0x1165   :  { %v5163_v18 = vsel %vm3592_vm14, %v5156_v62, %v5162_v27 }
0x1166   :  { %v5164_v59 = vsel %vm3594_vm15, %v5157_v16, %v5163_v18  ;;  %v10134_v16 = vld [vmem:[#allocation23_spill] sm:$0xff] }
0x1167   :  { %v5165_v26 = vsel %vm3596_vm0, %v5158_v5, %v5164_v59  ;;  %v10135_v59 = vmov 0.0  }
0x1168   :  { %v5320_v15 = vpop.f32.mrf.mxu3 }
0x116a   :  { %v5142_v1 = vpop.xlane.xlu2 %5141  ;;  %v9456_v28 = vpop.f32.mrf.mxu1 }
0x116b   :  { %v5159_v24 = vperm.slane %v5142_v1, %v10130_v57 }
0x116d   :  { %v5166_v42 = vsel %vm3598_vm1, %v5159_v24, %v5165_v26 }
0x116e   :  { %v5168_v20 = vsel %vm5143_vm8, -1e+30, %v5166_v42 }
0x116f   :  { %v5171_v25 = vadd.f32 %v5170_v29, %v5168_v20 }
0x1170   :  { %v9462_v38 = vpop.f32.mrf.mxu3 }
0x1171   :  { %v5172_v11 = vsel %vm3899_vm3, %v5171_v25, -inf }
0x1172   :  { %v5173_v30 = vrot.slane %v5172_v11, 4  ;;  %v5346_v49 = vpop.f32.mrf.mxu1 }
0x1174   :  { %v5174_v19 = vmax.f32 %v5172_v11, %v5173_v30 }
0x1176   :  { %v5175_v13 = vrot.slane %v5174_v19, 2 }
0x1178   :  { %v5176_v34 = vmax.f32 %v5174_v19, %v5175_v13  ;;  %v5372_v52 = vpop.f32.mrf.mxu3 }
0x117a   :  { %v5177_v47 = vrot.slane %v5176_v34, 1 }
0x117c   :  { %v5178_v53 = vmax.f32 %v5176_v34, %v5177_v47 }
0x117e   :  { %vm5179_vm9 = vcmp.eq.f32.partialorder %v5171_v25, %v5178_v53 }
0x117f   :  { %v5180_v12 = vsel %vm5179_vm9, %v10133_v31, 8 }
0x1180   :  { %v5181_v7 = vsel %vm3899_vm3, %v5180_v12, 2147483647 }
0x1181   :  { %v5182_v62 = vrot.slane %v5181_v7, 4 }
0x1183   :  { %vm5183_vm10 = vcmp.lt.s32.totalorder %v5181_v7, %v5182_v62 }
0x1184   :  { %v5184_v48 = vsel %vm5183_vm10, %v5181_v7, %v5182_v62 }
0x1185   :  { %v5185_v6 = vrot.slane %v5184_v48, 2 }
0x1187   :  { %vm5186_vm2 = vcmp.lt.s32.totalorder %v5184_v48, %v5185_v6 }
0x1188   :  { %v5187_v27 = vsel %vm5186_vm2, %v5184_v48, %v5185_v6 }
0x1189   :  { %v5188_v18 = vrot.slane %v5187_v27, 1 }
0x118b   :  { %vm5189_vm5 = vcmp.lt.s32.totalorder %v5187_v27, %v5188_v18 }
0x118c   :  { %v5190_v14 = vsel %vm5189_vm5, %v5187_v27, %v5188_v18 }
0x118d   :  { %vm5191_vm6 = vcmp.eq.s32.totalorder %v10133_v31, %v5190_v14  ;;  %v9470_v15 = vsel %vm5266_vm4, %v5190_v14, %v10134_v16 }
0x118e   :  { %v9473_v8 = vsel %vm5191_vm6, 1.0, %v10135_v59 }
0x118f   :  { %v5223_v10 = vperm.slane %v9473_v8, 4  ;;  %v5230_v5 = vperm.slane %v9473_v8, 5  ;;  %v5209_v1 = vperm.slane %v9473_v8, 2  ;;  %v5216_v24 = vperm.slane %v9473_v8, 3 }
0x1190   :  { %v5195_v26 = vperm.slane %v9473_v8, 0  ;;  %v5202_v29 = vperm.slane %v9473_v8, 1  ;;  %v5237_v11 = vperm.slane %v9473_v8, 6  ;;  %v5244_v30 = vperm.slane %v9473_v8, 7 }
0x1191   :  { %v7665_v42 = vpack.i.bf16 %v5230_v5, %v5223_v10  ;;  %v7660_v20 = vpack.i.bf16 %v5216_v24, %v5209_v1 }
0x1192   :  { %v7655_v25 = vpack.i.bf16 %v5202_v29, %v5195_v26  ;;  %v7670_v49 = vpack.i.bf16 %v5244_v30, %v5237_v11 }
0x1193   :  { %7666 = vperm.xlu2 %7550, %v7665_v42   ;;  %7661 = vperm.xlu1 %7552, %v7660_v20  }
0x1194   :  { %7656 = vperm.xlu0 %7584, %v7655_v25  }
0x119c   :  { %7671 = vperm.xlu0 %7584, %v7670_v49  }
0x11ed   :  { %v7667_v53 = vpop.permute.xlu2 %7666 }
0x11ee   :  { %v7668_v48 = vunpack.i.l.bf16 %v7667_v53  ;;  %v7669_v18 = vunpack.i.h.bf16 %v7667_v53 }
0x11f0   :  { %v5255_v5 = vmul.f32 %v7668_v48, %v9890_v37  ;;  %v5256_v26 = vmul.f32 %v7669_v18, %v9893_v55 }
0x1205   :  { %v7662_v19 = vpop.permute.xlu1 %7661 }
0x1206   :  { %v7657_v13 = vpop.permute.xlu0 %7656  ;;  %v7663_v34 = vunpack.i.l.bf16 %v7662_v19  ;;  %v7664_v12 = vunpack.i.h.bf16 %v7662_v19 }
0x1207   :  { %v7659_v52 = vunpack.i.h.bf16 %v7657_v13  ;;  %v7658_v47 = vunpack.i.l.bf16 %v7657_v13 }
0x1208   :  { %v5253_v6 = vmul.f32 %v7663_v34, %v9891_v50  ;;  %v5254_v14 = vmul.f32 %v7664_v12, %v9894_v32  ;;  %v10152_v34 = vld [vmem:[#allocation36_spill] sm:$0xff] }
0x1209   :  { %v5252_v7 = vmul.f32 %v7659_v52, %v9895_v4  ;;  %v5251_v62 = vmul.f32 %v7658_v47, %v9892_v40 }
0x120b   :  { %v5259_v27 = vadd.f32 %v5252_v7, %v5251_v62  ;;  %v10153_v7 = vld [vmem:[#allocation70_spill] sm:$0xff] }
0x120d   :  { %v5260_v16 = vadd.f32 %v5259_v27, %v5253_v6 }
0x120e   :  { %v7672_v10 = vpop.permute.xlu0 %7671 }
0x120f   :  { %v5261_v1 = vadd.f32 %v5260_v16, %v5254_v14  ;;  %v7673_v24 = vunpack.i.l.bf16 %v7672_v10  ;;  %v7674_v29 = vunpack.i.h.bf16 %v7672_v10 }
0x1211   :  { %v5262_v42 = vadd.f32 %v5261_v1, %v5255_v5  ;;  %v5257_v20 = vmul.f32 %v7673_v24, %v9896_v36  ;;  %v5258_v11 = vmul.f32 %v7674_v29, %v8588_v9 }
0x1213   :  { %v5263_v25 = vadd.f32 %v5262_v42, %v5256_v26 }
0x1215   :  { %v5264_v30 = vadd.f32 %v5263_v25, %v5257_v20 }
0x1217   :  { %v5265_v49 = vadd.f32 %v5264_v30, %v5258_v11 }
0x1219   :  { %v5268_v19 = vpack.c.bf16 %v5265_v49, %v5265_v49 }
0x121b   :  { %5278 = vmatmul.bf16.vlgmr.msrb.gmra.mxu0 %v5268_v19  ;;  %5304 = vmatmul.bf16.vlgmr.msrb.gmra.mxu2 %v5268_v19 }
0x121c   :  { %5588 = vmatpush.bf16.msrb.mxu0 %v8344_v44  ;;  %5614 = vmatpush.bf16.msrb.mxu2 %v9901_v21  ;;  %v10137_v44 = vld [vmem:[#allocation32_spill] sm:$0xff]  ;;  %v10139_v21 = vld [vmem:[#allocation34_spill] sm:$0xff] }
0x1220   :  { %5589 = vmatpush.bf16.msrb.mxu0 %v8355_v35  ;;  %5615 = vmatpush.bf16.msrb.mxu2 %v8332_v0  ;;  %v10136_v0 = vld [vmem:[#allocation38_spill] sm:$0xff]  ;;  %v10138_v35 = vld [vmem:[#allocation44_spill] sm:$0xff] }
0x1224   :  { %5590 = vmatpush.bf16.msrb.mxu0 %v9902_v22  ;;  %5616 = vmatpush.bf16.msrb.mxu2 %v9903_v2  ;;  %v10140_v22 = vld [vmem:[#allocation48_spill] sm:$0xff]  ;;  %v10141_v2 = vld [vmem:[#allocation39_spill] sm:$0xff] }
0x1228   :  { %5591 = vmatpush.bf16.msrb.mxu0 %v9904_v61  ;;  %5617 = vmatpush.bf16.msrb.mxu2 %v9905_v63  ;;  %v10142_v61 = vld [vmem:[#allocation52_spill] sm:$0xff]  ;;  %v10143_v63 = vld [vmem:[#allocation45_spill] sm:$0xff] }
0x122b   :  { %5330 = vmatmul.bf16.vlgmr.msra.gmra.mxu0 %v5268_v19  ;;  %5356 = vmatmul.bf16.vlgmr.msra.gmra.mxu2 %v5268_v19 }
0x122c   :  { %5592 = vmatpush.bf16.msrb.mxu0 %v9906_v58  ;;  %5618 = vmatpush.bf16.msrb.mxu2 %v9951_v46  ;;  %v10144_v58 = vld [vmem:[#allocation56_spill] sm:$0xff]  ;;  %v10145_v46 = vld [vmem:[#allocation49_spill] sm:$0xff] }
0x1230   :  { %5593 = vmatpush.bf16.msrb.mxu0 %v9952_v54  ;;  %5619 = vmatpush.bf16.msrb.mxu2 %v9999_v33  ;;  %v10146_v54 = vld [vmem:[#allocation60_spill] sm:$0xff]  ;;  %v10147_v33 = vld [vmem:[#allocation53_spill] sm:$0xff] }
0x1234   :  { %5594 = vmatpush.bf16.msrb.mxu0 %v10000_v17  ;;  %5620 = vmatpush.bf16.msrb.mxu2 %v10046_v23  ;;  %v10148_v17 = vld [vmem:[#allocation64_spill] sm:$0xff]  ;;  %v10149_v23 = vld [vmem:[#allocation57_spill] sm:$0xff] }
0x1238   :  { %5595 = vmatpush.bf16.msrb.mxu0 %v10047_v41  ;;  %5621 = vmatpush.bf16.msrb.mxu2 %v10093_v56  ;;  %v10150_v41 = vld [vmem:[#allocation67_spill] sm:$0xff]  ;;  %v10151_v56 = vld [vmem:[#allocation61_spill] sm:$0xff] }
0x123c   :  { %5640 = vmatpush.bf16.msra.mxu0 %v10136_v0  ;;  %5666 = vmatpush.bf16.msra.mxu2 %v10137_v44 }
0x1240   :  { %5641 = vmatpush.bf16.msra.mxu0 %v10138_v35  ;;  %5667 = vmatpush.bf16.msra.mxu2 %v10139_v21 }
0x1244   :  { %5642 = vmatpush.bf16.msra.mxu0 %v10140_v22  ;;  %5668 = vmatpush.bf16.msra.mxu2 %v10141_v2 }
0x1248   :  { %5643 = vmatpush.bf16.msra.mxu0 %v10142_v61  ;;  %5669 = vmatpush.bf16.msra.mxu2 %v10143_v63 }
0x124c   :  { %5644 = vmatpush.bf16.msra.mxu0 %v10144_v58  ;;  %5670 = vmatpush.bf16.msra.mxu2 %v10145_v46 }
0x1250   :  { %5645 = vmatpush.bf16.msra.mxu0 %v10146_v54  ;;  %5671 = vmatpush.bf16.msra.mxu2 %v10147_v33 }
0x1254   :  { %5646 = vmatpush.bf16.msra.mxu0 %v10148_v17  ;;  %5672 = vmatpush.bf16.msra.mxu2 %v10149_v23 }
0x1258   :  { %5647 = vmatpush.bf16.msra.mxu0 %v10150_v41  ;;  %5673 = vmatpush.bf16.msra.mxu2 %v10151_v56 }
0x1298   :  { %v5279_v13 = vpop.f32.mrf.mxu0 }
0x1299   :  { %v5280_v52 = vadd.f32 %v5279_v13, %v10152_v34 }
0x129b   :  { %v5293_v47 = vadd.f32 %v9436_v51, %v5280_v52 }
0x129d   :  { %v7208_v53 = vmul.f32 -1.442695, %v5293_v47 }
0x129e   :  { %v5305_v12 = vpop.f32.mrf.mxu2 }
0x129f   :  { %7919 = vpow2.f32 %v7208_v53  ;;  %v5306_v62 = vadd.f32 %v5305_v12, %v10153_v7 }
0x12a0   :  { %v5281_v48 = vpop.f32.mrf.mxu0 }
0x12a1   :  { %v5319_v6 = vadd.f32 %v9441_v39, %v5306_v62 }
0x12a3   :  { %v7209_v27 = vmul.f32 -1.442695, %v5319_v6 }
0x12a5   :  { %v7920_v18 = vpop.eup %7919  ;;  %7921 = vpow2.f32 %v7209_v27 }
0x12a6   :  { %v5377_v14 = vadd.f32 1.0, %v7920_v18  ;;  %v5307_v16 = vpop.f32.mrf.mxu2 }
0x12a8   :  { %7923 = vrcp.f32 %v5377_v14  ;;  %v5331_v10 = vpop.f32.mrf.mxu0  ;;  %v5389_v61 = vand.u32 2147483648, %v5377_v14  ;;  %vm5383_vm9 = vweird.f32 %v5377_v14 }
0x12a9   :  { %v5332_v39 = vadd.f32 %v5331_v10, %v8669_v43 }
0x12aa   :  { %v5390_v23 = vor.u32 1.1754944e-38, %v5389_v61 }
0x12ab   :  { %v7922_v5 = vpop.eup %7921  ;;  %v5345_v35 = vadd.f32 %v9456_v28, %v5332_v39 }
0x12ac   :  { %v5396_v1 = vadd.f32 1.0, %v7922_v5 }
0x12ae   :  { %v7924_v24 = vpop.eup %7923  ;;  %7925 = vrcp.f32 %v5396_v1  ;;  %v5357_v51 = vpop.f32.mrf.mxu2  ;;  %v5408_v21 = vand.u32 2147483648, %v5396_v1  ;;  %v5406_v63 = vand.u32 2147483647, %v5396_v1  ;;  %vm5402_vm10 = vweird.f32 %v5396_v1 }
0x12af   :  { %v5379_v26 = vmul.f32 %v7924_v24, %v5377_v14  ;;  %v5358_v29 = vadd.f32 %v5357_v51, %v9932_v45  ;;  %vm5384_vm7 = vweird.f32 %v7924_v24 }
0x12b0   :  { %v5333_v42 = vpop.f32.mrf.mxu0  ;;  %vm5385_vm2 = vmor %vm5383_vm9, %vm5384_vm7  ;;  %v5409_v54 = vor.u32 1.1754944e-38, %v5408_v21  ;;  %vm5407_vm5 = vcmp.eq.f32.partialorder %v5406_v63, 8.507059e+37 }
0x12b1   :  { %v5380_v20 = vsub.f32 1.0, %v5379_v26  ;;  %v5371_v25 = vadd.f32 %v9462_v38, %v5358_v29  ;;  %v5387_v38 = vand.u32 2147483647, %v5377_v14 }
0x12b3   :  { %v7210_v11 = vmul.f32 -1.442695, %v5371_v25  ;;  %v5381_v49 = vmul.f32 %v7924_v24, %v5380_v20  ;;  %vm5388_vm6 = vcmp.eq.f32.partialorder %v5387_v38, 8.507059e+37 }
0x12b4   :  { %v7926_v30 = vpop.eup %7925 }
0x12b5   :  { %v5398_v19 = vmul.f32 %v7926_v30, %v5396_v1  ;;  %7927 = vpow2.f32 %v7210_v11  ;;  %v5382_v22 = vadd.f32 %v7924_v24, %v5381_v49  ;;  %vm5403_vm8 = vweird.f32 %v7926_v30 }
0x12b6   :  { %v5359_v0 = vpop.f32.mrf.mxu2  ;;  %7929 = vtanh.f32 %v5345_v35  ;;  %vm5404_vm4 = vmor %vm5402_vm10, %vm5403_vm8 }
0x12b7   :  { %v5399_v44 = vsub.f32 1.0, %v5398_v19  ;;  %v5386_v33 = vsel %vm5385_vm2, %v7924_v24, %v5382_v22 }
0x12b8   :  { %v5391_v56 = vsel %vm5388_vm6, %v5390_v23, %v5386_v33 }
0x12b9   :  { %v5400_v2 = vmul.f32 %v7926_v30, %v5399_v44 }
0x12bb   :  { %v7928_v58 = vpop.eup %7927  ;;  %v5401_v46 = vadd.f32 %v7926_v30, %v5400_v2 }
0x12bc   :  { %v5416_v17 = vadd.f32 1.0, %v7928_v58  ;;  %v7930_v52 = vpop.eup %7929 }
0x12bd   :  { %v5405_v28 = vsel %vm5404_vm4, %v7926_v30, %v5401_v46  ;;  %v5433_v47 = vmul.f32 %v7930_v52, %v5391_v56 }
0x12be   :  { %v5410_v41 = vsel %vm5407_vm5, %v5409_v54, %v5405_v28  ;;  %7931 = vrcp.f32 %v5416_v17  ;;  %v5428_v6 = vand.u32 2147483648, %v5416_v17  ;;  %v5426_v18 = vand.u32 2147483647, %v5416_v17 }
0x12bf   :  { %v5432_v13 = vmul.f32 %v5410_v41, %v9393_v60  ;;  %vm5422_vm8 = vweird.f32 %v5416_v17  ;;  %v9558_v28 = vmax.f32 %v9453_v3, %v9473_v8 }
0x12c0   :  { %v5429_v16 = vor.u32 1.1754944e-38, %v5428_v6  ;;  %vm5427_vm10 = vcmp.eq.f32.partialorder %v5426_v18, 8.507059e+37 }
0x12c1   :  { %v9532_v12 = vadd.f32 %v5433_v47, %v5432_v13  ;;  %vm5461_vm2 = vcmp.gt.f32.partialorder %v9558_v28, 0.5 }
0x12c3   :  { %7933 = vtanh.f32 %v9532_v12 }
0x12c4   :  { %v7932_v53 = vpop.eup %7931 }
0x12c5   :  { %v5418_v62 = vmul.f32 %v7932_v53, %v5416_v17  ;;  %vm5423_vm7 = vweird.f32 %v7932_v53 }
0x12c6   :  { %vm5424_vm9 = vmor %vm5422_vm8, %vm5423_vm7  ;;  %vm5584_vm7 = vcmp.eq.s32.totalorder %v10133_v31, 6 }
0x12c7   :  { %v5419_v48 = vsub.f32 1.0, %v5418_v62  ;;  %v5488_v62 = vld [vmem:[#allocation9 + $0x30] sm:$0xff] }
0x12c9   :  { %v5420_v27 = vmul.f32 %v7932_v53, %v5419_v48  ;;  %v7934_v60 = vpop.eup %7933 }
0x12cb   :  { %v5421_v14 = vadd.f32 %v7932_v53, %v5420_v27 }
0x12cd   :  { %v5425_v10 = vsel %vm5424_vm9, %v7932_v53, %v5421_v14 }
0x12ce   :  { %v5430_v5 = vsel %vm5427_vm10, %v5429_v16, %v5425_v10 }
0x12cf   :  { %v5436_v1 = vmul.f32 %v7934_v60, %v5430_v5 }
0x12d1   :  { %v5587_v24 = vpack.c.bf16 %v5436_v1, %v5436_v1  ;;  %v5439_v51 = vmul.f32 %v5436_v1, %v9891_v50  ;;  %v5438_v26 = vmul.f32 %v5436_v1, %v9895_v4  ;;  %v5437_v29 = vmul.f32 %v5436_v1, %v9892_v40 }
0x12d2   :  { %v5442_v42 = vmul.f32 %v5436_v1, %v9893_v55  ;;  %v5441_v20 = vmul.f32 %v5436_v1, %v9890_v37  ;;  %v5440_v25 = vmul.f32 %v5436_v1, %v9894_v32  ;;  %v5444_v39 = vmul.f32 %v5436_v1, %v8588_v9 }
0x12d3   :  { %5609 = vmatmul.bf16.vlgmr.msrb.gmra.mxu1 %v5587_v24  ;;  %5635 = vmatmul.bf16.vlgmr.msrb.gmra.mxu3 %v5587_v24  ;;  %v5443_v11 = vmul.f32 %v5436_v1, %v9896_v36 }
0x12d4   :  { %5449 = vadd.xlane.f32.xlu2 %v5439_v51  ;;  %5447 = vadd.xlane.f32.xlu0 %v5438_v26 }
0x12d5   :  { %5445 = vadd.xlane.f32.xlu1 %v5437_v29 }
0x12dc   :  { %5455 = vadd.xlane.f32.xlu2 %v5442_v42  ;;  %5453 = vadd.xlane.f32.xlu0 %v5441_v20 }
0x12dd   :  { %5451 = vadd.xlane.f32.xlu1 %v5440_v25 }
0x12e3   :  { %5661 = vmatmul.bf16.vlgmr.msra.gmra.mxu1 %v5587_v24  ;;  %5687 = vmatmul.bf16.vlgmr.msra.gmra.mxu3 %v5587_v24 }
0x12e4   :  { %5459 = vadd.xlane.f32.xlu0 %v5444_v39 }
0x12e5   :  { %5457 = vadd.xlane.f32.xlu1 %v5443_v11 }
0x1347   :  { %v5448_v30 = vpop.xlane.xlu0 %5447  ;;  %v5450_v19 = vpop.xlane.xlu2 %5449 }
0x1348   :  { %v5446_v49 = vpop.xlane.xlu1 %5445  ;;  %v5471_v0 = vperm.slane %v5448_v30, %v10130_v57  ;;  %v5472_v35 = vperm.slane %v5450_v19, %v10130_v57 }
0x1349   :  { %v5470_v44 = vperm.slane %v5446_v49, %v10130_v57 }
0x134b   :  { %v5478_v22 = vsel %vm3587_vm11, %v5471_v0, %v5470_v44 }
0x134c   :  { %v5479_v58 = vsel %vm3588_vm12, %v5472_v35, %v5478_v22 }
0x134f   :  { %v5454_v21 = vpop.xlane.xlu0 %5453  ;;  %v5456_v54 = vpop.xlane.xlu2 %5455 }
0x1350   :  { %v5452_v2 = vpop.xlane.xlu1 %5451  ;;  %v9547_v61 = vpop.f32.mrf.mxu1  ;;  %v5474_v38 = vperm.slane %v5454_v21, %v10130_v57  ;;  %v5475_v41 = vperm.slane %v5456_v54, %v10130_v57 }
0x1351   :  { %v5473_v63 = vperm.slane %v5452_v2, %v10130_v57 }
0x1353   :  { %v5480_v46 = vsel %vm3590_vm13, %v5473_v63, %v5479_v58 }
0x1354   :  { %v5481_v17 = vsel %vm3592_vm14, %v5474_v38, %v5480_v46 }
0x1355   :  { %v5482_v53 = vsel %vm3594_vm15, %v5475_v41, %v5481_v17 }
0x1356   :  { %v9553_v33 = vpop.f32.mrf.mxu3 }
0x1357   :  { %v5460_v23 = vpop.xlane.xlu0 %5459 }
0x1358   :  { %v5477_v56 = vperm.slane %v5460_v23, %v10130_v57  ;;  %v5458_v13 = vpop.xlane.xlu1 %5457  ;;  %v5612_v52 = vpop.f32.mrf.mxu1 }
0x1359   :  { %v5476_v47 = vperm.slane %v5458_v13, %v10130_v57 }
0x135b   :  { %v5483_v48 = vsel %vm3596_vm0, %v5476_v47, %v5482_v53 }
0x135c   :  { %v5484_v6 = vsel %vm3598_vm1, %v5477_v56, %v5483_v48 }
0x135d   :  { %v5486_v27 = vsel %vm5461_vm2, -1e+30, %v5484_v6 }
0x135e   :  { %v5489_v3 = vadd.f32 %v5488_v62, %v5486_v27  ;;  %v5638_v8 = vpop.f32.mrf.mxu3 }
0x1360   :  { %v5490_v18 = vsel %vm3899_vm3, %v5489_v3, -inf  ;;  %v9568_v14 = vpop.f32.mrf.mxu1 }
0x1361   :  { %v5491_v16 = vrot.slane %v5490_v18, 4 }
0x1363   :  { %v5492_v10 = vmax.f32 %v5490_v18, %v5491_v16 }
0x1365   :  { %v5493_v60 = vrot.slane %v5492_v10, 2 }
0x1366   :  { %v9570_v5 = vpop.f32.mrf.mxu3 }
0x1367   :  { %v5494_v1 = vmax.f32 %v5492_v10, %v5493_v60 }
0x1368   :  { %v5664_v24 = vpop.f32.mrf.mxu1 }
0x1369   :  { %v5495_v51 = vrot.slane %v5494_v1, 1 }
0x136b   :  { %v5496_v26 = vmax.f32 %v5494_v1, %v5495_v51 }
0x136d   :  { %vm5497_vm4 = vcmp.eq.f32.partialorder %v5489_v3, %v5496_v26 }
0x136e   :  { %v5498_v29 = vsel %vm5497_vm4, %v10133_v31, 8  ;;  %v5690_v42 = vpop.f32.mrf.mxu3 }
0x136f   :  { %v5499_v20 = vsel %vm3899_vm3, %v5498_v29, 2147483647 }
0x1370   :  { %v5500_v25 = vrot.slane %v5499_v20, 4 }
0x1372   :  { %vm5501_vm5 = vcmp.lt.s32.totalorder %v5499_v20, %v5500_v25 }
0x1373   :  { %v5502_v39 = vsel %vm5501_vm5, %v5499_v20, %v5500_v25 }
0x1374   :  { %v5503_v11 = vrot.slane %v5502_v39, 2 }
0x1376   :  { %vm5504_vm6 = vcmp.lt.s32.totalorder %v5502_v39, %v5503_v11 }
0x1377   :  { %v5505_v30 = vsel %vm5504_vm6, %v5502_v39, %v5503_v11 }
0x1378   :  { %v5506_v49 = vrot.slane %v5505_v30, 1 }
0x137a   :  { %vm5507_vm8 = vcmp.lt.s32.totalorder %v5505_v30, %v5506_v49 }
0x137b   :  { %v5508_v19 = vsel %vm5507_vm8, %v5505_v30, %v5506_v49 }
0x137c   :  { %vm5509_vm9 = vcmp.eq.s32.totalorder %v10133_v31, %v5508_v19  ;;  %v9577_v0 = vsel %vm5584_vm7, %v5508_v19, %v9470_v15 }
0x137d   :  { %v9580_v44 = vsel %vm5509_vm9, 1.0, %v10135_v59 }
0x137e   :  { %v5541_v35 = vperm.slane %v9580_v44, 4  ;;  %v5548_v21 = vperm.slane %v9580_v44, 5  ;;  %v5527_v22 = vperm.slane %v9580_v44, 2  ;;  %v5534_v2 = vperm.slane %v9580_v44, 3 }
0x137f   :  { %v5513_v63 = vperm.slane %v9580_v44, 0  ;;  %v5520_v38 = vperm.slane %v9580_v44, 1  ;;  %v5555_v15 = vperm.slane %v9580_v44, 6  ;;  %v5562_v59 = vperm.slane %v9580_v44, 7 }
0x1380   :  { %v7685_v58 = vpack.i.bf16 %v5548_v21, %v5541_v35  ;;  %v7680_v46 = vpack.i.bf16 %v5534_v2, %v5527_v22 }
0x1381   :  { %v7675_v54 = vpack.i.bf16 %v5520_v38, %v5513_v63  ;;  %v7690_v17 = vpack.i.bf16 %v5562_v59, %v5555_v15 }
0x1382   :  { %7686 = vperm.xlu0 %7584, %v7685_v58   ;;  %7681 = vperm.xlu1 %7552, %v7680_v46  }
0x1383   :  { %7676 = vperm.xlu2 %7550, %v7675_v54  }
0x138b   :  { %7691 = vperm.xlu2 %7550, %v7690_v17  }
0x13dd   :  { %v7677_v23 = vpop.permute.xlu2 %7676 }
0x13de   :  { %v7679_v41 = vunpack.i.h.bf16 %v7677_v23  ;;  %v7678_v56 = vunpack.i.l.bf16 %v7677_v23 }
0x13e0   :  { %v5570_v13 = vmul.f32 %v7679_v41, %v9895_v4  ;;  %v5569_v52 = vmul.f32 %v7678_v56, %v9892_v40 }
0x13e2   :  { %v5577_v6 = vadd.f32 %v5570_v13, %v5569_v52 }
0x13e5   :  { %v7692_v8 = vpop.permute.xlu2 %7691 }
0x13e6   :  { %v7693_v60 = vunpack.i.l.bf16 %v7692_v8  ;;  %v7694_v51 = vunpack.i.h.bf16 %v7692_v8 }
0x13e8   :  { %v5575_v42 = vmul.f32 %v7693_v60, %v9896_v36  ;;  %v5576_v25 = vmul.f32 %v7694_v51, %v8588_v9 }
0x13f4   :  { %v7687_v47 = vpop.permute.xlu0 %7686  ;;  %v7682_v53 = vpop.permute.xlu1 %7681 }
0x13f5   :  { %v7684_v62 = vunpack.i.h.bf16 %v7682_v53  ;;  %v7683_v48 = vunpack.i.l.bf16 %v7682_v53  ;;  %v7688_v27 = vunpack.i.l.bf16 %v7687_v47  ;;  %v7689_v18 = vunpack.i.h.bf16 %v7687_v47 }
0x13f7   :  { %v5571_v3 = vmul.f32 %v7683_v48, %v9891_v50  ;;  %v5572_v16 = vmul.f32 %v7684_v62, %v9894_v32  ;;  %v5573_v1 = vmul.f32 %v7688_v27, %v9890_v37  ;;  %v5574_v26 = vmul.f32 %v7689_v18, %v9893_v55 }
0x13f9   :  { %v5578_v10 = vadd.f32 %v5577_v6, %v5571_v3 }
0x13fb   :  { %v5579_v24 = vadd.f32 %v5578_v10, %v5572_v16 }
0x13fd   :  { %v5580_v29 = vadd.f32 %v5579_v24, %v5573_v1 }
0x13ff   :  { %v5581_v20 = vadd.f32 %v5580_v29, %v5574_v26 }
0x1401   :  { %v5582_v39 = vadd.f32 %v5581_v20, %v5575_v42 }
0x1403   :  { %v5583_v11 = vadd.f32 %v5582_v39, %v5576_v25 }
0x1405   :  { %v5586_v30 = vpack.c.bf16 %v5583_v11, %v5583_v11 }
0x1407   :  { %5596 = vmatmul.bf16.vlgmr.msrb.gmra.mxu0 %v5586_v30  ;;  %5622 = vmatmul.bf16.vlgmr.msrb.gmra.mxu2 %v5586_v30 }
0x1417   :  { %5648 = vmatmul.bf16.vlgmr.msra.gmra.mxu0 %v5586_v30  ;;  %5674 = vmatmul.bf16.vlgmr.msra.gmra.mxu2 %v5586_v30 }
0x1484   :  { %v5597_v49 = vpop.f32.mrf.mxu0 }
0x1485   :  { %v5598_v19 = vadd.f32 %v5597_v49, %v10152_v34 }
0x1487   :  { %v5611_v35 = vadd.f32 %v9547_v61, %v5598_v19 }
0x1489   :  { %v7212_v21 = vmul.f32 -1.442695, %v5611_v35 }
0x148a   :  { %v5623_v22 = vpop.f32.mrf.mxu2 }
0x148b   :  { %7935 = vpow2.f32 %v7212_v21  ;;  %v5624_v2 = vadd.f32 %v5623_v22, %v10153_v7 }
0x148c   :  { %v5599_v63 = vpop.f32.mrf.mxu0 }
0x148d   :  { %v5637_v38 = vadd.f32 %v9553_v33, %v5624_v2 }
0x148f   :  { %v7213_v58 = vmul.f32 -1.442695, %v5637_v38 }
0x1491   :  { %v7936_v46 = vpop.eup %7935  ;;  %7937 = vpow2.f32 %v7213_v58 }
0x1492   :  { %v5695_v54 = vadd.f32 1.0, %v7936_v46  ;;  %v5625_v15 = vpop.f32.mrf.mxu2 }
0x1494   :  { %7939 = vrcp.f32 %v5695_v54  ;;  %v5649_v59 = vpop.f32.mrf.mxu0  ;;  %vm5701_vm4 = vweird.f32 %v5695_v54 }
0x1495   :  { %v5650_v33 = vadd.f32 %v5649_v59, %v8669_v43 }
0x1497   :  { %v7938_v17 = vpop.eup %7937  ;;  %v5663_v3 = vadd.f32 %v9568_v14, %v5650_v33 }
0x1498   :  { %v5714_v23 = vadd.f32 1.0, %v7938_v17 }
0x149a   :  { %v7940_v34 = vpop.eup %7939  ;;  %7941 = vrcp.f32 %v5714_v23  ;;  %v5675_v61 = vpop.f32.mrf.mxu2  ;;  %v5726_v8 = vand.u32 2147483648, %v5714_v23  ;;  %v5724_v10 = vand.u32 2147483647, %v5714_v23  ;;  %vm5720_vm5 = vweird.f32 %v5714_v23 }
0x149b   :  { %v5697_v41 = vmul.f32 %v7940_v34, %v5695_v54  ;;  %v5676_v56 = vadd.f32 %v5675_v61, %v9932_v45  ;;  %vm5702_vm10 = vweird.f32 %v7940_v34  ;;  %v5707_v45 = vand.u32 2147483648, %v5695_v54 }
0x149c   :  { %v5651_v13 = vpop.f32.mrf.mxu0  ;;  %vm5703_vm6 = vmor %vm5701_vm4, %vm5702_vm10  ;;  %v5727_v1 = vor.u32 1.1754944e-38, %v5726_v8  ;;  %vm5725_vm8 = vcmp.eq.f32.partialorder %v5724_v10, 8.507059e+37 }
0x149d   :  { %v5698_v7 = vsub.f32 1.0, %v5697_v41  ;;  %v5689_v52 = vadd.f32 %v9570_v5, %v5676_v56  ;;  %v5705_v5 = vand.u32 2147483647, %v5695_v54  ;;  %v5708_v26 = vor.u32 1.1754944e-38, %v5707_v45 }
0x149f   :  { %v7214_v47 = vmul.f32 -1.442695, %v5689_v52  ;;  %v5699_v62 = vmul.f32 %v7940_v34, %v5698_v7  ;;  %vm5706_vm9 = vcmp.eq.f32.partialorder %v5705_v5, 8.507059e+37 }
0x14a0   :  { %v7942_v53 = vpop.eup %7941 }
0x14a1   :  { %v5716_v48 = vmul.f32 %v7942_v53, %v5714_v23  ;;  %7943 = vpow2.f32 %v7214_v47  ;;  %v5700_v18 = vadd.f32 %v7940_v34, %v5699_v62  ;;  %vm5721_vm2 = vweird.f32 %v7942_v53 }
0x14a2   :  { %v5677_v6 = vpop.f32.mrf.mxu2  ;;  %7945 = vtanh.f32 %v5663_v3  ;;  %vm5722_vm7 = vmor %vm5720_vm5, %vm5721_vm2  ;;  %v5512_v3 = vmax.f32 %v9558_v28, %v9580_v44 }
0x14a3   :  { %v5717_v27 = vsub.f32 1.0, %v5716_v48  ;;  %v5704_v24 = vsel %vm5703_vm6, %v7940_v34, %v5700_v18 }
0x14a4   :  { %v5709_v42 = vsel %vm5706_vm9, %v5708_v26, %v5704_v24 }
0x14a5   :  { %v5718_v16 = vmul.f32 %v7942_v53, %v5717_v27 }
0x14a7   :  { %v7944_v60 = vpop.eup %7943  ;;  %v5719_v43 = vadd.f32 %v7942_v53, %v5718_v16  ;;  %v5806_v16 = vld [vmem:[#allocation9 + $0x38] sm:$0xff] }
0x14a8   :  { %v5734_v51 = vadd.f32 1.0, %v7944_v60  ;;  %v7946_v25 = vpop.eup %7945 }
0x14a9   :  { %v5723_v14 = vsel %vm5722_vm7, %v7942_v53, %v5719_v43  ;;  %v5751_v39 = vmul.f32 %v7946_v25, %v5709_v42 }
0x14aa   :  { %v5728_v29 = vsel %vm5725_vm8, %v5727_v1, %v5723_v14  ;;  %7947 = vrcp.f32 %v5734_v51  ;;  %v5746_v35 = vand.u32 2147483648, %v5734_v51  ;;  %v5744_v22 = vand.u32 2147483647, %v5734_v51 }
0x14ab   :  { %v5750_v20 = vmul.f32 %v5728_v29, %v9532_v12  ;;  %vm5740_vm2 = vweird.f32 %v5734_v51 }
0x14ac   :  { %v5747_v63 = vor.u32 1.1754944e-38, %v5746_v35  ;;  %vm5745_vm5 = vcmp.eq.f32.partialorder %v5744_v22, 8.507059e+37 }
0x14ad   :  { %v5752_v30 = vadd.f32 %v5751_v39, %v5750_v20 }
0x14af   :  { %7949 = vtanh.f32 %v5752_v30 }
0x14b0   :  { %v7948_v11 = vpop.eup %7947 }
0x14b1   :  { %v5736_v49 = vmul.f32 %v7948_v11, %v5734_v51  ;;  %vm5741_vm10 = vweird.f32 %v7948_v11 }
0x14b2   :  { %vm5742_vm4 = vmor %vm5740_vm2, %vm5741_vm10 }
0x14b3   :  { %v5737_v19 = vsub.f32 1.0, %v5736_v49 }
0x14b5   :  { %v5738_v21 = vmul.f32 %v7948_v11, %v5737_v19  ;;  %v7950_v58 = vpop.eup %7949 }
0x14b7   :  { %v5739_v2 = vadd.f32 %v7948_v11, %v5738_v21 }
0x14b9   :  { %v5743_v38 = vsel %vm5742_vm4, %v7948_v11, %v5739_v2 }
0x14ba   :  { %v5748_v46 = vsel %vm5745_vm5, %v5747_v63, %v5743_v38 }
0x14bb   :  { %v5754_v12 = vmul.f32 %v7950_v58, %v5748_v46 }
0x14bd   :  { %v5757_v54 = vmul.f32 %v5754_v12, %v9891_v50  ;;  %v5756_v15 = vmul.f32 %v5754_v12, %v9895_v4  ;;  %v5755_v59 = vmul.f32 %v5754_v12, %v9892_v40  ;;  %v5760_v17 = vmul.f32 %v5754_v12, %v9893_v55 }
0x14be   :  { %v5759_v23 = vmul.f32 %v5754_v12, %v9890_v37  ;;  %v5758_v34 = vmul.f32 %v5754_v12, %v9894_v32  ;;  %v5762_v61 = vmul.f32 %v5754_v12, %v8588_v9  ;;  %v5761_v50 = vmul.f32 %v5754_v12, %v9896_v36 }
0x14bf   :  { %5767 = vadd.xlane.f32.xlu2 %v5757_v54  ;;  %5765 = vadd.xlane.f32.xlu1 %v5756_v15 }
0x14c0   :  { %5763 = vadd.xlane.f32.xlu0 %v5755_v59 }
0x14c7   :  { %5773 = vadd.xlane.f32.xlu2 %v5760_v17  ;;  %5771 = vadd.xlane.f32.xlu1 %v5759_v23 }
0x14c8   :  { %5769 = vadd.xlane.f32.xlu0 %v5758_v34 }
0x14cf   :  { %5777 = vadd.xlane.f32.xlu1 %v5762_v61 }
0x14d0   :  { %5775 = vadd.xlane.f32.xlu0 %v5761_v50 }
0x1532   :  { %v5766_v4 = vpop.xlane.xlu1 %5765  ;;  %v5768_v41 = vpop.xlane.xlu2 %5767 }
0x1533   :  { %v5764_v40 = vpop.xlane.xlu0 %5763  ;;  %v5789_v56 = vperm.slane %v5766_v4, %v10130_v57  ;;  %v5790_v37 = vperm.slane %v5768_v41, %v10130_v57 }
0x1534   :  { %v5788_v55 = vperm.slane %v5764_v40, %v10130_v57 }
0x1536   :  { %v5796_v32 = vsel %vm3587_vm11, %v5789_v56, %v5788_v55  ;;  %vm5779_vm11 = vcmp.gt.f32.partialorder %v5512_v3, 0.5 }
0x1537   :  { %v5797_v36 = vsel %vm3588_vm12, %v5790_v37, %v5796_v32 }
0x153a   :  { %v5772_v13 = vpop.xlane.xlu1 %5771  ;;  %v5774_v47 = vpop.xlane.xlu2 %5773 }
0x153b   :  { %v5770_v7 = vpop.xlane.xlu0 %5769  ;;  %v5792_v9 = vperm.slane %v5772_v13, %v10130_v57  ;;  %v5793_v48 = vperm.slane %v5774_v47, %v10130_v57 }
0x153c   :  { %v5791_v52 = vperm.slane %v5770_v7, %v10130_v57 }
0x153e   :  { %v5798_v33 = vsel %vm3590_vm13, %v5791_v52, %v5797_v36 }
0x153f   :  { %v5799_v53 = vsel %vm3592_vm14, %v5792_v9, %v5798_v33 }
0x1540   :  { %v5800_v18 = vsel %vm3594_vm15, %v5793_v48, %v5799_v53  ;;  %vm5827_vm15 = vcmp.eq.s32.totalorder %v10133_v31, 7 }
0x1542   :  { %v5778_v62 = vpop.xlane.xlu1 %5777 }
0x1543   :  { %v5795_v6 = vperm.slane %v5778_v62, %v10130_v57  ;;  %v5776_v27 = vpop.xlane.xlu0 %5775 }
0x1544   :  { %v5794_v8 = vperm.slane %v5776_v27, %v10130_v57 }
0x1546   :  { %v5801_v45 = vsel %vm3596_vm0, %v5794_v8, %v5800_v18 }
0x1547   :  { %v5802_v10 = vsel %vm3598_vm1, %v5795_v6, %v5801_v45 }
0x1548   :  { %v5804_v5 = vsel %vm5779_vm11, -1e+30, %v5802_v10 }
0x1549   :  { %v5807_v60 = vadd.f32 %v5806_v16, %v5804_v5 }
0x154b   :  { %v5808_v43 = vsel %vm3899_vm3, %v5807_v60, -inf }
0x154c   :  { %v5809_v1 = vrot.slane %v5808_v43, 4 }
0x154e   :  { %v5810_v24 = vmax.f32 %v5808_v43, %v5809_v1 }
0x1550   :  { %v5811_v51 = vrot.slane %v5810_v24, 2 }
0x1552   :  { %v5812_v26 = vmax.f32 %v5810_v24, %v5811_v51 }
0x1554   :  { %v5813_v14 = vrot.slane %v5812_v26, 1 }
0x1556   :  { %v5814_v28 = vmax.f32 %v5812_v26, %v5813_v14 }
0x1558   :  { %vm5815_vm12 = vcmp.eq.f32.partialorder %v5807_v60, %v5814_v28 }
0x1559   :  { %v5816_v57 = vsel %vm5815_vm12, %v10133_v31, 8 }
0x155a   :  { %v5817_v44 = vsel %vm3899_vm3, %v5816_v57, 2147483647 }
0x155b   :  { %v5818_v29 = vrot.slane %v5817_v44, 4 }
0x155d   :  { %vm5819_vm13 = vcmp.lt.s32.totalorder %v5817_v44, %v5818_v29 }
0x155e   :  { %v5820_v42 = vsel %vm5819_vm13, %v5817_v44, %v5818_v29 }
0x155f   :  { %v5821_v20 = vrot.slane %v5820_v42, 2 }
0x1561   :  { %vm5822_vm14 = vcmp.lt.s32.totalorder %v5820_v42, %v5821_v20 }
0x1562   :  { %v5823_v25 = vsel %vm5822_vm14, %v5820_v42, %v5821_v20 }
0x1563   :  { %v5824_v39 = vrot.slane %v5823_v25, 1 }
0x1565   :  { %vm5825_vm0 = vcmp.lt.s32.totalorder %v5823_v25, %v5824_v39 }
0x1566   :  { %v5826_v11 = vsel %vm5825_vm0, %v5823_v25, %v5824_v39 }
0x1567   :  { %v5828_v30 = vsel %vm5827_vm15, %v5826_v11, %v9577_v0 }
0x1568   :  { %5829 = vst.msk [vmem:[#allocation10] sm:$0xff] %vm3899_vm3, %v5828_v30 }
0x1569   :  { %5840 = dma.vmem_to_hbm [thread:$0]  %s5836_s28, 128, %s5838_s8, [#allocation6]  }
0x156a   :  { %8051 = dma.done.wait [#allocation6], 128  }
0x156b   :  { %8052 = vsyncadd [#allocation6], 4294967168 }
0x156c   :  { %5845 = vsyncpa [#allocation5], 1 }
0x156d   :  { %5846 = vsyncpa [#allocation8], 1 }
0x156e   :  { %5847 = vsyncpa [#allocation6], 1 }

</bundles_post_ra>
